<compile_context>
chip_gen: v7x
topology: tpu7x:2x2x1
jax: 0.10.0
libtpu: 0.0.40
codegen_flags: <defaults>
</compile_context>

<pallas_src>
import functools

import numpy as np
import jax
import jax.numpy as jnp
from jax import lax
from jax.experimental import pallas as pl
from jax.experimental.pallas import tpu as pltpu


# ----------------------------- Pallas kernel -------------------------------
def head_kernel(x_ref, ut_ref, mask_ref, w1_ref, b1_ref, w2r_ref, b2_ref,
                w3_ref, b3_ref, o_ref, t_ref, stacked_ref, *, N, H, W):
    # x_ref:      (N, Cin, H0*W0)   all batch elements (channels-on-sublanes)
    # ut_ref:     (H0*W0, H*W)      bilinear upsample matrix U^T, bf16
    # mask_ref:   (9, N*H*W)        per-tap boundary masks (zero padding), f32
    # w1_ref:     (Cmid, Cin)       1x1 conv weight with BN scale folded, f32
    # b1_ref:     (Cmid, 1)         folded BN shift
    # w2r_ref:    (Cmid, 9*Cmid)    3x3 conv weight, taps flattened, BN folded, bf16
    # b2_ref:     (Cmid, 1)
    # w3_ref:     (Cout_pad, Cmid)  final 1x1 conv weight (zero-padded rows)
    # b3_ref:     (Cout_pad, 1)     final conv bias (zero-padded rows)
    # o_ref:      (N, Cout_pad, H*W)  lane-dense, full-sublane output
    # t_ref:      VMEM scratch (Cmid, N*H*W) f32      -- stage-1 activations
    # stacked_ref:VMEM scratch (9*Cmid, N*H*W) bf16   -- 3x3 conv RHS slab
    HW = H * W
    NHW = N * HW
    Cmid = w1_ref.shape[0]

    # --- stage 1: bilinear upsample fused with 1x1 conv (+BN) + ReLU ---------
    # conv1(upsample(x)) == (conv1(x_small)) @ U^T  (both linear).  Upsample is
    # per-image, so loop the (small) batch statically and write into the folded
    # lane layout.
    for n in range(N):
        s = jnp.dot(w1_ref[...], x_ref[n],
                    preferred_element_type=jnp.float32)              # (Cmid, HW0)
        up = jnp.dot(s.astype(jnp.bfloat16), ut_ref[...],
                     preferred_element_type=jnp.float32)             # (Cmid, HW)
        t_ref[:, pl.ds(n * HW, HW)] = jnp.maximum(up + b1_ref[...], 0.0)

    # --- stage 2: 9 shifted + masked taps written straight into the bf16 slab
    # Circular lane rolls; every wrapped element (including cross-image wraps
    # from the batch fold) corresponds to an out-of-bounds tap and is masked.
    for dy in range(3):
        for dx in range(3):
            k = dy * 3 + dx
            delta = (dy - 1) * W + (dx - 1)          # flat spatial offset
            tap = t_ref[...]                         # re-load per tap: bounds vregs
            if delta != 0:
                tap = pltpu.roll(tap, shift=(-delta) % NHW, axis=1)
            if k != 4:                               # center tap needs no mask
                tap = tap * mask_ref[k:k + 1, :]
            stacked_ref[pl.ds(k * Cmid, Cmid), :] = tap.astype(jnp.bfloat16)

    # --- stage 3: 3x3 conv (+BN) as one K=9*Cmid bf16 MXU matmul, + ReLU ------
    t2 = jnp.dot(w2r_ref[...], stacked_ref[...],
                 preferred_element_type=jnp.float32)                 # (Cmid, NHW)
    t2 = jnp.maximum(t2 + b2_ref[...], 0.0)

    # --- stage 4: final 1x1 conv with bias; per-image lane-dense stores -------
    out = jnp.dot(w3_ref[...], t2, preferred_element_type=jnp.float32) + b3_ref[...]
    for n in range(N):
        o_ref[n] = out[:, n * HW:(n + 1) * HW].astype(o_ref.dtype)


# ----------------------------- static helpers -------------------------------
def interp_matrix(in_size, out_size):
    """(out_size, in_size) bilinear interpolation matrix, align_corners=True."""
    if out_size > 1 and in_size > 1:
        pos = np.arange(out_size, dtype=np.float64) * ((in_size - 1) / (out_size - 1))
    else:
        pos = np.zeros((out_size,), np.float64)
    i0 = np.clip(np.floor(pos).astype(np.int64), 0, in_size - 1)
    i1 = np.clip(i0 + 1, 0, in_size - 1)
    frac = pos - i0
    M = np.zeros((out_size, in_size), np.float64)
    M[np.arange(out_size), i0] += 1.0 - frac
    M[np.arange(out_size), i1] += frac
    return M


def upsample_flat_matrix_t(H0, W0, scale):
    """U^T with U[(ho*Wo+wo),(h0*W0+w0)] = Ah[ho,h0]*Aw[wo,w0] (numpy)."""
    Ah = interp_matrix(H0, H0 * scale)
    Aw = interp_matrix(W0, W0 * scale)
    U = np.kron(Ah, Aw)                              # (Ho*Wo, H0*W0)
    return U.T                                       # (H0*W0, Ho*Wo)


def boundary_masks(H, W):
    """(9, H*W) float masks implementing the zero padding of the 3x3 conv."""
    hh = np.arange(H)[:, None]
    ww = np.arange(W)[None, :]
    m = np.zeros((9, H * W), np.float32)
    for dy in range(3):
        for dx in range(3):
            oy, ox = dy - 1, dx - 1
            valid = ((hh + oy >= 0) & (hh + oy < H) &
                     (ww + ox >= 0) & (ww + ox < W))
            m[dy * 3 + dx] = valid.astype(np.float32).reshape(-1)
    return m


# ----------------------------- JAX wrapper -----------------------------------
def base_net_head_forward(x_nchw, p, scale):
    N, Cin, H0, W0 = x_nchw.shape
    H, W = H0 * scale, W0 * scale
    HW0, HW = H0 * W0, H * W
    Cmid = p['w1'].shape[0]
    Cout = p['w3'].shape[0]
    Cout_pad = max(8, -(-Cout // 8) * 8)             # full-sublane output store

    x0 = x_nchw.reshape(N, Cin, HW0)                 # NCHW -> (N,Cin,H0*W0): free

    # Static operands (constant-folded at trace time under jit).
    u_t = jnp.asarray(upsample_flat_matrix_t(H0, W0, scale), jnp.bfloat16)
    masks = jnp.asarray(np.tile(boundary_masks(H, W), (1, N)), jnp.float32)

    # bf16 operands for the big MXU matmuls; pad the final conv to 8 out rows.
    w2r = p['w2r'].astype(jnp.bfloat16)
    w3p = jnp.zeros((Cout_pad, Cmid), jnp.float32).at[:Cout].set(p['w3'])
    b3p = jnp.zeros((Cout_pad, 1), jnp.float32).at[:Cout].set(p['b3'])

    def full(shape):
        nd = len(shape)
        return pl.BlockSpec(shape, lambda i, _nd=nd: (0,) * _nd)

    out = pl.pallas_call(
        functools.partial(head_kernel, N=N, H=H, W=W),
        out_shape=jax.ShapeDtypeStruct((N, Cout_pad, HW), jnp.float32),
        grid_spec=pltpu.PrefetchScalarGridSpec(
            num_scalar_prefetch=0,
            grid=(1,),                               # batch folded onto lanes
            in_specs=[
                full(x0.shape), full(u_t.shape), full(masks.shape),
                full(p['w1'].shape), full(p['b1'].shape),
                full(w2r.shape), full(p['b2'].shape),
                full(w3p.shape), full(b3p.shape),
            ],
            out_specs=full((N, Cout_pad, HW)),
            scratch_shapes=[
                pltpu.VMEM((Cmid, N * HW), jnp.float32),       # stage-1 activations
                pltpu.VMEM((9 * Cmid, N * HW), jnp.bfloat16),  # stacked 3x3 taps
            ]),
        # Total VMEM footprint is a few MiB, well under every chip's scoped
        # default, so no explicit vmem_limit_bytes is needed at these shapes.
        compiler_params=pltpu.CompilerParams(
            dimension_semantics=("arbitrary",)),
    )(x0, u_t, masks, p['w1'], p['b1'], w2r, p['b2'], w3p, b3p)

    # Drop the padded output channels; (N,Cout,HW) -> NCHW is a free reshape.
    return out[:, :Cout, :].reshape(N, Cout, H, W)


# ----------------------------- parameters ------------------------------------
def kaiming_uniform(key, shape_oihw):
    # PyTorch nn.init.kaiming_uniform_: a=0, fan_in, leaky_relu gain=sqrt(2)
    _, in_c, kh, kw = shape_oihw
    fan_in = in_c * kh * kw
    bound = float(np.sqrt(2.0) * np.sqrt(3.0 / fan_in))
    return jax.random.uniform(key, shape_oihw, jnp.float32, -bound, bound)


def init_params(key, in_planes, out_planes):
    Cmid = 32
    eps = 1e-5
    k1, k2, k3, kg1, kg2 = jax.random.split(key, 5)
    w1_oihw = kaiming_uniform(k1, (Cmid, in_planes, 1, 1))
    w2_oihw = kaiming_uniform(k2, (Cmid, Cmid, 3, 3))
    w3_oihw = kaiming_uniform(k3, (out_planes, Cmid, 1, 1))
    g1 = 1.0 + 0.02 * jax.random.normal(kg1, (Cmid,), jnp.float32)
    g2 = 1.0 + 0.02 * jax.random.normal(kg2, (Cmid,), jnp.float32)

    # BN eval mode (running_mean=0, running_var=1, beta=0): fold the per-channel
    # scale into the conv weights once at parameter-construction time.
    s1 = g1 / jnp.sqrt(1.0 + eps)
    s2 = g2 / jnp.sqrt(1.0 + eps)

    w1 = s1[:, None] * w1_oihw[:, :, 0, 0]                              # (Cmid, Cin)
    # w2r[o, (dy*3+dx)*Cmid + i] = s2[o] * w2_oihw[o, i, dy, dx]
    w2r = s2[:, None] * jnp.transpose(w2_oihw, (0, 2, 3, 1)).reshape(Cmid, 9 * Cmid)
    w3 = w3_oihw[:, :, 0, 0]                                            # (Cout, Cmid)

    return dict(
        w1=w1, b1=jnp.zeros((Cmid, 1), jnp.float32),
        w2r=w2r, b2=jnp.zeros((Cmid, 1), jnp.float32),
        w3=w3, b3=jnp.zeros((out_planes, 1), jnp.float32),   # conv bias zero-init
    )


# ----------------------------- reference (pure JAX, f32) ----------------------
def reference_forward(x_nchw, p, scale):
    N, Cin, H0, W0 = x_nchw.shape
    Cmid = p['w1'].shape[0]
    hp = lax.Precision.HIGHEST

    x = x_nchw
    if scale > 1:
        Ah = jnp.asarray(interp_matrix(H0, H0 * scale), jnp.float32)
        Aw = jnp.asarray(interp_matrix(W0, W0 * scale), jnp.float32)
        x = jnp.einsum('nchw,Hh,Ww->ncHW', x, Ah, Aw, precision=hp)

    t = jnp.einsum('nchw,oc->nohw', x, p['w1'], precision=hp)
    t = jnp.maximum(t + p['b1'].reshape(1, -1, 1, 1), 0.0)

    # rebuild HWIO 3x3 weight from the fused/folded layout
    w2_hwio = jnp.transpose(p['w2r'].reshape(Cmid, 3, 3, Cmid), (1, 2, 3, 0))
    dn = lax.conv_dimension_numbers(t.shape, w2_hwio.shape, ('NCHW', 'HWIO', 'NCHW'))
    t2 = lax.conv_general_dilated(t, w2_hwio, (1, 1), 'SAME',
                                  dimension_numbers=dn, precision=hp)
    t2 = jnp.maximum(t2 + p['b2'].reshape(1, -1, 1, 1), 0.0)

    out = jnp.einsum('nchw,oc->nohw', t2, p['w3'], precision=hp)
    return out + p['b3'].reshape(1, -1, 1, 1)


# ----------------------------- main -------------------------------------------
if __name__ == "__main__":
    key = jax.random.PRNGKey(0)
    kx, kp = jax.random.split(key)

    N, Cin, H, W = 2, 4, 16, 16
    Cout, scale = 2, 2

    x = jax.random.normal(kx, (N, Cin, H, W), jnp.float32)
    params = init_params(kp, Cin, Cout)

    # jit so the numpy-built upsample matrix / masks become compile-time
    # constants (no per-call host->device transfer).
    fwd = jax.jit(base_net_head_forward, static_argnums=2)
    out = fwd(x, params, scale)
    out = jax.block_until_ready(out)

    assert out.shape == (N, Cout, H * scale, W * scale), out.shape

    # Kernel uses bf16 MXU operands (f32 accumulation); reference is full f32,
    # so the tolerance is loosened accordingly.
    ref = reference_forward(x, params, scale)
    np.testing.assert_allclose(np.asarray(out), np.asarray(ref),
                               atol=1e-1, rtol=5e-2)
    print("KERNEL_OK")
</pallas_src>

<mosaic_0001>
module attributes {stable_mosaic.version = 11 : i64} {
  func.func @head_kernel(%arg0: i32, %arg1: memref<2x4x256xf32, #tpu.memory_space<vmem>>, %arg2: memref<256x1024xbf16, #tpu.memory_space<vmem>>, %arg3: memref<9x2048xf32, #tpu.memory_space<vmem>>, %arg4: memref<32x4xf32, #tpu.memory_space<vmem>>, %arg5: memref<32x1xf32, #tpu.memory_space<vmem>>, %arg6: memref<32x288xbf16, #tpu.memory_space<vmem>>, %arg7: memref<32x1xf32, #tpu.memory_space<vmem>>, %arg8: memref<8x32xf32, #tpu.memory_space<vmem>>, %arg9: memref<8x1xf32, #tpu.memory_space<vmem>>, %arg10: memref<2x8x1024xf32, #tpu.memory_space<vmem>>, %arg11: memref<32x2048xf32, #tpu.memory_space<vmem>>, %arg12: memref<288x2048xbf16, #tpu.memory_space<vmem>>) attributes {dimension_semantics = [#tpu.dimension_semantics<arbitrary>], iteration_bounds = array<i64: 1>, scalar_prefetch = 0 : i64, scratch_operands = 2 : i64, tpu.core_type = #tpu.core_type<tc>, window_params = [{pipeline_mode = #tpu.pipeline_mode<synchronous>, transform_indices = @transform_0, window_bounds = array<i64: 2, 4, 256>}, {pipeline_mode = #tpu.pipeline_mode<synchronous>, transform_indices = @transform_1, window_bounds = array<i64: 256, 1024>}, {pipeline_mode = #tpu.pipeline_mode<synchronous>, transform_indices = @transform_2, window_bounds = array<i64: 9, 2048>}, {pipeline_mode = #tpu.pipeline_mode<synchronous>, transform_indices = @transform_3, window_bounds = array<i64: 32, 4>}, {pipeline_mode = #tpu.pipeline_mode<synchronous>, transform_indices = @transform_4, window_bounds = array<i64: 32, 1>}, {pipeline_mode = #tpu.pipeline_mode<synchronous>, transform_indices = @transform_5, window_bounds = array<i64: 32, 288>}, {pipeline_mode = #tpu.pipeline_mode<synchronous>, transform_indices = @transform_6, window_bounds = array<i64: 32, 1>}, {pipeline_mode = #tpu.pipeline_mode<synchronous>, transform_indices = @transform_7, window_bounds = array<i64: 8, 32>}, {pipeline_mode = #tpu.pipeline_mode<synchronous>, transform_indices = @transform_8, window_bounds = array<i64: 8, 1>}, {pipeline_mode = #tpu.pipeline_mode<synchronous>, transform_indices = @transform_9, window_bounds = array<i64: 2, 8, 1024>}]} {
    %c0 = arith.constant 0 : index
    %c0_0 = arith.constant 0 : index
    %0 = vector.load %arg4[%c0, %c0_0] : memref<32x4xf32, #tpu.memory_space<vmem>>, vector<32x4xf32>
    %c0_1 = arith.constant 0 : index
    %c0_2 = arith.constant 0 : index
    %c0_3 = arith.constant 0 : index
    %1 = vector.load %arg1[%c0_1, %c0_2, %c0_3] : memref<2x4x256xf32, #tpu.memory_space<vmem>>, vector<1x4x256xf32>
    %2 = vector.shape_cast %1 : vector<1x4x256xf32> to vector<4x256xf32>
    %cst = arith.constant dense<0.000000e+00> : vector<32x256xf32>
    %3 = tpu.matmul %0, %2, %cst {dimension_numbers = #tpu.dot_dimension_numbers<[1], [0], [0], [1], [0, 0, 1, 1], [], []>} : vector<32x4xf32>, vector<4x256xf32>, vector<32x256xf32> -> vector<32x256xf32>
    %4 = arith.truncf %3 : vector<32x256xf32> to vector<32x256xbf16>
    %c0_4 = arith.constant 0 : index
    %c0_5 = arith.constant 0 : index
    %5 = vector.load %arg2[%c0_4, %c0_5] : memref<256x1024xbf16, #tpu.memory_space<vmem>>, vector<256x1024xbf16>
    %cst_6 = arith.constant dense<0.000000e+00> : vector<32x1024xf32>
    %6 = tpu.matmul %4, %5, %cst_6 {dimension_numbers = #tpu.dot_dimension_numbers<[1], [0], [0], [1], [0, 0, 1, 1], [], []>} : vector<32x256xbf16>, vector<256x1024xbf16>, vector<32x1024xf32> -> vector<32x1024xf32>
    %c0_7 = arith.constant 0 : index
    %c0_8 = arith.constant 0 : index
    %7 = vector.load %arg5[%c0_7, %c0_8] : memref<32x1xf32, #tpu.memory_space<vmem>>, vector<32x1xf32>
    %8 = vector.broadcast %7 : vector<32x1xf32> to vector<32x1024xf32>
    %9 = arith.addf %6, %8 : vector<32x1024xf32>
    %cst_9 = arith.constant 0.000000e+00 : f32
    %10 = vector.broadcast %cst_9 : f32 to vector<32x1024xf32>
    %11 = arith.maximumf %9, %10 : vector<32x1024xf32>
    %c0_10 = arith.constant 0 : index
    %c0_11 = arith.constant 0 : index
    %12 = vector.load %arg11[%c0_10, %c0_11] : memref<32x2048xf32, #tpu.memory_space<vmem>>, vector<32x1024xf32>
    tpu.vector_store %arg11[%c0_10, %c0_11], %11 {strides = array<i32>} : memref<32x2048xf32, #tpu.memory_space<vmem>>, vector<32x1024xf32>,
    %c0_12 = arith.constant 0 : index
    %c0_13 = arith.constant 0 : index
    %13 = vector.load %arg4[%c0_12, %c0_13] : memref<32x4xf32, #tpu.memory_space<vmem>>, vector<32x4xf32>
    %c1 = arith.constant 1 : index
    %c0_14 = arith.constant 0 : index
    %c0_15 = arith.constant 0 : index
    %14 = vector.load %arg1[%c1, %c0_14, %c0_15] : memref<2x4x256xf32, #tpu.memory_space<vmem>>, vector<1x4x256xf32>
    %15 = vector.shape_cast %14 : vector<1x4x256xf32> to vector<4x256xf32>
    %cst_16 = arith.constant dense<0.000000e+00> : vector<32x256xf32>
    %16 = tpu.matmul %13, %15, %cst_16 {dimension_numbers = #tpu.dot_dimension_numbers<[1], [0], [0], [1], [0, 0, 1, 1], [], []>} : vector<32x4xf32>, vector<4x256xf32>, vector<32x256xf32> -> vector<32x256xf32>
    %17 = arith.truncf %16 : vector<32x256xf32> to vector<32x256xbf16>
    %c0_17 = arith.constant 0 : index
    %c0_18 = arith.constant 0 : index
    %18 = vector.load %arg2[%c0_17, %c0_18] : memref<256x1024xbf16, #tpu.memory_space<vmem>>, vector<256x1024xbf16>
    %cst_19 = arith.constant dense<0.000000e+00> : vector<32x1024xf32>
    %19 = tpu.matmul %17, %18, %cst_19 {dimension_numbers = #tpu.dot_dimension_numbers<[1], [0], [0], [1], [0, 0, 1, 1], [], []>} : vector<32x256xbf16>, vector<256x1024xbf16>, vector<32x1024xf32> -> vector<32x1024xf32>
    %c0_20 = arith.constant 0 : index
    %c0_21 = arith.constant 0 : index
    %20 = vector.load %arg5[%c0_20, %c0_21] : memref<32x1xf32, #tpu.memory_space<vmem>>, vector<32x1xf32>
    %21 = vector.broadcast %20 : vector<32x1xf32> to vector<32x1024xf32>
    %22 = arith.addf %19, %21 : vector<32x1024xf32>
    %cst_22 = arith.constant 0.000000e+00 : f32
    %23 = vector.broadcast %cst_22 : f32 to vector<32x1024xf32>
    %24 = arith.maximumf %22, %23 : vector<32x1024xf32>
    %c0_23 = arith.constant 0 : index
    %c1024 = arith.constant 1024 : index
    %25 = vector.load %arg11[%c0_23, %c1024] : memref<32x2048xf32, #tpu.memory_space<vmem>>, vector<32x1024xf32>
    tpu.vector_store %arg11[%c0_23, %c1024], %24 {strides = array<i32>} : memref<32x2048xf32, #tpu.memory_space<vmem>>, vector<32x1024xf32>,
    %c0_24 = arith.constant 0 : index
    %c0_25 = arith.constant 0 : index
    %26 = vector.load %arg11[%c0_24, %c0_25] : memref<32x2048xf32, #tpu.memory_space<vmem>>, vector<32x2048xf32>
    %c33_i32 = arith.constant 33 : i32
    %27 = tpu.dynamic_rotate %26 by %c33_i32 dim 1 : vector<32x2048xf32>, i32 -> vector<32x2048xf32>
    %c0_26 = arith.constant 0 : index
    %c0_27 = arith.constant 0 : index
    %28 = vector.load %arg3[%c0_26, %c0_27] : memref<9x2048xf32, #tpu.memory_space<vmem>>, vector<1x2048xf32>
    %29 = vector.broadcast %28 : vector<1x2048xf32> to vector<32x2048xf32>
    %30 = arith.mulf %27, %29 : vector<32x2048xf32>
    %31 = arith.truncf %30 : vector<32x2048xf32> to vector<32x2048xbf16>
    %c0_28 = arith.constant 0 : index
    %c0_29 = arith.constant 0 : index
    %32 = vector.load %arg12[%c0_28, %c0_29] : memref<288x2048xbf16, #tpu.memory_space<vmem>>, vector<32x2048xbf16>
    tpu.vector_store %arg12[%c0_28, %c0_29], %31 {strides = array<i32>} : memref<288x2048xbf16, #tpu.memory_space<vmem>>, vector<32x2048xbf16>,
    %c0_30 = arith.constant 0 : index
    %c0_31 = arith.constant 0 : index
    %33 = vector.load %arg11[%c0_30, %c0_31] : memref<32x2048xf32, #tpu.memory_space<vmem>>, vector<32x2048xf32>
    %c32_i32 = arith.constant 32 : i32
    %34 = tpu.dynamic_rotate %33 by %c32_i32 dim 1 : vector<32x2048xf32>, i32 -> vector<32x2048xf32>
    %c1_32 = arith.constant 1 : index
    %c0_33 = arith.constant 0 : index
    %35 = vector.load %arg3[%c1_32, %c0_33] : memref<9x2048xf32, #tpu.memory_space<vmem>>, vector<1x2048xf32>
    %36 = vector.broadcast %35 : vector<1x2048xf32> to vector<32x2048xf32>
    %37 = arith.mulf %34, %36 : vector<32x2048xf32>
    %38 = arith.truncf %37 : vector<32x2048xf32> to vector<32x2048xbf16>
    %c32 = arith.constant 32 : index
    %c0_34 = arith.constant 0 : index
    %39 = vector.load %arg12[%c32, %c0_34] : memref<288x2048xbf16, #tpu.memory_space<vmem>>, vector<32x2048xbf16>
    tpu.vector_store %arg12[%c32, %c0_34], %38 {strides = array<i32>} : memref<288x2048xbf16, #tpu.memory_space<vmem>>, vector<32x2048xbf16>,
    %c0_35 = arith.constant 0 : index
    %c0_36 = arith.constant 0 : index
    %40 = vector.load %arg11[%c0_35, %c0_36] : memref<32x2048xf32, #tpu.memory_space<vmem>>, vector<32x2048xf32>
    %c31_i32 = arith.constant 31 : i32
    %41 = tpu.dynamic_rotate %40 by %c31_i32 dim 1 : vector<32x2048xf32>, i32 -> vector<32x2048xf32>
    %c2 = arith.constant 2 : index
    %c0_37 = arith.constant 0 : index
    %42 = vector.load %arg3[%c2, %c0_37] : memref<9x2048xf32, #tpu.memory_space<vmem>>, vector<1x2048xf32>
    %43 = vector.broadcast %42 : vector<1x2048xf32> to vector<32x2048xf32>
    %44 = arith.mulf %41, %43 : vector<32x2048xf32>
    %45 = arith.truncf %44 : vector<32x2048xf32> to vector<32x2048xbf16>
    %c64 = arith.constant 64 : index
    %c0_38 = arith.constant 0 : index
    %46 = vector.load %arg12[%c64, %c0_38] : memref<288x2048xbf16, #tpu.memory_space<vmem>>, vector<32x2048xbf16>
    tpu.vector_store %arg12[%c64, %c0_38], %45 {strides = array<i32>} : memref<288x2048xbf16, #tpu.memory_space<vmem>>, vector<32x2048xbf16>,
    %c0_39 = arith.constant 0 : index
    %c0_40 = arith.constant 0 : index
    %47 = vector.load %arg11[%c0_39, %c0_40] : memref<32x2048xf32, #tpu.memory_space<vmem>>, vector<32x2048xf32>
    %c1_i32 = arith.constant 1 : i32
    %48 = tpu.dynamic_rotate %47 by %c1_i32 dim 1 : vector<32x2048xf32>, i32 -> vector<32x2048xf32>
    %c3 = arith.constant 3 : index
    %c0_41 = arith.constant 0 : index
    %49 = vector.load %arg3[%c3, %c0_41] : memref<9x2048xf32, #tpu.memory_space<vmem>>, vector<1x2048xf32>
    %50 = vector.broadcast %49 : vector<1x2048xf32> to vector<32x2048xf32>
    %51 = arith.mulf %48, %50 : vector<32x2048xf32>
    %52 = arith.truncf %51 : vector<32x2048xf32> to vector<32x2048xbf16>
    %c96 = arith.constant 96 : index
    %c0_42 = arith.constant 0 : index
    %53 = vector.load %arg12[%c96, %c0_42] : memref<288x2048xbf16, #tpu.memory_space<vmem>>, vector<32x2048xbf16>
    tpu.vector_store %arg12[%c96, %c0_42], %52 {strides = array<i32>} : memref<288x2048xbf16, #tpu.memory_space<vmem>>, vector<32x2048xbf16>,
    %c0_43 = arith.constant 0 : index
    %c0_44 = arith.constant 0 : index
    %54 = vector.load %arg11[%c0_43, %c0_44] : memref<32x2048xf32, #tpu.memory_space<vmem>>, vector<32x2048xf32>
    %55 = arith.truncf %54 : vector<32x2048xf32> to vector<32x2048xbf16>
    %c128 = arith.constant 128 : index
    %c0_45 = arith.constant 0 : index
    %56 = vector.load %arg12[%c128, %c0_45] : memref<288x2048xbf16, #tpu.memory_space<vmem>>, vector<32x2048xbf16>
    tpu.vector_store %arg12[%c128, %c0_45], %55 {strides = array<i32>} : memref<288x2048xbf16, #tpu.memory_space<vmem>>, vector<32x2048xbf16>,
    %c0_46 = arith.constant 0 : index
    %c0_47 = arith.constant 0 : index
    %57 = vector.load %arg11[%c0_46, %c0_47] : memref<32x2048xf32, #tpu.memory_space<vmem>>, vector<32x2048xf32>
    %c2047_i32 = arith.constant 2047 : i32
    %58 = tpu.dynamic_rotate %57 by %c2047_i32 dim 1 : vector<32x2048xf32>, i32 -> vector<32x2048xf32>
    %c5 = arith.constant 5 : index
    %c0_48 = arith.constant 0 : index
    %59 = vector.load %arg3[%c5, %c0_48] : memref<9x2048xf32, #tpu.memory_space<vmem>>, vector<1x2048xf32>
    %60 = vector.broadcast %59 : vector<1x2048xf32> to vector<32x2048xf32>
    %61 = arith.mulf %58, %60 : vector<32x2048xf32>
    %62 = arith.truncf %61 : vector<32x2048xf32> to vector<32x2048xbf16>
    %c160 = arith.constant 160 : index
    %c0_49 = arith.constant 0 : index
    %63 = vector.load %arg12[%c160, %c0_49] : memref<288x2048xbf16, #tpu.memory_space<vmem>>, vector<32x2048xbf16>
    tpu.vector_store %arg12[%c160, %c0_49], %62 {strides = array<i32>} : memref<288x2048xbf16, #tpu.memory_space<vmem>>, vector<32x2048xbf16>,
    %c0_50 = arith.constant 0 : index
    %c0_51 = arith.constant 0 : index
    %64 = vector.load %arg11[%c0_50, %c0_51] : memref<32x2048xf32, #tpu.memory_space<vmem>>, vector<32x2048xf32>
    %c2017_i32 = arith.constant 2017 : i32
    %65 = tpu.dynamic_rotate %64 by %c2017_i32 dim 1 : vector<32x2048xf32>, i32 -> vector<32x2048xf32>
    %c6 = arith.constant 6 : index
    %c0_52 = arith.constant 0 : index
    %66 = vector.load %arg3[%c6, %c0_52] : memref<9x2048xf32, #tpu.memory_space<vmem>>, vector<1x2048xf32>
    %67 = vector.broadcast %66 : vector<1x2048xf32> to vector<32x2048xf32>
    %68 = arith.mulf %65, %67 : vector<32x2048xf32>
    %69 = arith.truncf %68 : vector<32x2048xf32> to vector<32x2048xbf16>
    %c192 = arith.constant 192 : index
    %c0_53 = arith.constant 0 : index
    %70 = vector.load %arg12[%c192, %c0_53] : memref<288x2048xbf16, #tpu.memory_space<vmem>>, vector<32x2048xbf16>
    tpu.vector_store %arg12[%c192, %c0_53], %69 {strides = array<i32>} : memref<288x2048xbf16, #tpu.memory_space<vmem>>, vector<32x2048xbf16>,
    %c0_54 = arith.constant 0 : index
    %c0_55 = arith.constant 0 : index
    %71 = vector.load %arg11[%c0_54, %c0_55] : memref<32x2048xf32, #tpu.memory_space<vmem>>, vector<32x2048xf32>
    %c2016_i32 = arith.constant 2016 : i32
    %72 = tpu.dynamic_rotate %71 by %c2016_i32 dim 1 : vector<32x2048xf32>, i32 -> vector<32x2048xf32>
    %c7 = arith.constant 7 : index
    %c0_56 = arith.constant 0 : index
    %73 = vector.load %arg3[%c7, %c0_56] : memref<9x2048xf32, #tpu.memory_space<vmem>>, vector<1x2048xf32>
    %74 = vector.broadcast %73 : vector<1x2048xf32> to vector<32x2048xf32>
    %75 = arith.mulf %72, %74 : vector<32x2048xf32>
    %76 = arith.truncf %75 : vector<32x2048xf32> to vector<32x2048xbf16>
    %c224 = arith.constant 224 : index
    %c0_57 = arith.constant 0 : index
    %77 = vector.load %arg12[%c224, %c0_57] : memref<288x2048xbf16, #tpu.memory_space<vmem>>, vector<32x2048xbf16>
    tpu.vector_store %arg12[%c224, %c0_57], %76 {strides = array<i32>} : memref<288x2048xbf16, #tpu.memory_space<vmem>>, vector<32x2048xbf16>,
    %c0_58 = arith.constant 0 : index
    %c0_59 = arith.constant 0 : index
    %78 = vector.load %arg11[%c0_58, %c0_59] : memref<32x2048xf32, #tpu.memory_space<vmem>>, vector<32x2048xf32>
    %c2015_i32 = arith.constant 2015 : i32
    %79 = tpu.dynamic_rotate %78 by %c2015_i32 dim 1 : vector<32x2048xf32>, i32 -> vector<32x2048xf32>
    %c8 = arith.constant 8 : index
    %c0_60 = arith.constant 0 : index
    %80 = vector.load %arg3[%c8, %c0_60] : memref<9x2048xf32, #tpu.memory_space<vmem>>, vector<1x2048xf32>
    %81 = vector.broadcast %80 : vector<1x2048xf32> to vector<32x2048xf32>
    %82 = arith.mulf %79, %81 : vector<32x2048xf32>
    %83 = arith.truncf %82 : vector<32x2048xf32> to vector<32x2048xbf16>
    %c256 = arith.constant 256 : index
    %c0_61 = arith.constant 0 : index
    %84 = vector.load %arg12[%c256, %c0_61] : memref<288x2048xbf16, #tpu.memory_space<vmem>>, vector<32x2048xbf16>
    tpu.vector_store %arg12[%c256, %c0_61], %83 {strides = array<i32>} : memref<288x2048xbf16, #tpu.memory_space<vmem>>, vector<32x2048xbf16>,
    %c0_62 = arith.constant 0 : index
    %c0_63 = arith.constant 0 : index
    %85 = vector.load %arg6[%c0_62, %c0_63] : memref<32x288xbf16, #tpu.memory_space<vmem>>, vector<32x288xbf16>
    %c0_64 = arith.constant 0 : index
    %c0_65 = arith.constant 0 : index
    %86 = vector.load %arg12[%c0_64, %c0_65] : memref<288x2048xbf16, #tpu.memory_space<vmem>>, vector<288x2048xbf16>
    %cst_66 = arith.constant dense<0.000000e+00> : vector<32x2048xf32>
    %87 = tpu.matmul %85, %86, %cst_66 {dimension_numbers = #tpu.dot_dimension_numbers<[1], [0], [0], [1], [0, 0, 1, 1], [], []>} : vector<32x288xbf16>, vector<288x2048xbf16>, vector<32x2048xf32> -> vector<32x2048xf32>
    %c0_67 = arith.constant 0 : index
    %c0_68 = arith.constant 0 : index
    %88 = vector.load %arg7[%c0_67, %c0_68] : memref<32x1xf32, #tpu.memory_space<vmem>>, vector<32x1xf32>
    %89 = vector.broadcast %88 : vector<32x1xf32> to vector<32x2048xf32>
    %90 = arith.addf %87, %89 : vector<32x2048xf32>
    %cst_69 = arith.constant 0.000000e+00 : f32
    %91 = vector.broadcast %cst_69 : f32 to vector<32x2048xf32>
    %92 = arith.maximumf %90, %91 : vector<32x2048xf32>
    %c0_70 = arith.constant 0 : index
    %c0_71 = arith.constant 0 : index
    %93 = vector.load %arg8[%c0_70, %c0_71] : memref<8x32xf32, #tpu.memory_space<vmem>>, vector<8x32xf32>
    %cst_72 = arith.constant dense<0.000000e+00> : vector<8x2048xf32>
    %94 = tpu.matmul %93, %92, %cst_72 {dimension_numbers = #tpu.dot_dimension_numbers<[1], [0], [0], [1], [0, 0, 1, 1], [], []>} : vector<8x32xf32>, vector<32x2048xf32>, vector<8x2048xf32> -> vector<8x2048xf32>
    %c0_73 = arith.constant 0 : index
    %c0_74 = arith.constant 0 : index
    %95 = vector.load %arg9[%c0_73, %c0_74] : memref<8x1xf32, #tpu.memory_space<vmem>>, vector<8x1xf32>
    %96 = vector.broadcast %95 : vector<8x1xf32> to vector<8x2048xf32>
    %97 = arith.addf %94, %96 : vector<8x2048xf32>
    %98 = vector.extract_strided_slice %97 {offsets = [0, 0], sizes = [8, 1024], strides = [1, 1]} : vector<8x2048xf32> to vector<8x1024xf32>
    %c0_75 = arith.constant 0 : index
    %c0_76 = arith.constant 0 : index
    %c0_77 = arith.constant 0 : index
    %99 = vector.load %arg10[%c0_75, %c0_76, %c0_77] : memref<2x8x1024xf32, #tpu.memory_space<vmem>>, vector<1x8x1024xf32>
    %100 = vector.shape_cast %99 : vector<1x8x1024xf32> to vector<8x1024xf32>
    %101 = vector.shape_cast %98 : vector<8x1024xf32> to vector<1x8x1024xf32>
    tpu.vector_store %arg10[%c0_75, %c0_76, %c0_77], %101 {strides = array<i32>} : memref<2x8x1024xf32, #tpu.memory_space<vmem>>, vector<1x8x1024xf32>,
    %102 = vector.extract_strided_slice %97 {offsets = [0, 1024], sizes = [8, 1024], strides = [1, 1]} : vector<8x2048xf32> to vector<8x1024xf32>
    %c1_78 = arith.constant 1 : index
    %c0_79 = arith.constant 0 : index
    %c0_80 = arith.constant 0 : index
    %103 = vector.load %arg10[%c1_78, %c0_79, %c0_80] : memref<2x8x1024xf32, #tpu.memory_space<vmem>>, vector<1x8x1024xf32>
    %104 = vector.shape_cast %103 : vector<1x8x1024xf32> to vector<8x1024xf32>
    %105 = vector.shape_cast %102 : vector<8x1024xf32> to vector<1x8x1024xf32>
    tpu.vector_store %arg10[%c1_78, %c0_79, %c0_80], %105 {strides = array<i32>} : memref<2x8x1024xf32, #tpu.memory_space<vmem>>, vector<1x8x1024xf32>,
    return
  }
  func.func @transform_0(%arg0: i32) -> (i32, i32, i32) {
    %c0_i32 = arith.constant 0 : i32
    %c0_i32_0 = arith.constant 0 : i32
    %c0_i32_1 = arith.constant 0 : i32
    %c0_i32_2 = arith.constant 0 : i32
    return %c0_i32, %c0_i32_0, %c0_i32_1 : i32, i32, i32
  }
  func.func @transform_1(%arg0: i32) -> (i32, i32) {
    %c0_i32 = arith.constant 0 : i32
    %c0_i32_0 = arith.constant 0 : i32
    %c0_i32_1 = arith.constant 0 : i32
    return %c0_i32, %c0_i32_0 : i32, i32
  }
  func.func @transform_2(%arg0: i32) -> (i32, i32) {
    %c0_i32 = arith.constant 0 : i32
    %c0_i32_0 = arith.constant 0 : i32
    %c0_i32_1 = arith.constant 0 : i32
    return %c0_i32, %c0_i32_0 : i32, i32
  }
  func.func @transform_3(%arg0: i32) -> (i32, i32) {
    %c0_i32 = arith.constant 0 : i32
    %c0_i32_0 = arith.constant 0 : i32
    %c0_i32_1 = arith.constant 0 : i32
    return %c0_i32, %c0_i32_0 : i32, i32
  }
  func.func @transform_4(%arg0: i32) -> (i32, i32) {
    %c0_i32 = arith.constant 0 : i32
    %c0_i32_0 = arith.constant 0 : i32
    %c0_i32_1 = arith.constant 0 : i32
    return %c0_i32, %c0_i32_0 : i32, i32
  }
  func.func @transform_5(%arg0: i32) -> (i32, i32) {
    %c0_i32 = arith.constant 0 : i32
    %c0_i32_0 = arith.constant 0 : i32
    %c0_i32_1 = arith.constant 0 : i32
    return %c0_i32, %c0_i32_0 : i32, i32
  }
  func.func @transform_6(%arg0: i32) -> (i32, i32) {
    %c0_i32 = arith.constant 0 : i32
    %c0_i32_0 = arith.constant 0 : i32
    %c0_i32_1 = arith.constant 0 : i32
    return %c0_i32, %c0_i32_0 : i32, i32
  }
  func.func @transform_7(%arg0: i32) -> (i32, i32) {
    %c0_i32 = arith.constant 0 : i32
    %c0_i32_0 = arith.constant 0 : i32
    %c0_i32_1 = arith.constant 0 : i32
    return %c0_i32, %c0_i32_0 : i32, i32
  }
  func.func @transform_8(%arg0: i32) -> (i32, i32) {
    %c0_i32 = arith.constant 0 : i32
    %c0_i32_0 = arith.constant 0 : i32
    %c0_i32_1 = arith.constant 0 : i32
    return %c0_i32, %c0_i32_0 : i32, i32
  }
  func.func @transform_9(%arg0: i32) -> (i32, i32, i32) {
    %c0_i32 = arith.constant 0 : i32
    %c0_i32_0 = arith.constant 0 : i32
    %c0_i32_1 = arith.constant 0 : i32
    %c0_i32_2 = arith.constant 0 : i32
    return %c0_i32, %c0_i32_0, %c0_i32_1 : i32, i32, i32
  }
}

</mosaic_0001>

<bundles_post_ra>
// kernel: base_net_head_forward.1
= control target key start
LH: loop header
LB: loop body
LE: loop exit
PB: predicated region body
PF: predicated region fallthrough
CT: control target
= control target key end

     0   :  { %vm53_vm0 = vcmask 1043456   ;;  %v15684_v1 = vmov 0.0   ;;  %vm40_vm1 = vcmask 31744   ;;  %s8767_s27 = smov 31   ;;  %s8768_s28 = smov 33   ;;  %vm6683_vm10 = vcmask 261120   ;;  %s15672_s0 = inlined_call_operand.vmem [shape: f32[2,4,256], index: 0, kind: input, shape index: {}]   ;;  %s15673_s3 = inlined_call_operand.vmem [shape: f32[32,4], index: 3, kind: input, shape index: {}]   ;;  %s15674_s1 = inlined_call_operand.vmem [shape: bf16[256,1024], index: 1, kind: input, shape index: {}]   ;;  %s15675_s4 = inlined_call_operand.vmem [shape: f32[32,1], index: 4, kind: input, shape index: {}]   ;;  %s15676_s2 = inlined_call_operand.vmem [shape: f32[9,2048], index: 2, kind: input, shape index: {}]   ;;  %s15677_s5 = inlined_call_operand.vmem [shape: bf16[32,288], index: 5, kind: input, shape index: {}]   ;;  %s15678_s6 = inlined_call_operand.vmem [shape: f32[32,1], index: 6, kind: input, shape index: {}]   ;;  %s15679_s8 = inlined_call_operand.vmem [shape: f32[8,1], index: 8, kind: input, shape index: {}]   ;;  %s15680_s7 = inlined_call_operand.vmem [shape: f32[8,32], index: 7, kind: input, shape index: {}]   ;;  %s15681_s9 = inlined_call_operand.vmem [shape: f32[2,8,1024], index: 9, kind: output, shape index: {}]  }
   0x1   :  { %v37_v0 = vld [vmem:[%s15672_s0] sm:$0xff]  ;;  %122 = vmatprep.mubr.f32.mxu0 %v15684_v1  ;;  %v152_v6 = vld [vmem:[%s15674_s1 + $0x8] sm:$0xff]  ;;  %v8924_v31 = vld [vmem:[%s15673_s3 + $0x10] sm:$0xff]  ;;  %s8769_s29 = smov 1   ;;  %s8770_s30 = smov 32  }
   0x2   :  { %v39_v2 = vcombine.high %v37_v0, %v37_v0  ;;  %v8832_v3 = vld [vmem:[%s15673_s3] sm:$0xff]  ;;  %v156_v8 = vld [vmem:[%s15674_s1 + $0x28] sm:$0xff]  ;;  %v8956_v40 = vld [vmem:[%s15673_s3 + $0x18] sm:$0xff]  ;;  %s8771_s10 = smov 127   ;;  %s8772_s11 = smov 97  }
   0x3   :  { %v151_v4 = vld [vmem:[%s15674_s1] sm:$0xff]  ;;  %v8858_v12 = vcombine.low %v152_v6, %v156_v8  ;;  %v8860_v13 = vcombine.high %v152_v6, %v156_v8  ;;  %v160_v15 = vld [vmem:[%s15674_s1 + $0x48] sm:$0xff]  ;;  %s8773_s12 = smov 96   ;;  %s8774_s13 = smov 95  }
   0x4   :  { %v155_v5 = vld [vmem:[%s15674_s1 + $0x20] sm:$0xff]  ;;  %8201 = vmatprep.subr.msk.mxu0 %vm53_vm0, %v39_v2  ;;  %v164_v16 = vld [vmem:[%s15674_s1 + $0x68] sm:$0xff] }
   0x5   :  { %v8844_v7 = vcombine.high %v151_v4, %v155_v5  ;;  %v8849_v9 = vcombine.low %v151_v4, %v155_v5  ;;  %v159_v10 = vld [vmem:[%s15674_s1 + $0x40] sm:$0xff]  ;;  %8202 = vmatpush1.msk.msra.mxu0 %vm53_vm0, %v37_v0  ;;  %v8876_v18 = vcombine.high %v160_v15, %v164_v16  ;;  %v168_v20 = vld [vmem:[%s15674_s1 + $0x88] sm:$0xff]  ;;  %v8896_v23 = vcombine.low %v160_v15, %v164_v16 }
   0x6   :  { %v163_v11 = vld [vmem:[%s15674_s1 + $0x60] sm:$0xff]  ;;  %8203 = vmatmul.mubr.msk.f32.vlgmr.msra.gmra.mrb[0].mxu0 %vm40_vm1, %v8832_v3  ;;  %v172_v21 = vld [vmem:[%s15674_s1 + $0xa8] sm:$0xff]  ;;  %996 = vmatprep.subr.bf16.mxu0 %v8860_v13 }
   0x7   :  { %v8862_v14 = vcombine.high %v159_v10, %v163_v11  ;;  %v167_v17 = vld [vmem:[%s15674_s1 + $0x80] sm:$0xff]  ;;  %943 = vmatprep.subr.bf16.mxu1 %v8844_v7  ;;  %128 = vmatprep.mubr.f32.mxu0 %v15684_v1  ;;  %v8891_v22 = vld [vmem:[%s15673_s3 + $0x8] sm:$0xff]  ;;  %v8898_v24 = vcombine.low %v159_v10, %v163_v11  ;;  %v8904_v26 = vcombine.high %v168_v20, %v172_v21 }
   0x8   :  { %v171_v19 = vld [vmem:[%s15674_s1 + $0xa0] sm:$0xff]  ;;  %944 = vmatpush1.bf16.msra.mxu1 %v8849_v9  ;;  %997 = vmatpush1.bf16.msra.mxu0 %v8858_v12  ;;  %v176_v29 = vld [vmem:[%s15674_s1 + $0xc8] sm:$0xff]  ;;  %v8928_v32 = vcombine.low %v168_v20, %v172_v21 }
   0x9   :  { %945 = vmatprep.subr.bf16.mxu1 %v8862_v14  ;;  %998 = vmatprep.subr.bf16.mxu0 %v8876_v18  ;;  %v8902_v25 = vcombine.high %v167_v17, %v171_v19  ;;  %v175_v27 = vld [vmem:[%s15674_s1 + $0xc0] sm:$0xff]  ;;  %v180_v30 = vld [vmem:[%s15674_s1 + $0xe8] sm:$0xff]  ;;  %v8930_v33 = vcombine.low %v167_v17, %v171_v19 }
   0xa   :  { %8204 = vmatmul.mubr.msk.f32.gmra.mrb[2].mxu0 %vm40_vm1, %v8891_v22  ;;  %v179_v28 = vld [vmem:[%s15674_s1 + $0xe0] sm:$0xff]  ;;  %v8936_v35 = vcombine.high %v176_v29, %v180_v30  ;;  %v184_v38 = vld [vmem:[%s15674_s1 + $0x108] sm:$0xff]  ;;  %v8960_v41 = vcombine.low %v176_v29, %v180_v30 }
   0xb   :  { %134 = vmatprep.mubr.f32.mxu0 %v15684_v1  ;;  %v8934_v34 = vcombine.high %v175_v27, %v179_v28  ;;  %v183_v36 = vld [vmem:[%s15674_s1 + $0x100] sm:$0xff]  ;;  %v188_v39 = vld [vmem:[%s15674_s1 + $0x128] sm:$0xff]  ;;  %v8962_v42 = vcombine.low %v175_v27, %v179_v28 }
   0xc   :  { %946 = vmatpush1.bf16.msra.mxu1 %v8898_v24  ;;  %999 = vmatpush1.bf16.msra.mxu0 %v8896_v23  ;;  %v187_v37 = vld [vmem:[%s15674_s1 + $0x120] sm:$0xff]  ;;  %v8968_v44 = vcombine.high %v184_v38, %v188_v39  ;;  %v192_v47 = vld [vmem:[%s15674_s1 + $0x148] sm:$0xff]  ;;  %v8986_v49 = vcombine.low %v184_v38, %v188_v39 }
   0xd   :  { %947 = vmatprep.subr.bf16.mxu1 %v8902_v25  ;;  %1000 = vmatprep.subr.bf16.mxu0 %v8904_v26  ;;  %v8966_v43 = vcombine.high %v183_v36, %v187_v37  ;;  %v191_v45 = vld [vmem:[%s15674_s1 + $0x140] sm:$0xff]  ;;  %v196_v48 = vld [vmem:[%s15674_s1 + $0x168] sm:$0xff]  ;;  %v8988_v50 = vcombine.low %v183_v36, %v187_v37 }
   0xe   :  { %8205 = vmatmul.mubr.msk.f32.gmra.mrb[4].mxu0 %vm40_vm1, %v8924_v31  ;;  %v195_v46 = vld [vmem:[%s15674_s1 + $0x160] sm:$0xff]  ;;  %v8994_v52 = vcombine.high %v192_v47, %v196_v48  ;;  %v200_v55 = vld [vmem:[%s15674_s1 + $0x188] sm:$0xff]  ;;  %v9010_v57 = vcombine.low %v192_v47, %v196_v48 }
   0xf   :  { %140 = vmatprep.mubr.f32.mxu0 %v15684_v1  ;;  %v8992_v51 = vcombine.high %v191_v45, %v195_v46  ;;  %v199_v53 = vld [vmem:[%s15674_s1 + $0x180] sm:$0xff]  ;;  %v204_v56 = vld [vmem:[%s15674_s1 + $0x1a8] sm:$0xff]  ;;  %v9012_v58 = vcombine.low %v191_v45, %v195_v46  ;;  %v177_v1 = vld [vmem:[%s15674_s1 + $0xd0] sm:$0xff] }
  0x10   :  { %948 = vmatpush1.bf16.msra.mxu1 %v8930_v33  ;;  %1001 = vmatpush1.bf16.msra.mxu0 %v8928_v32  ;;  %v203_v54 = vld [vmem:[%s15674_s1 + $0x1a0] sm:$0xff]  ;;  %v9018_v60 = vcombine.high %v200_v55, %v204_v56  ;;  %v208_v63 = vld [vmem:[%s15674_s1 + $0x1c8] sm:$0xff]  ;;  %v9034_v2 = vcombine.low %v200_v55, %v204_v56 }
  0x11   :  { %949 = vmatprep.subr.bf16.mxu1 %v8934_v34  ;;  %1002 = vmatprep.subr.bf16.mxu0 %v8936_v35  ;;  %v9016_v59 = vcombine.high %v199_v53, %v203_v54  ;;  %v207_v61 = vld [vmem:[%s15674_s1 + $0x1c0] sm:$0xff]  ;;  %v212_v0 = vld [vmem:[%s15674_s1 + $0x1e8] sm:$0xff]  ;;  %v9036_v4 = vcombine.low %v199_v53, %v203_v54 }
  0x12   :  { %8206 = vmatmul.mubr.msk.f32.gmra.mrb[6].mxu0 %vm40_vm1, %v8956_v40  ;;  %v211_v62 = vld [vmem:[%s15674_s1 + $0x1e0] sm:$0xff]  ;;  %v9042_v6 = vcombine.high %v208_v63, %v212_v0  ;;  %v216_v11 = vld [vmem:[%s15674_s1 + $0x208] sm:$0xff]  ;;  %v9058_v16 = vcombine.low %v208_v63, %v212_v0 }
  0x13   :  { %v9040_v5 = vcombine.high %v207_v61, %v211_v62  ;;  %v215_v8 = vld [vmem:[%s15674_s1 + $0x200] sm:$0xff]  ;;  %v220_v15 = vld [vmem:[%s15674_s1 + $0x228] sm:$0xff]  ;;  %v9060_v17 = vcombine.low %v207_v61, %v211_v62 }
  0x14   :  { %950 = vmatpush1.bf16.msra.mxu1 %v8962_v42  ;;  %1003 = vmatpush1.bf16.msra.mxu0 %v8960_v41  ;;  %v219_v10 = vld [vmem:[%s15674_s1 + $0x220] sm:$0xff]  ;;  %v9066_v20 = vcombine.high %v216_v11, %v220_v15  ;;  %v224_v28 = vld [vmem:[%s15674_s1 + $0x248] sm:$0xff]  ;;  %v9082_v30 = vcombine.low %v216_v11, %v220_v15 }
  0x15   :  { %951 = vmatprep.subr.bf16.mxu1 %v8966_v43  ;;  %1004 = vmatprep.subr.bf16.mxu0 %v8968_v44  ;;  %v9064_v19 = vcombine.high %v215_v8, %v219_v10  ;;  %v223_v21 = vld [vmem:[%s15674_s1 + $0x240] sm:$0xff]  ;;  %v228_v29 = vld [vmem:[%s15674_s1 + $0x268] sm:$0xff]  ;;  %v9084_v36 = vcombine.low %v215_v8, %v219_v10 }
  0x16   :  { %v227_v27 = vld [vmem:[%s15674_s1 + $0x260] sm:$0xff]  ;;  %16267 = vst [vmem:[#allocation4_spill] sm:$0xff] %v9082_v30  ;;  %v8282_v38 = vcombine.high %v224_v28, %v228_v29  ;;  %v232_v46 = vld [vmem:[%s15674_s1 + $0x288] sm:$0xff]  ;;  %v8281_v48 = vcombine.low %v224_v28, %v228_v29 }
  0x17   :  { %v9088_v37 = vcombine.high %v223_v21, %v227_v27  ;;  %v231_v39 = vld [vmem:[%s15674_s1 + $0x280] sm:$0xff]  ;;  %v236_v47 = vld [vmem:[%s15674_s1 + $0x2a8] sm:$0xff]  ;;  %v9104_v53 = vcombine.low %v223_v21, %v227_v27 }
  0x18   :  { %952 = vmatpush1.bf16.msra.mxu1 %v8988_v50  ;;  %1005 = vmatpush1.bf16.msra.mxu0 %v8986_v49  ;;  %v235_v45 = vld [vmem:[%s15674_s1 + $0x2a0] sm:$0xff]  ;;  %v8290_v55 = vcombine.high %v232_v46, %v236_v47  ;;  %v240_v62 = vld [vmem:[%s15674_s1 + $0x2c8] sm:$0xff]  ;;  %v8289_v0 = vcombine.low %v232_v46, %v236_v47 }
  0x19   :  { %953 = vmatprep.subr.bf16.mxu1 %v8992_v51  ;;  %1006 = vmatprep.subr.bf16.mxu0 %v8994_v52  ;;  %16268 = vst [vmem:[#allocation5_spill] sm:$0xff] %v9088_v37  ;;  %16269 = vst [vmem:[#allocation6_spill] sm:$0xff] %v9104_v53  ;;  %v8288_v54 = vcombine.high %v231_v39, %v235_v45  ;;  %v239_v56 = vld [vmem:[%s15674_s1 + $0x2c0] sm:$0xff]  ;;  %v244_v63 = vld [vmem:[%s15674_s1 + $0x2e8] sm:$0xff]  ;;  %v8287_v8 = vcombine.low %v231_v39, %v235_v45 }
  0x1a   :  { %v243_v61 = vld [vmem:[%s15674_s1 + $0x2e0] sm:$0xff]  ;;  %v8298_v11 = vcombine.high %v240_v62, %v244_v63  ;;  %v248_v27 = vld [vmem:[%s15674_s1 + $0x308] sm:$0xff]  ;;  %v8297_v29 = vcombine.low %v240_v62, %v244_v63 }
  0x1b   :  { %v8296_v10 = vcombine.high %v239_v56, %v243_v61  ;;  %v247_v15 = vld [vmem:[%s15674_s1 + $0x300] sm:$0xff]  ;;  %v252_v28 = vld [vmem:[%s15674_s1 + $0x328] sm:$0xff] }
  0x1c   :  { %954 = vmatpush1.bf16.msra.mxu1 %v9012_v58  ;;  %1007 = vmatpush1.bf16.msra.mxu0 %v9010_v57  ;;  %v251_v21 = vld [vmem:[%s15674_s1 + $0x320] sm:$0xff]  ;;  %v8306_v45 = vcombine.high %v248_v27, %v252_v28 }
  0x1d   :  { %955 = vmatprep.subr.bf16.mxu1 %v9016_v59  ;;  %1008 = vmatprep.subr.bf16.mxu0 %v9018_v60  ;;  %v8304_v39 = vcombine.high %v247_v15, %v251_v21  ;;  %v255_v46 = vld [vmem:[%s15674_s1 + $0x340] sm:$0xff] }
  0x1e   :  { %v259_v47 = vld [vmem:[%s15674_s1 + $0x360] sm:$0xff] }
  0x20   :  { %956 = vmatpush1.bf16.msra.mxu1 %v9036_v4  ;;  %1009 = vmatpush1.bf16.msra.mxu0 %v9034_v2 }
  0x21   :  { %957 = vmatprep.subr.bf16.mxu1 %v9040_v5  ;;  %1010 = vmatprep.subr.bf16.mxu0 %v9042_v6 }
  0x24   :  { %958 = vmatpush1.bf16.msra.mxu1 %v9060_v17  ;;  %1011 = vmatpush1.bf16.msra.mxu0 %v9058_v16 }
  0x25   :  { %959 = vmatprep.subr.bf16.mxu1 %v9064_v19  ;;  %1012 = vmatprep.subr.bf16.mxu0 %v9066_v20 }
  0x28   :  { %960 = vmatpush1.bf16.msra.mxu1 %v9084_v36  ;;  %1013 = vmatpush1.bf16.msra.mxu0 %v9082_v30  ;;  %v181_v30 = vld [vmem:[%s15674_s1 + $0xf0] sm:$0xff] }
  0x29   :  { %961 = vmatprep.subr.bf16.mxu1 %v9088_v37  ;;  %1014 = vmatprep.subr.bf16.mxu0 %v8282_v38  ;;  %v8295_v38 = vcombine.low %v239_v56, %v243_v61  ;;  %v8303_v56 = vcombine.low %v247_v15, %v251_v21  ;;  %v8312_v61 = vcombine.high %v255_v46, %v259_v47  ;;  %v268_v21 = vld [vmem:[%s15674_s1 + $0x3a8] sm:$0xff] }
  0x2c   :  { %962 = vmatpush1.bf16.msra.mxu1 %v9104_v53  ;;  %1015 = vmatpush1.bf16.msra.mxu0 %v8281_v48  ;;  %v256_v48 = vld [vmem:[%s15674_s1 + $0x348] sm:$0xff] }
  0x2d   :  { %963 = vmatprep.subr.bf16.mxu1 %v8288_v54  ;;  %1016 = vmatprep.subr.bf16.mxu0 %v8290_v55  ;;  %v260_v54 = vld [vmem:[%s15674_s1 + $0x368] sm:$0xff]  ;;  %v8305_v55 = vcombine.low %v248_v27, %v252_v28 }
  0x2e   :  { %v8314_v62 = vcombine.high %v256_v48, %v260_v54  ;;  %v8313_v63 = vcombine.low %v256_v48, %v260_v54 }
  0x30   :  { %964 = vmatpush1.bf16.msra.mxu1 %v8287_v8  ;;  %1017 = vmatpush1.bf16.msra.mxu0 %v8289_v0  ;;  %v8311_v0 = vcombine.low %v255_v46, %v259_v47  ;;  %v263_v8 = vld [vmem:[%s15674_s1 + $0x380] sm:$0xff]  ;;  %v276_v47 = vld [vmem:[%s15674_s1 + $0x3e8] sm:$0xff] }
  0x31   :  { %965 = vmatprep.subr.bf16.mxu1 %v8296_v10  ;;  %1018 = vmatprep.subr.bf16.mxu0 %v8298_v11  ;;  %v267_v10 = vld [vmem:[%s15674_s1 + $0x3a0] sm:$0xff]  ;;  %v264_v11 = vld [vmem:[%s15674_s1 + $0x388] sm:$0xff] }
  0x32   :  { %v8320_v15 = vcombine.high %v263_v8, %v267_v10  ;;  %v8321_v27 = vcombine.low %v264_v11, %v268_v21  ;;  %v8322_v28 = vcombine.high %v264_v11, %v268_v21  ;;  %v279_v21 = vld [vmem:[%s15675_s4] sm:$0xff] }
  0x34   :  { %966 = vmatpush1.bf16.msra.mxu1 %v8295_v38  ;;  %1019 = vmatpush1.bf16.msra.mxu0 %v8297_v29  ;;  %v8319_v29 = vcombine.low %v263_v8, %v267_v10  ;;  %v271_v38 = vld [vmem:[%s15674_s1 + $0x3c0] sm:$0xff] }
  0x35   :  { %967 = vmatprep.subr.bf16.mxu1 %v8304_v39  ;;  %1020 = vmatprep.subr.bf16.mxu0 %v8306_v45  ;;  %v275_v39 = vld [vmem:[%s15674_s1 + $0x3e0] sm:$0xff]  ;;  %v272_v45 = vld [vmem:[%s15674_s1 + $0x3c8] sm:$0xff] }
  0x36   :  { %v8328_v46 = vcombine.high %v271_v38, %v275_v39  ;;  %v8329_v48 = vcombine.low %v272_v45, %v276_v47  ;;  %v8330_v54 = vcombine.high %v272_v45, %v276_v47  ;;  %v161_v45 = vld [vmem:[%s15674_s1 + $0x50] sm:$0xff] }
  0x37   :  { %v165_v47 = vld [vmem:[%s15674_s1 + $0x70] sm:$0xff] }
  0x38   :  { %968 = vmatpush1.bf16.msra.mxu1 %v8303_v56  ;;  %1021 = vmatpush1.bf16.msra.mxu0 %v8305_v55  ;;  %v8327_v55 = vcombine.low %v271_v38, %v275_v39  ;;  %v153_v56 = vld [vmem:[%s15674_s1 + $0x10] sm:$0xff] }
  0x39   :  { %969 = vmatprep.subr.bf16.mxu1 %v8312_v61  ;;  %1022 = vmatprep.subr.bf16.mxu0 %v8314_v62  ;;  %v157_v61 = vld [vmem:[%s15674_s1 + $0x30] sm:$0xff]  ;;  %v154_v62 = vld [vmem:[%s15674_s1 + $0x18] sm:$0xff] }
  0x3a   :  { %v8211_v8 = vcombine.low %v153_v56, %v157_v61 }
  0x3c   :  { %970 = vmatpush1.bf16.msra.mxu1 %v8311_v0  ;;  %1023 = vmatpush1.bf16.msra.mxu0 %v8313_v63  ;;  %v8212_v63 = vcombine.high %v153_v56, %v157_v61  ;;  %v158_v0 = vld [vmem:[%s15674_s1 + $0x38] sm:$0xff] }
  0x3d   :  { %971 = vmatprep.subr.bf16.mxu1 %v8320_v15  ;;  %1024 = vmatprep.subr.bf16.mxu0 %v8322_v28  ;;  %v8213_v10 = vcombine.low %v154_v62, %v158_v0  ;;  %v8214_v11 = vcombine.high %v154_v62, %v158_v0  ;;  %v15682_v15 = vmov 0   ;;  %v1466_v28 = vld [vmem:[%s15675_s4 + $0x10] sm:$0xff]  ;;  %v8220_v62 = vcombine.high %v161_v45, %v165_v47 }
  0x3e   :  { %8740 = vset.pattern.permute.xlu0 %v15682_v15  ;;  %8741 = vset.pattern.permute.xlu1 %v15682_v15  ;;  %v169_v0 = vld [vmem:[%s15674_s1 + $0x90] sm:$0xff] }
  0x3f   :  { %285 = vperm.xlu0 %8740, %v279_v21   ;;  %295 = vperm.xlu1 %8741, %v1466_v28  }
  0x40   :  { %972 = vmatpush1.bf16.msra.mxu1 %v8319_v29  ;;  %1025 = vmatpush1.bf16.msra.mxu0 %v8321_v27  ;;  %v280_v27 = vld [vmem:[%s15675_s4 + $0x8] sm:$0xff]  ;;  %v282_v29 = vld [vmem:[%s15675_s4 + $0x18] sm:$0xff] }
  0x41   :  { %973 = vmatprep.subr.bf16.mxu1 %v8328_v46  ;;  %1026 = vmatprep.subr.bf16.mxu0 %v8330_v54  ;;  %v166_v54 = vld [vmem:[%s15674_s1 + $0x78] sm:$0xff] }
  0x43   :  { %290 = vperm.xlu0 %8740, %v280_v27   ;;  %300 = vperm.xlu1 %8741, %v282_v29  }
  0x44   :  { %974 = vmatpush1.bf16.msra.mxu1 %v8327_v55  ;;  %1027 = vmatpush1.bf16.msra.mxu0 %v8329_v48  ;;  %v162_v48 = vld [vmem:[%s15674_s1 + $0x58] sm:$0xff] }
  0x45   :  { %1049 = vmatprep.subr.bf16.mxu1 %v8212_v63  ;;  %1102 = vmatprep.subr.bf16.mxu0 %v8214_v11  ;;  %v8222_v63 = vcombine.high %v162_v48, %v166_v54 }
  0x47   :  { %1470 = vperm.xlu0 %8740, %v279_v21   ;;  %1475 = vperm.xlu1 %8741, %v280_v27   ;;  %v173_v21 = vld [vmem:[%s15674_s1 + $0xb0] sm:$0xff]  ;;  %v170_v27 = vld [vmem:[%s15674_s1 + $0x98] sm:$0xff] }
  0x4b   :  { %1480 = vperm.xlu0 %8740, %v1466_v28   ;;  %1485 = vperm.xlu1 %8741, %v282_v29   ;;  %v174_v28 = vld [vmem:[%s15674_s1 + $0xb8] sm:$0xff] }
  0xd9   :  { %v124_v38 = vpop.f32.mrb[0].mxu0 }
  0xda   :  { %v126_v39 = vpop.f32.mrb[1].mxu0 }
  0xdd   :  { %v130_v46 = vpop.f32.mrb[2].mxu0 }
  0xde   :  { %v9206_v55 = vpack.c.bf16 %v130_v46, %v124_v38  ;;  %v132_v56 = vpop.f32.mrb[3].mxu0  ;;  %v8219_v38 = vcombine.low %v161_v45, %v165_v47  ;;  %v8228_v46 = vcombine.high %v169_v0, %v173_v21  ;;  %v8227_v47 = vcombine.low %v169_v0, %v173_v21  ;;  %v190_v0 = vld [vmem:[%s15674_s1 + $0x138] sm:$0xff] }
  0xdf   :  { %v148_v61 = vpack.c.bf16 %v132_v56, %v126_v39  ;;  %v8221_v39 = vcombine.low %v162_v48, %v166_v54  ;;  %v8230_v56 = vcombine.high %v170_v27, %v174_v28  ;;  %v185_v48 = vld [vmem:[%s15674_s1 + $0x110] sm:$0xff]  ;;  %v8236_v54 = vcombine.high %v177_v1, %v181_v30 }
  0xe1   :  { %975 = vmatprep.mubr.bf16.mxu1 %v148_v61  ;;  %1028 = vmatprep.mubr.bf16.mxu0 %v148_v61  ;;  %v136_v11 = vpop.f32.mrb[4].mxu0 }
  0xe2   :  { %976 = vmatmul.mubr.bf16.vlgmr.msra.gmra.mrb[0].mxu1 %v9206_v55  ;;  %1029 = vmatmul.mubr.bf16.vlgmr.msra.gmra.mrb[8].mxu0 %v9206_v55  ;;  %v138_v29 = vpop.f32.mrb[5].mxu0 }
  0xe3   :  { %1050 = vmatpush1.bf16.msra.mxu1 %v8211_v8  ;;  %1103 = vmatpush1.bf16.msra.mxu0 %v8213_v10  ;;  %v178_v8 = vld [vmem:[%s15674_s1 + $0xd8] sm:$0xff] }
  0xe4   :  { %1051 = vmatprep.subr.bf16.mxu1 %v8220_v62  ;;  %1104 = vmatprep.subr.bf16.mxu0 %v8222_v63  ;;  %v182_v10 = vld [vmem:[%s15674_s1 + $0xf8] sm:$0xff] }
  0xe5   :  { %v142_v15 = vpop.f32.mrb[6].mxu0  ;;  %v8238_v62 = vcombine.high %v178_v8, %v182_v10  ;;  %v186_v63 = vld [vmem:[%s15674_s1 + $0x118] sm:$0xff]  ;;  %v8237_v21 = vcombine.low %v178_v8, %v182_v10  ;;  %v201_v8 = vld [vmem:[%s15674_s1 + $0x190] sm:$0xff] }
  0xe6   :  { %v9225_v53 = vpack.c.bf16 %v142_v15, %v136_v11  ;;  %v144_v37 = vpop.f32.mrb[7].mxu0  ;;  %v8229_v15 = vcombine.low %v170_v27, %v174_v28  ;;  %v8235_v11 = vcombine.low %v177_v1, %v181_v30  ;;  %v8246_v28 = vcombine.high %v186_v63, %v190_v0  ;;  %v198_v1 = vld [vmem:[%s15674_s1 + $0x178] sm:$0xff]  ;;  %v205_v10 = vld [vmem:[%s15674_s1 + $0x1b0] sm:$0xff] }
  0xe7   :  { %v9236_v45 = vpack.c.bf16 %v144_v37, %v138_v29  ;;  %1052 = vmatpush1.bf16.msra.mxu1 %v8219_v38  ;;  %1105 = vmatpush1.bf16.msra.mxu0 %v8221_v39  ;;  %v189_v37 = vld [vmem:[%s15674_s1 + $0x130] sm:$0xff]  ;;  %v194_v39 = vld [vmem:[%s15674_s1 + $0x158] sm:$0xff] }
  0xe8   :  { %1053 = vmatprep.subr.bf16.mxu1 %v8228_v46  ;;  %1106 = vmatprep.subr.bf16.mxu0 %v8230_v56  ;;  %v8244_v27 = vcombine.high %v185_v48, %v189_v37  ;;  %v193_v29 = vld [vmem:[%s15674_s1 + $0x150] sm:$0xff]  ;;  %v8243_v30 = vcombine.low %v185_v48, %v189_v37  ;;  %v8254_v56 = vcombine.high %v194_v39, %v198_v1 }
  0xe9   :  { %985 = vmatprep.mubr.bf16.mxu1 %v9236_v45  ;;  %1038 = vmatprep.mubr.bf16.mxu0 %v9236_v45  ;;  %v197_v38 = vld [vmem:[%s15674_s1 + $0x170] sm:$0xff] }
  0xea   :  { %986 = vmatmul.mubr.bf16.gmra.mrb[4].mxu1 %v9225_v53  ;;  %1039 = vmatmul.mubr.bf16.gmra.mrb[12].mxu0 %v9225_v53  ;;  %v8252_v46 = vcombine.high %v193_v29, %v197_v38  ;;  %v8251_v48 = vcombine.low %v193_v29, %v197_v38 }
  0xeb   :  { %1054 = vmatpush1.bf16.msra.mxu1 %v8227_v47  ;;  %1107 = vmatpush1.bf16.msra.mxu0 %v8229_v15  ;;  %v202_v47 = vld [vmem:[%s15674_s1 + $0x198] sm:$0xff] }
  0xec   :  { %1081 = vmatprep.mubr.bf16.mxu1 %v148_v61  ;;  %1134 = vmatprep.mubr.bf16.mxu0 %v148_v61  ;;  %v8245_v61 = vcombine.low %v186_v63, %v190_v0  ;;  %v206_v15 = vld [vmem:[%s15674_s1 + $0x1b8] sm:$0xff]  ;;  %v209_v63 = vld [vmem:[%s15674_s1 + $0x1d0] sm:$0xff] }
  0xed   :  { %1055 = vmatprep.subr.bf16.mxu1 %v8236_v54  ;;  %1108 = vmatprep.subr.bf16.mxu0 %v8238_v62  ;;  %v8253_v54 = vcombine.low %v194_v39, %v198_v1  ;;  %v8260_v62 = vcombine.high %v201_v8, %v205_v10  ;;  %v8262_v37 = vcombine.high %v202_v47, %v206_v15  ;;  %v213_v0 = vld [vmem:[%s15674_s1 + $0x1f0] sm:$0xff] }
  0xee   :  { %v8268_v29 = vcombine.high %v209_v63, %v213_v0  ;;  %v217_v39 = vld [vmem:[%s15674_s1 + $0x210] sm:$0xff] }
  0xef   :  { %1056 = vmatpush1.bf16.msra.mxu1 %v8235_v11  ;;  %1109 = vmatpush1.bf16.msra.mxu0 %v8237_v21  ;;  %v210_v11 = vld [vmem:[%s15674_s1 + $0x1d8] sm:$0xff]  ;;  %v221_v1 = vld [vmem:[%s15674_s1 + $0x230] sm:$0xff] }
  0xf0   :  { %1057 = vmatprep.subr.bf16.mxu1 %v8244_v27  ;;  %1110 = vmatprep.subr.bf16.mxu0 %v8246_v28  ;;  %v214_v21 = vld [vmem:[%s15674_s1 + $0x1f8] sm:$0xff]  ;;  %v8259_v27 = vcombine.low %v201_v8, %v205_v10  ;;  %v8261_v28 = vcombine.low %v202_v47, %v206_v15  ;;  %v8276_v8 = vcombine.high %v217_v39, %v221_v1  ;;  %v225_v47 = vld [vmem:[%s15674_s1 + $0x250] sm:$0xff] }
  0xf1   :  { %v8270_v38 = vcombine.high %v210_v11, %v214_v21  ;;  %v229_v15 = vld [vmem:[%s15674_s1 + $0x270] sm:$0xff] }
  0xf3   :  { %1058 = vmatpush1.bf16.msra.mxu1 %v8243_v30  ;;  %1111 = vmatpush1.bf16.msra.mxu0 %v8245_v61  ;;  %v218_v30 = vld [vmem:[%s15674_s1 + $0x218] sm:$0xff] }
  0xf4   :  { %1059 = vmatprep.subr.bf16.mxu1 %v8252_v46  ;;  %1112 = vmatprep.subr.bf16.mxu0 %v8254_v56  ;;  %v222_v61 = vld [vmem:[%s15674_s1 + $0x238] sm:$0xff]  ;;  %v8267_v46 = vcombine.low %v209_v63, %v213_v0  ;;  %v8269_v56 = vcombine.low %v210_v11, %v214_v21  ;;  %v8284_v63 = vcombine.high %v225_v47, %v229_v15  ;;  %v233_v11 = vld [vmem:[%s15674_s1 + $0x290] sm:$0xff] }
  0xf5   :  { %v8278_v10 = vcombine.high %v218_v30, %v222_v61  ;;  %v237_v21 = vld [vmem:[%s15674_s1 + $0x2b0] sm:$0xff] }
  0xf7   :  { %1060 = vmatpush1.bf16.msra.mxu1 %v8251_v48  ;;  %1113 = vmatpush1.bf16.msra.mxu0 %v8253_v54  ;;  %v226_v48 = vld [vmem:[%s15674_s1 + $0x258] sm:$0xff] }
  0xf8   :  { %1061 = vmatprep.subr.bf16.mxu1 %v8260_v62  ;;  %1114 = vmatprep.subr.bf16.mxu0 %v8262_v37  ;;  %v230_v54 = vld [vmem:[%s15674_s1 + $0x278] sm:$0xff]  ;;  %v8275_v62 = vcombine.low %v217_v39, %v221_v1  ;;  %v8277_v37 = vcombine.low %v218_v30, %v222_v61  ;;  %v8292_v39 = vcombine.high %v233_v11, %v237_v21  ;;  %v241_v30 = vld [vmem:[%s15674_s1 + $0x2d0] sm:$0xff] }
  0xf9   :  { %v8286_v0 = vcombine.high %v226_v48, %v230_v54  ;;  %v245_v61 = vld [vmem:[%s15674_s1 + $0x2f0] sm:$0xff] }
  0xfb   :  { %1062 = vmatpush1.bf16.msra.mxu1 %v8259_v27  ;;  %1115 = vmatpush1.bf16.msra.mxu0 %v8261_v28  ;;  %v234_v27 = vld [vmem:[%s15674_s1 + $0x298] sm:$0xff] }
  0xfc   :  { %1063 = vmatprep.subr.bf16.mxu1 %v8268_v29  ;;  %1116 = vmatprep.subr.bf16.mxu0 %v8270_v38  ;;  %v238_v28 = vld [vmem:[%s15674_s1 + $0x2b8] sm:$0xff]  ;;  %v8283_v29 = vcombine.low %v225_v47, %v229_v15  ;;  %v8285_v38 = vcombine.low %v226_v48, %v230_v54  ;;  %v8300_v47 = vcombine.high %v241_v30, %v245_v61  ;;  %v249_v48 = vld [vmem:[%s15674_s1 + $0x310] sm:$0xff] }
  0xfd   :  { %v8294_v1 = vcombine.high %v234_v27, %v238_v28  ;;  %v253_v54 = vld [vmem:[%s15674_s1 + $0x330] sm:$0xff] }
  0xff   :  { %1064 = vmatpush1.bf16.msra.mxu1 %v8267_v46  ;;  %1117 = vmatpush1.bf16.msra.mxu0 %v8269_v56  ;;  %v242_v46 = vld [vmem:[%s15674_s1 + $0x2d8] sm:$0xff] }
 0x100   :  { %1065 = vmatprep.subr.bf16.mxu1 %v8276_v8  ;;  %1118 = vmatprep.subr.bf16.mxu0 %v8278_v10  ;;  %v246_v56 = vld [vmem:[%s15674_s1 + $0x2f8] sm:$0xff]  ;;  %v8291_v8 = vcombine.low %v233_v11, %v237_v21  ;;  %v8293_v10 = vcombine.low %v234_v27, %v238_v28  ;;  %v8308_v11 = vcombine.high %v249_v48, %v253_v54  ;;  %v257_v27 = vld [vmem:[%s15674_s1 + $0x350] sm:$0xff] }
 0x101   :  { %v8302_v15 = vcombine.high %v242_v46, %v246_v56  ;;  %v261_v28 = vld [vmem:[%s15674_s1 + $0x370] sm:$0xff] }
 0x103   :  { %1066 = vmatpush1.bf16.msra.mxu1 %v8275_v62  ;;  %1119 = vmatpush1.bf16.msra.mxu0 %v8277_v37  ;;  %v250_v62 = vld [vmem:[%s15674_s1 + $0x318] sm:$0xff] }
 0x104   :  { %1067 = vmatprep.subr.bf16.mxu1 %v8284_v63  ;;  %1120 = vmatprep.subr.bf16.mxu0 %v8286_v0  ;;  %v254_v37 = vld [vmem:[%s15674_s1 + $0x338] sm:$0xff]  ;;  %v8299_v63 = vcombine.low %v241_v30, %v245_v61  ;;  %v8301_v0 = vcombine.low %v242_v46, %v246_v56  ;;  %v8316_v30 = vcombine.high %v257_v27, %v261_v28  ;;  %v265_v46 = vld [vmem:[%s15674_s1 + $0x390] sm:$0xff] }
 0x105   :  { %v8310_v21 = vcombine.high %v250_v62, %v254_v37  ;;  %v269_v56 = vld [vmem:[%s15674_s1 + $0x3b0] sm:$0xff] }
 0x107   :  { %1068 = vmatpush1.bf16.msra.mxu1 %v8283_v29  ;;  %1121 = vmatpush1.bf16.msra.mxu0 %v8285_v38  ;;  %v258_v29 = vld [vmem:[%s15674_s1 + $0x358] sm:$0xff] }
 0x108   :  { %1069 = vmatprep.subr.bf16.mxu1 %v8292_v39  ;;  %1122 = vmatprep.subr.bf16.mxu0 %v8294_v1  ;;  %v262_v38 = vld [vmem:[%s15674_s1 + $0x378] sm:$0xff]  ;;  %v8307_v39 = vcombine.low %v249_v48, %v253_v54  ;;  %v8309_v1 = vcombine.low %v250_v62, %v254_v37  ;;  %v8324_v48 = vcombine.high %v265_v46, %v269_v56  ;;  %v273_v62 = vld [vmem:[%s15674_s1 + $0x3d0] sm:$0xff] }
 0x109   :  { %v8318_v61 = vcombine.high %v258_v29, %v262_v38  ;;  %v277_v37 = vld [vmem:[%s15674_s1 + $0x3f0] sm:$0xff] }
 0x10b   :  { %1070 = vmatpush1.bf16.msra.mxu1 %v8291_v8  ;;  %1123 = vmatpush1.bf16.msra.mxu0 %v8293_v10  ;;  %v266_v8 = vld [vmem:[%s15674_s1 + $0x398] sm:$0xff] }
 0x10c   :  { %1071 = vmatprep.subr.bf16.mxu1 %v8300_v47  ;;  %1124 = vmatprep.subr.bf16.mxu0 %v8302_v15  ;;  %v270_v10 = vld [vmem:[%s15674_s1 + $0x3b8] sm:$0xff]  ;;  %v8315_v47 = vcombine.low %v257_v27, %v261_v28  ;;  %v8317_v15 = vcombine.low %v258_v29, %v262_v38  ;;  %v8332_v27 = vcombine.high %v273_v62, %v277_v37  ;;  %v8335_v29 = vld [vmem:[%s15672_s0 + $0x8] sm:$0xff] }
 0x10d   :  { %v8326_v54 = vcombine.high %v266_v8, %v270_v10  ;;  %v8331_v38 = vcombine.low %v273_v62, %v277_v37  ;;  %v1461_v62 = vld [vmem:[%s15674_s1 + $0x3e8] sm:$0xff] }
 0x10f   :  { %1072 = vmatpush1.bf16.msra.mxu1 %v8299_v63  ;;  %1125 = vmatpush1.bf16.msra.mxu0 %v8301_v0  ;;  %v274_v63 = vld [vmem:[%s15674_s1 + $0x3d8] sm:$0xff] }
 0x110   :  { %1073 = vmatprep.subr.bf16.mxu1 %v8308_v11  ;;  %1126 = vmatprep.subr.bf16.mxu0 %v8310_v21  ;;  %v278_v0 = vld [vmem:[%s15674_s1 + $0x3f8] sm:$0xff]  ;;  %v8323_v11 = vcombine.low %v265_v46, %v269_v56  ;;  %v8325_v21 = vcombine.low %v266_v8, %v270_v10  ;;  %v1453_v56 = vld [vmem:[%s15674_s1 + $0x3a8] sm:$0xff] }
 0x111   :  { %v8334_v28 = vcombine.high %v274_v63, %v278_v0 }
 0x113   :  { %1074 = vmatpush1.bf16.msra.mxu1 %v8307_v39  ;;  %1127 = vmatpush1.bf16.msra.mxu0 %v8309_v1  ;;  %v8333_v39 = vcombine.low %v274_v63, %v278_v0  ;;  %v1226_v1 = vcombine.high %v8335_v29, %v8335_v29 }
 0x114   :  { %1075 = vmatprep.subr.bf16.mxu1 %v8316_v30  ;;  %1128 = vmatprep.subr.bf16.mxu0 %v8318_v61  ;;  %v1449_v30 = vld [vmem:[%s15674_s1 + $0x388] sm:$0xff] }
 0x115   :  { %v8456_v8 = vcombine.low %v1449_v30, %v1453_v56  ;;  %v8457_v10 = vcombine.high %v1449_v30, %v1453_v56 }
 0x117   :  { %1076 = vmatpush1.bf16.msra.mxu1 %v8315_v47  ;;  %1129 = vmatpush1.bf16.msra.mxu0 %v8317_v15  ;;  %v1456_v47 = vld [vmem:[%s15674_s1 + $0x3c0] sm:$0xff] }
 0x118   :  { %1077 = vmatprep.subr.bf16.mxu1 %v8324_v48  ;;  %1130 = vmatprep.subr.bf16.mxu0 %v8326_v54  ;;  %v1460_v15 = vld [vmem:[%s15674_s1 + $0x3e0] sm:$0xff]  ;;  %v1457_v48 = vld [vmem:[%s15674_s1 + $0x3c8] sm:$0xff] }
 0x119   :  { %v8463_v54 = vcombine.high %v1456_v47, %v1460_v15  ;;  %v8462_v37 = vcombine.low %v1456_v47, %v1460_v15  ;;  %v8464_v63 = vcombine.low %v1457_v48, %v1461_v62  ;;  %v8465_v0 = vcombine.high %v1457_v48, %v1461_v62  ;;  %v1346_v62 = vld [vmem:[%s15674_s1 + $0x50] sm:$0xff] }
 0x11b   :  { %1078 = vmatpush1.bf16.msra.mxu1 %v8323_v11  ;;  %1131 = vmatpush1.bf16.msra.mxu0 %v8325_v21  ;;  %v9528_v11 = vld [vmem:[%s15674_s1 + $0x10] sm:$0xff] }
 0x11c   :  { %1079 = vmatprep.subr.bf16.mxu1 %v8332_v27  ;;  %1132 = vmatprep.subr.bf16.mxu0 %v8334_v28  ;;  %v9533_v21 = vld [vmem:[%s15674_s1 + $0x30] sm:$0xff]  ;;  %v9538_v27 = vld [vmem:[%s15674_s1 + $0x18] sm:$0xff] }
 0x11d   :  { %v8347_v28 = vcombine.high %v9528_v11, %v9533_v21 }
 0x11f   :  { %1080 = vmatpush1.bf16.msra.mxu1 %v8331_v38  ;;  %1133 = vmatpush1.bf16.msra.mxu0 %v8333_v39  ;;  %v8346_v38 = vcombine.low %v9528_v11, %v9533_v21 }
 0x120   :  { %8336 = vmatprep.subr.msk.mxu1 %vm53_vm0, %v1226_v1  ;;  %2128 = vmatprep.subr.bf16.mxu0 %v8844_v7  ;;  %v16270_v7 = vmov 0.0  }
 0x122   :  { %1082 = vmatmul.mubr.bf16.vlgmr.msra.gmra.mrb[8].mxu1 %v9206_v55  ;;  %1135 = vmatmul.mubr.bf16.vlgmr.msra.gmra.mrb[16].mxu0 %v9206_v55  ;;  %v1448_v55 = vld [vmem:[%s15674_s1 + $0x380] sm:$0xff] }
 0x123   :  { %1091 = vmatprep.mubr.bf16.mxu1 %v9236_v45  ;;  %8337 = vmatpush1.msk.msra.mxu1 %vm53_vm0, %v8335_v29  ;;  %v9545_v29 = vld [vmem:[%s15674_s1 + $0x38] sm:$0xff] }
 0x124   :  { %1144 = vmatprep.mubr.bf16.mxu0 %v9236_v45  ;;  %2181 = vmatprep.subr.bf16.mxu1 %v8860_v13  ;;  %v1452_v45 = vld [vmem:[%s15674_s1 + $0x3a0] sm:$0xff]  ;;  %v8348_v39 = vcombine.low %v9538_v27, %v9545_v29  ;;  %v8349_v1 = vcombine.high %v9538_v27, %v9545_v29 }
 0x125   :  { %2129 = vmatpush1.bf16.msra.mxu0 %v8849_v9  ;;  %v1409_v9 = vld [vmem:[%s15674_s1 + $0x248] sm:$0xff]  ;;  %v8454_v61 = vcombine.low %v1448_v55, %v1452_v45  ;;  %v8455_v46 = vcombine.high %v1448_v55, %v1452_v45 }
 0x126   :  { %2130 = vmatprep.subr.bf16.mxu0 %v8862_v14 }
 0x129   :  { %2131 = vmatpush1.bf16.msra.mxu0 %v8898_v24  ;;  %v1420_v24 = vld [vmem:[%s15674_s1 + $0x2a0] sm:$0xff] }
 0x12a   :  { %1092 = vmatmul.mubr.bf16.gmra.mrb[12].mxu1 %v9225_v53  ;;  %1145 = vmatmul.mubr.bf16.gmra.mrb[20].mxu0 %v9225_v53 }
 0x12b   :  { %1307 = vmatprep.mubr.f32.mxu1 %v16270_v7  ;;  %2132 = vmatprep.subr.bf16.mxu0 %v8902_v25  ;;  %v1417_v25 = vld [vmem:[%s15674_s1 + $0x288] sm:$0xff] }
 0x12d   :  { %2133 = vmatpush1.bf16.msra.mxu0 %v8930_v33 }
 0x12e   :  { %2134 = vmatprep.subr.bf16.mxu0 %v8934_v34 }
 0x131   :  { %2135 = vmatpush1.bf16.msra.mxu0 %v8962_v42 }
 0x132   :  { %8338 = vmatmul.mubr.msk.f32.vlgmr.msra.gmra.mrb[16].mxu1 %vm40_vm1, %v8832_v3  ;;  %2136 = vmatprep.subr.bf16.mxu0 %v8966_v43  ;;  %v16271_v3 = vld [vmem:[#allocation4_spill] sm:$0xff]  ;;  %v1429_v43 = vld [vmem:[%s15674_s1 + $0x2e8] sm:$0xff] }
 0x133   :  { %1313 = vmatprep.mubr.f32.mxu1 %v16270_v7  ;;  %2182 = vmatpush1.bf16.msra.mxu1 %v8858_v12  ;;  %v1413_v12 = vld [vmem:[%s15674_s1 + $0x268] sm:$0xff] }
 0x134   :  { %2183 = vmatprep.subr.bf16.mxu1 %v8876_v18  ;;  %v8416_v13 = vcombine.low %v1409_v9, %v1413_v12  ;;  %v8417_v14 = vcombine.high %v1409_v9, %v1413_v12  ;;  %v16272_v18 = vld [vmem:[#allocation5_spill] sm:$0xff] }
 0x135   :  { %2137 = vmatpush1.bf16.msra.mxu0 %v8988_v50 }
 0x136   :  { %8339 = vmatmul.mubr.msk.f32.gmra.mrb[18].mxu1 %vm40_vm1, %v8891_v22  ;;  %2138 = vmatprep.subr.bf16.mxu0 %v8992_v51  ;;  %v16273_v22 = vld [vmem:[#allocation6_spill] sm:$0xff]  ;;  %v1432_v51 = vld [vmem:[%s15674_s1 + $0x300] sm:$0xff] }
 0x137   :  { %1319 = vmatprep.mubr.f32.mxu1 %v16270_v7  ;;  %2184 = vmatpush1.bf16.msra.mxu1 %v8896_v23  ;;  %v1416_v23 = vld [vmem:[%s15674_s1 + $0x280] sm:$0xff] }
 0x138   :  { %2185 = vmatprep.subr.bf16.mxu1 %v8904_v26  ;;  %v8423_v26 = vcombine.high %v1416_v23, %v1420_v24 }
 0x139   :  { %2139 = vmatpush1.bf16.msra.mxu0 %v9012_v58 }
 0x13a   :  { %8340 = vmatmul.mubr.msk.f32.gmra.mrb[20].mxu1 %vm40_vm1, %v8924_v31  ;;  %2140 = vmatprep.subr.bf16.mxu0 %v9016_v59  ;;  %v1421_v31 = vld [vmem:[%s15674_s1 + $0x2a8] sm:$0xff] }
 0x13b   :  { %1325 = vmatprep.mubr.f32.mxu1 %v16270_v7  ;;  %2186 = vmatpush1.bf16.msra.mxu1 %v8928_v32  ;;  %v8422_v32 = vcombine.low %v1416_v23, %v1420_v24  ;;  %v8424_v33 = vcombine.low %v1417_v25, %v1421_v31  ;;  %v8425_v34 = vcombine.high %v1417_v25, %v1421_v31 }
 0x13c   :  { %2187 = vmatprep.subr.bf16.mxu1 %v8936_v35  ;;  %v1424_v35 = vld [vmem:[%s15674_s1 + $0x2c0] sm:$0xff] }
 0x13d   :  { %2141 = vmatpush1.bf16.msra.mxu0 %v9036_v4 }
 0x13e   :  { %8341 = vmatmul.mubr.msk.f32.gmra.mrb[22].mxu1 %vm40_vm1, %v8956_v40  ;;  %2142 = vmatprep.subr.bf16.mxu0 %v9040_v5  ;;  %v1428_v40 = vld [vmem:[%s15674_s1 + $0x2e0] sm:$0xff] }
 0x13f   :  { %2188 = vmatpush1.bf16.msra.mxu1 %v8960_v41  ;;  %v1425_v41 = vld [vmem:[%s15674_s1 + $0x2c8] sm:$0xff]  ;;  %v8431_v42 = vcombine.high %v1424_v35, %v1428_v40  ;;  %v1440_v5 = vld [vmem:[%s15674_s1 + $0x340] sm:$0xff] }
 0x140   :  { %2189 = vmatprep.subr.bf16.mxu1 %v8968_v44  ;;  %v8430_v44 = vcombine.low %v1424_v35, %v1428_v40  ;;  %v8433_v50 = vcombine.high %v1425_v41, %v1429_v43 }
 0x141   :  { %2143 = vmatpush1.bf16.msra.mxu0 %v9060_v17 }
 0x142   :  { %2144 = vmatprep.subr.bf16.mxu0 %v9064_v19 }
 0x143   :  { %2190 = vmatpush1.bf16.msra.mxu1 %v8986_v49  ;;  %v8432_v49 = vcombine.low %v1425_v41, %v1429_v43 }
 0x144   :  { %2191 = vmatprep.subr.bf16.mxu1 %v8994_v52  ;;  %v1436_v52 = vld [vmem:[%s15674_s1 + $0x320] sm:$0xff] }
 0x145   :  { %2145 = vmatpush1.bf16.msra.mxu0 %v9084_v36  ;;  %v8438_v58 = vcombine.low %v1432_v51, %v1436_v52  ;;  %v8439_v59 = vcombine.high %v1432_v51, %v1436_v52 }
 0x146   :  { %2146 = vmatprep.subr.bf16.mxu0 %v16272_v18 }
 0x147   :  { %2192 = vmatpush1.bf16.msra.mxu1 %v9010_v57  ;;  %v1433_v57 = vld [vmem:[%s15674_s1 + $0x308] sm:$0xff] }
 0x148   :  { %2193 = vmatprep.subr.bf16.mxu1 %v9018_v60  ;;  %v1437_v60 = vld [vmem:[%s15674_s1 + $0x328] sm:$0xff] }
 0x149   :  { %2147 = vmatpush1.bf16.msra.mxu0 %v16273_v22  ;;  %v8441_v4 = vcombine.high %v1433_v57, %v1437_v60 }
 0x14a   :  { %2148 = vmatprep.subr.bf16.mxu0 %v8423_v26 }
 0x14b   :  { %2194 = vmatpush1.bf16.msra.mxu1 %v9034_v2  ;;  %v8440_v2 = vcombine.low %v1433_v57, %v1437_v60 }
 0x14c   :  { %2195 = vmatprep.subr.bf16.mxu1 %v9042_v6  ;;  %v1444_v6 = vld [vmem:[%s15674_s1 + $0x360] sm:$0xff] }
 0x14d   :  { %2149 = vmatpush1.bf16.msra.mxu0 %v8422_v32  ;;  %v8446_v17 = vcombine.low %v1440_v5, %v1444_v6  ;;  %v8447_v19 = vcombine.high %v1440_v5, %v1444_v6 }
 0x14e   :  { %2150 = vmatprep.subr.bf16.mxu0 %v8431_v42 }
 0x14f   :  { %2196 = vmatpush1.bf16.msra.mxu1 %v9058_v16  ;;  %v1441_v16 = vld [vmem:[%s15674_s1 + $0x348] sm:$0xff] }
 0x150   :  { %2197 = vmatprep.subr.bf16.mxu1 %v9066_v20  ;;  %v1445_v20 = vld [vmem:[%s15674_s1 + $0x368] sm:$0xff] }
 0x151   :  { %2151 = vmatpush1.bf16.msra.mxu0 %v8430_v44  ;;  %v8448_v36 = vcombine.low %v1441_v16, %v1445_v20  ;;  %v8449_v53 = vcombine.high %v1441_v16, %v1445_v20 }
 0x152   :  { %2152 = vmatprep.subr.bf16.mxu0 %v8439_v59 }
 0x153   :  { %2198 = vmatpush1.bf16.msra.mxu1 %v16271_v3  ;;  %v9553_v3 = vpop.permute.xlu0 %285 }
 0x154   :  { %2199 = vmatprep.subr.bf16.mxu1 %v8417_v14 }
 0x155   :  { %2153 = vmatpush1.bf16.msra.mxu0 %v8438_v58 }
 0x156   :  { %2154 = vmatprep.subr.bf16.mxu0 %v8447_v19 }
 0x157   :  { %2200 = vmatpush1.bf16.msra.mxu1 %v8416_v13  ;;  %v9615_v57 = vpop.permute.xlu0 %290 }
 0x158   :  { %2201 = vmatprep.subr.bf16.mxu1 %v8425_v34 }
 0x159   :  { %2155 = vmatpush1.bf16.msra.mxu0 %v8446_v17 }
 0x15a   :  { %2156 = vmatprep.subr.bf16.mxu0 %v8455_v46 }
 0x15b   :  { %2202 = vmatpush1.bf16.msra.mxu1 %v8424_v33 }
 0x15c   :  { %2203 = vmatprep.subr.bf16.mxu1 %v8433_v50 }
 0x15d   :  { %2157 = vmatpush1.bf16.msra.mxu0 %v8454_v61 }
 0x15e   :  { %2158 = vmatprep.subr.bf16.mxu0 %v8463_v54 }
 0x15f   :  { %2204 = vmatpush1.bf16.msra.mxu1 %v8432_v49 }
 0x160   :  { %2205 = vmatprep.subr.bf16.mxu1 %v8441_v4 }
 0x161   :  { %2159 = vmatpush1.bf16.msra.mxu0 %v8462_v37  ;;  %v1350_v37 = vld [vmem:[%s15674_s1 + $0x70] sm:$0xff] }
 0x162   :  { %2234 = vmatprep.subr.bf16.mxu0 %v8347_v28 }
 0x163   :  { %2206 = vmatpush1.bf16.msra.mxu1 %v8440_v2 }
 0x164   :  { %2207 = vmatprep.subr.bf16.mxu1 %v8449_v53 }
 0x167   :  { %2208 = vmatpush1.bf16.msra.mxu1 %v8448_v36 }
 0x168   :  { %2209 = vmatprep.subr.bf16.mxu1 %v8457_v10 }
 0x16b   :  { %2210 = vmatpush1.bf16.msra.mxu1 %v8456_v8 }
 0x16c   :  { %2211 = vmatprep.subr.bf16.mxu1 %v8465_v0 }
 0x16f   :  { %2212 = vmatpush1.bf16.msra.mxu1 %v8464_v63 }
 0x170   :  { %2287 = vmatprep.subr.bf16.mxu1 %v8349_v1  ;;  %v1347_v1 = vld [vmem:[%s15674_s1 + $0x58] sm:$0xff] }
 0x1b5   :  { %v977_v9 = vpop.f32.mrb[0].mxu1  ;;  %v1030_v12 = vpop.f32.mrb[8].mxu0 }
 0x1b6   :  { %v978_v13 = vadd.f32 %v977_v9, %v9553_v3  ;;  %v979_v14 = vpop.f32.mrb[1].mxu1  ;;  %v1032_v18 = vpop.f32.mrb[9].mxu0  ;;  %v1031_v25 = vadd.f32 %v1030_v12, %v9553_v3  ;;  %v1351_v9 = vld [vmem:[%s15674_s1 + $0x78] sm:$0xff] }
 0x1b7   :  { %v981_v22 = vpop.f32.mrb[2].mxu1  ;;  %v1034_v23 = vpop.f32.mrb[10].mxu0  ;;  %v980_v49 = vadd.f32 %v979_v14, %v9553_v3  ;;  %v1033_v51 = vadd.f32 %v1032_v18, %v9553_v3  ;;  %v8355_v14 = vcombine.high %v1346_v62, %v1350_v37  ;;  %v8357_v18 = vcombine.high %v1347_v1, %v1351_v9 }
 0x1b8   :  { %v9556_v24 = vmax.f32 %v978_v13, 0.0  ;;  %v9559_v26 = vpop.f32.mrb[3].mxu1  ;;  %v9561_v31 = vpop.f32.mrb[11].mxu0  ;;  %v9567_v32 = vmax.f32 %v1031_v25, 0.0  ;;  %v982_v58 = vadd.f32 %v981_v22, %v9615_v57  ;;  %v1035_v60 = vadd.f32 %v1034_v23, %v9615_v57  ;;  %v1354_v25 = vld [vmem:[%s15674_s1 + $0x90] sm:$0xff] }
 0x1b9   :  { %v9598_v50 = vmax.f32 %v980_v49, 0.0  ;;  %v9605_v52 = vmax.f32 %v1033_v51, 0.0  ;;  %v984_v10 = vadd.f32 %v9559_v26, %v9615_v57  ;;  %v1037_v63 = vadd.f32 %v9561_v31, %v9615_v57  ;;  %v1358_v49 = vld [vmem:[%s15674_s1 + $0xb0] sm:$0xff]  ;;  %v1355_v51 = vld [vmem:[%s15674_s1 + $0x98] sm:$0xff] }
 0x1ba   :  { %16274 = vst [vmem:[#allocation4_spill] sm:$0xff] %v9556_v24  ;;  %3419 = vrot.lane.b32.xlu1 %v9556_v24, %s8767_s27  ;;  %2468 = vrot.lane.b32.xlu0 %v9556_v24, %s8768_s28  ;;  %16275 = vst [vmem:[#allocation5_spill] sm:$0xff] %v9567_v32  ;;  %v9622_v59 = vmax.f32 %v982_v58, 0.0  ;;  %v9629_v2 = vmax.f32 %v1035_v60, 0.0  ;;  %v8354_v26 = vcombine.low %v1346_v62, %v1350_v37  ;;  %v1359_v58 = vld [vmem:[%s15674_s1 + $0xb8] sm:$0xff]  ;;  %v9783_v37 = vpop.permute.xlu1 %295 }
 0x1bb   :  { %16276 = vst [vmem:[#allocation6_spill] sm:$0xff] %v9598_v50  ;;  %v9709_v48 = vmax.f32 %v984_v10, 0.0  ;;  %v9735_v22 = vmax.f32 %v1037_v63, 0.0  ;;  %v8356_v31 = vcombine.low %v1347_v1, %v1351_v9  ;;  %v8363_v29 = vcombine.high %v1354_v25, %v1358_v49  ;;  %v1366_v10 = vld [vmem:[%s15674_s1 + $0xf0] sm:$0xff] }
 0x1bc   :  { %16277 = vst [vmem:[#allocation7_spill] sm:$0xff] %v9622_v59  ;;  %16278 = vst [vmem:[#allocation8_spill] sm:$0xff] %v9629_v2  ;;  %v8364_v62 = vcombine.low %v1355_v51, %v1359_v58  ;;  %v1370_v1 = vld [vmem:[%s15674_s1 + $0x110] sm:$0xff] }
 0x1bd   :  { %v9569_v33 = vpop.f32.mrb[4].mxu1  ;;  %v9571_v34 = vpop.f32.mrb[12].mxu0  ;;  %16285 = vst [vmem:[#allocation15_spill] sm:$0xff] %v9709_v48  ;;  %v1374_v9 = vld [vmem:[%s15674_s1 + $0x130] sm:$0xff] }
 0x1be   :  { %3435 = vrot.lane.b32.xlu1 %v9567_v32, %s8767_s27  ;;  %2484 = vrot.lane.b32.xlu0 %v9567_v32, %s8768_s28  ;;  %v9577_v35 = vpop.f32.mrb[5].mxu1  ;;  %v9579_v40 = vpop.f32.mrb[13].mxu0 }
 0x1bf   :  { %v9581_v41 = vpop.f32.mrb[6].mxu1  ;;  %v9583_v42 = vpop.f32.mrb[14].mxu0 }
 0x1c0   :  { %v9585_v43 = vpop.f32.mrb[7].mxu1  ;;  %v9587_v44 = vpop.f32.mrb[15].mxu0 }
 0x1c2   :  { %3894 = vrot.lane.b32.xlu1 %v9556_v24, %s8769_s29  ;;  %2944 = vrot.lane.b32.xlu0 %v9556_v24, %s8770_s30 }
 0x1c6   :  { %3910 = vrot.lane.b32.xlu1 %v9567_v32, %s8769_s29  ;;  %2960 = vrot.lane.b32.xlu0 %v9567_v32, %s8770_s30 }
 0x1ca   :  { %4513 = vrot.lane.b32.xlu1 %v9567_v32, %s8771_s10  ;;  %2476 = vrot.lane.b32.xlu0 %v9598_v50, %s8768_s28 }
 0x1ce   :  { %4497 = vrot.lane.b32.xlu1 %v9556_v24, %s8771_s10  ;;  %2492 = vrot.lane.b32.xlu0 %v9605_v52, %s8768_s28 }
 0x1d2   :  { %4988 = vrot.lane.b32.xlu1 %v9567_v32, %s8772_s11  ;;  %2952 = vrot.lane.b32.xlu0 %v9598_v50, %s8770_s30 }
 0x1d6   :  { %4972 = vrot.lane.b32.xlu1 %v9556_v24, %s8772_s11  ;;  %2968 = vrot.lane.b32.xlu0 %v9605_v52, %s8770_s30 }
 0x1da   :  { %5463 = vrot.lane.b32.xlu1 %v9567_v32, %s8773_s12  ;;  %3421 = vrot.lane.b32.xlu0 %v9622_v59, %s8767_s27 }
 0x1de   :  { %5447 = vrot.lane.b32.xlu1 %v9556_v24, %s8773_s12  ;;  %3437 = vrot.lane.b32.xlu0 %v9629_v2, %s8767_s27 }
 0x1e2   :  { %5938 = vrot.lane.b32.xlu1 %v9567_v32, %s8774_s13  ;;  %3896 = vrot.lane.b32.xlu0 %v9622_v59, %s8769_s29 }
 0x1e6   :  { %5922 = vrot.lane.b32.xlu1 %v9556_v24, %s8774_s13  ;;  %3912 = vrot.lane.b32.xlu0 %v9629_v2, %s8769_s29 }
 0x1ea   :  { %3427 = vrot.lane.b32.xlu1 %v9598_v50, %s8767_s27  ;;  %4515 = vrot.lane.b32.xlu0 %v9629_v2, %s8771_s10 }
 0x1ee   :  { %3443 = vrot.lane.b32.xlu1 %v9605_v52, %s8767_s27  ;;  %4499 = vrot.lane.b32.xlu0 %v9622_v59, %s8771_s10 }
 0x1f2   :  { %3902 = vrot.lane.b32.xlu1 %v9598_v50, %s8769_s29  ;;  %4990 = vrot.lane.b32.xlu0 %v9629_v2, %s8772_s11 }
 0x1f5   :  { %v9655_v4 = vpop.f32.mrb[8].mxu1  ;;  %v9657_v5 = vpop.f32.mrb[16].mxu0 }
 0x1f6   :  { %v9659_v6 = vpop.f32.mrb[9].mxu1  ;;  %v9661_v16 = vpop.f32.mrb[17].mxu0  ;;  %3918 = vrot.lane.b32.xlu1 %v9605_v52, %s8769_s29  ;;  %4974 = vrot.lane.b32.xlu0 %v9622_v59, %s8772_s11 }
 0x1f7   :  { %v9667_v17 = vpop.f32.mrb[10].mxu1  ;;  %v9669_v19 = vpop.f32.mrb[18].mxu0 }
 0x1f8   :  { %v9671_v20 = vpop.f32.mrb[11].mxu1  ;;  %v9673_v36 = vpop.f32.mrb[19].mxu0 }
 0x1fa   :  { %4505 = vrot.lane.b32.xlu1 %v9598_v50, %s8771_s10  ;;  %5465 = vrot.lane.b32.xlu0 %v9629_v2, %s8773_s12 }
 0x1fd   :  { %v9679_v53 = vpop.f32.mrb[12].mxu1  ;;  %v9681_v55 = vpop.f32.mrb[20].mxu0 }
 0x1fe   :  { %4521 = vrot.lane.b32.xlu1 %v9605_v52, %s8771_s10  ;;  %5449 = vrot.lane.b32.xlu0 %v9622_v59, %s8773_s12  ;;  %v9687_v45 = vpop.f32.mrb[13].mxu1  ;;  %v9689_v30 = vpop.f32.mrb[21].mxu0 }
 0x1ff   :  { %16279 = vst [vmem:[#allocation9_spill] sm:$0xff] %v9687_v45  ;;  %16280 = vst [vmem:[#allocation10_spill] sm:$0xff] %v9689_v30  ;;  %v9691_v61 = vpop.f32.mrb[14].mxu1  ;;  %v9693_v46 = vpop.f32.mrb[22].mxu0 }
 0x200   :  { %16281 = vst [vmem:[#allocation11_spill] sm:$0xff] %v9691_v61  ;;  %16282 = vst [vmem:[#allocation12_spill] sm:$0xff] %v9693_v46  ;;  %v9695_v56 = vpop.f32.mrb[15].mxu1  ;;  %v9697_v8 = vpop.f32.mrb[23].mxu0 }
 0x201   :  { %16283 = vst [vmem:[#allocation13_spill] sm:$0xff] %v9695_v56  ;;  %16284 = vst [vmem:[#allocation14_spill] sm:$0xff] %v9697_v8 }
 0x202   :  { %4980 = vrot.lane.b32.xlu1 %v9598_v50, %s8772_s11  ;;  %5940 = vrot.lane.b32.xlu0 %v9629_v2, %s8774_s13 }
 0x205   :  { %v1309_v47 = vpop.f32.mrb[16].mxu1 }
 0x206   :  { %4996 = vrot.lane.b32.xlu1 %v9605_v52, %s8772_s11  ;;  %5924 = vrot.lane.b32.xlu0 %v9622_v59, %s8774_s13  ;;  %v1311_v15 = vpop.f32.mrb[17].mxu1 }
 0x209   :  { %v1315_v54 = vpop.f32.mrb[18].mxu1 }
 0x20a   :  { %v9719_v0 = vpack.c.bf16 %v1315_v54, %v1309_v47  ;;  %v1317_v28 = vpop.f32.mrb[19].mxu1  ;;  %5455 = vrot.lane.b32.xlu1 %v9598_v50, %s8773_s12  ;;  %3429 = vrot.lane.b32.xlu0 %v9709_v48, %s8767_s27  ;;  %v1363_v47 = vld [vmem:[%s15674_s1 + $0xd8] sm:$0xff]  ;;  %v8362_v54 = vcombine.low %v1354_v25, %v1358_v49  ;;  %v8379_v25 = vcombine.high %v1370_v1, %v1374_v9  ;;  %v1382_v49 = vld [vmem:[%s15674_s1 + $0x170] sm:$0xff] }
 0x20b   :  { %v9731_v12 = vpack.c.bf16 %v1317_v28, %v1311_v15  ;;  %v1367_v15 = vld [vmem:[%s15674_s1 + $0xf8] sm:$0xff] }
 0x20c   :  { %v8373_v28 = vcombine.high %v1363_v47, %v1367_v15 }
 0x20d   :  { %2160 = vmatprep.mubr.bf16.mxu0 %v9731_v12  ;;  %2213 = vmatprep.mubr.bf16.mxu1 %v9731_v12  ;;  %v1321_v13 = vpop.f32.mrb[20].mxu1 }
 0x20e   :  { %2161 = vmatmul.mubr.bf16.vlgmr.msra.gmra.mrb[24].mxu0 %v9719_v0  ;;  %2214 = vmatmul.mubr.bf16.vlgmr.msra.gmra.mrb[24].mxu1 %v9719_v0  ;;  %v1323_v23 = vpop.f32.mrb[21].mxu1 }
 0x20f   :  { %2235 = vmatpush1.bf16.msra.mxu0 %v8346_v38  ;;  %2288 = vmatpush1.bf16.msra.mxu1 %v8348_v39  ;;  %v8365_v38 = vcombine.high %v1355_v51, %v1359_v58  ;;  %v1362_v39 = vld [vmem:[%s15674_s1 + $0xd0] sm:$0xff]  ;;  %v1379_v51 = vld [vmem:[%s15674_s1 + $0x158] sm:$0xff] }
 0x210   :  { %5471 = vrot.lane.b32.xlu1 %v9605_v52, %s8773_s12  ;;  %3445 = vrot.lane.b32.xlu0 %v9735_v22, %s8767_s27  ;;  %v8371_v63 = vcombine.high %v1362_v39, %v1366_v10  ;;  %v1383_v58 = vld [vmem:[%s15674_s1 + $0x178] sm:$0xff] }
 0x211   :  { %v1327_v11 = vpop.f32.mrb[22].mxu1  ;;  %2236 = vmatprep.subr.bf16.mxu0 %v8355_v14  ;;  %2289 = vmatprep.subr.bf16.mxu1 %v8357_v18  ;;  %v1375_v14 = vld [vmem:[%s15674_s1 + $0x138] sm:$0xff]  ;;  %v8370_v18 = vcombine.low %v1362_v39, %v1366_v10  ;;  %v8389_v39 = vcombine.high %v1379_v51, %v1383_v58  ;;  %v1390_v10 = vld [vmem:[%s15674_s1 + $0x1b0] sm:$0xff] }
 0x212   :  { %v9761_v21 = vpack.c.bf16 %v1327_v11, %v1321_v13  ;;  %v1329_v27 = vpop.f32.mrb[23].mxu1  ;;  %v1371_v13 = vld [vmem:[%s15674_s1 + $0x118] sm:$0xff]  ;;  %v9817_v11 = vpop.permute.xlu1 %300 }
 0x213   :  { %v9766_v60 = vpack.c.bf16 %v1329_v27, %v1323_v23  ;;  %2237 = vmatpush1.bf16.msra.mxu0 %v8354_v26  ;;  %2290 = vmatpush1.bf16.msra.mxu1 %v8356_v31  ;;  %v8372_v23 = vcombine.low %v1363_v47, %v1367_v15  ;;  %v8381_v26 = vcombine.high %v1371_v13, %v1375_v14  ;;  %v1378_v31 = vld [vmem:[%s15674_s1 + $0x150] sm:$0xff]  ;;  %v1387_v47 = vld [vmem:[%s15674_s1 + $0x198] sm:$0xff] }
 0x214   :  { %5930 = vrot.lane.b32.xlu1 %v9598_v50, %s8774_s13  ;;  %3904 = vrot.lane.b32.xlu0 %v9709_v48, %s8769_s29  ;;  %16286 = vst [vmem:[#allocation16_spill] sm:$0xff] %v9817_v11  ;;  %v8378_v27 = vcombine.low %v1370_v1, %v1374_v9  ;;  %v1391_v15 = vld [vmem:[%s15674_s1 + $0x1b8] sm:$0xff] }
 0x215   :  { %2170 = vmatprep.mubr.bf16.mxu0 %v9766_v60  ;;  %2223 = vmatprep.mubr.bf16.mxu1 %v9766_v60  ;;  %v8397_v9 = vcombine.high %v1387_v47, %v1391_v15 }
 0x216   :  { %2238 = vmatprep.subr.bf16.mxu0 %v8363_v29  ;;  %2291 = vmatprep.subr.bf16.mxu1 %v8365_v38  ;;  %v8380_v29 = vcombine.low %v1371_v13, %v1375_v14  ;;  %v8387_v38 = vcombine.high %v1378_v31, %v1382_v49  ;;  %v1394_v13 = vld [vmem:[%s15674_s1 + $0x1d0] sm:$0xff] }
 0x217   :  { %2171 = vmatmul.mubr.bf16.gmra.mrb[28].mxu0 %v9761_v21  ;;  %2224 = vmatmul.mubr.bf16.gmra.mrb[28].mxu1 %v9761_v21  ;;  %v1398_v14 = vld [vmem:[%s15674_s1 + $0x1f0] sm:$0xff] }
 0x218   :  { %2239 = vmatpush1.bf16.msra.mxu0 %v8362_v54  ;;  %2292 = vmatpush1.bf16.msra.mxu1 %v8364_v62  ;;  %v8386_v54 = vcombine.low %v1378_v31, %v1382_v49  ;;  %v8388_v62 = vcombine.low %v1379_v51, %v1383_v58  ;;  %v8403_v31 = vcombine.high %v1394_v13, %v1398_v14  ;;  %v1402_v51 = vld [vmem:[%s15674_s1 + $0x210] sm:$0xff] }
 0x219   :  { %5946 = vrot.lane.b32.xlu1 %v9605_v52, %s8774_s13  ;;  %3920 = vrot.lane.b32.xlu0 %v9735_v22, %s8769_s29  ;;  %v1406_v58 = vld [vmem:[%s15674_s1 + $0x230] sm:$0xff] }
 0x21a   :  { %2240 = vmatprep.subr.bf16.mxu0 %v8371_v63  ;;  %2293 = vmatprep.subr.bf16.mxu1 %v8373_v28  ;;  %v9839_v63 = vpop.permute.xlu0 %1470  ;;  %v9841_v28 = vpop.permute.xlu1 %1475 }
 0x21b   :  { %2266 = vmatprep.mubr.bf16.mxu0 %v9731_v12  ;;  %2319 = vmatprep.mubr.bf16.mxu1 %v9731_v12  ;;  %v1386_v12 = vld [vmem:[%s15674_s1 + $0x190] sm:$0xff]  ;;  %16287 = vst [vmem:[#allocation17_spill] sm:$0xff] %v9839_v63  ;;  %16288 = vst [vmem:[#allocation18_spill] sm:$0xff] %v9841_v28  ;;  %v2596_v28 = vlaneseq }
 0x21c   :  { %2241 = vmatpush1.bf16.msra.mxu0 %v8370_v18  ;;  %2294 = vmatpush1.bf16.msra.mxu1 %v8372_v23  ;;  %v8395_v1 = vcombine.high %v1386_v12, %v1390_v10  ;;  %v1395_v18 = vld [vmem:[%s15674_s1 + $0x1d8] sm:$0xff] }
 0x21d   :  { %2470 = vrot.lane.b32.xlu1 %v9622_v59, %s8768_s28  ;;  %4507 = vrot.lane.b32.xlu0 %v9709_v48, %s8771_s10  ;;  %v1399_v23 = vld [vmem:[%s15674_s1 + $0x1f8] sm:$0xff] }
 0x21e   :  { %2242 = vmatprep.subr.bf16.mxu0 %v8379_v25  ;;  %2295 = vmatprep.subr.bf16.mxu1 %v8381_v26  ;;  %v8394_v25 = vcombine.low %v1386_v12, %v1390_v10  ;;  %v8396_v26 = vcombine.low %v1387_v47, %v1391_v15  ;;  %v8405_v49 = vcombine.high %v1395_v18, %v1399_v23 }
 0x21f   :  { %v8402_v12 = vcombine.low %v1394_v13, %v1398_v14  ;;  %v8404_v10 = vcombine.low %v1395_v18, %v1399_v23  ;;  %v8411_v47 = vcombine.high %v1402_v51, %v1406_v58  ;;  %v8410_v18 = vcombine.low %v1402_v51, %v1406_v58  ;;  %v1419_v51 = vld [vmem:[%s15674_s1 + $0x298] sm:$0xff] }
 0x220   :  { %2243 = vmatpush1.bf16.msra.mxu0 %v8378_v27  ;;  %2296 = vmatpush1.bf16.msra.mxu1 %v8380_v29  ;;  %v1403_v27 = vld [vmem:[%s15674_s1 + $0x218] sm:$0xff] }
 0x221   :  { %2486 = vrot.lane.b32.xlu1 %v9629_v2, %s8768_s28  ;;  %4523 = vrot.lane.b32.xlu0 %v9735_v22, %s8771_s10  ;;  %v1407_v29 = vld [vmem:[%s15674_s1 + $0x238] sm:$0xff] }
 0x222   :  { %2244 = vmatprep.subr.bf16.mxu0 %v8387_v38  ;;  %2297 = vmatprep.subr.bf16.mxu1 %v8389_v39  ;;  %v9871_v38 = vpop.permute.xlu0 %1480  ;;  %v9873_v39 = vpop.permute.xlu1 %1485  ;;  %v8413_v15 = vcombine.high %v1403_v27, %v1407_v29  ;;  %v8412_v23 = vcombine.low %v1403_v27, %v1407_v29  ;;  %v1423_v58 = vld [vmem:[%s15674_s1 + $0x2b8] sm:$0xff] }
 0x223   :  { %16289 = vst [vmem:[#allocation19_spill] sm:$0xff] %v9871_v38  ;;  %16290 = vst [vmem:[#allocation20_spill] sm:$0xff] %v9873_v39 }
 0x224   :  { %2245 = vmatpush1.bf16.msra.mxu0 %v8386_v54  ;;  %2298 = vmatpush1.bf16.msra.mxu1 %v8388_v62  ;;  %v1410_v54 = vld [vmem:[%s15674_s1 + $0x250] sm:$0xff] }
 0x225   :  { %2946 = vrot.lane.b32.xlu1 %v9622_v59, %s8770_s30  ;;  %4982 = vrot.lane.b32.xlu0 %v9709_v48, %s8772_s11  ;;  %v1414_v62 = vld [vmem:[%s15674_s1 + $0x270] sm:$0xff] }
 0x226   :  { %2246 = vmatprep.subr.bf16.mxu0 %v8395_v1  ;;  %2299 = vmatprep.subr.bf16.mxu1 %v8397_v9  ;;  %v1411_v1 = vld [vmem:[%s15674_s1 + $0x258] sm:$0xff] }
 0x227   :  { %v1415_v9 = vld [vmem:[%s15674_s1 + $0x278] sm:$0xff] }
 0x228   :  { %2247 = vmatpush1.bf16.msra.mxu0 %v8394_v25  ;;  %2300 = vmatpush1.bf16.msra.mxu1 %v8396_v26  ;;  %v8419_v25 = vcombine.high %v1410_v54, %v1414_v62  ;;  %v8421_v26 = vcombine.high %v1411_v1, %v1415_v9 }
 0x229   :  { %2962 = vrot.lane.b32.xlu1 %v9629_v2, %s8770_s30  ;;  %4998 = vrot.lane.b32.xlu0 %v9735_v22, %s8772_s11 }
 0x22a   :  { %2248 = vmatprep.subr.bf16.mxu0 %v8403_v31  ;;  %2301 = vmatprep.subr.bf16.mxu1 %v8405_v49  ;;  %v1418_v31 = vld [vmem:[%s15674_s1 + $0x290] sm:$0xff] }
 0x22b   :  { %v1422_v49 = vld [vmem:[%s15674_s1 + $0x2b0] sm:$0xff] }
 0x22c   :  { %2249 = vmatpush1.bf16.msra.mxu0 %v8402_v12  ;;  %2302 = vmatpush1.bf16.msra.mxu1 %v8404_v10  ;;  %v9891_v13 = vpop.permute.xlu1 %3419  ;;  %v9893_v14 = vpop.permute.xlu0 %2468  ;;  %v8418_v12 = vcombine.low %v1410_v54, %v1414_v62  ;;  %v8420_v10 = vcombine.low %v1411_v1, %v1415_v9  ;;  %v1427_v54 = vld [vmem:[%s15674_s1 + $0x2d8] sm:$0xff] }
 0x22d   :  { %16291 = vst [vmem:[#allocation21_spill] sm:$0xff] %v9891_v13  ;;  %16292 = vst [vmem:[#allocation22_spill] sm:$0xff] %v9893_v14  ;;  %2478 = vrot.lane.b32.xlu1 %v9709_v48, %s8768_s28  ;;  %5457 = vrot.lane.b32.xlu0 %v9709_v48, %s8773_s12  ;;  %v1431_v62 = vld [vmem:[%s15674_s1 + $0x2f8] sm:$0xff] }
 0x22e   :  { %2250 = vmatprep.subr.bf16.mxu0 %v8411_v47  ;;  %2303 = vmatprep.subr.bf16.mxu1 %v8413_v15  ;;  %v8427_v47 = vcombine.high %v1418_v31, %v1422_v49  ;;  %v8429_v15 = vcombine.high %v1419_v51, %v1423_v58  ;;  %v8437_v59 = vcombine.high %v1427_v54, %v1431_v62 }
 0x230   :  { %2251 = vmatpush1.bf16.msra.mxu0 %v8410_v18  ;;  %2304 = vmatpush1.bf16.msra.mxu1 %v8412_v23  ;;  %v9911_v27 = vpop.permute.xlu1 %3435  ;;  %v9913_v29 = vpop.permute.xlu0 %2484  ;;  %v1426_v18 = vld [vmem:[%s15674_s1 + $0x2d0] sm:$0xff] }
 0x231   :  { %2494 = vrot.lane.b32.xlu1 %v9735_v22, %s8768_s28  ;;  %5473 = vrot.lane.b32.xlu0 %v9735_v22, %s8773_s12  ;;  %v1430_v23 = vld [vmem:[%s15674_s1 + $0x2f0] sm:$0xff] }
 0x232   :  { %2252 = vmatprep.subr.bf16.mxu0 %v8419_v25  ;;  %2305 = vmatprep.subr.bf16.mxu1 %v8421_v26  ;;  %v8426_v25 = vcombine.low %v1418_v31, %v1422_v49  ;;  %v8428_v26 = vcombine.low %v1419_v51, %v1423_v58  ;;  %v8435_v7 = vcombine.high %v1426_v18, %v1430_v23  ;;  %v1438_v31 = vld [vmem:[%s15674_s1 + $0x330] sm:$0xff]  ;;  %v1435_v49 = vld [vmem:[%s15674_s1 + $0x318] sm:$0xff] }
 0x233   :  { %v1439_v51 = vld [vmem:[%s15674_s1 + $0x338] sm:$0xff] }
 0x234   :  { %2253 = vmatpush1.bf16.msra.mxu0 %v8418_v12  ;;  %2306 = vmatpush1.bf16.msra.mxu1 %v8420_v10  ;;  %v9931_v1 = vpop.permute.xlu1 %3894  ;;  %v9933_v9 = vpop.permute.xlu0 %2944  ;;  %v1434_v12 = vld [vmem:[%s15674_s1 + $0x310] sm:$0xff]  ;;  %v988_v10 = vadd.f32 %v9569_v33, %v9783_v37  ;;  %v8436_v33 = vcombine.low %v1427_v54, %v1431_v62  ;;  %v8444_v62 = vcombine.low %v1435_v49, %v1439_v51 }
 0x235   :  { %16293 = vst [vmem:[#allocation23_spill] sm:$0xff] %v9931_v1  ;;  %16294 = vst [vmem:[#allocation24_spill] sm:$0xff] %v9933_v9  ;;  %2954 = vrot.lane.b32.xlu1 %v9709_v48, %s8770_s30  ;;  %5932 = vrot.lane.b32.xlu0 %v9709_v48, %s8774_s13  ;;  %v8443_v24 = vcombine.high %v1434_v12, %v1438_v31  ;;  %v8445_v48 = vcombine.high %v1435_v49, %v1439_v51 }
 0x236   :  { %2254 = vmatprep.subr.bf16.mxu0 %v8427_v47  ;;  %2307 = vmatprep.subr.bf16.mxu1 %v8429_v15  ;;  %v8434_v15 = vcombine.low %v1426_v18, %v1430_v23  ;;  %v9966_v50 = vmax.f32 %v988_v10, 0.0  ;;  %v1446_v18 = vld [vmem:[%s15674_s1 + $0x370] sm:$0xff] }
 0x238   :  { %2255 = vmatpush1.bf16.msra.mxu0 %v8426_v25  ;;  %2308 = vmatpush1.bf16.msra.mxu1 %v8428_v26  ;;  %v9953_v58 = vpop.permute.xlu1 %3910  ;;  %v9955_v47 = vpop.permute.xlu0 %2960  ;;  %v1442_v25 = vld [vmem:[%s15674_s1 + $0x350] sm:$0xff]  ;;  %v1041_v26 = vadd.f32 %v9571_v34, %v9783_v37  ;;  %16295 = vst [vmem:[#allocation25_spill] sm:$0xff] %v9966_v50  ;;  %v8442_v34 = vcombine.low %v1434_v12, %v1438_v31  ;;  %v1451_v31 = vld [vmem:[%s15674_s1 + $0x398] sm:$0xff] }
 0x239   :  { %2970 = vrot.lane.b32.xlu1 %v9735_v22, %s8770_s30  ;;  %5948 = vrot.lane.b32.xlu0 %v9735_v22, %s8774_s13  ;;  %v8451_v10 = vcombine.high %v1442_v25, %v1446_v18  ;;  %v1454_v12 = vld [vmem:[%s15674_s1 + $0x3b0] sm:$0xff]  ;;  %v8450_v51 = vcombine.low %v1442_v25, %v1446_v18  ;;  %v1459_v25 = vld [vmem:[%s15674_s1 + $0x3d8] sm:$0xff] }
 0x23a   :  { %2256 = vmatprep.subr.bf16.mxu0 %v8435_v7  ;;  %2309 = vmatprep.subr.bf16.mxu1 %v8437_v59  ;;  %v1443_v7 = vld [vmem:[%s15674_s1 + $0x358] sm:$0xff] }
 0x23b   :  { %v1447_v59 = vld [vmem:[%s15674_s1 + $0x378] sm:$0xff] }
 0x23c   :  { %2257 = vmatpush1.bf16.msra.mxu0 %v8434_v15  ;;  %2310 = vmatpush1.bf16.msra.mxu1 %v8436_v33  ;;  %v9977_v23 = vpop.permute.xlu1 %4513  ;;  %v9979_v54 = vpop.permute.xlu0 %2476  ;;  %v8453_v1 = vcombine.high %v1443_v7, %v1447_v59  ;;  %v1450_v15 = vld [vmem:[%s15674_s1 + $0x390] sm:$0xff]  ;;  %v9988_v33 = vmax.f32 %v1041_v26, 0.0  ;;  %v8452_v26 = vcombine.low %v1443_v7, %v1447_v59  ;;  %v1463_v18 = vld [vmem:[%s15674_s1 + $0x3f8] sm:$0xff] }
 0x23d   :  { %16296 = vst [vmem:[#allocation26_spill] sm:$0xff] %v9977_v23  ;;  %3423 = vrot.lane.b32.xlu1 %v9966_v50, %s8767_s27  ;;  %2472 = vrot.lane.b32.xlu0 %v9966_v50, %s8768_s28  ;;  %v8459_v13 = vcombine.high %v1450_v15, %v1454_v12  ;;  %v8458_v59 = vcombine.low %v1450_v15, %v1454_v12 }
 0x23e   :  { %2258 = vmatprep.subr.bf16.mxu0 %v8443_v24  ;;  %2311 = vmatprep.subr.bf16.mxu1 %v8445_v48  ;;  %16297 = vst [vmem:[#allocation27_spill] sm:$0xff] %v9988_v33  ;;  %v1455_v24 = vld [vmem:[%s15674_s1 + $0x3b8] sm:$0xff]  ;;  %v8469_v39 = vcombine.high %v1459_v25, %v1463_v18  ;;  %v8468_v12 = vcombine.low %v1459_v25, %v1463_v18 }
 0x23f   :  { %v8461_v9 = vcombine.high %v1451_v31, %v1455_v24  ;;  %v1045_v25 = vadd.f32 %v9583_v42, %v9817_v11 }
 0x240   :  { %2259 = vmatpush1.bf16.msra.mxu0 %v8442_v34  ;;  %2312 = vmatpush1.bf16.msra.mxu1 %v8444_v62  ;;  %v9999_v48 = vpop.permute.xlu1 %4497  ;;  %v10001_v49 = vpop.permute.xlu0 %2492  ;;  %v1458_v34 = vld [vmem:[%s15674_s1 + $0x3d0] sm:$0xff] }
 0x241   :  { %16298 = vst [vmem:[#allocation28_spill] sm:$0xff] %v9999_v48  ;;  %16299 = vst [vmem:[#allocation29_spill] sm:$0xff] %v10001_v49  ;;  %3439 = vrot.lane.b32.xlu1 %v9988_v33, %s8767_s27  ;;  %2488 = vrot.lane.b32.xlu0 %v9988_v33, %s8768_s28  ;;  %v1462_v62 = vld [vmem:[%s15674_s1 + $0x3f0] sm:$0xff] }
 0x242   :  { %2260 = vmatprep.subr.bf16.mxu0 %v8451_v10  ;;  %2313 = vmatprep.subr.bf16.mxu1 %v8453_v1  ;;  %v8460_v10 = vcombine.low %v1451_v31, %v1455_v24  ;;  %v8467_v48 = vcombine.high %v1458_v34, %v1462_v62  ;;  %v8466_v15 = vcombine.low %v1458_v34, %v1462_v62 }
 0x244   :  { %2261 = vmatpush1.bf16.msra.mxu0 %v8450_v51  ;;  %2314 = vmatpush1.bf16.msra.mxu1 %v8452_v26  ;;  %v10019_v1 = vpop.permute.xlu1 %4988  ;;  %v10021_v7 = vpop.permute.xlu0 %2952  ;;  %v990_v51 = vadd.f32 %v9577_v35, %v9783_v37 }
 0x245   :  { %16300 = vst [vmem:[#allocation30_spill] sm:$0xff] %v10019_v1  ;;  %16301 = vst [vmem:[#allocation31_spill] sm:$0xff] %v10021_v7  ;;  %3898 = vrot.lane.b32.xlu1 %v9966_v50, %s8769_s29  ;;  %2948 = vrot.lane.b32.xlu0 %v9966_v50, %s8770_s30  ;;  %v10219_v1 = vand.u32 127, %v2596_v28 }
 0x246   :  { %2262 = vmatprep.subr.bf16.mxu0 %v8459_v13  ;;  %2315 = vmatprep.subr.bf16.mxu1 %v8461_v9  ;;  %v1043_v13 = vadd.f32 %v9579_v40, %v9783_v37  ;;  %v10039_v35 = vmax.f32 %v990_v51, 0.0 }
 0x247   :  { %vm2598_vm2 = vcmp.lt.s32.totalorder %v10219_v1, 33  ;;  %vm3072_vm3 = vcmp.lt.s32.totalorder %v10219_v1, 32  ;;  %vm3547_vm4 = vcmp.lt.s32.totalorder %v10219_v1, 31  ;;  %vm4022_vm5 = vcmp.lt.s32.totalorder %v10219_v1, 1 }
 0x248   :  { %2263 = vmatpush1.bf16.msra.mxu0 %v8458_v59  ;;  %2316 = vmatpush1.bf16.msra.mxu1 %v8460_v10  ;;  %v10029_v26 = vpop.permute.xlu1 %4972  ;;  %v10031_v38 = vpop.permute.xlu0 %2968  ;;  %16304 = vst [vmem:[#allocation34_spill] sm:$0xff] %v10039_v35  ;;  %v10049_v24 = vmax.f32 %v1043_v13, 0.0  ;;  %vm4625_vm6 = vcmp.lt.s32.totalorder %v10219_v1, 127  ;;  %vm5100_vm7 = vcmp.lt.s32.totalorder %v10219_v1, 97  ;;  %vm5575_vm8 = vcmp.lt.s32.totalorder %v10219_v1, 96 }
 0x249   :  { %16302 = vst [vmem:[#allocation32_spill] sm:$0xff] %v10029_v26  ;;  %16303 = vst [vmem:[#allocation33_spill] sm:$0xff] %v10031_v38  ;;  %3914 = vrot.lane.b32.xlu1 %v9988_v33, %s8769_s29  ;;  %2964 = vrot.lane.b32.xlu0 %v9988_v33, %s8770_s30  ;;  %vm6050_vm9 = vcmp.lt.s32.totalorder %v10219_v1, 95 }
 0x24a   :  { %2264 = vmatprep.subr.bf16.mxu0 %v8467_v48  ;;  %2317 = vmatprep.subr.bf16.mxu1 %v8469_v39  ;;  %16307 = vst [vmem:[#allocation37_spill] sm:$0xff] %v10049_v24 }
 0x24c   :  { %2265 = vmatpush1.bf16.msra.mxu0 %v8466_v15  ;;  %2318 = vmatpush1.bf16.msra.mxu1 %v8468_v12  ;;  %v10041_v9 = vpop.permute.xlu1 %5463  ;;  %v10043_v31 = vpop.permute.xlu0 %3421 }
 0x24d   :  { %16305 = vst [vmem:[#allocation35_spill] sm:$0xff] %v10041_v9  ;;  %16306 = vst [vmem:[#allocation36_spill] sm:$0xff] %v10043_v31  ;;  %4517 = vrot.lane.b32.xlu1 %v9988_v33, %s8771_s10  ;;  %2480 = vrot.lane.b32.xlu0 %v10039_v35, %s8768_s28  ;;  %v994_v31 = vadd.f32 %v9585_v43, %v9817_v11 }
 0x24f   :  { %2267 = vmatmul.mubr.bf16.vlgmr.msra.gmra.mrb[32].mxu0 %v9719_v0  ;;  %2320 = vmatmul.mubr.bf16.vlgmr.msra.gmra.mrb[32].mxu1 %v9719_v0  ;;  %v992_v0 = vadd.f32 %v9581_v41, %v9817_v11 }
 0x250   :  { %v10053_v40 = vpop.permute.xlu1 %5447  ;;  %v10055_v39 = vpop.permute.xlu0 %3437  ;;  %2276 = vmatprep.mubr.bf16.mxu0 %v9766_v60  ;;  %2329 = vmatprep.mubr.bf16.mxu1 %v9766_v60 }
 0x251   :  { %16308 = vst [vmem:[#allocation38_spill] sm:$0xff] %v10053_v40  ;;  %4501 = vrot.lane.b32.xlu1 %v9966_v50, %s8771_s10  ;;  %2496 = vrot.lane.b32.xlu0 %v10049_v24, %s8768_s28  ;;  %v10085_v18 = vmax.f32 %v992_v0, 0.0 }
 0x253   :  { %16312 = vst [vmem:[#allocation42_spill] sm:$0xff] %v10085_v18 }
 0x254   :  { %v10063_v48 = vpop.permute.xlu1 %5938  ;;  %v10065_v34 = vpop.permute.xlu0 %3896 }
 0x255   :  { %16309 = vst [vmem:[#allocation39_spill] sm:$0xff] %v10063_v48  ;;  %16310 = vst [vmem:[#allocation40_spill] sm:$0xff] %v10065_v34  ;;  %4992 = vrot.lane.b32.xlu1 %v9988_v33, %s8772_s11  ;;  %2956 = vrot.lane.b32.xlu0 %v10039_v35, %s8770_s30  ;;  %v1047_v48 = vadd.f32 %v9587_v44, %v9817_v11 }
 0x257   :  { %2277 = vmatmul.mubr.bf16.gmra.mrb[36].mxu0 %v9761_v21  ;;  %2330 = vmatmul.mubr.bf16.gmra.mrb[36].mxu1 %v9761_v21  ;;  %v10095_v21 = vmax.f32 %v1045_v25, 0.0  ;;  %v10195_v43 = vmax.f32 %v1047_v48, 0.0  ;;  %v2663_v48 = vld [vmem:[%s15676_s2] ss:$8 sm:$0xf] }
 0x258   :  { %v10075_v60 = vpop.permute.xlu1 %5922  ;;  %v10077_v62 = vpop.permute.xlu0 %3912 }
 0x259   :  { %16311 = vst [vmem:[#allocation41_spill] sm:$0xff] %v10075_v60  ;;  %4976 = vrot.lane.b32.xlu1 %v9966_v50, %s8772_s11  ;;  %2972 = vrot.lane.b32.xlu0 %v10049_v24, %s8770_s30  ;;  %16315 = vst [vmem:[#allocation45_spill] sm:$0xff] %v10095_v21 }
 0x25a   :  { %16339 = vst [vmem:[#allocation69_spill] sm:$0xff] %v10195_v43 }
 0x25c   :  { %v10087_v41 = vpop.permute.xlu1 %3427  ;;  %v10089_v59 = vpop.permute.xlu0 %4515 }
 0x25d   :  { %16313 = vst [vmem:[#allocation43_spill] sm:$0xff] %v10087_v41  ;;  %16314 = vst [vmem:[#allocation44_spill] sm:$0xff] %v10089_v59  ;;  %5467 = vrot.lane.b32.xlu1 %v9988_v33, %s8773_s12  ;;  %3425 = vrot.lane.b32.xlu0 %v10085_v18, %s8767_s27 }
 0x260   :  { %v10097_v10 = vpop.permute.xlu1 %3443  ;;  %v10099_v51 = vpop.permute.xlu0 %4499 }
 0x261   :  { %16316 = vst [vmem:[#allocation46_spill] sm:$0xff] %v10097_v10  ;;  %16317 = vst [vmem:[#allocation47_spill] sm:$0xff] %v10099_v51  ;;  %5451 = vrot.lane.b32.xlu1 %v9966_v50, %s8773_s12  ;;  %3441 = vrot.lane.b32.xlu0 %v10095_v21, %s8767_s27 }
 0x264   :  { %v10105_v42 = vpop.permute.xlu1 %3902  ;;  %v10107_v15 = vpop.permute.xlu0 %4990 }
 0x265   :  { %16318 = vst [vmem:[#allocation48_spill] sm:$0xff] %v10105_v42  ;;  %16319 = vst [vmem:[#allocation49_spill] sm:$0xff] %v10107_v15  ;;  %5942 = vrot.lane.b32.xlu1 %v9988_v33, %s8774_s13  ;;  %3900 = vrot.lane.b32.xlu0 %v10085_v18, %s8769_s29 }
 0x268   :  { %v10113_v12 = vpop.permute.xlu1 %3918  ;;  %v10115_v13 = vpop.permute.xlu0 %4974 }
 0x269   :  { %16320 = vst [vmem:[#allocation50_spill] sm:$0xff] %v10113_v12  ;;  %16321 = vst [vmem:[#allocation51_spill] sm:$0xff] %v10115_v13  ;;  %5926 = vrot.lane.b32.xlu1 %v9966_v50, %s8774_s13  ;;  %3916 = vrot.lane.b32.xlu0 %v10095_v21, %s8769_s29 }
 0x26c   :  { %v10121_v0 = vpop.permute.xlu1 %4505  ;;  %v10123_v25 = vpop.permute.xlu0 %5465 }
 0x26d   :  { %16322 = vst [vmem:[#allocation52_spill] sm:$0xff] %v10121_v0  ;;  %16323 = vst [vmem:[#allocation53_spill] sm:$0xff] %v10123_v25  ;;  %3431 = vrot.lane.b32.xlu1 %v10039_v35, %s8767_s27  ;;  %4519 = vrot.lane.b32.xlu0 %v10095_v21, %s8771_s10 }
 0x270   :  { %v10129_v60 = vpop.permute.xlu1 %4521  ;;  %v10131_v40 = vpop.permute.xlu0 %5449 }
 0x271   :  { %16324 = vst [vmem:[#allocation54_spill] sm:$0xff] %v10129_v60  ;;  %16325 = vst [vmem:[#allocation55_spill] sm:$0xff] %v10131_v40  ;;  %3447 = vrot.lane.b32.xlu1 %v10049_v24, %s8767_s27  ;;  %4503 = vrot.lane.b32.xlu0 %v10085_v18, %s8771_s10 }
 0x274   :  { %v10137_v13 = vpop.permute.xlu1 %4980  ;;  %v10139_v26 = vpop.permute.xlu0 %5940 }
 0x275   :  { %16326 = vst [vmem:[#allocation56_spill] sm:$0xff] %v10137_v13  ;;  %16327 = vst [vmem:[#allocation57_spill] sm:$0xff] %v10139_v26  ;;  %3906 = vrot.lane.b32.xlu1 %v10039_v35, %s8769_s29  ;;  %4994 = vrot.lane.b32.xlu0 %v10095_v21, %s8772_s11  ;;  %v10185_v26 = vmax.f32 %v994_v31, 0.0 }
 0x277   :  { %16336 = vst [vmem:[#allocation66_spill] sm:$0xff] %v10185_v26 }
 0x278   :  { %v10145_v51 = vpop.permute.xlu1 %4996  ;;  %v10147_v0 = vpop.permute.xlu0 %5924 }
 0x279   :  { %16328 = vst [vmem:[#allocation58_spill] sm:$0xff] %v10145_v51  ;;  %16329 = vst [vmem:[#allocation59_spill] sm:$0xff] %v10147_v0  ;;  %3922 = vrot.lane.b32.xlu1 %v10049_v24, %s8769_s29  ;;  %4978 = vrot.lane.b32.xlu0 %v10085_v18, %s8772_s11 }
 0x27c   :  { %v10153_v40 = vpop.permute.xlu1 %5455  ;;  %v10155_v13 = vpop.permute.xlu0 %3429 }
 0x27d   :  { %16330 = vst [vmem:[#allocation60_spill] sm:$0xff] %v10153_v40  ;;  %16331 = vst [vmem:[#allocation61_spill] sm:$0xff] %v10155_v13  ;;  %4509 = vrot.lane.b32.xlu1 %v10039_v35, %s8771_s10  ;;  %5469 = vrot.lane.b32.xlu0 %v10095_v21, %s8773_s12 }
 0x281   :  { %4525 = vrot.lane.b32.xlu1 %v10049_v24, %s8771_s10  ;;  %5453 = vrot.lane.b32.xlu0 %v10085_v18, %s8773_s12 }
 0x282   :  { %v10165_v0 = vpop.permute.xlu1 %5471  ;;  %v10167_v50 = vpop.permute.xlu0 %3445 }
 0x283   :  { %16332 = vst [vmem:[#allocation62_spill] sm:$0xff] %v10165_v0  ;;  %16333 = vst [vmem:[#allocation63_spill] sm:$0xff] %v10167_v50 }
 0x285   :  { %4984 = vrot.lane.b32.xlu1 %v10039_v35, %s8772_s11  ;;  %5944 = vrot.lane.b32.xlu0 %v10095_v21, %s8774_s13 }
 0x286   :  { %v10173_v40 = vpop.permute.xlu1 %5930  ;;  %v10175_v34 = vpop.permute.xlu0 %3904 }
 0x287   :  { %16334 = vst [vmem:[#allocation64_spill] sm:$0xff] %v10173_v40  ;;  %16335 = vst [vmem:[#allocation65_spill] sm:$0xff] %v10175_v34 }
 0x289   :  { %5000 = vrot.lane.b32.xlu1 %v10049_v24, %s8772_s11  ;;  %5928 = vrot.lane.b32.xlu0 %v10085_v18, %s8774_s13 }
 0x28b   :  { %v10187_v9 = vpop.permute.xlu1 %5946  ;;  %v10189_v25 = vpop.permute.xlu0 %3920 }
 0x28c   :  { %16337 = vst [vmem:[#allocation67_spill] sm:$0xff] %v10187_v9  ;;  %16338 = vst [vmem:[#allocation68_spill] sm:$0xff] %v10189_v25  ;;  %v10207_v9 = vshrl.u32 %v2596_v28, 7 }
 0x28d   :  { %5459 = vrot.lane.b32.xlu1 %v10039_v35, %s8773_s12  ;;  %3433 = vrot.lane.b32.xlu0 %v10185_v26, %s8767_s27 }
 0x28e   :  { %16343 = vst [vmem:[#allocation73_spill] sm:$0xff] %v10207_v9 }
 0x28f   :  { %v10197_v40 = vpop.permute.xlu1 %2470  ;;  %v10199_v0 = vpop.permute.xlu0 %4507 }
 0x290   :  { %16340 = vst [vmem:[#allocation70_spill] sm:$0xff] %v10197_v40  ;;  %16341 = vst [vmem:[#allocation71_spill] sm:$0xff] %v10199_v0  ;;  %v2664_v0 = vld [vmem:[%s15676_s2] ss:$8 sm:$0xf0] }
 0x291   :  { %5475 = vrot.lane.b32.xlu1 %v10049_v24, %s8773_s12  ;;  %3449 = vrot.lane.b32.xlu0 %v10195_v43, %s8767_s27  ;;  %v10225_v63 = vor.u32 %v2664_v0, %v2663_v48  ;;  %v10244_v0 = vsub.s32 3, %v10207_v9  ;;  %v2655_v48 = vsel %vm2598_vm2, %v9893_v14, %v9979_v54 }
 0x293   :  { %v2487_v44 = vpop.permute.xlu1 %2486  ;;  %v10205_v31 = vpop.permute.xlu0 %4523  ;;  %16346 = vst [vmem:[#allocation76_spill] sm:$0xff] %v10225_v63  ;;  %16350 = vst [vmem:[#allocation80_spill] sm:$0xff] %v10244_v0  ;;  %v10265_v61 = vrot.slane %v10225_v63, %v10244_v0 }
 0x294   :  { %16342 = vst [vmem:[#allocation72_spill] sm:$0xff] %v10205_v31 }
 0x295   :  { %5934 = vrot.lane.b32.xlu1 %v10039_v35, %s8774_s13  ;;  %3908 = vrot.lane.b32.xlu0 %v10185_v26, %s8769_s29  ;;  %v10228_v35 = vsub.s32 1, %v10207_v9 }
 0x297   :  { %v10221_v15 = vpop.permute.xlu1 %2946  ;;  %v10223_v51 = vpop.permute.xlu0 %4982  ;;  %16347 = vst [vmem:[#allocation77_spill] sm:$0xff] %v10228_v35 }
 0x298   :  { %16344 = vst [vmem:[#allocation74_spill] sm:$0xff] %v10221_v15  ;;  %16345 = vst [vmem:[#allocation75_spill] sm:$0xff] %v10223_v51  ;;  %v10241_v51 = vrot.slane %v10225_v63, %v10228_v35  ;;  %v10255_v15 = vsub.s32 2, %v10207_v9 }
 0x299   :  { %5950 = vrot.lane.b32.xlu1 %v10049_v24, %s8774_s13  ;;  %3924 = vrot.lane.b32.xlu0 %v10195_v43, %s8769_s29 }
 0x29a   :  { %16349 = vst [vmem:[#allocation79_spill] sm:$0xff] %v10241_v51  ;;  %16351 = vst [vmem:[#allocation81_spill] sm:$0xff] %v10255_v15  ;;  %v2753_v46 = vmul.f32 %v10241_v51, %v2655_v48  ;;  %v10280_v48 = vrot.slane %v10225_v63, %v10255_v15 }
 0x29b   :  { %v10235_v8 = vpop.permute.xlu1 %2962  ;;  %v10237_v28 = vpop.permute.xlu0 %4998 }
 0x29c   :  { %16348 = vst [vmem:[#allocation78_spill] sm:$0xff] %v10237_v28 }
 0x29d   :  { %2474 = vrot.lane.b32.xlu1 %v10085_v18, %s8768_s28  ;;  %4511 = vrot.lane.b32.xlu0 %v10185_v26, %s8771_s10 }
 0x29f   :  { %v2479_v28 = vpop.permute.xlu1 %2478  ;;  %v10257_v35 = vpop.permute.xlu0 %5457 }
 0x2a0   :  { %16352 = vst [vmem:[#allocation82_spill] sm:$0xff] %v10257_v35  ;;  %v2656_v56 = vsel %vm2598_vm2, %v10197_v40, %v2479_v28  ;;  %v2647_v35 = vsel %vm2598_vm2, %v9913_v29, %v10001_v49  ;;  %v2652_v14 = vsel %vm2598_vm2, %v2479_v28, %v2487_v44  ;;  %v2651_v49 = vsel %vm2598_vm2, %v9979_v54, %v9913_v29 }
 0x2a1   :  { %v2769_v11 = vmul.f32 %v10241_v51, %v2656_v56  ;;  %2490 = vrot.lane.b32.xlu1 %v10095_v21, %s8768_s28  ;;  %4527 = vrot.lane.b32.xlu0 %v10195_v43, %s8771_s10  ;;  %v2755_v9 = vmul.f32 %v10265_v61, %v2647_v35  ;;  %v2770_v23 = vmul.f32 %v10280_v48, %v2652_v14 }
 0x2a3   :  { %v10282_v40 = vpop.permute.xlu1 %2494  ;;  %v10284_v56 = vpop.permute.xlu0 %5473  ;;  %v2817_v51 = vpack.c.bf16 %v2769_v11, %v2753_v46  ;;  %v2754_v46 = vmul.f32 %v10280_v48, %v2651_v49 }
 0x2a4   :  { %16353 = vst [vmem:[#allocation83_spill] sm:$0xff] %v10282_v40  ;;  %16354 = vst [vmem:[#allocation84_spill] sm:$0xff] %v10284_v56  ;;  %v2648_v28 = vsel %vm2598_vm2, %v2487_v44, %v10282_v40 }
 0x2a5   :  { %v2771_v63 = vmul.f32 %v10265_v61, %v2648_v28  ;;  %6690 = vmatprep.subr.bf16.mxu0 %v2817_v51  ;;  %2950 = vrot.lane.b32.xlu1 %v10085_v18, %s8770_s30  ;;  %v2818_v44 = vpack.c.bf16 %v2770_v23, %v2754_v46  ;;  %v1084_v46 = vadd.f32 %v9655_v4, %v9553_v3 }
 0x2a6   :  { %4986 = vrot.lane.b32.xlu0 %v10185_v26, %s8772_s11 }
 0x2a7   :  { %v10301_v11 = vpop.permute.xlu1 %2954  ;;  %v10303_v29 = vpop.permute.xlu0 %5932  ;;  %v2819_v54 = vpack.c.bf16 %v2771_v63, %v2755_v9  ;;  %v10347_v40 = vmax.f32 %v1084_v46, 0.0 }
 0x2a8   :  { %16355 = vst [vmem:[#allocation85_spill] sm:$0xff] %v10301_v11  ;;  %16356 = vst [vmem:[#allocation86_spill] sm:$0xff] %v10303_v29  ;;  %v1137_v29 = vadd.f32 %v9657_v5, %v9553_v3 }
 0x2a9   :  { %6796 = vmatprep.subr.bf16.mxu1 %v2819_v54  ;;  %2966 = vrot.lane.b32.xlu1 %v10095_v21, %s8770_s30  ;;  %16363 = vst [vmem:[#allocation93_spill] sm:$0xff] %v10347_v40 }
 0x2aa   :  { %5002 = vrot.lane.b32.xlu0 %v10195_v43, %s8772_s11  ;;  %6797 = vmatpush1.bf16.msra.mxu1 %v2818_v44 }
 0x2ab   :  { %v10309_v14 = vpop.permute.xlu1 %2970  ;;  %v10311_v35 = vpop.permute.xlu0 %5948 }
 0x2ac   :  { %16357 = vst [vmem:[#allocation87_spill] sm:$0xff] %v10309_v14  ;;  %16358 = vst [vmem:[#allocation88_spill] sm:$0xff] %v10311_v35  ;;  %v1139_v35 = vadd.f32 %v9661_v16, %v9553_v3 }
 0x2ad   :  { %2482 = vrot.lane.b32.xlu1 %v10185_v26, %s8768_s28 }
 0x2ae   :  { %5461 = vrot.lane.b32.xlu0 %v10185_v26, %s8773_s12  ;;  %v10399_v56 = vmax.f32 %v1139_v35, 0.0 }
 0x2af   :  { %v10317_v63 = vpop.permute.xlu1 %3423  ;;  %v10319_v23 = vpop.permute.xlu0 %2472 }
 0x2b0   :  { %16359 = vst [vmem:[#allocation89_spill] sm:$0xff] %v10317_v63  ;;  %16360 = vst [vmem:[#allocation90_spill] sm:$0xff] %v10319_v23  ;;  %v1086_v63 = vadd.f32 %v9659_v6, %v9553_v3 }
 0x2b1   :  { %2498 = vrot.lane.b32.xlu1 %v10195_v43, %s8768_s28  ;;  %16376 = vst [vmem:[#allocation106_spill] sm:$0xff] %v10399_v56 }
 0x2b2   :  { %5477 = vrot.lane.b32.xlu0 %v10195_v43, %s8773_s12  ;;  %v10387_v23 = vmax.f32 %v1086_v63, 0.0 }
 0x2b3   :  { %v10325_v49 = vpop.permute.xlu1 %3439  ;;  %v10327_v9 = vpop.permute.xlu0 %2488 }
 0x2b4   :  { %16373 = vst [vmem:[#allocation103_spill] sm:$0xff] %v10387_v23 }
 0x2b5   :  { %2958 = vrot.lane.b32.xlu1 %v10185_v26, %s8770_s30 }
 0x2b6   :  { %5936 = vrot.lane.b32.xlu0 %v10185_v26, %s8774_s13  ;;  %v10359_v26 = vmax.f32 %v1137_v29, 0.0 }
 0x2b7   :  { %v10333_v51 = vpop.permute.xlu1 %3898  ;;  %v10335_v28 = vpop.permute.xlu0 %2948 }
 0x2b8   :  { %16361 = vst [vmem:[#allocation91_spill] sm:$0xff] %v10333_v51  ;;  %16362 = vst [vmem:[#allocation92_spill] sm:$0xff] %v10335_v28 }
 0x2b9   :  { %2974 = vrot.lane.b32.xlu1 %v10195_v43, %s8770_s30  ;;  %16366 = vst [vmem:[#allocation96_spill] sm:$0xff] %v10359_v26 }
 0x2ba   :  { %5952 = vrot.lane.b32.xlu0 %v10195_v43, %s8774_s13 }
 0x2bb   :  { %v10343_v54 = vpop.permute.xlu1 %3914  ;;  %v10345_v44 = vpop.permute.xlu0 %2964 }
 0x2bd   :  { %4529 = vrot.lane.b32.xlu1 %v10347_v40, %s8771_s10 }
 0x2be   :  { %2500 = vrot.lane.b32.xlu0 %v10347_v40, %s8768_s28 }
 0x2bf   :  { %v10355_v4 = vpop.permute.xlu1 %4517  ;;  %v10357_v18 = vpop.permute.xlu0 %2480 }
 0x2c0   :  { %16364 = vst [vmem:[#allocation94_spill] sm:$0xff] %v10355_v4  ;;  %16365 = vst [vmem:[#allocation95_spill] sm:$0xff] %v10357_v18 }
 0x2c1   :  { %5004 = vrot.lane.b32.xlu1 %v10347_v40, %s8772_s11 }
 0x2c2   :  { %2516 = vrot.lane.b32.xlu0 %v10359_v26, %s8768_s28 }
 0x2c3   :  { %v10365_v46 = vpop.permute.xlu1 %4501  ;;  %v10367_v5 = vpop.permute.xlu0 %2496 }
 0x2c4   :  { %16367 = vst [vmem:[#allocation97_spill] sm:$0xff] %v10365_v46  ;;  %16368 = vst [vmem:[#allocation98_spill] sm:$0xff] %v10367_v5  ;;  %v2649_v45 = vsel %vm2598_vm2, %v10327_v9, %v10367_v5 }
 0x2c5   :  { %5479 = vrot.lane.b32.xlu1 %v10347_v40, %s8773_s12 }
 0x2c6   :  { %2976 = vrot.lane.b32.xlu0 %v10347_v40, %s8770_s30 }
 0x2c7   :  { %v10373_v51 = vpop.permute.xlu1 %4992  ;;  %v10375_v29 = vpop.permute.xlu0 %2956 }
 0x2c8   :  { %16369 = vst [vmem:[#allocation99_spill] sm:$0xff] %v10373_v51  ;;  %16370 = vst [vmem:[#allocation100_spill] sm:$0xff] %v10375_v29 }
 0x2c9   :  { %5954 = vrot.lane.b32.xlu1 %v10347_v40, %s8774_s13 }
 0x2ca   :  { %2992 = vrot.lane.b32.xlu0 %v10359_v26, %s8770_s30 }
 0x2cb   :  { %v10383_v46 = vpop.permute.xlu1 %4976  ;;  %v10385_v28 = vpop.permute.xlu0 %2972 }
 0x2cc   :  { %16371 = vst [vmem:[#allocation101_spill] sm:$0xff] %v10383_v46  ;;  %16372 = vst [vmem:[#allocation102_spill] sm:$0xff] %v10385_v28  ;;  %v1088_v46 = vadd.f32 %v9667_v17, %v9615_v57 }
 0x2cd   :  { %3451 = vrot.lane.b32.xlu1 %v10347_v40, %s8767_s27 }
 0x2ce   :  { %2508 = vrot.lane.b32.xlu0 %v10387_v23, %s8768_s28 }
 0x2cf   :  { %v10395_v6 = vpop.permute.xlu1 %5467  ;;  %v10397_v51 = vpop.permute.xlu0 %3425 }
 0x2d0   :  { %16374 = vst [vmem:[#allocation104_spill] sm:$0xff] %v10395_v6  ;;  %16375 = vst [vmem:[#allocation105_spill] sm:$0xff] %v10397_v51 }
 0x2d1   :  { %3467 = vrot.lane.b32.xlu1 %v10359_v26, %s8767_s27 }
 0x2d2   :  { %2524 = vrot.lane.b32.xlu0 %v10399_v56, %s8768_s28 }
 0x2d3   :  { %v10405_v63 = vpop.permute.xlu1 %5451  ;;  %v10407_v3 = vpop.permute.xlu0 %3441 }
 0x2d4   :  { %16377 = vst [vmem:[#allocation107_spill] sm:$0xff] %v10405_v63 }
 0x2d5   :  { %3926 = vrot.lane.b32.xlu1 %v10347_v40, %s8769_s29  ;;  %v10427_v40 = vmax.f32 %v1088_v46, 0.0 }
 0x2d6   :  { %2984 = vrot.lane.b32.xlu0 %v10387_v23, %s8770_s30 }
 0x2d7   :  { %v10413_v16 = vpop.permute.xlu1 %5942  ;;  %v10415_v35 = vpop.permute.xlu0 %3900  ;;  %16381 = vst [vmem:[#allocation111_spill] sm:$0xff] %v10427_v40 }
 0x2d8   :  { %16378 = vst [vmem:[#allocation108_spill] sm:$0xff] %v10413_v16  ;;  %16379 = vst [vmem:[#allocation109_spill] sm:$0xff] %v10415_v35 }
 0x2d9   :  { %3942 = vrot.lane.b32.xlu1 %v10359_v26, %s8769_s29 }
 0x2da   :  { %3000 = vrot.lane.b32.xlu0 %v10399_v56, %s8770_s30 }
 0x2db   :  { %v10423_v63 = vpop.permute.xlu1 %5926  ;;  %v10425_v51 = vpop.permute.xlu0 %3916 }
 0x2dc   :  { %16380 = vst [vmem:[#allocation110_spill] sm:$0xff] %v10423_v63 }
 0x2dd   :  { %4545 = vrot.lane.b32.xlu1 %v10359_v26, %s8771_s10 }
 0x2de   :  { %4531 = vrot.lane.b32.xlu0 %v10427_v40, %s8771_s10 }
 0x2df   :  { %v10433_v35 = vpop.permute.xlu1 %3431  ;;  %v10435_v17 = vpop.permute.xlu0 %4519 }
 0x2e0   :  { %16382 = vst [vmem:[#allocation112_spill] sm:$0xff] %v10433_v35  ;;  %16383 = vst [vmem:[#allocation113_spill] sm:$0xff] %v10435_v17 }
 0x2e1   :  { %v10437_v16 = vpop.f32.mrb[24].mxu0  ;;  %v10439_v6 = vpop.f32.mrb[24].mxu1  ;;  %5020 = vrot.lane.b32.xlu1 %v10359_v26, %s8772_s11 }
 0x2e2   :  { %16384 = vst [vmem:[#allocation114_spill] sm:$0xff] %v10437_v16  ;;  %16385 = vst [vmem:[#allocation115_spill] sm:$0xff] %v10439_v6  ;;  %5006 = vrot.lane.b32.xlu0 %v10427_v40, %s8772_s11  ;;  %v10445_v46 = vpop.f32.mrb[25].mxu0  ;;  %v10447_v63 = vpop.f32.mrb[25].mxu1 }
 0x2e3   :  { %16386 = vst [vmem:[#allocation116_spill] sm:$0xff] %v10445_v46  ;;  %16387 = vst [vmem:[#allocation117_spill] sm:$0xff] %v10447_v63  ;;  %v10449_v4 = vpop.permute.xlu1 %3447  ;;  %v10451_v60 = vpop.permute.xlu0 %4503 }
 0x2e4   :  { %16388 = vst [vmem:[#allocation118_spill] sm:$0xff] %v10449_v4  ;;  %16389 = vst [vmem:[#allocation119_spill] sm:$0xff] %v10451_v60  ;;  %v10453_v59 = vpop.f32.mrb[26].mxu0  ;;  %v10455_v17 = vpop.f32.mrb[26].mxu1 }
 0x2e5   :  { %16390 = vst [vmem:[#allocation120_spill] sm:$0xff] %v10453_v59  ;;  %16391 = vst [vmem:[#allocation121_spill] sm:$0xff] %v10455_v17  ;;  %v10457_v16 = vpop.f32.mrb[27].mxu0  ;;  %v10459_v6 = vpop.f32.mrb[27].mxu1  ;;  %5495 = vrot.lane.b32.xlu1 %v10359_v26, %s8773_s12  ;;  %v1141_v59 = vadd.f32 %v9669_v19, %v9615_v57 }
 0x2e6   :  { %16392 = vst [vmem:[#allocation122_spill] sm:$0xff] %v10457_v16  ;;  %16393 = vst [vmem:[#allocation123_spill] sm:$0xff] %v10459_v6  ;;  %5481 = vrot.lane.b32.xlu0 %v10427_v40, %s8773_s12 }
 0x2e7   :  { %v10465_v46 = vpop.permute.xlu1 %3906  ;;  %v10467_v63 = vpop.permute.xlu0 %4994 }
 0x2e8   :  { %16394 = vst [vmem:[#allocation124_spill] sm:$0xff] %v10465_v46  ;;  %16395 = vst [vmem:[#allocation125_spill] sm:$0xff] %v10467_v63 }
 0x2e9   :  { %5970 = vrot.lane.b32.xlu1 %v10359_v26, %s8774_s13 }
 0x2ea   :  { %5956 = vrot.lane.b32.xlu0 %v10427_v40, %s8774_s13  ;;  %v10473_v60 = vpop.f32.mrb[28].mxu0  ;;  %v10475_v16 = vpop.f32.mrb[28].mxu1 }
 0x2eb   :  { %16396 = vst [vmem:[#allocation126_spill] sm:$0xff] %v10473_v60  ;;  %16397 = vst [vmem:[#allocation127_spill] sm:$0xff] %v10475_v16  ;;  %v10477_v6 = vpop.permute.xlu1 %3922  ;;  %v10479_v17 = vpop.permute.xlu0 %4978 }
 0x2ec   :  { %16398 = vst [vmem:[#allocation128_spill] sm:$0xff] %v10477_v6  ;;  %16399 = vst [vmem:[#allocation129_spill] sm:$0xff] %v10479_v17  ;;  %v10483_v31 = vpop.f32.mrb[29].mxu0  ;;  %v10485_v63 = vpop.f32.mrb[29].mxu1 }
 0x2ed   :  { %16400 = vst [vmem:[#allocation130_spill] sm:$0xff] %v10483_v31  ;;  %16401 = vst [vmem:[#allocation131_spill] sm:$0xff] %v10485_v63  ;;  %v10487_v30 = vpop.f32.mrb[30].mxu0  ;;  %v10489_v26 = vpop.f32.mrb[30].mxu1  ;;  %3459 = vrot.lane.b32.xlu1 %v10387_v23, %s8767_s27  ;;  %v10503_v31 = vmax.f32 %v1141_v59, 0.0 }
 0x2ee   :  { %16402 = vst [vmem:[#allocation132_spill] sm:$0xff] %v10487_v30  ;;  %16403 = vst [vmem:[#allocation133_spill] sm:$0xff] %v10489_v26  ;;  %3453 = vrot.lane.b32.xlu0 %v10427_v40, %s8767_s27  ;;  %v10495_v16 = vpop.f32.mrb[31].mxu0  ;;  %v10497_v17 = vpop.f32.mrb[31].mxu1 }
 0x2ef   :  { %16404 = vst [vmem:[#allocation134_spill] sm:$0xff] %v10495_v16  ;;  %16405 = vst [vmem:[#allocation135_spill] sm:$0xff] %v10497_v17  ;;  %v10499_v60 = vpop.permute.xlu1 %4509  ;;  %v10501_v19 = vpop.permute.xlu0 %5469 }
 0x2f0   :  { %16406 = vst [vmem:[#allocation136_spill] sm:$0xff] %v10499_v60  ;;  %16407 = vst [vmem:[#allocation137_spill] sm:$0xff] %v10501_v19  ;;  %v1090_v19 = vadd.f32 %v9671_v20, %v9615_v57 }
 0x2f1   :  { %16408 = vst [vmem:[#allocation138_spill] sm:$0xff] %v10503_v31  ;;  %3475 = vrot.lane.b32.xlu1 %v10399_v56, %s8767_s27 }
 0x2f2   :  { %3469 = vrot.lane.b32.xlu0 %v10503_v31, %s8767_s27 }
 0x2f3   :  { %v10509_v26 = vpop.permute.xlu1 %4525  ;;  %v10511_v30 = vpop.permute.xlu0 %5453 }
 0x2f4   :  { %16409 = vst [vmem:[#allocation139_spill] sm:$0xff] %v10509_v26  ;;  %16410 = vst [vmem:[#allocation140_spill] sm:$0xff] %v10511_v30  ;;  %v10563_v26 = vmax.f32 %v1090_v19, 0.0 }
 0x2f5   :  { %3934 = vrot.lane.b32.xlu1 %v10387_v23, %s8769_s29 }
 0x2f6   :  { %3928 = vrot.lane.b32.xlu0 %v10427_v40, %s8769_s29  ;;  %16423 = vst [vmem:[#allocation153_spill] sm:$0xff] %v10563_v26 }
 0x2f7   :  { %v10517_v60 = vpop.permute.xlu1 %4984  ;;  %v10519_v59 = vpop.permute.xlu0 %5944 }
 0x2f8   :  { %16411 = vst [vmem:[#allocation141_spill] sm:$0xff] %v10517_v60  ;;  %16412 = vst [vmem:[#allocation142_spill] sm:$0xff] %v10519_v59 }
 0x2f9   :  { %3950 = vrot.lane.b32.xlu1 %v10399_v56, %s8769_s29 }
 0x2fa   :  { %3944 = vrot.lane.b32.xlu0 %v10503_v31, %s8769_s29 }
 0x2fb   :  { %v10525_v17 = vpop.permute.xlu1 %5000  ;;  %v10527_v16 = vpop.permute.xlu0 %5928 }
 0x2fc   :  { %16413 = vst [vmem:[#allocation143_spill] sm:$0xff] %v10525_v17  ;;  %16414 = vst [vmem:[#allocation144_spill] sm:$0xff] %v10527_v16 }
 0x2fd   :  { %4537 = vrot.lane.b32.xlu1 %v10387_v23, %s8771_s10 }
 0x2fe   :  { %4547 = vrot.lane.b32.xlu0 %v10503_v31, %s8771_s10 }
 0x2ff   :  { %v10533_v30 = vpop.permute.xlu1 %5459  ;;  %v10535_v60 = vpop.permute.xlu0 %3433 }
 0x300   :  { %16415 = vst [vmem:[#allocation145_spill] sm:$0xff] %v10533_v30  ;;  %16416 = vst [vmem:[#allocation146_spill] sm:$0xff] %v10535_v60 }
 0x301   :  { %4553 = vrot.lane.b32.xlu1 %v10399_v56, %s8771_s10 }
 0x302   :  { %5022 = vrot.lane.b32.xlu0 %v10503_v31, %s8772_s11 }
 0x303   :  { %v10541_v63 = vpop.permute.xlu1 %5475  ;;  %v10543_v59 = vpop.permute.xlu0 %3449 }
 0x304   :  { %16417 = vst [vmem:[#allocation147_spill] sm:$0xff] %v10541_v63  ;;  %16418 = vst [vmem:[#allocation148_spill] sm:$0xff] %v10543_v59 }
 0x305   :  { %5012 = vrot.lane.b32.xlu1 %v10387_v23, %s8772_s11 }
 0x306   :  { %5497 = vrot.lane.b32.xlu0 %v10503_v31, %s8773_s12 }
 0x307   :  { %v10549_v16 = vpop.permute.xlu1 %5934  ;;  %v10551_v30 = vpop.permute.xlu0 %3908 }
 0x308   :  { %16419 = vst [vmem:[#allocation149_spill] sm:$0xff] %v10549_v16  ;;  %16420 = vst [vmem:[#allocation150_spill] sm:$0xff] %v10551_v30  ;;  %v1143_v16 = vadd.f32 %v9673_v36, %v9615_v57 }
 0x309   :  { %5028 = vrot.lane.b32.xlu1 %v10399_v56, %s8772_s11 }
 0x30a   :  { %5972 = vrot.lane.b32.xlu0 %v10503_v31, %s8774_s13  ;;  %v10575_v33 = vmax.f32 %v1143_v16, 0.0 }
 0x30b   :  { %v10559_v63 = vpop.permute.xlu1 %5950  ;;  %v10561_v17 = vpop.permute.xlu0 %3924 }
 0x30c   :  { %16421 = vst [vmem:[#allocation151_spill] sm:$0xff] %v10559_v63  ;;  %16422 = vst [vmem:[#allocation152_spill] sm:$0xff] %v10561_v17 }
 0x30d   :  { %5487 = vrot.lane.b32.xlu1 %v10387_v23, %s8773_s12  ;;  %16426 = vst [vmem:[#allocation156_spill] sm:$0xff] %v10575_v33 }
 0x30e   :  { %3461 = vrot.lane.b32.xlu0 %v10563_v26, %s8767_s27 }
 0x30f   :  { %v10571_v20 = vpop.permute.xlu1 %2474  ;;  %v10573_v21 = vpop.permute.xlu0 %4511 }
 0x310   :  { %16424 = vst [vmem:[#allocation154_spill] sm:$0xff] %v10571_v20  ;;  %16425 = vst [vmem:[#allocation155_spill] sm:$0xff] %v10573_v21 }
 0x311   :  { %5503 = vrot.lane.b32.xlu1 %v10399_v56, %s8773_s12 }
 0x312   :  { %3477 = vrot.lane.b32.xlu0 %v10575_v33, %s8767_s27 }
 0x313   :  { %v2491_v19 = vpop.permute.xlu1 %2490  ;;  %v10581_v57 = vpop.permute.xlu0 %4527 }
 0x314   :  { %16427 = vst [vmem:[#allocation157_spill] sm:$0xff] %v10581_v57 }
 0x315   :  { %5962 = vrot.lane.b32.xlu1 %v10387_v23, %s8774_s13  ;;  %v8473_v23 = vld [vmem:[%s15676_s2 + $0x1] ss:$8 sm:$0xf0] }
 0x316   :  { %3936 = vrot.lane.b32.xlu0 %v10563_v26, %s8769_s29 }
 0x317   :  { %v10587_v36 = vpop.permute.xlu1 %2950 }
 0x318   :  { %16428 = vst [vmem:[#allocation158_spill] sm:$0xff] %v10587_v36  ;;  %v10589_v21 = vpop.permute.xlu0 %4986 }
 0x319   :  { %16429 = vst [vmem:[#allocation159_spill] sm:$0xff] %v10589_v21  ;;  %5978 = vrot.lane.b32.xlu1 %v10399_v56, %s8774_s13  ;;  %v8472_v21 = vld [vmem:[%s15676_s2 + $0x1] ss:$8 sm:$0xf] }
 0x31a   :  { %3952 = vrot.lane.b32.xlu0 %v10575_v33, %s8769_s29  ;;  %v10620_v57 = vor.u32 %v8473_v23, %v8472_v21  ;;  %v3122_v21 = vsel %vm3072_vm3, %v10235_v8, %v10309_v14  ;;  %v3121_v14 = vsel %vm3072_vm3, %v9955_v47, %v10031_v38 }
 0x31b   :  { %v10595_v16 = vpop.permute.xlu1 %2966 }
 0x31c   :  { %v10597_v20 = vpop.permute.xlu0 %5002  ;;  %16435 = vst [vmem:[#allocation165_spill] sm:$0xff] %v10620_v57  ;;  %v3162_v5 = vrot.slane %v10620_v57, %v10244_v0 }
 0x31d   :  { %16430 = vst [vmem:[#allocation160_spill] sm:$0xff] %v10597_v20  ;;  %2502 = vrot.lane.b32.xlu1 %v10427_v40, %s8768_s28 }
 0x31e   :  { %4539 = vrot.lane.b32.xlu0 %v10563_v26, %s8771_s10 }
 0x31f   :  { %v10609_v36 = vpop.permute.xlu1 %2482 }
 0x320   :  { %16431 = vst [vmem:[#allocation161_spill] sm:$0xff] %v10609_v36  ;;  %v10611_v56 = vpop.permute.xlu0 %5461 }
 0x321   :  { %16432 = vst [vmem:[#allocation162_spill] sm:$0xff] %v10611_v56  ;;  %2518 = vrot.lane.b32.xlu1 %v10503_v31, %s8768_s28  ;;  %v2654_v56 = vsel %vm2598_vm2, %v10609_v36, %v2491_v19  ;;  %v2653_v36 = vsel %vm2598_vm2, %v10357_v18, %v10327_v9 }
 0x322   :  { %v10615_v63 = vpop.f32.mrb[32].mxu0  ;;  %v10617_v20 = vpop.f32.mrb[32].mxu1  ;;  %4555 = vrot.lane.b32.xlu0 %v10575_v33, %s8771_s10  ;;  %v2802_v2 = vmul.f32 %v10280_v48, %v2654_v56 }
 0x323   :  { %16433 = vst [vmem:[#allocation163_spill] sm:$0xff] %v10615_v63  ;;  %16434 = vst [vmem:[#allocation164_spill] sm:$0xff] %v10617_v20  ;;  %v10631_v43 = vpop.f32.mrb[33].mxu0  ;;  %v10633_v63 = vpop.f32.mrb[33].mxu1 }
 0x324   :  { %16436 = vst [vmem:[#allocation166_spill] sm:$0xff] %v10631_v43  ;;  %16437 = vst [vmem:[#allocation167_spill] sm:$0xff] %v10633_v63  ;;  %v10639_v23 = vpop.permute.xlu1 %2498  ;;  %v10641_v20 = vpop.permute.xlu0 %5477 }
 0x325   :  { %16438 = vst [vmem:[#allocation168_spill] sm:$0xff] %v10639_v23  ;;  %16439 = vst [vmem:[#allocation169_spill] sm:$0xff] %v10641_v20  ;;  %v2650_v43 = vsel %vm2598_vm2, %v2491_v19, %v10639_v23  ;;  %v10652_v63 = vpop.f32.mrb[34].mxu0  ;;  %v10654_v24 = vpop.f32.mrb[34].mxu1  ;;  %v2787_v20 = vmul.f32 %v10265_v61, %v2649_v45  ;;  %2978 = vrot.lane.b32.xlu1 %v10427_v40, %s8770_s30  ;;  %v3126_v19 = vsel %vm3072_vm3, %v10301_v11, %v10235_v8 }
 0x326   :  { %16440 = vst [vmem:[#allocation170_spill] sm:$0xff] %v10652_v63  ;;  %16441 = vst [vmem:[#allocation171_spill] sm:$0xff] %v10654_v24  ;;  %v2803_v32 = vmul.f32 %v10265_v61, %v2650_v43  ;;  %v10663_v9 = vpop.f32.mrb[35].mxu0  ;;  %v10665_v18 = vpop.f32.mrb[35].mxu1  ;;  %v3246_v23 = vmul.f32 %v3162_v5, %v3122_v21  ;;  %5014 = vrot.lane.b32.xlu0 %v10563_v26, %s8772_s11  ;;  %v3158_v45 = vrot.slane %v10620_v57, %v10255_v15 }
 0x327   :  { %16442 = vst [vmem:[#allocation172_spill] sm:$0xff] %v10663_v9  ;;  %16443 = vst [vmem:[#allocation173_spill] sm:$0xff] %v10665_v18  ;;  %v2786_v61 = vmul.f32 %v10280_v48, %v2653_v36  ;;  %v3125_v40 = vsel %vm3072_vm3, %v10021_v7, %v9955_v47  ;;  %v3230_v8 = vmul.f32 %v3162_v5, %v3121_v14  ;;  %v8476_v21 = vld [vmem:[%s15676_s2 + $0x2] ss:$8 sm:$0xf] }
 0x328   :  { %v10678_v43 = vpop.permute.xlu1 %2958  ;;  %v10680_v56 = vpop.permute.xlu0 %5936  ;;  %v2835_v38 = vpack.c.bf16 %v2803_v32, %v2787_v20  ;;  %v8477_v11 = vld [vmem:[%s15676_s2 + $0x2] ss:$8 sm:$0xf0]  ;;  %v3245_v48 = vmul.f32 %v3158_v45, %v3126_v19  ;;  %v3229_v7 = vmul.f32 %v3158_v45, %v3125_v40 }
 0x329   :  { %16444 = vst [vmem:[#allocation174_spill] sm:$0xff] %v10678_v43  ;;  %16445 = vst [vmem:[#allocation175_spill] sm:$0xff] %v10680_v56  ;;  %v2834_v36 = vpack.c.bf16 %v2802_v2, %v2786_v61  ;;  %2994 = vrot.lane.b32.xlu1 %v10503_v31, %s8770_s30  ;;  %v3294_v56 = vpack.c.bf16 %v3246_v23, %v3230_v8  ;;  %v10709_v61 = vor.u32 %v8477_v11, %v8476_v21  ;;  %v16551_v9 = vld [vmem:[#allocation115_spill] sm:$0xff]  ;;  %v16564_v31 = vld [vmem:[#allocation157_spill] sm:$0xff] }
 0x32a   :  { %v10694_v32 = vpop.f32.mrb[36].mxu0  ;;  %v10696_v20 = vpop.f32.mrb[36].mxu1  ;;  %6798 = vmatprep.subr.bf16.mxu1 %v2835_v38  ;;  %5030 = vrot.lane.b32.xlu0 %v10575_v33, %s8772_s11  ;;  %v3128_v38 = vsel %vm3072_vm3, %v10678_v43, %v10595_v16  ;;  %v3597_v11 = vsel %vm3547_vm4, %v10055_v39, %v10167_v50  ;;  %v3293_v21 = vpack.c.bf16 %v3245_v48, %v3229_v7 }
 0x32b   :  { %16446 = vst [vmem:[#allocation176_spill] sm:$0xff] %v10694_v32  ;;  %16447 = vst [vmem:[#allocation177_spill] sm:$0xff] %v10696_v20  ;;  %v10698_v47 = vpop.f32.mrb[37].mxu0  ;;  %v10700_v14 = vpop.f32.mrb[37].mxu1  ;;  %6799 = vmatpush1.bf16.msra.mxu1 %v2834_v36  ;;  %v3123_v36 = vsel %vm3072_vm3, %v10345_v44, %v10385_v28  ;;  %v3127_v7 = vsel %vm3072_vm3, %v10375_v29, %v10345_v44  ;;  %v3596_v48 = vsel %vm3547_vm4, %v9911_v27, %v10097_v10  ;;  %v16546_v20 = vld [vmem:[#allocation114_spill] sm:$0xff] }
 0x32c   :  { %16448 = vst [vmem:[#allocation178_spill] sm:$0xff] %v10698_v47  ;;  %16449 = vst [vmem:[#allocation179_spill] sm:$0xff] %v10700_v14  ;;  %v10704_v19 = vpop.permute.xlu1 %2974  ;;  %v10706_v2 = vpop.permute.xlu0 %5952  ;;  %6800 = vmatprep.subr.bf16.mxu1 %v3294_v56  ;;  %v3277_v28 = vmul.f32 %v3158_v45, %v3128_v38  ;;  %v3601_v44 = vsel %vm3547_vm4, %v10155_v13, %v10055_v39  ;;  %v3262_v29 = vmul.f32 %v3162_v5, %v3123_v36  ;;  %v8480_v38 = vld [vmem:[%s15676_s2 + $0x3] ss:$8 sm:$0xf] }
 0x32d   :  { %16450 = vst [vmem:[#allocation180_spill] sm:$0xff] %v10704_v19  ;;  %16451 = vst [vmem:[#allocation181_spill] sm:$0xff] %v10709_v61  ;;  %v3124_v40 = vsel %vm3072_vm3, %v10595_v16, %v10704_v19  ;;  %v10719_v23 = vpop.f32.mrb[38].mxu0  ;;  %v10721_v8 = vpop.f32.mrb[38].mxu1  ;;  %2510 = vrot.lane.b32.xlu1 %v10563_v26, %s8768_s28  ;;  %v3637_v16 = vrot.slane %v10709_v61, %v10244_v0  ;;  %v3261_v10 = vmul.f32 %v3158_v45, %v3127_v7 }
 0x32e   :  { %16452 = vst [vmem:[#allocation182_spill] sm:$0xff] %v10719_v23  ;;  %16453 = vst [vmem:[#allocation183_spill] sm:$0xff] %v10721_v8  ;;  %v10731_v43 = vpop.f32.mrb[39].mxu0  ;;  %v10733_v47 = vpop.f32.mrb[39].mxu1  ;;  %v3278_v56 = vmul.f32 %v3162_v5, %v3124_v40  ;;  %5489 = vrot.lane.b32.xlu0 %v10563_v26, %s8773_s12  ;;  %v3600_v39 = vsel %vm3547_vm4, %v10087_v41, %v9911_v27  ;;  %v3598_v45 = vsel %vm3547_vm4, %v10325_v49, %v10449_v4 }
 0x32f   :  { %16454 = vst [vmem:[#allocation184_spill] sm:$0xff] %v10731_v43  ;;  %16455 = vst [vmem:[#allocation185_spill] sm:$0xff] %v10733_v47  ;;  %6801 = vmatpush1.bf16.msra.mxu1 %v3293_v21  ;;  %v3721_v40 = vmul.f32 %v3637_v16, %v3597_v11  ;;  %v3633_v47 = vrot.slane %v10709_v61, %v10255_v15  ;;  %v8481_v21 = vld [vmem:[%s15676_s2 + $0x3] ss:$8 sm:$0xf0]  ;;  %v3705_v5 = vmul.f32 %v3637_v16, %v3596_v48 }
 0x330   :  { %v10749_v19 = vpop.permute.xlu1 %4529  ;;  %v10751_v50 = vpop.permute.xlu0 %2500  ;;  %v3310_v11 = vpack.c.bf16 %v3278_v56, %v3262_v29  ;;  %v3309_v7 = vpack.c.bf16 %v3277_v28, %v3261_v10  ;;  %v10786_v43 = vor.u32 %v8481_v21, %v8480_v38  ;;  %v3603_v27 = vsel %vm3547_vm4, %v10535_v60, %v10407_v3  ;;  %v16520_v60 = vld [vmem:[#allocation13_spill] sm:$0xff] }
 0x331   :  { %16456 = vst [vmem:[#allocation186_spill] sm:$0xff] %v10749_v19  ;;  %16457 = vst [vmem:[#allocation187_spill] sm:$0xff] %v10751_v50  ;;  %v3599_v50 = vsel %vm3547_vm4, %v10407_v3, %v10543_v59  ;;  %2526 = vrot.lane.b32.xlu1 %v10575_v33, %s8768_s28  ;;  %v3720_v36 = vmul.f32 %v3633_v47, %v3601_v44  ;;  %v3769_v56 = vpack.c.bf16 %v3721_v40, %v3705_v5 }
 0x332   :  { %5505 = vrot.lane.b32.xlu0 %v10575_v33, %s8773_s12  ;;  %16459 = vst [vmem:[#allocation189_spill] sm:$0xff] %v10786_v43  ;;  %v3753_v29 = vmul.f32 %v3637_v16, %v3599_v50  ;;  %6802 = vmatprep.subr.bf16.mxu1 %v3310_v11  ;;  %v3704_v48 = vmul.f32 %v3633_v47, %v3600_v39 }
 0x333   :  { %v4072_v10 = vsel %vm4022_vm5, %v10077_v62, %v10189_v25  ;;  %6803 = vmatpush1.bf16.msra.mxu1 %v3309_v7  ;;  %v4112_v28 = vrot.slane %v10786_v43, %v10244_v0  ;;  %v3602_v50 = vsel %vm3547_vm4, %v10433_v35, %v10325_v49  ;;  %v3737_v3 = vmul.f32 %v3637_v16, %v3598_v45 }
 0x334   :  { %v10782_v59 = vpop.permute.xlu1 %5004  ;;  %v10784_v13 = vpop.permute.xlu0 %2516  ;;  %6804 = vmatprep.subr.bf16.mxu1 %v3769_v56  ;;  %v1094_v44 = vadd.f32 %v9679_v53, %v9783_v37  ;;  %v4071_v40 = vsel %vm4022_vm5, %v9953_v58, %v10113_v12  ;;  %v3768_v38 = vpack.c.bf16 %v3720_v36, %v3704_v48  ;;  %v3752_v21 = vmul.f32 %v3633_v47, %v3603_v27 }
 0x335   :  { %16458 = vst [vmem:[#allocation188_spill] sm:$0xff] %v10782_v59  ;;  %2986 = vrot.lane.b32.xlu1 %v10563_v26, %s8770_s30  ;;  %v4076_v49 = vsel %vm4022_vm5, %v10175_v34, %v10077_v62  ;;  %v4196_v53 = vmul.f32 %v4112_v28, %v4072_v10  ;;  %v3785_v16 = vpack.c.bf16 %v3753_v29, %v3737_v3 }
 0x336   :  { %5964 = vrot.lane.b32.xlu0 %v10563_v26, %s8774_s13  ;;  %v4108_v11 = vrot.slane %v10786_v43, %v10255_v15  ;;  %v3736_v45 = vmul.f32 %v3633_v47, %v3602_v50  ;;  %v4074_v36 = vsel %vm4022_vm5, %v10425_v51, %v10561_v17  ;;  %v4075_v62 = vsel %vm4022_vm5, %v10105_v42, %v9953_v58 }
 0x337   :  { %6805 = vmatpush1.bf16.msra.mxu1 %v3768_v38  ;;  %v4180_v7 = vmul.f32 %v4112_v28, %v4071_v40  ;;  %v10832_v27 = vmax.f32 %v1094_v44, 0.0  ;;  %v4073_v47 = vsel %vm4022_vm5, %v10343_v54, %v10477_v6  ;;  %v4078_v58 = vsel %vm4022_vm5, %v10551_v30, %v10425_v51 }
 0x338   :  { %v10812_v39 = vpop.permute.xlu1 %5479  ;;  %v10814_v5 = vpop.permute.xlu0 %2976  ;;  %6806 = vmatprep.subr.bf16.mxu1 %v3785_v16  ;;  %v4195_v29 = vmul.f32 %v4108_v11, %v4076_v49  ;;  %v3784_v56 = vpack.c.bf16 %v3752_v21, %v3736_v45  ;;  %v4228_v50 = vmul.f32 %v4112_v28, %v4074_v36  ;;  %v1147_v44 = vadd.f32 %v9681_v55, %v9783_v37 }
 0x339   :  { %16460 = vst [vmem:[#allocation190_spill] sm:$0xff] %v10812_v39  ;;  %16461 = vst [vmem:[#allocation191_spill] sm:$0xff] %v10814_v5  ;;  %3002 = vrot.lane.b32.xlu1 %v10575_v33, %s8770_s30  ;;  %v4244_v3 = vpack.c.bf16 %v4196_v53, %v4180_v7  ;;  %v4179_v40 = vmul.f32 %v4108_v11, %v4075_v62  ;;  %v4077_v38 = vsel %vm4022_vm5, %v10465_v46, %v10343_v54 }
 0x33a   :  { %16462 = vst [vmem:[#allocation192_spill] sm:$0xff] %v10832_v27  ;;  %5980 = vrot.lane.b32.xlu0 %v10575_v33, %s8774_s13  ;;  %v4212_v21 = vmul.f32 %v4112_v28, %v4073_v47  ;;  %v4227_v16 = vmul.f32 %v4108_v11, %v4078_v58  ;;  %v10862_v45 = vmax.f32 %v1147_v44, 0.0  ;;  %v4211_v36 = vmul.f32 %v4108_v11, %v4077_v38  ;;  %v16468_v11 = vld [vmem:[#allocation5_spill] sm:$0xff] }
 0x33b   :  { %6807 = vmatpush1.bf16.msra.mxu1 %v3784_v56  ;;  %v4243_v49 = vpack.c.bf16 %v4195_v29, %v4179_v40  ;;  %v4372_v7 = vpack.c.bf16 %v9735_v22, %v9605_v52  ;;  %v16469_v29 = vld [vmem:[#allocation8_spill] sm:$0xff]  ;;  %v16472_v22 = vld [vmem:[#allocation37_spill] sm:$0xff] }
 0x33c   :  { %v10840_v48 = vpop.permute.xlu1 %5954  ;;  %v10842_v10 = vpop.permute.xlu0 %2992  ;;  %6808 = vmatprep.subr.bf16.mxu1 %v4244_v3  ;;  %v4260_v53 = vpack.c.bf16 %v4228_v50, %v4212_v21  ;;  %16466 = vst [vmem:[#allocation196_spill] sm:$0xff] %v10862_v45  ;;  %v4259_v54 = vpack.c.bf16 %v4227_v16, %v4211_v36  ;;  %v4371_v47 = vpack.c.bf16 %v16469_v29, %v16468_v11  ;;  %v8484_v50 = vld [vmem:[%s15676_s2 + $0x5] ss:$8 sm:$0xf] }
 0x33d   :  { %16463 = vst [vmem:[#allocation193_spill] sm:$0xff] %v10840_v48  ;;  %4533 = vrot.lane.b32.xlu1 %v10832_v27, %s8771_s10  ;;  %v8485_v52 = vld [vmem:[%s15676_s2 + $0x5] ss:$8 sm:$0xf0] }
 0x33e   :  { %2504 = vrot.lane.b32.xlu0 %v10832_v27, %s8768_s28  ;;  %v16473_v3 = vld [vmem:[#allocation69_spill] sm:$0xff]  ;;  %v10896_v21 = vor.u32 %v8485_v52, %v8484_v50  ;;  %v16481_v11 = vld [vmem:[#allocation10_spill] sm:$0xff]  ;;  %v16483_v50 = vld [vmem:[#allocation44_spill] sm:$0xff] }
 0x33f   :  { %6809 = vmatpush1.bf16.msra.mxu1 %v4243_v49  ;;  %v4388_v44 = vpack.c.bf16 %v16473_v3, %v16472_v22  ;;  %v16474_v40 = vld [vmem:[#allocation9_spill] sm:$0xff]  ;;  %v16476_v49 = vld [vmem:[#allocation27_spill] sm:$0xff]  ;;  %v1149_v29 = vadd.f32 %v16481_v11, %v9783_v37 }
 0x340   :  { %v10858_v51 = vpop.permute.xlu1 %3451  ;;  %v10860_v55 = vpop.permute.xlu0 %2508  ;;  %6810 = vmatprep.subr.bf16.mxu1 %v4260_v53  ;;  %v1096_v38 = vadd.f32 %v16474_v40, %v9783_v37  ;;  %16475 = vst [vmem:[#allocation37_spill] sm:$0xff] %v10896_v21  ;;  %v16477_v16 = vld [vmem:[#allocation45_spill] sm:$0xff]  ;;  %v10917_v22 = vrot.slane %v10896_v21, %v10244_v0  ;;  %v10923_v3 = vrot.slane %v10896_v21, %v10255_v15  ;;  %v16485_v40 = vld [vmem:[#allocation26_spill] sm:$0xff] }
 0x341   :  { %16464 = vst [vmem:[#allocation194_spill] sm:$0xff] %v10858_v51  ;;  %16465 = vst [vmem:[#allocation195_spill] sm:$0xff] %v10860_v55  ;;  %5008 = vrot.lane.b32.xlu1 %v10832_v27, %s8772_s11  ;;  %v4387_v53 = vpack.c.bf16 %v16477_v16, %v16476_v49  ;;  %v10944_v6 = vmax.f32 %v1149_v29, 0.0  ;;  %v16565_v33 = vld [vmem:[#allocation113_spill] sm:$0xff] }
 0x342   :  { %2520 = vrot.lane.b32.xlu0 %v10862_v45, %s8768_s28 }
 0x343   :  { %6811 = vmatpush1.bf16.msra.mxu1 %v4259_v54 }
 0x344   :  { %v10868_v28 = vpop.permute.xlu1 %3467  ;;  %v10870_v62 = vpop.permute.xlu0 %2524  ;;  %6812 = vmatprep.subr.bf16.mxu1 %v4372_v7  ;;  %v10907_v7 = vmax.f32 %v1096_v38, 0.0 }
 0x345   :  { %16467 = vst [vmem:[#allocation197_spill] sm:$0xff] %v10870_v62  ;;  %5483 = vrot.lane.b32.xlu1 %v10832_v27, %s8773_s12 }
 0x346   :  { %2980 = vrot.lane.b32.xlu0 %v10832_v27, %s8770_s30  ;;  %16480 = vst [vmem:[#allocation27_spill] sm:$0xff] %v10907_v7 }
 0x347   :  { %6813 = vmatpush1.bf16.msra.mxu1 %v4371_v47  ;;  %v16482_v47 = vld [vmem:[#allocation72_spill] sm:$0xff] }
 0x348   :  { %v10880_v56 = vpop.permute.xlu1 %3926  ;;  %v10882_v58 = vpop.permute.xlu0 %2984  ;;  %6814 = vmatprep.subr.bf16.mxu1 %v4388_v44  ;;  %v4675_v52 = vsel %vm4625_vm6, %v16483_v50, %v16482_v47  ;;  %v16484_v44 = vld [vmem:[#allocation54_spill] sm:$0xff]  ;;  %16488 = vst [vmem:[#allocation72_spill] sm:$0xff] %v10944_v6 }
 0x349   :  { %16470 = vst [vmem:[#allocation5_spill] sm:$0xff] %v10880_v56  ;;  %16471 = vst [vmem:[#allocation8_spill] sm:$0xff] %v10882_v58  ;;  %5958 = vrot.lane.b32.xlu1 %v10832_v27, %s8774_s13  ;;  %v4670_v37 = vsel %vm4625_vm6, %v16484_v44, %v10749_v19  ;;  %v4674_v38 = vsel %vm4625_vm6, %v16485_v40, %v16484_v44  ;;  %v11006_v56 = vld [vmem:[%s15677_s5 + $0x4] ss:$12 sps:$4 sm:$0xff]  }
 0x34a   :  { %2996 = vrot.lane.b32.xlu0 %v10862_v45, %s8770_s30  ;;  %v4783_v17 = vmul.f32 %v10917_v22, %v4670_v37  ;;  %v4782_v4 = vmul.f32 %v10923_v3, %v4674_v38  ;;  %v16493_v38 = vld [vmem:[#allocation16_spill] sm:$0xff]  ;;  %16503 = vst [vmem:[#allocation207_spill] sm:$0xff] %v11006_v56  ;;  %6828 = vmatprep.mubr.bf16.mxu1 %v11006_v56 }
 0x34b   :  { %6815 = vmatpush1.bf16.msra.mxu1 %v4387_v53  ;;  %v4798_v53 = vmul.f32 %v10923_v3, %v4675_v52  ;;  %6722 = vmatprep.mubr.bf16.mxu0 %v11006_v56  ;;  %v1100_v41 = vadd.f32 %v16520_v60, %v16493_v38  ;;  %v4677_v56 = vsel %vm4625_vm6, %v16565_v33, %v16564_v31 }
 0x34c   :  { %v10902_v36 = vpop.permute.xlu1 %3942  ;;  %v10904_v54 = vpop.permute.xlu0 %3000 }
 0x34d   :  { %16478 = vst [vmem:[#allocation69_spill] sm:$0xff] %v10902_v36  ;;  %16479 = vst [vmem:[#allocation9_spill] sm:$0xff] %v10904_v54  ;;  %3455 = vrot.lane.b32.xlu1 %v10832_v27, %s8767_s27 }
 0x34e   :  { %2512 = vrot.lane.b32.xlu0 %v10907_v7, %s8768_s28 }
 0x350   :  { %v10935_v49 = vpop.permute.xlu1 %4545  ;;  %v10937_v16 = vpop.permute.xlu0 %4531 }
 0x351   :  { %16486 = vst [vmem:[#allocation45_spill] sm:$0xff] %v10935_v49  ;;  %16487 = vst [vmem:[#allocation10_spill] sm:$0xff] %v10937_v16  ;;  %v4671_v11 = vsel %vm4625_vm6, %v16482_v47, %v10937_v16  ;;  %3471 = vrot.lane.b32.xlu1 %v10862_v45, %s8767_s27  ;;  %v4846_v47 = vpack.c.bf16 %v4798_v53, %v4782_v4 }
 0x352   :  { %v4799_v44 = vmul.f32 %v10917_v22, %v4671_v11  ;;  %2528 = vrot.lane.b32.xlu0 %v10944_v6, %s8768_s28  ;;  %v16494_v11 = vld [vmem:[#allocation11_spill] sm:$0xff] }
 0x353   :  { %v1098_v16 = vadd.f32 %v16494_v11, %v16493_v38 }
 0x354   :  { %v10953_v52 = vpop.permute.xlu1 %5020  ;;  %v10955_v19 = vpop.permute.xlu0 %5006  ;;  %v4847_v25 = vpack.c.bf16 %v4799_v44, %v4783_v17 }
 0x355   :  { %16489 = vst [vmem:[#allocation54_spill] sm:$0xff] %v10953_v52  ;;  %16490 = vst [vmem:[#allocation198_spill] sm:$0xff] %v10955_v19  ;;  %3930 = vrot.lane.b32.xlu1 %v10832_v27, %s8769_s29  ;;  %v10975_v17 = vmax.f32 %v1098_v16, 0.0 }
 0x356   :  { %6816 = vmatprep.subr.bf16.mxu1 %v4847_v25  ;;  %2988 = vrot.lane.b32.xlu0 %v10907_v7, %s8770_s30 }
 0x357   :  { %6817 = vmatpush1.bf16.msra.mxu1 %v4846_v47  ;;  %16497 = vst [vmem:[#allocation201_spill] sm:$0xff] %v10975_v17 }
 0x358   :  { %v10961_v29 = vpop.permute.xlu1 %5495  ;;  %v10963_v37 = vpop.permute.xlu0 %5481 }
 0x359   :  { %16491 = vst [vmem:[#allocation199_spill] sm:$0xff] %v10961_v29  ;;  %16492 = vst [vmem:[#allocation200_spill] sm:$0xff] %v10963_v37  ;;  %3946 = vrot.lane.b32.xlu1 %v10862_v45, %s8769_s29  ;;  %v16524_v29 = vld [vmem:[#allocation14_spill] sm:$0xff] }
 0x35a   :  { %3004 = vrot.lane.b32.xlu0 %v10944_v6, %s8770_s30 }
 0x35c   :  { %v10971_v4 = vpop.permute.xlu1 %5970  ;;  %v10973_v25 = vpop.permute.xlu0 %5956 }
 0x35d   :  { %16495 = vst [vmem:[#allocation16_spill] sm:$0xff] %v10971_v4  ;;  %16496 = vst [vmem:[#allocation11_spill] sm:$0xff] %v10973_v25  ;;  %4549 = vrot.lane.b32.xlu1 %v10862_v45, %s8771_s10 }
 0x35e   :  { %4535 = vrot.lane.b32.xlu0 %v10975_v17, %s8771_s10 }
 0x360   :  { %v10981_v53 = vpop.permute.xlu1 %3459  ;;  %v10983_v44 = vpop.permute.xlu0 %3453 }
 0x361   :  { %16498 = vst [vmem:[#allocation202_spill] sm:$0xff] %v10981_v53  ;;  %16499 = vst [vmem:[#allocation203_spill] sm:$0xff] %v10983_v44  ;;  %5024 = vrot.lane.b32.xlu1 %v10862_v45, %s8772_s11 }
 0x362   :  { %5010 = vrot.lane.b32.xlu0 %v10975_v17, %s8772_s11 }
 0x364   :  { %v10989_v47 = vpop.permute.xlu1 %3475  ;;  %v10991_v16 = vpop.permute.xlu0 %3469 }
 0x365   :  { %16500 = vst [vmem:[#allocation204_spill] sm:$0xff] %v10989_v47  ;;  %5499 = vrot.lane.b32.xlu1 %v10862_v45, %s8773_s12 }
 0x366   :  { %5485 = vrot.lane.b32.xlu0 %v10975_v17, %s8773_s12 }
 0x368   :  { %v10997_v11 = vpop.permute.xlu1 %3934  ;;  %v10999_v12 = vpop.permute.xlu0 %3928 }
 0x369   :  { %16501 = vst [vmem:[#allocation205_spill] sm:$0xff] %v10997_v11  ;;  %16502 = vst [vmem:[#allocation206_spill] sm:$0xff] %v10999_v12  ;;  %3463 = vrot.lane.b32.xlu1 %v10907_v7, %s8767_s27  ;;  %v16506_v12 = vld [vmem:[#allocation12_spill] sm:$0xff]  ;;  %v16569_v11 = vld [vmem:[#allocation94_spill] sm:$0xff] }
 0x36a   :  { %5960 = vrot.lane.b32.xlu0 %v10975_v17, %s8774_s13  ;;  %v1151_v44 = vadd.f32 %v16506_v12, %v16493_v38 }
 0x36c   :  { %v11010_v51 = vpop.permute.xlu1 %3950  ;;  %v11012_v5 = vpop.permute.xlu0 %3944  ;;  %v11026_v27 = vmax.f32 %v1151_v44, 0.0 }
 0x36d   :  { %16504 = vst [vmem:[#allocation208_spill] sm:$0xff] %v11010_v51  ;;  %16505 = vst [vmem:[#allocation209_spill] sm:$0xff] %v11012_v5  ;;  %3479 = vrot.lane.b32.xlu1 %v10944_v6, %s8767_s27  ;;  %v16572_v51 = vld [vmem:[#allocation49_spill] sm:$0xff] }
 0x36e   :  { %3457 = vrot.lane.b32.xlu0 %v10975_v17, %s8767_s27  ;;  %16509 = vst [vmem:[#allocation211_spill] sm:$0xff] %v11026_v27 }
 0x370   :  { %v11022_v40 = vpop.permute.xlu1 %4537  ;;  %v11024_v50 = vpop.permute.xlu0 %4547 }
 0x371   :  { %16507 = vst [vmem:[#allocation12_spill] sm:$0xff] %v11022_v40  ;;  %16508 = vst [vmem:[#allocation210_spill] sm:$0xff] %v11024_v50  ;;  %3938 = vrot.lane.b32.xlu1 %v10907_v7, %s8769_s29 }
 0x372   :  { %3473 = vrot.lane.b32.xlu0 %v11026_v27, %s8767_s27 }
 0x374   :  { %v11032_v26 = vpop.permute.xlu1 %4553  ;;  %v11034_v12 = vpop.permute.xlu0 %5022 }
 0x375   :  { %16510 = vst [vmem:[#allocation212_spill] sm:$0xff] %v11032_v26  ;;  %16511 = vst [vmem:[#allocation213_spill] sm:$0xff] %v11034_v12  ;;  %3954 = vrot.lane.b32.xlu1 %v10944_v6, %s8769_s29 }
 0x376   :  { %3932 = vrot.lane.b32.xlu0 %v10975_v17, %s8769_s29 }
 0x378   :  { %v11040_v40 = vpop.permute.xlu1 %5012  ;;  %v11042_v44 = vpop.permute.xlu0 %5497 }
 0x379   :  { %16512 = vst [vmem:[#allocation214_spill] sm:$0xff] %v11040_v40  ;;  %16513 = vst [vmem:[#allocation215_spill] sm:$0xff] %v11042_v44  ;;  %4541 = vrot.lane.b32.xlu1 %v10907_v7, %s8771_s10  ;;  %v1153_v44 = vadd.f32 %v16524_v29, %v16493_v38 }
 0x37a   :  { %3948 = vrot.lane.b32.xlu0 %v11026_v27, %s8769_s29 }
 0x37b   :  { %v11090_v52 = vmax.f32 %v1153_v44, 0.0 }
 0x37c   :  { %v11048_v46 = vpop.permute.xlu1 %5028  ;;  %v11050_v30 = vpop.permute.xlu0 %5972 }
 0x37d   :  { %16514 = vst [vmem:[#allocation216_spill] sm:$0xff] %v11048_v46  ;;  %16515 = vst [vmem:[#allocation217_spill] sm:$0xff] %v11050_v30  ;;  %4557 = vrot.lane.b32.xlu1 %v10944_v6, %s8771_s10  ;;  %v11078_v30 = vmax.f32 %v1100_v41, 0.0 }
 0x37e   :  { %4551 = vrot.lane.b32.xlu0 %v11026_v27, %s8771_s10  ;;  %16527 = vst [vmem:[#allocation225_spill] sm:$0xff] %v11090_v52 }
 0x37f   :  { %16523 = vst [vmem:[#allocation223_spill] sm:$0xff] %v11078_v30 }
 0x380   :  { %v11056_v42 = vpop.permute.xlu1 %5487  ;;  %v11058_v40 = vpop.permute.xlu0 %3461 }
 0x381   :  { %16516 = vst [vmem:[#allocation218_spill] sm:$0xff] %v11056_v42  ;;  %16517 = vst [vmem:[#allocation219_spill] sm:$0xff] %v11058_v40  ;;  %5016 = vrot.lane.b32.xlu1 %v10907_v7, %s8772_s11 }
 0x382   :  { %5026 = vrot.lane.b32.xlu0 %v11026_v27, %s8772_s11 }
 0x384   :  { %v11064_v34 = vpop.permute.xlu1 %5503  ;;  %v11066_v35 = vpop.permute.xlu0 %3477 }
 0x385   :  { %16518 = vst [vmem:[#allocation220_spill] sm:$0xff] %v11064_v34  ;;  %16519 = vst [vmem:[#allocation221_spill] sm:$0xff] %v11066_v35  ;;  %5032 = vrot.lane.b32.xlu1 %v10944_v6, %s8772_s11 }
 0x386   :  { %5501 = vrot.lane.b32.xlu0 %v11026_v27, %s8773_s12 }
 0x388   :  { %v11074_v42 = vpop.permute.xlu1 %5962  ;;  %v11076_v4 = vpop.permute.xlu0 %3936 }
 0x389   :  { %16521 = vst [vmem:[#allocation13_spill] sm:$0xff] %v11074_v42  ;;  %16522 = vst [vmem:[#allocation222_spill] sm:$0xff] %v11076_v4  ;;  %5491 = vrot.lane.b32.xlu1 %v10907_v7, %s8773_s12 }
 0x38a   :  { %3465 = vrot.lane.b32.xlu0 %v11078_v30, %s8767_s27 }
 0x38c   :  { %v11086_v60 = vpop.permute.xlu1 %5978  ;;  %v11088_v34 = vpop.permute.xlu0 %3952 }
 0x38d   :  { %16525 = vst [vmem:[#allocation14_spill] sm:$0xff] %v11086_v60  ;;  %16526 = vst [vmem:[#allocation224_spill] sm:$0xff] %v11088_v34  ;;  %5507 = vrot.lane.b32.xlu1 %v10944_v6, %s8773_s12 }
 0x38e   :  { %3481 = vrot.lane.b32.xlu0 %v11090_v52, %s8767_s27 }
 0x390   :  { %v11096_v41 = vpop.permute.xlu1 %2502  ;;  %v11098_v29 = vpop.permute.xlu0 %4539 }
 0x391   :  { %16528 = vst [vmem:[#allocation226_spill] sm:$0xff] %v11096_v41  ;;  %16529 = vst [vmem:[#allocation227_spill] sm:$0xff] %v11098_v29  ;;  %5966 = vrot.lane.b32.xlu1 %v10907_v7, %s8774_s13 }
 0x392   :  { %3940 = vrot.lane.b32.xlu0 %v11078_v30, %s8769_s29 }
 0x394   :  { %v11104_v38 = vpop.permute.xlu1 %2518  ;;  %v11106_v44 = vpop.permute.xlu0 %4555 }
 0x395   :  { %16530 = vst [vmem:[#allocation228_spill] sm:$0xff] %v11106_v44  ;;  %2506 = vrot.lane.b32.xlu1 %v10975_v17, %s8768_s28  ;;  %v8488_v44 = vld [vmem:[%s15676_s2 + $0x6] ss:$8 sm:$0xf] }
 0x396   :  { %3956 = vrot.lane.b32.xlu0 %v11090_v52, %s8769_s29 }
 0x398   :  { %v11112_v42 = vpop.permute.xlu1 %2978  ;;  %v11114_v41 = vpop.permute.xlu0 %5014 }
 0x399   :  { %16531 = vst [vmem:[#allocation229_spill] sm:$0xff] %v11112_v42  ;;  %16532 = vst [vmem:[#allocation230_spill] sm:$0xff] %v11114_v41  ;;  %2522 = vrot.lane.b32.xlu1 %v11026_v27, %s8768_s28 }
 0x39a   :  { %4543 = vrot.lane.b32.xlu0 %v11078_v30, %s8771_s10 }
 0x39c   :  { %v11120_v29 = vpop.permute.xlu1 %2994  ;;  %v11122_v7 = vpop.permute.xlu0 %5030 }
 0x39d   :  { %16533 = vst [vmem:[#allocation231_spill] sm:$0xff] %v11122_v7  ;;  %2982 = vrot.lane.b32.xlu1 %v10975_v17, %s8770_s30 }
 0x39e   :  { %4559 = vrot.lane.b32.xlu0 %v11090_v52, %s8771_s10 }
 0x3a0   :  { %v11128_v60 = vpop.permute.xlu1 %2510  ;;  %v11130_v42 = vpop.permute.xlu0 %5489 }
 0x3a1   :  { %16534 = vst [vmem:[#allocation232_spill] sm:$0xff] %v11128_v60  ;;  %16535 = vst [vmem:[#allocation233_spill] sm:$0xff] %v11130_v42  ;;  %2998 = vrot.lane.b32.xlu1 %v11026_v27, %s8770_s30 }
 0x3a2   :  { %5018 = vrot.lane.b32.xlu0 %v11078_v30, %s8772_s11 }
 0x3a4   :  { %v11136_v41 = vpop.permute.xlu1 %2526  ;;  %v11138_v12 = vpop.permute.xlu0 %5505 }
 0x3a5   :  { %16536 = vst [vmem:[#allocation234_spill] sm:$0xff] %v11136_v41  ;;  %16537 = vst [vmem:[#allocation235_spill] sm:$0xff] %v11138_v12  ;;  %2514 = vrot.lane.b32.xlu1 %v11078_v30, %s8768_s28 }
 0x3a6   :  { %5034 = vrot.lane.b32.xlu0 %v11090_v52, %s8772_s11 }
 0x3a8   :  { %v11144_v17 = vpop.permute.xlu1 %2986  ;;  %v11146_v46 = vpop.permute.xlu0 %5964 }
 0x3a9   :  { %16538 = vst [vmem:[#allocation236_spill] sm:$0xff] %v11144_v17  ;;  %16539 = vst [vmem:[#allocation237_spill] sm:$0xff] %v11146_v46  ;;  %2530 = vrot.lane.b32.xlu1 %v11090_v52, %s8768_s28 }
 0x3aa   :  { %5493 = vrot.lane.b32.xlu0 %v11078_v30, %s8773_s12 }
 0x3ac   :  { %v11152_v42 = vpop.permute.xlu1 %3002  ;;  %v11154_v7 = vpop.permute.xlu0 %5980 }
 0x3ad   :  { %16540 = vst [vmem:[#allocation238_spill] sm:$0xff] %v11152_v42  ;;  %16541 = vst [vmem:[#allocation239_spill] sm:$0xff] %v11154_v7  ;;  %2990 = vrot.lane.b32.xlu1 %v11078_v30, %s8770_s30  ;;  %v16545_v7 = vld [vmem:[#allocation17_spill] sm:$0xff] }
 0x3ae   :  { %5509 = vrot.lane.b32.xlu0 %v11090_v52, %s8773_s12  ;;  %v2163_v32 = vadd.f32 %v16546_v20, %v16545_v7  ;;  %v2216_v20 = vadd.f32 %v16551_v9, %v16545_v7 }
 0x3b0   :  { %v11160_v12 = vpop.permute.xlu1 %4533  ;;  %v11162_v8 = vpop.permute.xlu0 %2504 }
 0x3b1   :  { %16542 = vst [vmem:[#allocation240_spill] sm:$0xff] %v11160_v12  ;;  %16543 = vst [vmem:[#allocation241_spill] sm:$0xff] %v11162_v8  ;;  %3006 = vrot.lane.b32.xlu1 %v11090_v52, %s8770_s30 }
 0x3b2   :  { %5968 = vrot.lane.b32.xlu0 %v11078_v30, %s8774_s13  ;;  %v11184_v30 = vmax.f32 %v2163_v32, 0.0  ;;  %v11200_v32 = vmax.f32 %v2216_v20, 0.0 }
 0x3b4   :  { %v11168_v46 = vpop.permute.xlu1 %5008  ;;  %v11170_v23 = vpop.permute.xlu0 %2520  ;;  %16549 = vst [vmem:[#allocation244_spill] sm:$0xff] %v11184_v30 }
 0x3b5   :  { %16544 = vst [vmem:[#allocation242_spill] sm:$0xff] %v11168_v46  ;;  %5974 = vrot.lane.b32.xlu1 %v10862_v45, %s8774_s13 }
 0x3b6   :  { %5976 = vrot.lane.b32.xlu0 %v11026_v27, %s8774_s13 }
 0x3b8   :  { %v11178_v8 = vpop.permute.xlu1 %5483  ;;  %v11180_v14 = vpop.permute.xlu0 %2980 }
 0x3b9   :  { %16547 = vst [vmem:[#allocation114_spill] sm:$0xff] %v11178_v8  ;;  %16548 = vst [vmem:[#allocation243_spill] sm:$0xff] %v11180_v14  ;;  %5982 = vrot.lane.b32.xlu1 %v10944_v6, %s8774_s13 }
 0x3ba   :  { %5984 = vrot.lane.b32.xlu0 %v11090_v52, %s8774_s13 }
 0x3bc   :  { %v11188_v18 = vpop.permute.xlu1 %5958  ;;  %v11192_v24 = vpop.permute.xlu0 %2996 }
 0x3bd   :  { %16550 = vst [vmem:[#allocation245_spill] sm:$0xff] %v11188_v18  ;;  %4561 = vrot.lane.b32.xlu1 %v11184_v30, %s8771_s10 }
 0x3be   :  { %2532 = vrot.lane.b32.xlu0 %v11184_v30, %s8768_s28 }
 0x3c0   :  { %v11198_v14 = vpop.permute.xlu1 %3455  ;;  %v11202_v63 = vpop.permute.xlu0 %2512 }
 0x3c1   :  { %16552 = vst [vmem:[#allocation115_spill] sm:$0xff] %v11198_v14  ;;  %16553 = vst [vmem:[#allocation246_spill] sm:$0xff] %v11202_v63  ;;  %5036 = vrot.lane.b32.xlu1 %v11184_v30, %s8772_s11  ;;  %v16557_v14 = vld [vmem:[#allocation116_spill] sm:$0xff] }
 0x3c2   :  { %2548 = vrot.lane.b32.xlu0 %v11200_v32, %s8768_s28  ;;  %v2165_v26 = vadd.f32 %v16557_v14, %v16545_v7  ;;  %v16561_v14 = vld [vmem:[#allocation117_spill] sm:$0xff] }
 0x3c3   :  { %v2218_v45 = vadd.f32 %v16561_v14, %v16545_v7  ;;  %v16567_v14 = vld [vmem:[#allocation78_spill] sm:$0xff] }
 0x3c4   :  { %v11208_v9 = vpop.permute.xlu1 %3471  ;;  %v11210_v49 = vpop.permute.xlu0 %2528  ;;  %v11234_v27 = vmax.f32 %v2165_v26, 0.0  ;;  %v5146_v7 = vsel %vm5100_vm7, %v16567_v14, %v10955_v19  ;;  %v8492_v19 = vld [vmem:[%s15676_s2 + $0x7] ss:$8 sm:$0xf]  ;;  %v5150_v43 = vsel %vm5100_vm7, %v16572_v51, %v16567_v14 }
 0x3c5   :  { %16554 = vst [vmem:[#allocation247_spill] sm:$0xff] %v11208_v9  ;;  %16555 = vst [vmem:[#allocation248_spill] sm:$0xff] %v11210_v49  ;;  %5511 = vrot.lane.b32.xlu1 %v11184_v30, %s8773_s12 }
 0x3c6   :  { %3008 = vrot.lane.b32.xlu0 %v11184_v30, %s8770_s30  ;;  %16560 = vst [vmem:[#allocation251_spill] sm:$0xff] %v11234_v27 }
 0x3c8   :  { %v11216_v20 = vpop.permute.xlu1 %3930  ;;  %v11220_v21 = vpop.permute.xlu0 %2988 }
 0x3c9   :  { %16556 = vst [vmem:[#allocation249_spill] sm:$0xff] %v11216_v20  ;;  %16558 = vst [vmem:[#allocation116_spill] sm:$0xff] %v11220_v21  ;;  %5986 = vrot.lane.b32.xlu1 %v11184_v30, %s8774_s13  ;;  %v8489_v20 = vld [vmem:[%s15676_s2 + $0x6] ss:$8 sm:$0xf0] }
 0x3ca   :  { %3024 = vrot.lane.b32.xlu0 %v11200_v32, %s8770_s30  ;;  %v11243_v6 = vor.u32 %v8489_v20, %v8488_v44  ;;  %v11261_v20 = vmax.f32 %v2218_v45, 0.0  ;;  %v8493_v45 = vld [vmem:[%s15676_s2 + $0x7] ss:$8 sm:$0xf0] }
 0x3cc   :  { %v11226_v50 = vpop.permute.xlu1 %3946  ;;  %v11238_v52 = vpop.permute.xlu0 %3004  ;;  %16563 = vst [vmem:[#allocation252_spill] sm:$0xff] %v11243_v6 }
 0x3cd   :  { %16559 = vst [vmem:[#allocation250_spill] sm:$0xff] %v11226_v50  ;;  %16562 = vst [vmem:[#allocation117_spill] sm:$0xff] %v11238_v52  ;;  %3483 = vrot.lane.b32.xlu1 %v11184_v30, %s8767_s27  ;;  %v16568_v50 = vld [vmem:[#allocation139_spill] sm:$0xff] }
 0x3ce   :  { %2540 = vrot.lane.b32.xlu0 %v11234_v27, %s8768_s28  ;;  %v4672_v44 = vsel %vm4625_vm6, %v16568_v50, %v11160_v12  ;;  %v4676_v33 = vsel %vm4625_vm6, %v16569_v11, %v16568_v50  ;;  %v4830_v12 = vmul.f32 %v10923_v3, %v4677_v56  ;;  %v16571_v50 = vld [vmem:[#allocation58_spill] sm:$0xff] }
 0x3cf   :  { %v5145_v11 = vsel %vm5100_vm7, %v16571_v50, %v10782_v59  ;;  %v4815_v34 = vmul.f32 %v10917_v22, %v4672_v44  ;;  %v5186_v59 = vrot.slane %v11243_v6, %v10255_v15 }
 0x3d0   :  { %v11251_v26 = vpop.permute.xlu1 %4549  ;;  %v11269_v4 = vpop.permute.xlu0 %4535 }
 0x3d1   :  { %16566 = vst [vmem:[#allocation157_spill] sm:$0xff] %v11251_v26  ;;  %v5190_v26 = vrot.slane %v11243_v6, %v10244_v0  ;;  %16570 = vst [vmem:[#allocation78_spill] sm:$0xff] %v11269_v4  ;;  %3499 = vrot.lane.b32.xlu1 %v11200_v32, %s8767_s27  ;;  %v4673_v36 = vsel %vm4625_vm6, %v16564_v31, %v11269_v4  ;;  %v4814_v31 = vmul.f32 %v10923_v3, %v4676_v33  ;;  %v16574_v4 = vld [vmem:[#allocation30_spill] sm:$0xff]  ;;  %v16577_v6 = vld [vmem:[#allocation143_spill] sm:$0xff] }
 0x3d2   :  { %v4831_v56 = vmul.f32 %v10917_v22, %v4673_v36  ;;  %2556 = vrot.lane.b32.xlu0 %v11261_v20, %s8768_s28  ;;  %v5149_v14 = vsel %vm5100_vm7, %v16574_v4, %v16571_v50  ;;  %v5273_v22 = vmul.f32 %v5186_v59, %v5150_v43  ;;  %v5147_v33 = vsel %vm5100_vm7, %v16577_v6, %v11168_v46  ;;  %v16578_v3 = vld [vmem:[#allocation160_spill] sm:$0xff]  ;;  %v16582_v46 = vld [vmem:[#allocation18_spill] sm:$0xff] }
 0x3d3   :  { %v5274_v5 = vmul.f32 %v5190_v26, %v5146_v7  ;;  %v11305_v7 = vor.u32 %v8493_v45, %v8492_v19  ;;  %v5258_v44 = vmul.f32 %v5190_v26, %v5145_v11  ;;  %v16579_v11 = vld [vmem:[#allocation125_spill] sm:$0xff]  ;;  %v5257_v50 = vmul.f32 %v5186_v59, %v5149_v14 }
 0x3d4   :  { %v11296_v9 = vpop.permute.xlu1 %5024  ;;  %v11307_v51 = vpop.permute.xlu0 %5010  ;;  %v4863_v36 = vpack.c.bf16 %v4831_v56, %v4815_v34  ;;  %v5152_v45 = vsel %vm5100_vm7, %v16579_v11, %v16578_v3  ;;  %v5290_v11 = vmul.f32 %v5190_v26, %v5147_v33 }
 0x3d5   :  { %16573 = vst [vmem:[#allocation139_spill] sm:$0xff] %v11296_v9  ;;  %16575 = vst [vmem:[#allocation58_spill] sm:$0xff] %v11305_v7  ;;  %3958 = vrot.lane.b32.xlu1 %v11184_v30, %s8769_s29  ;;  %v4862_v9 = vpack.c.bf16 %v4830_v12, %v4814_v31  ;;  %v5148_v19 = vsel %vm5100_vm7, %v16578_v3, %v11307_v51  ;;  %v5322_v12 = vpack.c.bf16 %v5274_v5, %v5258_v44  ;;  %v16581_v31 = vld [vmem:[#allocation84_spill] sm:$0xff]  ;;  %v16584_v30 = vld [vmem:[#allocation99_spill] sm:$0xff] }
 0x3d6   :  { %16576 = vst [vmem:[#allocation253_spill] sm:$0xff] %v11307_v51  ;;  %v5306_v34 = vmul.f32 %v5190_v26, %v5148_v19  ;;  %3016 = vrot.lane.b32.xlu0 %v11234_v27, %s8770_s30  ;;  %6818 = vmatprep.subr.bf16.mxu1 %v4863_v36  ;;  %v5665_v56 = vrot.slane %v11305_v7, %v10244_v0  ;;  %v16583_v3 = vld [vmem:[#allocation120_spill] sm:$0xff] }
 0x3d7   :  { %v5621_v51 = vsel %vm5575_vm8, %v16581_v31, %v10963_v37  ;;  %6819 = vmatpush1.bf16.msra.mxu1 %v4862_v9  ;;  %v2167_v19 = vadd.f32 %v16583_v3, %v16582_v46  ;;  %v5151_v36 = vsel %vm5100_vm7, %v16584_v30, %v16577_v6  ;;  %v5321_v14 = vpack.c.bf16 %v5273_v22, %v5257_v50  ;;  %v16586_v37 = vld [vmem:[#allocation62_spill] sm:$0xff]  ;;  %v16587_v3 = vld [vmem:[#allocation53_spill] sm:$0xff] }
 0x3d8   :  { %v11326_v43 = vpop.permute.xlu1 %5499  ;;  %6820 = vmatprep.subr.bf16.mxu1 %v5322_v12  ;;  %v11340_v5 = vpop.permute.xlu0 %5485  ;;  %v5305_v44 = vmul.f32 %v5186_v59, %v5152_v45  ;;  %v5620_v9 = vsel %vm5575_vm8, %v16586_v37, %v10812_v39  ;;  %v5625_v4 = vsel %vm5575_vm8, %v16587_v3, %v16581_v31  ;;  %v5749_v6 = vmul.f32 %v5665_v56, %v5621_v51  ;;  %v8496_v45 = vld [vmem:[%s15676_s2 + $0x80] ss:$8 sm:$0xf] }
 0x3d9   :  { %16580 = vst [vmem:[#allocation143_spill] sm:$0xff] %v11326_v43  ;;  %16585 = vst [vmem:[#allocation160_spill] sm:$0xff] %v11340_v5  ;;  %3974 = vrot.lane.b32.xlu1 %v11200_v32, %s8769_s29  ;;  %v5338_v33 = vpack.c.bf16 %v5306_v34, %v5290_v11  ;;  %v5661_v22 = vrot.slane %v11305_v7, %v10255_v15  ;;  %v8497_v12 = vld [vmem:[%s15676_s2 + $0x80] ss:$8 sm:$0xf0]  ;;  %v5289_v50 = vmul.f32 %v5186_v59, %v5151_v36 }
 0x3da   :  { %3032 = vrot.lane.b32.xlu0 %v11261_v20, %s8770_s30  ;;  %v16589_v51 = vld [vmem:[#allocation169_spill] sm:$0xff]  ;;  %v16590_v11 = vld [vmem:[#allocation35_spill] sm:$0xff]  ;;  %v11372_v39 = vmax.f32 %v2167_v19, 0.0  ;;  %v5733_v30 = vmul.f32 %v5665_v56, %v5620_v9  ;;  %v11383_v43 = vor.u32 %v8497_v12, %v8496_v45  ;;  %v16598_v45 = vld [vmem:[#allocation104_spill] sm:$0xff] }
 0x3db   :  { %v5623_v31 = vsel %vm5575_vm8, %v16589_v51, %v11340_v5  ;;  %6821 = vmatpush1.bf16.msra.mxu1 %v5321_v14  ;;  %v5624_v34 = vsel %vm5575_vm8, %v16590_v11, %v16586_v37  ;;  %v5748_v59 = vmul.f32 %v5661_v22, %v5625_v4  ;;  %v5337_v36 = vpack.c.bf16 %v5305_v44, %v5289_v50  ;;  %v16593_v14 = vld [vmem:[#allocation147_spill] sm:$0xff]  ;;  %v16595_v37 = vld [vmem:[#allocation137_spill] sm:$0xff]  ;;  %v16597_v50 = vld [vmem:[#allocation88_spill] sm:$0xff] }
 0x3dc   :  { %v11354_v26 = vpop.permute.xlu1 %3463  ;;  %16591 = vst [vmem:[#allocation18_spill] sm:$0xff] %v11372_v39  ;;  %6822 = vmatprep.subr.bf16.mxu1 %v5338_v33  ;;  %v11374_v3 = vpop.permute.xlu0 %5960  ;;  %v5622_v5 = vsel %vm5575_vm8, %v16593_v14, %v11178_v8  ;;  %16594 = vst [vmem:[#allocation62_spill] sm:$0xff] %v11383_v43  ;;  %v5627_v19 = vsel %vm5575_vm8, %v16595_v37, %v16589_v51  ;;  %v5781_v9 = vmul.f32 %v5665_v56, %v5623_v31 }
 0x3dd   :  { %16588 = vst [vmem:[#allocation84_spill] sm:$0xff] %v11354_v26  ;;  %16592 = vst [vmem:[#allocation120_spill] sm:$0xff] %v11374_v3  ;;  %3491 = vrot.lane.b32.xlu1 %v11234_v27, %s8767_s27  ;;  %v5797_v4 = vpack.c.bf16 %v5749_v6, %v5733_v30  ;;  %v5732_v44 = vmul.f32 %v5661_v22, %v5624_v34  ;;  %v6096_v8 = vsel %vm6050_vm9, %v16597_v50, %v10973_v25  ;;  %v16600_v34 = vld [vmem:[#allocation67_spill] sm:$0xff]  ;;  %v16601_v25 = vld [vmem:[#allocation57_spill] sm:$0xff] }
 0x3de   :  { %4563 = vrot.lane.b32.xlu0 %v11372_v39, %s8771_s10  ;;  %v5626_v12 = vsel %vm5575_vm8, %v16598_v45, %v16593_v14  ;;  %v6140_v51 = vrot.slane %v11383_v43, %v10244_v0  ;;  %v5765_v31 = vmul.f32 %v5665_v56, %v5622_v5  ;;  %v5780_v6 = vmul.f32 %v5661_v22, %v5627_v19 }
 0x3df   :  { %6823 = vmatpush1.bf16.msra.mxu1 %v5337_v36  ;;  %v5796_v30 = vpack.c.bf16 %v5748_v59, %v5732_v44  ;;  %v6095_v36 = vsel %vm6050_vm9, %v16600_v34, %v10840_v48  ;;  %v6100_v14 = vsel %vm6050_vm9, %v16601_v25, %v16597_v50  ;;  %v6136_v59 = vrot.slane %v11383_v43, %v10255_v15  ;;  %v16603_v44 = vld [vmem:[#allocation39_spill] sm:$0xff]  ;;  %v16604_v48 = vld [vmem:[#allocation73_spill] sm:$0xff] }
 0x3e0   :  { %v11391_v33 = vpop.permute.xlu1 %3479  ;;  %6824 = vmatprep.subr.bf16.mxu1 %v5797_v4  ;;  %v11403_v37 = vpop.permute.xlu0 %3457  ;;  %v6224_v45 = vmul.f32 %v6140_v51, %v6096_v8  ;;  %v5813_v5 = vpack.c.bf16 %v5781_v9, %v5765_v31  ;;  %v5764_v19 = vmul.f32 %v5661_v22, %v5626_v12  ;;  %v6098_v4 = vsel %vm6050_vm9, %v10706_v2, %v11374_v3  ;;  %v16606_v31 = vld [vmem:[#allocation151_spill] sm:$0xff]  ;;  %v16607_v3 = vld [vmem:[#allocation142_spill] sm:$0xff] }
 0x3e1   :  { %16596 = vst [vmem:[#allocation169_spill] sm:$0xff] %v11391_v33  ;;  %16599 = vst [vmem:[#allocation147_spill] sm:$0xff] %v11403_v37  ;;  %3507 = vrot.lane.b32.xlu1 %v11261_v20, %s8767_s27  ;;  %v6099_v8 = vsel %vm6050_vm9, %v16603_v44, %v16600_v34  ;;  %v6208_v50 = vmul.f32 %v6140_v51, %v6095_v36  ;;  %v11430_v37 = vsub.s32 7, %v16604_v48 }
 0x3e2   :  { %5038 = vrot.lane.b32.xlu0 %v11372_v39, %s8772_s11  ;;  %v6223_v22 = vmul.f32 %v6136_v59, %v6100_v14  ;;  %v5812_v12 = vpack.c.bf16 %v5780_v6, %v5764_v19  ;;  %v6102_v34 = vsel %vm6050_vm9, %v16607_v3, %v10706_v2  ;;  %v6256_v36 = vmul.f32 %v6140_v51, %v6098_v4  ;;  %v11451_v6 = vld [vmem:[%s15677_s5] ss:$12 sps:$4 sm:$0xff]   ;;  %v11460_v2 = vld [vmem:[%s15677_s5 + $0x1c] ss:$12 sps:$4 sm:$0xff]  }
 0x3e3   :  { %6825 = vmatpush1.bf16.msra.mxu1 %v5796_v30  ;;  %16605 = vst [vmem:[#allocation67_spill] sm:$0xff] %v11430_v37  ;;  %v6097_v30 = vsel %vm6050_vm9, %v16606_v31, %v11188_v18  ;;  %v6272_v25 = vpack.c.bf16 %v6224_v45, %v6208_v50  ;;  %16609 = vst [vmem:[#allocation254_spill] sm:$0xff] %v11451_v6  ;;  %v6207_v14 = vmul.f32 %v6136_v59, %v6099_v8  ;;  %v16611_v4 = vld [vmem:[#allocation108_spill] sm:$0xff] }
 0x3e4   :  { %v11417_v56 = vpop.permute.xlu1 %3938  ;;  %6826 = vmatprep.subr.bf16.mxu1 %v5813_v5  ;;  %v11432_v9 = vpop.permute.xlu0 %3473  ;;  %v2632_v19 = vsel %vm2598_vm2, %v11104_v38, %v11136_v41  ;;  %16610 = vst [vmem:[#allocation255_spill] sm:$0xff] %v11460_v2  ;;  %v6101_v45 = vsel %vm6050_vm9, %v16611_v4, %v16606_v31  ;;  %v16612_v50 = vld [vmem:[#allocation76_spill] sm:$0xff]  ;;  %v6240_v8 = vmul.f32 %v6140_v51, %v6097_v30  ;;  %v16614_v31 = vld [vmem:[#allocation121_spill] sm:$0xff] }
 0x3e5   :  { %16602 = vst [vmem:[#allocation88_spill] sm:$0xff] %v11417_v56  ;;  %3966 = vrot.lane.b32.xlu1 %v11234_v27, %s8769_s29  ;;  %v11468_v18 = vrot.slane %v16612_v50, %v11430_v37  ;;  %v6255_v41 = vmul.f32 %v6136_v59, %v6102_v34  ;;  %v2631_v44 = vsel %vm2598_vm2, %v10784_v13, %v10870_v62 }
 0x3e6   :  { %5513 = vrot.lane.b32.xlu0 %v11372_v39, %s8773_s12  ;;  %v2220_v4 = vadd.f32 %v16614_v31, %v16582_v46  ;;  %v6288_v51 = vpack.c.bf16 %v6256_v36, %v6240_v8  ;;  %v11501_v36 = vld [vmem:[%s15677_s5 + $0x18] ss:$12 sps:$4 sm:$0xff]   ;;  %v16620_v8 = vmov 0   ;;  %v2637_v43 = vsel %vm2598_vm2, %v11202_v63, %v11170_v23 }
 0x3e7   :  { %6827 = vmatpush1.bf16.msra.mxu1 %v5812_v12  ;;  %v6271_v12 = vpack.c.bf16 %v6223_v22, %v6207_v14  ;;  %v2775_v11 = vmul.f32 %v11468_v18, %v2632_v19  ;;  %v6239_v22 = vmul.f32 %v6136_v59, %v6101_v45  ;;  %v2759_v30 = vmul.f32 %v11468_v18, %v2631_v44 }
 0x3e8   :  { %v11446_v5 = vpop.permute.xlu1 %3954  ;;  %6849 = vmatprep.subr.bf16.mxu1 %v6272_v25  ;;  %v11470_v3 = vpop.permute.xlu0 %3932  ;;  %v11492_v19 = vmax.f32 %v2220_v4, 0.0  ;;  %16616 = vst [vmem:[#allocation257_spill] sm:$0xff] %v11501_v36  ;;  %v11504_v44 = vsub.s32 6, %v16604_v48  ;;  %v16638_v48 = vld [vmem:[#allocation127_spill] sm:$0xff] }
 0x3e9   :  { %16608 = vst [vmem:[#allocation151_spill] sm:$0xff] %v11446_v5  ;;  %16613 = vst [vmem:[#allocation256_spill] sm:$0xff] %v11470_v3  ;;  %3982 = vrot.lane.b32.xlu1 %v11261_v20, %s8769_s29  ;;  %v6287_v14 = vpack.c.bf16 %v6255_v41, %v6239_v22  ;;  %v2823_v59 = vpack.c.bf16 %v2775_v11, %v2759_v30  ;;  %v2636_v41 = vsel %vm2598_vm2, %v11128_v60, %v11104_v38  ;;  %v16622_v22 = vld [vmem:[#allocation122_spill] sm:$0xff] }
 0x3ea   :  { %5988 = vrot.lane.b32.xlu0 %v11372_v39, %s8774_s13  ;;  %6829 = vmatmul.mubr.bf16.vlgmr.msra.gmra.mrb[40].mxu1 %v11451_v6  ;;  %16617 = vst [vmem:[#allocation258_spill] sm:$0xff] %v11504_v44  ;;  %v11521_v4 = vrot.slane %v16612_v50, %v11504_v44  ;;  %v2169_v30 = vadd.f32 %v16622_v22, %v16582_v46 }
 0x3eb   :  { %6850 = vmatpush1.bf16.msra.mxu1 %v6271_v12  ;;  %6838 = vmatprep.mubr.bf16.mxu1 %v11460_v2  ;;  %v2635_v12 = vsel %vm2598_vm2, %v10860_v55, %v10784_v13  ;;  %v2633_v6 = vsel %vm2598_vm2, %v11170_v23, %v11210_v49  ;;  %v3110_v23 = vsel %vm3072_vm3, %v11144_v17, %v11120_v29  ;;  %v16705_v17 = vld [vmem:[#allocation45_spill] sm:$0xff] }
 0x3ec   :  { %v11484_v25 = vpop.permute.xlu1 %4541  ;;  %6851 = vmatprep.subr.bf16.mxu1 %v6288_v51  ;;  %v11488_v34 = vpop.permute.xlu0 %3948  ;;  %v2774_v38 = vmul.f32 %v11521_v4, %v2636_v41  ;;  %v2758_v13 = vmul.f32 %v11521_v4, %v2635_v12  ;;  %v11549_v22 = vmax.f32 %v2169_v30, 0.0 }
 0x3ed   :  { %16615 = vst [vmem:[#allocation121_spill] sm:$0xff] %v11484_v25  ;;  %2534 = vrot.lane.b32.xlu1 %v11372_v39, %s8768_s28 }
 0x3ee   :  { %3485 = vrot.lane.b32.xlu0 %v11372_v39, %s8767_s27  ;;  %v2822_v41 = vpack.c.bf16 %v2774_v38, %v2758_v13  ;;  %16625 = vst [vmem:[#allocation263_spill] sm:$0xff] %v11549_v22 }
 0x3ef   :  { %6852 = vmatpush1.bf16.msra.mxu1 %v6287_v14 }
 0x3f0   :  { %v11496_v31 = vpop.permute.xlu1 %4557  ;;  %7008 = vmatprep.subr.bf16.mxu1 %v2823_v59  ;;  %v11506_v45 = vpop.permute.xlu0 %4551  ;;  %v11542_v59 = vld [vmem:[%s15677_s5 + $0x8] ss:$12 sps:$4 sm:$0xff]  }
 0x3f1   :  { %16618 = vst [vmem:[#allocation259_spill] sm:$0xff] %v11506_v45  ;;  %2550 = vrot.lane.b32.xlu1 %v11492_v19, %s8768_s28  ;;  %16623 = vst [vmem:[#allocation122_spill] sm:$0xff] %v11542_v59 }
 0x3f2   :  { %3501 = vrot.lane.b32.xlu0 %v11492_v19, %s8767_s27  ;;  %6839 = vmatmul.mubr.bf16.gmra.mrb[44].mxu1 %v11501_v36 }
 0x3f3   :  { %6881 = vmatprep.mubr.bf16.mxu1 %v16620_v8 }
 0x3f4   :  { %v11517_v11 = vpop.permute.xlu1 %5016  ;;  %v11528_v51 = vpop.permute.xlu0 %5026 }
 0x3f5   :  { %16619 = vst [vmem:[#allocation260_spill] sm:$0xff] %v11517_v11  ;;  %16621 = vst [vmem:[#allocation261_spill] sm:$0xff] %v11528_v51  ;;  %3010 = vrot.lane.b32.xlu1 %v11372_v39, %s8770_s30  ;;  %v16626_v11 = vld [vmem:[#allocation123_spill] sm:$0xff] }
 0x3f6   :  { %3960 = vrot.lane.b32.xlu0 %v11372_v39, %s8769_s29  ;;  %v2222_v25 = vadd.f32 %v16626_v11, %v16582_v46 }
 0x3f8   :  { %v11537_v14 = vpop.permute.xlu1 %5032  ;;  %v11545_v62 = vpop.permute.xlu0 %5501  ;;  %v11564_v38 = vmax.f32 %v2222_v25, 0.0  ;;  %v16633_v25 = vld [vmem:[#allocation19_spill] sm:$0xff] }
 0x3f9   :  { %16624 = vst [vmem:[#allocation262_spill] sm:$0xff] %v11545_v62  ;;  %3026 = vrot.lane.b32.xlu1 %v11492_v19, %s8770_s30 }
 0x3fa   :  { %3976 = vrot.lane.b32.xlu0 %v11492_v19, %s8769_s29  ;;  %8508 = vmatmul.mubr.msk.bf16.vlgmr.msra.gmra.mrb[40].mxu1 %vm6683_vm10, %v11542_v59  ;;  %v2226_v59 = vadd.f32 %v16638_v48, %v16633_v25 }
 0x3fb   :  { %7009 = vmatpush1.bf16.msra.mxu1 %v2822_v41  ;;  %6891 = vmatprep.mubr.bf16.mxu1 %v16620_v8 }
 0x3fc   :  { %v11557_v3 = vpop.permute.xlu1 %5491  ;;  %v11560_v12 = vpop.permute.xlu0 %3465  ;;  %v11606_v8 = vmax.f32 %v2226_v59, 0.0  ;;  %v16643_v59 = vld [vmem:[#allocation130_spill] sm:$0xff] }
 0x3fd   :  { %16627 = vst [vmem:[#allocation123_spill] sm:$0xff] %v11557_v3  ;;  %16628 = vst [vmem:[#allocation264_spill] sm:$0xff] %v11560_v12  ;;  %2542 = vrot.lane.b32.xlu1 %v11549_v22, %s8768_s28  ;;  %v16634_v3 = vld [vmem:[#allocation126_spill] sm:$0xff]  ;;  %v2175_v15 = vadd.f32 %v16643_v59, %v16633_v25  ;;  %v16644_v59 = vld [vmem:[#allocation131_spill] sm:$0xff] }
 0x3fe   :  { %3493 = vrot.lane.b32.xlu0 %v11549_v22, %s8767_s27  ;;  %v2173_v55 = vadd.f32 %v16634_v3, %v16633_v25  ;;  %v2228_v0 = vadd.f32 %v16644_v59, %v16633_v25  ;;  %v3105_v59 = vsel %vm3072_vm3, %v10842_v10, %v10904_v54 }
 0x3ff   :  { %v11651_v62 = vmax.f32 %v2175_v15, 0.0  ;;  %v2791_v15 = vmul.f32 %v11468_v18, %v2633_v6 }
 0x400   :  { %v11568_v11 = vpop.permute.xlu1 %5507  ;;  %v11570_v30 = vpop.permute.xlu0 %3481  ;;  %v11592_v50 = vmax.f32 %v2173_v55, 0.0  ;;  %v11682_v54 = vmax.f32 %v2228_v0, 0.0  ;;  %v3107_v0 = vsel %vm3072_vm3, %v11192_v24, %v11238_v52 }
 0x401   :  { %16629 = vst [vmem:[#allocation265_spill] sm:$0xff] %v11568_v11  ;;  %16630 = vst [vmem:[#allocation266_spill] sm:$0xff] %v11570_v30  ;;  %2558 = vrot.lane.b32.xlu1 %v11564_v38, %s8768_s28 }
 0x402   :  { %3509 = vrot.lane.b32.xlu0 %v11564_v38, %s8767_s27  ;;  %16637 = vst [vmem:[#allocation269_spill] sm:$0xff] %v11592_v50  ;;  %16646 = vst [vmem:[#allocation131_spill] sm:$0xff] %v11651_v62 }
 0x404   :  { %v11576_v13 = vpop.permute.xlu1 %5966  ;;  %v11578_v41 = vpop.permute.xlu0 %3940 }
 0x405   :  { %16631 = vst [vmem:[#allocation267_spill] sm:$0xff] %v11576_v13  ;;  %16632 = vst [vmem:[#allocation268_spill] sm:$0xff] %v11578_v41  ;;  %3018 = vrot.lane.b32.xlu1 %v11549_v22, %s8770_s30 }
 0x406   :  { %3968 = vrot.lane.b32.xlu0 %v11549_v22, %s8769_s29 }
 0x408   :  { %v11586_v60 = vpop.permute.xlu1 %2506  ;;  %v11588_v39 = vpop.permute.xlu0 %3956 }
 0x409   :  { %16635 = vst [vmem:[#allocation19_spill] sm:$0xff] %v11586_v60  ;;  %16636 = vst [vmem:[#allocation126_spill] sm:$0xff] %v11588_v39  ;;  %3034 = vrot.lane.b32.xlu1 %v11564_v38, %s8770_s30 }
 0x40a   :  { %3984 = vrot.lane.b32.xlu0 %v11564_v38, %s8769_s29 }
 0x40c   :  { %v2523_v13 = vpop.permute.xlu1 %2522  ;;  %v11598_v3 = vpop.permute.xlu0 %4543 }
 0x40d   :  { %16639 = vst [vmem:[#allocation127_spill] sm:$0xff] %v11598_v3  ;;  %4565 = vrot.lane.b32.xlu1 %v11592_v50, %s8771_s10 }
 0x40e   :  { %2536 = vrot.lane.b32.xlu0 %v11592_v50, %s8768_s28 }
 0x410   :  { %v11604_v60 = vpop.permute.xlu1 %2982  ;;  %v11608_v55 = vpop.permute.xlu0 %4559 }
 0x411   :  { %16640 = vst [vmem:[#allocation270_spill] sm:$0xff] %v11604_v60  ;;  %5040 = vrot.lane.b32.xlu1 %v11592_v50, %s8772_s11 }
 0x412   :  { %2552 = vrot.lane.b32.xlu0 %v11606_v8, %s8768_s28 }
 0x414   :  { %v2999_v48 = vpop.permute.xlu1 %2998  ;;  %v11614_v3 = vpop.permute.xlu0 %5018 }
 0x415   :  { %16641 = vst [vmem:[#allocation271_spill] sm:$0xff] %v11614_v3  ;;  %5515 = vrot.lane.b32.xlu1 %v11592_v50, %s8773_s12  ;;  %v3106_v3 = vsel %vm3072_vm3, %v11120_v29, %v11152_v42  ;;  %v3109_v29 = vsel %vm3072_vm3, %v10882_v58, %v10842_v10 }
 0x416   :  { %3012 = vrot.lane.b32.xlu0 %v11592_v50, %s8770_s30 }
 0x418   :  { %v11620_v60 = vpop.permute.xlu1 %2514  ;;  %v11627_v2 = vpop.permute.xlu0 %5034 }
 0x419   :  { %16642 = vst [vmem:[#allocation272_spill] sm:$0xff] %v11620_v60  ;;  %v2638_v36 = vsel %vm2598_vm2, %v11620_v60, %v2523_v13  ;;  %5990 = vrot.lane.b32.xlu1 %v11592_v50, %s8774_s13  ;;  %v3178_v60 = vrot.slane %v10620_v57, %v11430_v37 }
 0x41a   :  { %3028 = vrot.lane.b32.xlu0 %v11606_v8, %s8770_s30  ;;  %v2806_v49 = vmul.f32 %v11521_v4, %v2638_v36  ;;  %v3174_v36 = vrot.slane %v10620_v57, %v11504_v44 }
 0x41b   :  { %v3250_v63 = vmul.f32 %v3178_v60, %v3106_v3  ;;  %v3234_v3 = vmul.f32 %v3178_v60, %v3105_v59 }
 0x41c   :  { %v11649_v42 = vpop.permute.xlu1 %2530  ;;  %v11667_v51 = vpop.permute.xlu0 %5493  ;;  %v3233_v59 = vmul.f32 %v3174_v36, %v3109_v29 }
 0x41d   :  { %16645 = vst [vmem:[#allocation130_spill] sm:$0xff] %v11649_v42  ;;  %v2634_v11 = vsel %vm2598_vm2, %v2523_v13, %v11649_v42  ;;  %16647 = vst [vmem:[#allocation273_spill] sm:$0xff] %v11667_v51  ;;  %3487 = vrot.lane.b32.xlu1 %v11592_v50, %s8767_s27  ;;  %v2790_v13 = vmul.f32 %v11521_v4, %v2637_v43  ;;  %v3298_v10 = vpack.c.bf16 %v3250_v63, %v3234_v3 }
 0x41e   :  { %v2807_v7 = vmul.f32 %v11468_v18, %v2634_v11  ;;  %2544 = vrot.lane.b32.xlu0 %v11651_v62, %s8768_s28  ;;  %v3249_v11 = vmul.f32 %v3174_v36, %v3110_v23  ;;  %v3111_v63 = vsel %vm3072_vm3, %v11220_v21, %v11192_v24  ;;  %v3585_v24 = vsel %vm3547_vm4, %v11058_v40, %v10991_v16 }
 0x41f   :  { %v2838_v42 = vpack.c.bf16 %v2806_v49, %v2790_v13  ;;  %v3653_v49 = vrot.slane %v10709_v61, %v11430_v37 }
 0x420   :  { %v11680_v18 = vpop.permute.xlu1 %2990  ;;  %v2839_v6 = vpack.c.bf16 %v2807_v7, %v2791_v15  ;;  %v11687_v4 = vpop.permute.xlu0 %5509  ;;  %v3581_v7 = vsel %vm3547_vm4, %v10991_v16, %v11066_v35  ;;  %v3580_v15 = vsel %vm3547_vm4, %v10868_v28, %v10989_v47  ;;  %v3584_v16 = vsel %vm3547_vm4, %v10981_v53, %v10868_v28 }
 0x421   :  { %16648 = vst [vmem:[#allocation274_spill] sm:$0xff] %v11680_v18  ;;  %v3112_v43 = vsel %vm3072_vm3, %v11680_v18, %v2999_v48  ;;  %3503 = vrot.lane.b32.xlu1 %v11606_v8, %s8767_s27  ;;  %v3725_v3 = vmul.f32 %v3653_v49, %v3581_v7  ;;  %v3587_v28 = vsel %vm3547_vm4, %v11560_v12, %v11432_v9 }
 0x422   :  { %7010 = vmatprep.subr.bf16.mxu1 %v2839_v6  ;;  %2560 = vrot.lane.b32.xlu0 %v11682_v54, %s8768_s28  ;;  %v3281_v13 = vmul.f32 %v3174_v36, %v3112_v43  ;;  %v3266_v6 = vmul.f32 %v3178_v60, %v3107_v0  ;;  %v3265_v43 = vmul.f32 %v3174_v36, %v3111_v63  ;;  %v16652_v0 = vld [vmem:[#allocation20_spill] sm:$0xff] }
 0x423   :  { %7011 = vmatpush1.bf16.msra.mxu1 %v2838_v42  ;;  %v3297_v42 = vpack.c.bf16 %v3249_v11, %v3233_v59  ;;  %v3649_v11 = vrot.slane %v10709_v61, %v11504_v44  ;;  %v16653_v36 = vld [vmem:[#allocation132_spill] sm:$0xff] }
 0x424   :  { %v11707_v23 = vpop.permute.xlu1 %3006  ;;  %7012 = vmatprep.subr.bf16.mxu1 %v3298_v10  ;;  %v11720_v10 = vpop.permute.xlu0 %5968  ;;  %v2177_v63 = vadd.f32 %v16653_v36, %v16652_v0  ;;  %v16657_v36 = vld [vmem:[#allocation209_spill] sm:$0xff] }
 0x425   :  { %16649 = vst [vmem:[#allocation275_spill] sm:$0xff] %v11707_v23  ;;  %v3108_v29 = vsel %vm3072_vm3, %v2999_v48, %v11707_v23  ;;  %16650 = vst [vmem:[#allocation276_spill] sm:$0xff] %v11720_v10  ;;  %3962 = vrot.lane.b32.xlu1 %v11592_v50, %s8769_s29  ;;  %v3583_v48 = vsel %vm3547_vm4, %v11432_v9, %v11570_v30  ;;  %v16654_v23 = vld [vmem:[#allocation247_spill] sm:$0xff]  ;;  %v3313_v30 = vpack.c.bf16 %v3281_v13, %v3265_v43  ;;  %v16658_v13 = vld [vmem:[#allocation189_spill] sm:$0xff] }
 0x426   :  { %v3282_v52 = vmul.f32 %v3178_v60, %v3108_v29  ;;  %v3709_v60 = vmul.f32 %v3653_v49, %v3580_v15  ;;  %3020 = vrot.lane.b32.xlu0 %v11651_v62, %s8770_s30  ;;  %v3724_v29 = vmul.f32 %v3649_v11, %v3585_v24  ;;  %v3757_v15 = vmul.f32 %v3653_v49, %v3583_v48  ;;  %v16662_v10 = vld [vmem:[#allocation222_spill] sm:$0xff] }
 0x427   :  { %7013 = vmatpush1.bf16.msra.mxu1 %v3297_v42  ;;  %v3582_v42 = vsel %vm3547_vm4, %v16654_v23, %v11391_v33  ;;  %v3708_v24 = vmul.f32 %v3649_v11, %v3584_v16  ;;  %v4128_v43 = vrot.slane %v16658_v13, %v11430_v37  ;;  %v3586_v9 = vsel %vm3547_vm4, %v11354_v26, %v16654_v23  ;;  %v16659_v16 = vld [vmem:[#allocation208_spill] sm:$0xff]  ;;  %v16700_v26 = vld [vmem:[#allocation37_spill] sm:$0xff] }
 0x428   :  { %v11736_v59 = vpop.permute.xlu1 %5974  ;;  %v3314_v7 = vpack.c.bf16 %v3282_v52, %v3266_v6  ;;  %v11748_v35 = vpop.permute.xlu0 %5976  ;;  %v3773_v52 = vpack.c.bf16 %v3725_v3, %v3709_v60  ;;  %v16656_v6 = vld [vmem:[#allocation224_spill] sm:$0xff]  ;;  %v3741_v48 = vmul.f32 %v3653_v49, %v3582_v42  ;;  %v16660_v60 = vld [vmem:[#allocation69_spill] sm:$0xff]  ;;  %v11770_v47 = vmax.f32 %v2177_v63, 0.0 }
 0x429   :  { %16651 = vst [vmem:[#allocation277_spill] sm:$0xff] %v11736_v59  ;;  %16655 = vst [vmem:[#allocation20_spill] sm:$0xff] %v11748_v35  ;;  %3495 = vrot.lane.b32.xlu1 %v11651_v62, %s8767_s27  ;;  %v4056_v33 = vsel %vm4022_vm5, %v16657_v36, %v16656_v6  ;;  %v3756_v6 = vmul.f32 %v3649_v11, %v3587_v28  ;;  %v4060_v49 = vsel %vm4022_vm5, %v16662_v10, %v16657_v36 }
 0x42a   :  { %7014 = vmatprep.subr.bf16.mxu1 %v3314_v7  ;;  %3036 = vrot.lane.b32.xlu0 %v11682_v54, %s8770_s30  ;;  %v3772_v7 = vpack.c.bf16 %v3724_v29, %v3708_v24  ;;  %16661 = vst [vmem:[#allocation132_spill] sm:$0xff] %v11770_v47  ;;  %v4200_v23 = vmul.f32 %v4128_v43, %v4056_v33  ;;  %v16663_v29 = vld [vmem:[#allocation133_spill] sm:$0xff] }
 0x42b   :  { %7015 = vmatpush1.bf16.msra.mxu1 %v3313_v30  ;;  %v4055_v30 = vsel %vm4022_vm5, %v16660_v60, %v16659_v16  ;;  %v4124_v51 = vrot.slane %v16658_v13, %v11504_v44  ;;  %v3740_v16 = vmul.f32 %v3649_v11, %v3586_v9  ;;  %v4058_v63 = vsel %vm4022_vm5, %v11488_v34, %v11588_v39  ;;  %v16664_v33 = vld [vmem:[#allocation205_spill] sm:$0xff]  ;;  %v16666_v9 = vld [vmem:[#allocation250_spill] sm:$0xff] }
 0x42c   :  { %v11764_v3 = vpop.permute.xlu1 %5982  ;;  %7016 = vmatprep.subr.bf16.mxu1 %v3773_v52  ;;  %v11776_v42 = vpop.permute.xlu0 %5984  ;;  %v3789_v52 = vpack.c.bf16 %v3757_v15, %v3741_v48  ;;  %v2230_v28 = vadd.f32 %v16663_v29, %v16652_v0  ;;  %v4059_v24 = vsel %vm4022_vm5, %v16664_v33, %v16660_v60  ;;  %v4184_v36 = vmul.f32 %v4128_v43, %v4055_v30 }
 0x42d   :  { %3511 = vrot.lane.b32.xlu1 %v11682_v54, %s8767_s27  ;;  %v4199_v11 = vmul.f32 %v4124_v51, %v4060_v49  ;;  %v4057_v48 = vsel %vm4022_vm5, %v16666_v9, %v11446_v5  ;;  %v4062_v29 = vsel %vm4022_vm5, %v11578_v41, %v11488_v34  ;;  %v4232_v60 = vmul.f32 %v4128_v43, %v4058_v63  ;;  %v11811_v49 = vld [vmem:[%s15677_s5 + $0x20] ss:$12 sps:$4 sm:$0xff]   ;;  %v16699_v41 = vld [vmem:[#allocation210_spill] sm:$0xff] }
 0x42e   :  { %4567 = vrot.lane.b32.xlu0 %v11770_v47, %s8771_s10  ;;  %v4248_v39 = vpack.c.bf16 %v4200_v23, %v4184_v36  ;;  %16668 = vst [vmem:[#allocation69_spill] sm:$0xff] %v11811_v49  ;;  %v4061_v34 = vsel %vm4022_vm5, %v11417_v56, %v16666_v9  ;;  %8509 = vmatmul.mubr.msk.bf16.gmra.mrb[44].mxu1 %vm6683_vm10, %v11811_v49  ;;  %v16698_v56 = vld [vmem:[#allocation228_spill] sm:$0xff] }
 0x42f   :  { %7017 = vmatpush1.bf16.msra.mxu1 %v3772_v7  ;;  %v3788_v7 = vpack.c.bf16 %v3756_v6, %v3740_v16  ;;  %v11813_v6 = vmax.f32 %v2230_v28, 0.0  ;;  %v4216_v16 = vmul.f32 %v4128_v43, %v4057_v48  ;;  %v4215_v43 = vmul.f32 %v4124_v51, %v4061_v34  ;;  %v16673_v48 = vld [vmem:[#allocation106_spill] sm:$0xff] }
 0x430   :  { %v11794_v15 = vpop.permute.xlu1 %4561  ;;  %7018 = vmatprep.subr.bf16.mxu1 %v3789_v52  ;;  %v11804_v30 = vpop.permute.xlu0 %2532  ;;  %v4183_v52 = vmul.f32 %v4124_v51, %v4059_v24  ;;  %v4231_v24 = vmul.f32 %v4124_v51, %v4062_v29  ;;  %v16674_v29 = vld [vmem:[#allocation156_spill] sm:$0xff]  ;;  %v11906_v12 = vrot.slane %v16700_v26, %v11430_v37  ;;  %v11914_v10 = vrot.slane %v16700_v26, %v11504_v44 }
 0x431   :  { %16665 = vst [vmem:[#allocation247_spill] sm:$0xff] %v11794_v15  ;;  %16667 = vst [vmem:[#allocation209_spill] sm:$0xff] %v11804_v30  ;;  %2538 = vrot.lane.b32.xlu1 %v11770_v47, %s8768_s28  ;;  %v4264_v28 = vpack.c.bf16 %v4232_v60, %v4216_v16  ;;  %v16675_v60 = vld [vmem:[#allocation134_spill] sm:$0xff]  ;;  %v16677_v16 = vld [vmem:[#allocation96_spill] sm:$0xff] }
 0x432   :  { %5042 = vrot.lane.b32.xlu0 %v11770_v47, %s8772_s11  ;;  %v4247_v23 = vpack.c.bf16 %v4199_v11, %v4183_v52  ;;  %v4376_v52 = vpack.c.bf16 %v16674_v29, %v16673_v48  ;;  %v2179_v51 = vadd.f32 %v16675_v60, %v16652_v0  ;;  %v16683_v29 = vld [vmem:[#allocation135_spill] sm:$0xff] }
 0x433   :  { %7019 = vmatpush1.bf16.msra.mxu1 %v3788_v7  ;;  %v16670_v7 = vld [vmem:[#allocation207_spill] sm:$0xff]  ;;  %v2232_v60 = vadd.f32 %v16683_v29, %v16652_v0 }
 0x434   :  { %v11821_v63 = vpop.permute.xlu1 %5036  ;;  %7020 = vmatprep.subr.bf16.mxu1 %v4248_v39  ;;  %v11825_v36 = vpop.permute.xlu0 %2548  ;;  %7040 = vmatprep.mubr.bf16.mxu1 %v16670_v7  ;;  %v4263_v39 = vpack.c.bf16 %v4231_v24, %v4215_v43  ;;  %v16680_v7 = vld [vmem:[#allocation72_spill] sm:$0xff]  ;;  %v16681_v43 = vld [vmem:[#allocation225_spill] sm:$0xff]  ;;  %v11854_v48 = vmax.f32 %v2179_v51, 0.0  ;;  %v16693_v29 = vld [vmem:[#allocation167_spill] sm:$0xff] }
 0x435   :  { %16669 = vst [vmem:[#allocation133_spill] sm:$0xff] %v11821_v63  ;;  %2554 = vrot.lane.b32.xlu1 %v11813_v6, %s8768_s28  ;;  %v11868_v51 = vmax.f32 %v2232_v60, 0.0 }
 0x436   :  { %5517 = vrot.lane.b32.xlu0 %v11770_v47, %s8773_s12  ;;  %16682 = vst [vmem:[#allocation134_spill] sm:$0xff] %v11854_v48 }
 0x437   :  { %7021 = vmatpush1.bf16.msra.mxu1 %v4247_v23  ;;  %v16678_v23 = vld [vmem:[#allocation138_spill] sm:$0xff] }
 0x438   :  { %v11832_v9 = vpop.permute.xlu1 %5511  ;;  %7022 = vmatprep.subr.bf16.mxu1 %v4264_v28  ;;  %v11834_v11 = vpop.permute.xlu0 %3008  ;;  %v4375_v24 = vpack.c.bf16 %v16678_v23, %v16677_v16  ;;  %v16685_v16 = vld [vmem:[#allocation196_spill] sm:$0xff]  ;;  %v16686_v23 = vld [vmem:[#allocation211_spill] sm:$0xff] }
 0x439   :  { %16671 = vst [vmem:[#allocation250_spill] sm:$0xff] %v11832_v9  ;;  %16672 = vst [vmem:[#allocation207_spill] sm:$0xff] %v11834_v11  ;;  %3014 = vrot.lane.b32.xlu1 %v11770_v47, %s8770_s30  ;;  %v4391_v5 = vpack.c.bf16 %v16686_v23, %v16685_v16  ;;  %v16695_v23 = vld [vmem:[#allocation163_spill] sm:$0xff] }
 0x43a   :  { %5992 = vrot.lane.b32.xlu0 %v11770_v47, %s8774_s13 }
 0x43b   :  { %7023 = vmatpush1.bf16.msra.mxu1 %v4263_v39  ;;  %v4392_v39 = vpack.c.bf16 %v16681_v43, %v16680_v7 }
 0x43c   :  { %v11844_v34 = vpop.permute.xlu1 %5986  ;;  %7024 = vmatprep.subr.bf16.mxu1 %v4376_v52  ;;  %v11848_v28 = vpop.permute.xlu0 %3024 }
 0x43d   :  { %16676 = vst [vmem:[#allocation106_spill] sm:$0xff] %v11844_v34  ;;  %16679 = vst [vmem:[#allocation156_spill] sm:$0xff] %v11848_v28  ;;  %3030 = vrot.lane.b32.xlu1 %v11813_v6, %s8770_s30 }
 0x43e   :  { %3489 = vrot.lane.b32.xlu0 %v11770_v47, %s8767_s27 }
 0x43f   :  { %7025 = vmatpush1.bf16.msra.mxu1 %v4375_v24 }
 0x440   :  { %v11860_v52 = vpop.permute.xlu1 %3483  ;;  %7026 = vmatprep.subr.bf16.mxu1 %v4392_v39  ;;  %v11864_v11 = vpop.permute.xlu0 %2540 }
 0x441   :  { %16684 = vst [vmem:[#allocation96_spill] sm:$0xff] %v11860_v52  ;;  %16687 = vst [vmem:[#allocation138_spill] sm:$0xff] %v11864_v11  ;;  %2546 = vrot.lane.b32.xlu1 %v11854_v48, %s8768_s28 }
 0x442   :  { %3505 = vrot.lane.b32.xlu0 %v11813_v6, %s8767_s27 }
 0x443   :  { %7027 = vmatpush1.bf16.msra.mxu1 %v4391_v5  ;;  %v16692_v5 = vld [vmem:[#allocation17_spill] sm:$0xff] }
 0x444   :  { %v11872_v24 = vpop.permute.xlu1 %3499  ;;  %v11874_v7 = vpop.permute.xlu0 %2556  ;;  %v2324_v60 = vadd.f32 %v16693_v29, %v16692_v5  ;;  %v2269_v52 = vadd.f32 %v16695_v23, %v16692_v5  ;;  %v4659_v29 = vsel %vm4625_vm6, %v16699_v41, %v16698_v56  ;;  %v16704_v41 = vld [vmem:[#allocation164_spill] sm:$0xff] }
 0x445   :  { %16688 = vst [vmem:[#allocation72_spill] sm:$0xff] %v11872_v24  ;;  %16689 = vst [vmem:[#allocation225_spill] sm:$0xff] %v11874_v7  ;;  %2562 = vrot.lane.b32.xlu1 %v11868_v51, %s8768_s28  ;;  %v2322_v18 = vadd.f32 %v16704_v41, %v16692_v5  ;;  %v4802_v58 = vmul.f32 %v11914_v10, %v4659_v29 }
 0x446   :  { %3964 = vrot.lane.b32.xlu0 %v11770_v47, %s8769_s29  ;;  %v11920_v40 = vmax.f32 %v2269_v52, 0.0 }
 0x447   :  { %v11944_v47 = vmax.f32 %v2322_v18, 0.0  ;;  %v16712_v18 = vld [vmem:[#allocation166_spill] sm:$0xff] }
 0x448   :  { %v11880_v43 = vpop.permute.xlu1 %3958  ;;  %v11882_v39 = vpop.permute.xlu0 %3016  ;;  %16703 = vst [vmem:[#allocation228_spill] sm:$0xff] %v11920_v40 }
 0x449   :  { %16690 = vst [vmem:[#allocation135_spill] sm:$0xff] %v11880_v43  ;;  %16691 = vst [vmem:[#allocation196_spill] sm:$0xff] %v11882_v39  ;;  %3022 = vrot.lane.b32.xlu1 %v11854_v48, %s8770_s30  ;;  %v11898_v43 = vmax.f32 %v2324_v60, 0.0  ;;  %v16702_v60 = vld [vmem:[#allocation212_spill] sm:$0xff] }
 0x44a   :  { %3497 = vrot.lane.b32.xlu0 %v11854_v48, %s8767_s27  ;;  %v4654_v21 = vsel %vm4625_vm6, %v16702_v60, %v11794_v15  ;;  %v4658_v33 = vsel %vm4625_vm6, %v16705_v17, %v16702_v60  ;;  %16708 = vst [vmem:[#allocation278_spill] sm:$0xff] %v11944_v47 }
 0x44b   :  { %16697 = vst [vmem:[#allocation167_spill] sm:$0xff] %v11898_v43  ;;  %v4787_v15 = vmul.f32 %v11906_v12, %v4654_v21  ;;  %v4786_v17 = vmul.f32 %v11914_v10, %v4658_v33  ;;  %v16710_v21 = vld [vmem:[#allocation170_spill] sm:$0xff]  ;;  %v2271_v33 = vadd.f32 %v16712_v18, %v16692_v5 }
 0x44c   :  { %v11890_v16 = vpop.permute.xlu1 %3974  ;;  %v11894_v30 = vpop.permute.xlu0 %3032 }
 0x44d   :  { %16694 = vst [vmem:[#allocation211_spill] sm:$0xff] %v11890_v16  ;;  %16696 = vst [vmem:[#allocation17_spill] sm:$0xff] %v11894_v30  ;;  %3038 = vrot.lane.b32.xlu1 %v11868_v51, %s8770_s30 }
 0x44e   :  { %3513 = vrot.lane.b32.xlu0 %v11868_v51, %s8767_s27 }
 0x450   :  { %v11910_v23 = vpop.permute.xlu1 %3491  ;;  %v11928_v53 = vpop.permute.xlu0 %4563 }
 0x451   :  { %16701 = vst [vmem:[#allocation163_spill] sm:$0xff] %v11910_v23  ;;  %16706 = vst [vmem:[#allocation212_spill] sm:$0xff] %v11928_v53  ;;  %3064 = vrot.lane.b32.xlu1 %v11898_v43, %s8770_s30  ;;  %v4655_v52 = vsel %vm4625_vm6, %v16698_v56, %v11928_v53  ;;  %v4850_v56 = vpack.c.bf16 %v4802_v58, %v4786_v17  ;;  %v2273_v53 = vadd.f32 %v16710_v21, %v16582_v46  ;;  %v16715_v58 = vld [vmem:[#allocation171_spill] sm:$0xff] }
 0x452   :  { %v4803_v41 = vmul.f32 %v11906_v12, %v4655_v52  ;;  %2564 = vrot.lane.b32.xlu0 %v11920_v40, %s8768_s28  ;;  %v2326_v17 = vadd.f32 %v16715_v58, %v16582_v46  ;;  %v16722_v58 = vld [vmem:[#allocation173_spill] sm:$0xff] }
 0x454   :  { %v11941_v60 = vpop.permute.xlu1 %3507  ;;  %v11946_v50 = vpop.permute.xlu0 %5038  ;;  %v4851_v29 = vpack.c.bf16 %v4803_v41, %v4787_v15  ;;  %v11962_v15 = vmax.f32 %v2273_v53, 0.0  ;;  %v11976_v5 = vmax.f32 %v2326_v17, 0.0  ;;  %v16720_v53 = vld [vmem:[#allocation172_spill] sm:$0xff] }
 0x455   :  { %16707 = vst [vmem:[#allocation164_spill] sm:$0xff] %v11941_v60  ;;  %16709 = vst [vmem:[#allocation279_spill] sm:$0xff] %v11946_v50  ;;  %3539 = vrot.lane.b32.xlu1 %v11898_v43, %s8767_s27  ;;  %v2275_v21 = vadd.f32 %v16720_v53, %v16582_v46 }
 0x456   :  { %2580 = vrot.lane.b32.xlu0 %v11944_v47, %s8768_s28  ;;  %7028 = vmatprep.subr.bf16.mxu1 %v4851_v29  ;;  %16714 = vst [vmem:[#allocation280_spill] sm:$0xff] %v11962_v15  ;;  %v11970_v29 = vmax.f32 %v2271_v33, 0.0  ;;  %16719 = vst [vmem:[#allocation283_spill] sm:$0xff] %v11976_v5  ;;  %v2328_v47 = vadd.f32 %v16722_v58, %v16582_v46  ;;  %v16727_v46 = vld [vmem:[#allocation179_spill] sm:$0xff] }
 0x457   :  { %7029 = vmatpush1.bf16.msra.mxu1 %v4850_v56  ;;  %v11990_v13 = vmax.f32 %v2275_v21, 0.0  ;;  %v2334_v58 = vadd.f32 %v16727_v46, %v16633_v25 }
 0x458   :  { %v11954_v52 = vpop.permute.xlu1 %3966  ;;  %v11958_v26 = vpop.permute.xlu0 %5513  ;;  %16717 = vst [vmem:[#allocation281_spill] sm:$0xff] %v11970_v29  ;;  %v11996_v53 = vmax.f32 %v2328_v47, 0.0 }
 0x459   :  { %16711 = vst [vmem:[#allocation170_spill] sm:$0xff] %v11954_v52  ;;  %16713 = vst [vmem:[#allocation166_spill] sm:$0xff] %v11958_v26  ;;  %4014 = vrot.lane.b32.xlu1 %v11898_v43, %s8769_s29  ;;  %v12012_v47 = vmax.f32 %v2334_v58, 0.0 }
 0x45a   :  { %3040 = vrot.lane.b32.xlu0 %v11920_v40, %s8770_s30  ;;  %16724 = vst [vmem:[#allocation284_spill] sm:$0xff] %v11990_v13  ;;  %16725 = vst [vmem:[#allocation285_spill] sm:$0xff] %v11996_v53 }
 0x45b   :  { %16730 = vst [vmem:[#allocation288_spill] sm:$0xff] %v12012_v47 }
 0x45c   :  { %v11968_v41 = vpop.permute.xlu1 %3982  ;;  %v11972_v56 = vpop.permute.xlu0 %5988 }
 0x45d   :  { %16716 = vst [vmem:[#allocation171_spill] sm:$0xff] %v11968_v41  ;;  %16718 = vst [vmem:[#allocation282_spill] sm:$0xff] %v11972_v56  ;;  %2566 = vrot.lane.b32.xlu1 %v11962_v15, %s8768_s28 }
 0x45e   :  { %2572 = vrot.lane.b32.xlu0 %v11970_v29, %s8768_s28 }
 0x460   :  { %v11982_v18 = vpop.permute.xlu1 %2534  ;;  %v11986_v33 = vpop.permute.xlu0 %3485 }
 0x461   :  { %16721 = vst [vmem:[#allocation172_spill] sm:$0xff] %v11982_v18  ;;  %16723 = vst [vmem:[#allocation173_spill] sm:$0xff] %v11986_v33  ;;  %2582 = vrot.lane.b32.xlu1 %v11976_v5, %s8768_s28 }
 0x462   :  { %2588 = vrot.lane.b32.xlu0 %v11898_v43, %s8768_s28  ;;  %v16731_v43 = vld [vmem:[#allocation176_spill] sm:$0xff] }
 0x463   :  { %v2279_v46 = vadd.f32 %v16731_v43, %v16633_v25  ;;  %v16737_v43 = vld [vmem:[#allocation182_spill] sm:$0xff] }
 0x464   :  { %v11994_v17 = vpop.permute.xlu1 %2550  ;;  %v11998_v29 = vpop.permute.xlu0 %3501  ;;  %v2283_v57 = vadd.f32 %v16737_v43, %v16652_v0 }
 0x465   :  { %16726 = vst [vmem:[#allocation286_spill] sm:$0xff] %v11998_v29  ;;  %2574 = vrot.lane.b32.xlu1 %v11990_v13, %s8768_s28  ;;  %v12028_v58 = vmax.f32 %v2279_v46, 0.0  ;;  %v16740_v46 = vld [vmem:[#allocation178_spill] sm:$0xff]  ;;  %v16770_v29 = vld [vmem:[#allocation231_spill] sm:$0xff] }
 0x466   :  { %3066 = vrot.lane.b32.xlu0 %v11996_v53, %s8770_s30  ;;  %v2281_v16 = vadd.f32 %v16740_v46, %v16633_v25 }
 0x467   :  { %16734 = vst [vmem:[#allocation290_spill] sm:$0xff] %v12028_v58 }
 0x468   :  { %v12006_v21 = vpop.permute.xlu1 %3010  ;;  %v12008_v33 = vpop.permute.xlu0 %3960 }
 0x469   :  { %16728 = vst [vmem:[#allocation179_spill] sm:$0xff] %v12006_v21  ;;  %16729 = vst [vmem:[#allocation287_spill] sm:$0xff] %v12008_v33  ;;  %2590 = vrot.lane.b32.xlu1 %v11996_v53, %s8768_s28  ;;  %v16735_v21 = vld [vmem:[#allocation177_spill] sm:$0xff] }
 0x46a   :  { %3541 = vrot.lane.b32.xlu0 %v11996_v53, %s8767_s27  ;;  %v2332_v13 = vadd.f32 %v16735_v21, %v16633_v25  ;;  %v12050_v21 = vmax.f32 %v2283_v57, 0.0  ;;  %v16748_v57 = vld [vmem:[#allocation184_spill] sm:$0xff] }
 0x46b   :  { %v2285_v46 = vadd.f32 %v16748_v57, %v16652_v0 }
 0x46c   :  { %v12016_v18 = vpop.permute.xlu1 %3026  ;;  %v12020_v5 = vpop.permute.xlu0 %3976  ;;  %16742 = vst [vmem:[#allocation292_spill] sm:$0xff] %v12050_v21 }
 0x46d   :  { %16732 = vst [vmem:[#allocation176_spill] sm:$0xff] %v12020_v5  ;;  %3068 = vrot.lane.b32.xlu1 %v12012_v47, %s8770_s30  ;;  %v16743_v5 = vld [vmem:[#allocation183_spill] sm:$0xff] }
 0x46e   :  { %4016 = vrot.lane.b32.xlu0 %v11996_v53, %s8769_s29  ;;  %v12042_v53 = vmax.f32 %v2332_v13, 0.0  ;;  %v2336_v43 = vadd.f32 %v16743_v5, %v16652_v0  ;;  %v12058_v13 = vmax.f32 %v2281_v16, 0.0  ;;  %v12076_v16 = vmax.f32 %v2285_v46, 0.0 }
 0x470   :  { %v12026_v33 = vpop.permute.xlu1 %2542  ;;  %v12032_v61 = vpop.permute.xlu0 %3493  ;;  %16739 = vst [vmem:[#allocation291_spill] sm:$0xff] %v12042_v53  ;;  %16745 = vst [vmem:[#allocation293_spill] sm:$0xff] %v12058_v13  ;;  %v12064_v25 = vmax.f32 %v2336_v43, 0.0 }
 0x471   :  { %16733 = vst [vmem:[#allocation289_spill] sm:$0xff] %v12026_v33  ;;  %16736 = vst [vmem:[#allocation177_spill] sm:$0xff] %v12032_v61  ;;  %3543 = vrot.lane.b32.xlu1 %v12012_v47, %s8767_s27 }
 0x472   :  { %2568 = vrot.lane.b32.xlu0 %v12028_v58, %s8768_s28  ;;  %16747 = vst [vmem:[#allocation295_spill] sm:$0xff] %v12064_v25  ;;  %16751 = vst [vmem:[#allocation297_spill] sm:$0xff] %v12076_v16 }
 0x474   :  { %v12040_v52 = vpop.permute.xlu1 %2558  ;;  %v12046_v41 = vpop.permute.xlu0 %3509 }
 0x475   :  { %16738 = vst [vmem:[#allocation182_spill] sm:$0xff] %v12040_v52  ;;  %16741 = vst [vmem:[#allocation178_spill] sm:$0xff] %v12046_v41  ;;  %4018 = vrot.lane.b32.xlu1 %v12012_v47, %s8769_s29 }
 0x476   :  { %2584 = vrot.lane.b32.xlu0 %v12042_v53, %s8768_s28 }
 0x478   :  { %v12056_v23 = vpop.permute.xlu1 %3018  ;;  %v12060_v49 = vpop.permute.xlu0 %3968 }
 0x479   :  { %16744 = vst [vmem:[#allocation183_spill] sm:$0xff] %v12056_v23  ;;  %16746 = vst [vmem:[#allocation294_spill] sm:$0xff] %v12060_v49  ;;  %2570 = vrot.lane.b32.xlu1 %v12050_v21, %s8768_s28  ;;  %v16752_v49 = vld [vmem:[#allocation185_spill] sm:$0xff] }
 0x47a   :  { %2576 = vrot.lane.b32.xlu0 %v12058_v13, %s8768_s28  ;;  %v2338_v61 = vadd.f32 %v16752_v49, %v16652_v0 }
 0x47c   :  { %v12070_v5 = vpop.permute.xlu1 %3034  ;;  %v12072_v53 = vpop.permute.xlu0 %3984  ;;  %v12088_v13 = vmax.f32 %v2338_v61, 0.0 }
 0x47d   :  { %16749 = vst [vmem:[#allocation184_spill] sm:$0xff] %v12070_v5  ;;  %16750 = vst [vmem:[#allocation296_spill] sm:$0xff] %v12072_v53  ;;  %2586 = vrot.lane.b32.xlu1 %v12064_v25, %s8768_s28 }
 0x47e   :  { %2592 = vrot.lane.b32.xlu0 %v12012_v47, %s8768_s28  ;;  %16755 = vst [vmem:[#allocation299_spill] sm:$0xff] %v12088_v13 }
 0x480   :  { %v12082_v43 = vpop.permute.xlu1 %4565  ;;  %v12084_v57 = vpop.permute.xlu0 %2536 }
 0x481   :  { %16753 = vst [vmem:[#allocation185_spill] sm:$0xff] %v12082_v43  ;;  %16754 = vst [vmem:[#allocation298_spill] sm:$0xff] %v12084_v57  ;;  %2578 = vrot.lane.b32.xlu1 %v12076_v16, %s8768_s28  ;;  %v4656_v41 = vsel %vm4625_vm6, %v11496_v31, %v12082_v43 }
 0x482   :  { %3972 = vrot.lane.b32.xlu0 %v11854_v48, %s8769_s29  ;;  %v4819_v30 = vmul.f32 %v11906_v12, %v4656_v41 }
 0x484   :  { %v12092_v46 = vpop.permute.xlu1 %5040  ;;  %v12094_v25 = vpop.permute.xlu0 %2552 }
 0x485   :  { %16756 = vst [vmem:[#allocation300_spill] sm:$0xff] %v12092_v46  ;;  %2594 = vrot.lane.b32.xlu1 %v12088_v13, %s8768_s28 }
 0x486   :  { %3980 = vrot.lane.b32.xlu0 %v11813_v6, %s8769_s29 }
 0x488   :  { %v12100_v0 = vpop.permute.xlu1 %5515  ;;  %v12102_v49 = vpop.permute.xlu0 %3012 }
 0x489   :  { %16757 = vst [vmem:[#allocation301_spill] sm:$0xff] %v12100_v0  ;;  %16758 = vst [vmem:[#allocation302_spill] sm:$0xff] %v12102_v49  ;;  %3970 = vrot.lane.b32.xlu1 %v11651_v62, %s8769_s29 }
 0x48a   :  { %3988 = vrot.lane.b32.xlu0 %v11868_v51, %s8769_s29 }
 0x48c   :  { %v12108_v61 = vpop.permute.xlu1 %5990  ;;  %v12110_v57 = vpop.permute.xlu0 %3028 }
 0x48d   :  { %16759 = vst [vmem:[#allocation303_spill] sm:$0xff] %v12108_v61  ;;  %16760 = vst [vmem:[#allocation304_spill] sm:$0xff] %v12110_v57  ;;  %3978 = vrot.lane.b32.xlu1 %v11606_v8, %s8769_s29  ;;  %v16771_v57 = vld [vmem:[#allocation157_spill] sm:$0xff] }
 0x48e   :  { %3070 = vrot.lane.b32.xlu0 %v12088_v13, %s8770_s30 }
 0x490   :  { %v12116_v47 = vpop.permute.xlu1 %3487  ;;  %v12118_v16 = vpop.permute.xlu0 %2544 }
 0x491   :  { %16761 = vst [vmem:[#allocation305_spill] sm:$0xff] %v12116_v47  ;;  %16762 = vst [vmem:[#allocation306_spill] sm:$0xff] %v12118_v16  ;;  %3986 = vrot.lane.b32.xlu1 %v11682_v54, %s8769_s29 }
 0x492   :  { %4571 = vrot.lane.b32.xlu0 %v11549_v22, %s8771_s10 }
 0x494   :  { %v12124_v49 = vpop.permute.xlu1 %3503  ;;  %v12126_v53 = vpop.permute.xlu0 %2560 }
 0x495   :  { %16763 = vst [vmem:[#allocation307_spill] sm:$0xff] %v12124_v49  ;;  %16764 = vst [vmem:[#allocation308_spill] sm:$0xff] %v12126_v53  ;;  %4569 = vrot.lane.b32.xlu1 %v11234_v27, %s8771_s10 }
 0x496   :  { %3545 = vrot.lane.b32.xlu0 %v12088_v13, %s8767_s27 }
 0x498   :  { %v12132_v24 = vpop.permute.xlu1 %3962  ;;  %v12134_v47 = vpop.permute.xlu0 %3020 }
 0x499   :  { %16765 = vst [vmem:[#allocation309_spill] sm:$0xff] %v12132_v24  ;;  %16766 = vst [vmem:[#allocation310_spill] sm:$0xff] %v12134_v47  ;;  %4577 = vrot.lane.b32.xlu1 %v11200_v32, %s8771_s10  ;;  %v4661_v24 = vsel %vm4625_vm6, %v11506_v45, %v11608_v55  ;;  %v4660_v45 = vsel %vm4625_vm6, %v16771_v57, %v11496_v31  ;;  %v16775_v57 = vld [vmem:[#allocation213_spill] sm:$0xff] }
 0x49a   :  { %4579 = vrot.lane.b32.xlu0 %v11492_v19, %s8771_s10  ;;  %v5134_v23 = vsel %vm5100_vm7, %v16775_v57, %v16770_v29 }
 0x49c   :  { %v12140_v60 = vpop.permute.xlu1 %3495  ;;  %v12142_v49 = vpop.permute.xlu0 %3036 }
 0x49d   :  { %16767 = vst [vmem:[#allocation311_spill] sm:$0xff] %v12140_v60  ;;  %16768 = vst [vmem:[#allocation312_spill] sm:$0xff] %v12142_v49  ;;  %4585 = vrot.lane.b32.xlu1 %v11261_v20, %s8771_s10  ;;  %v5130_v60 = vsel %vm5100_vm7, %v16770_v29, %v11946_v50  ;;  %v16772_v49 = vld [vmem:[#allocation252_spill] sm:$0xff]  ;;  %v4834_v50 = vmul.f32 %v11914_v10, %v4661_v24 }
 0x49e   :  { %4020 = vrot.lane.b32.xlu0 %v12088_v13, %s8769_s29  ;;  %v5206_v13 = vrot.slane %v16772_v49, %v11430_v37 }
 0x4a0   :  { %v12152_v47 = vpop.permute.xlu1 %3511  ;;  %v12168_v39 = vpop.permute.xlu0 %4567  ;;  %v5278_v28 = vmul.f32 %v5206_v13, %v5130_v60 }
 0x4a1   :  { %16769 = vst [vmem:[#allocation313_spill] sm:$0xff] %v12152_v47  ;;  %16773 = vst [vmem:[#allocation231_spill] sm:$0xff] %v12168_v39  ;;  %4593 = vrot.lane.b32.xlu1 %v11920_v40, %s8771_s10  ;;  %v16774_v47 = vld [vmem:[#allocation216_spill] sm:$0xff]  ;;  %v4657_v31 = vsel %vm4625_vm6, %v11608_v55, %v12168_v39  ;;  %v4818_v55 = vmul.f32 %v11914_v10, %v4660_v45  ;;  %v16777_v39 = vld [vmem:[#allocation54_spill] sm:$0xff] }
 0x4a2   :  { %v5129_v43 = vsel %vm5100_vm7, %v16774_v47, %v11821_v63  ;;  %v4835_v24 = vmul.f32 %v11906_v12, %v4657_v31  ;;  %4587 = vrot.lane.b32.xlu0 %v11564_v38, %s8771_s10  ;;  %v5202_v63 = vrot.slane %v16772_v49, %v11504_v44  ;;  %v5133_v29 = vsel %vm5100_vm7, %v16777_v39, %v16774_v47  ;;  %v16779_v10 = vld [vmem:[#allocation261_spill] sm:$0xff] }
 0x4a3   :  { %v5262_v60 = vmul.f32 %v5206_v13, %v5129_v43  ;;  %v4866_v31 = vpack.c.bf16 %v4834_v50, %v4818_v55  ;;  %v5136_v47 = vsel %vm5100_vm7, %v16779_v10, %v11627_v2 }
 0x4a4   :  { %v12189_v16 = vpop.permute.xlu1 %2538  ;;  %v12198_v57 = vpop.permute.xlu0 %5042  ;;  %v4867_v12 = vpack.c.bf16 %v4835_v24, %v4819_v30  ;;  %v5277_v41 = vmul.f32 %v5202_v63, %v5134_v23  ;;  %v5261_v23 = vmul.f32 %v5202_v63, %v5133_v29  ;;  %v16780_v24 = vld [vmem:[#allocation235_spill] sm:$0xff]  ;;  %v5309_v29 = vmul.f32 %v5202_v63, %v5136_v47 }
 0x4a5   :  { %16776 = vst [vmem:[#allocation252_spill] sm:$0xff] %v12189_v16  ;;  %16778 = vst [vmem:[#allocation216_spill] sm:$0xff] %v12198_v57  ;;  %4573 = vrot.lane.b32.xlu1 %v11651_v62, %s8771_s10  ;;  %v5131_v16 = vsel %vm5100_vm7, %v11537_v14, %v12092_v46  ;;  %v5132_v45 = vsel %vm5100_vm7, %v11627_v2, %v12198_v57  ;;  %v5326_v30 = vpack.c.bf16 %v5278_v28, %v5262_v60  ;;  %v16781_v46 = vld [vmem:[#allocation139_spill] sm:$0xff]  ;;  %v16784_v60 = vld [vmem:[#allocation220_spill] sm:$0xff] }
 0x4a6   :  { %v5310_v43 = vmul.f32 %v5206_v13, %v5132_v45  ;;  %4595 = vrot.lane.b32.xlu0 %v11962_v15, %s8771_s10  ;;  %7030 = vmatprep.subr.bf16.mxu1 %v4867_v12  ;;  %v5605_v55 = vsel %vm5575_vm8, %v16780_v24, %v11958_v26  ;;  %v5135_v2 = vsel %vm5100_vm7, %v16781_v46, %v11537_v14  ;;  %v16782_v45 = vld [vmem:[#allocation58_spill] sm:$0xff]  ;;  %v16785_v26 = vld [vmem:[#allocation215_spill] sm:$0xff] }
 0x4a7   :  { %7031 = vmatpush1.bf16.msra.mxu1 %v4866_v31  ;;  %v5681_v57 = vrot.slane %v16782_v45, %v11430_v37  ;;  %v5294_v10 = vmul.f32 %v5206_v13, %v5131_v16  ;;  %v5325_v28 = vpack.c.bf16 %v5277_v41, %v5261_v23  ;;  %v5604_v31 = vsel %vm5575_vm8, %v16784_v60, %v11832_v9  ;;  %v16787_v23 = vld [vmem:[#allocation199_spill] sm:$0xff] }
 0x4a8   :  { %v12216_v50 = vpop.permute.xlu1 %2554  ;;  %7032 = vmatprep.subr.bf16.mxu1 %v5326_v30  ;;  %v12228_v12 = vpop.permute.xlu0 %5517  ;;  %v5609_v14 = vsel %vm5575_vm8, %v16785_v26, %v16780_v24  ;;  %v5677_v41 = vrot.slane %v16782_v45, %v11504_v44  ;;  %v5293_v47 = vmul.f32 %v5202_v63, %v5135_v2  ;;  %v5608_v24 = vsel %vm5575_vm8, %v16787_v23, %v16784_v60 }
 0x4a9   :  { %16783 = vst [vmem:[#allocation235_spill] sm:$0xff] %v12228_v12  ;;  %4581 = vrot.lane.b32.xlu1 %v11606_v8, %s8771_s10  ;;  %v5753_v46 = vmul.f32 %v5681_v57, %v5605_v55  ;;  %v5342_v16 = vpack.c.bf16 %v5310_v43, %v5294_v10  ;;  %v5607_v30 = vsel %vm5575_vm8, %v11687_v4, %v12228_v12  ;;  %v16789_v43 = vld [vmem:[#allocation265_spill] sm:$0xff] }
 0x4aa   :  { %4575 = vrot.lane.b32.xlu0 %v11854_v48, %s8771_s10  ;;  %v5737_v55 = vmul.f32 %v5681_v57, %v5604_v31  ;;  %v5752_v10 = vmul.f32 %v5677_v41, %v5609_v14  ;;  %v5341_v63 = vpack.c.bf16 %v5309_v29, %v5293_v47  ;;  %v5606_v2 = vsel %vm5575_vm8, %v16789_v43, %v12100_v0  ;;  %v16791_v29 = vld [vmem:[#allocation239_spill] sm:$0xff] }
 0x4ab   :  { %7033 = vmatpush1.bf16.msra.mxu1 %v5325_v28  ;;  %v16790_v28 = vld [vmem:[#allocation262_spill] sm:$0xff]  ;;  %v5785_v60 = vmul.f32 %v5681_v57, %v5607_v30  ;;  %v6080_v14 = vsel %vm6050_vm9, %v16791_v29, %v11972_v56  ;;  %v16792_v47 = vld [vmem:[#allocation143_spill] sm:$0xff]  ;;  %v16796_v56 = vld [vmem:[#allocation217_spill] sm:$0xff] }
 0x4ac   :  { %v12242_v13 = vpop.permute.xlu1 %3014  ;;  %7034 = vmatprep.subr.bf16.mxu1 %v5342_v16  ;;  %v12254_v9 = vpop.permute.xlu0 %5992  ;;  %v5611_v12 = vsel %vm5575_vm8, %v16790_v28, %v11687_v4  ;;  %v5801_v16 = vpack.c.bf16 %v5753_v46, %v5737_v55  ;;  %v5610_v0 = vsel %vm5575_vm8, %v16792_v47, %v16789_v43  ;;  %v16793_v4 = vld [vmem:[#allocation62_spill] sm:$0xff]  ;;  %v5769_v28 = vmul.f32 %v5681_v57, %v5606_v2 }
 0x4ad   :  { %16786 = vst [vmem:[#allocation58_spill] sm:$0xff] %v12242_v13  ;;  %16788 = vst [vmem:[#allocation220_spill] sm:$0xff] %v12254_v9  ;;  %4589 = vrot.lane.b32.xlu1 %v11682_v54, %s8771_s10  ;;  %v5736_v13 = vmul.f32 %v5677_v41, %v5608_v24  ;;  %v6156_v30 = vrot.slane %v16793_v4, %v11430_v37  ;;  %v5784_v24 = vmul.f32 %v5677_v41, %v5611_v12  ;;  %v16795_v55 = vld [vmem:[#allocation14_spill] sm:$0xff] }
 0x4ae   :  { %4583 = vrot.lane.b32.xlu0 %v11813_v6, %s8771_s10  ;;  %v6084_v43 = vsel %vm6050_vm9, %v16796_v56, %v16791_v29  ;;  %v8470_v57 = vld [vmem:[%s15676_s2 + $0x40] ss:$8 sm:$0xf]  ;;  %v6082_v29 = vsel %vm6050_vm9, %v11776_v42, %v12254_v9 }
 0x4af   :  { %7035 = vmatpush1.bf16.msra.mxu1 %v5341_v63  ;;  %v5800_v46 = vpack.c.bf16 %v5752_v10, %v5736_v13  ;;  %v6079_v63 = vsel %vm6050_vm9, %v16795_v55, %v11844_v34  ;;  %v8471_v2 = vld [vmem:[%s15676_s2 + $0x40] ss:$8 sm:$0xf0]  ;;  %v6228_v13 = vmul.f32 %v6156_v30, %v6080_v14  ;;  %v5817_v10 = vpack.c.bf16 %v5785_v60, %v5769_v28 }
 0x4b0   :  { %v12268_v31 = vpop.permute.xlu1 %3030  ;;  %7036 = vmatprep.subr.bf16.mxu1 %v5801_v16  ;;  %v12280_v26 = vpop.permute.xlu0 %3489  ;;  %v6152_v16 = vrot.slane %v16793_v4, %v11504_v44  ;;  %v5768_v34 = vmul.f32 %v5677_v41, %v5610_v0  ;;  %v6212_v37 = vmul.f32 %v6156_v30, %v6079_v63  ;;  %v12316_v41 = vor.u32 %v8471_v2, %v8470_v57 }
 0x4b1   :  { %16794 = vst [vmem:[#allocation265_spill] sm:$0xff] %v12280_v26  ;;  %4597 = vrot.lane.b32.xlu1 %v12028_v58, %s8771_s10  ;;  %v16798_v26 = vld [vmem:[#allocation16_spill] sm:$0xff]  ;;  %v6081_v60 = vsel %vm6050_vm9, %v11764_v3, %v12108_v61  ;;  %v6260_v63 = vmul.f32 %v6156_v30, %v6082_v29  ;;  %v2616_v57 = vsel %vm2598_vm2, %v11994_v17, %v12040_v52  ;;  %v16830_v61 = vld [vmem:[#allocation286_spill] sm:$0xff] }
 0x4b2   :  { %4591 = vrot.lane.b32.xlu0 %v11868_v51, %s8771_s10  ;;  %v6083_v14 = vsel %vm6050_vm9, %v16798_v26, %v16795_v55  ;;  %v6227_v28 = vmul.f32 %v6152_v16, %v6084_v43  ;;  %v5816_v0 = vpack.c.bf16 %v5784_v24, %v5768_v34  ;;  %16799 = vst [vmem:[#allocation62_spill] sm:$0xff] %v12316_v41  ;;  %v16819_v52 = vld [vmem:[#allocation156_spill] sm:$0xff] }
 0x4b3   :  { %7037 = vmatpush1.bf16.msra.mxu1 %v5800_v46  ;;  %v6085_v46 = vsel %vm6050_vm9, %v11736_v59, %v11764_v3  ;;  %v6086_v55 = vsel %vm6050_vm9, %v11748_v35, %v11776_v42  ;;  %v6276_v24 = vpack.c.bf16 %v6228_v13, %v6212_v37  ;;  %v6211_v43 = vmul.f32 %v6152_v16, %v6083_v14  ;;  %v16801_v3 = vld [vmem:[#allocation80_spill] sm:$0xff]  ;;  %v16856_v35 = vld [vmem:[#allocation211_spill] sm:$0xff] }
 0x4b4   :  { %v12300_v12 = vpop.permute.xlu1 %2546  ;;  %7038 = vmatprep.subr.bf16.mxu1 %v5817_v10  ;;  %v12312_v47 = vpop.permute.xlu0 %3505  ;;  %v2719_v2 = vrot.slane %v12316_v41, %v16801_v3  ;;  %v6244_v10 = vmul.f32 %v6156_v30, %v6081_v60  ;;  %v6243_v44 = vmul.f32 %v6152_v16, %v6085_v46  ;;  %v6259_v37 = vmul.f32 %v6152_v16, %v6086_v55 }
 0x4b5   :  { %16797 = vst [vmem:[#allocation239_spill] sm:$0xff] %v12300_v12  ;;  %5044 = vrot.lane.b32.xlu1 %v11234_v27, %s8772_s11  ;;  %v6275_v29 = vpack.c.bf16 %v6227_v28, %v6211_v43  ;;  %v2615_v13 = vsel %vm2598_vm2, %v11825_v36, %v11874_v7 }
 0x4b6   :  { %4599 = vrot.lane.b32.xlu0 %v12050_v21, %s8771_s10  ;;  %v2779_v14 = vmul.f32 %v2719_v2, %v2616_v57  ;;  %v6292_v60 = vpack.c.bf16 %v6260_v63, %v6244_v10  ;;  %v2763_v28 = vmul.f32 %v2719_v2, %v2615_v13  ;;  %v6291_v46 = vpack.c.bf16 %v6259_v37, %v6243_v44  ;;  %v16809_v44 = vld [vmem:[#allocation257_spill] sm:$0xff] }
 0x4b7   :  { %7039 = vmatpush1.bf16.msra.mxu1 %v5816_v0  ;;  %v16803_v0 = vld [vmem:[#allocation254_spill] sm:$0xff]  ;;  %v2620_v57 = vsel %vm2598_vm2, %v12026_v33, %v11994_v17  ;;  %v16811_v13 = vld [vmem:[#allocation81_spill] sm:$0xff] }
 0x4b8   :  { %v12332_v34 = vpop.permute.xlu1 %2562  ;;  %7061 = vmatprep.subr.bf16.mxu1 %v6276_v24  ;;  %v12340_v42 = vpop.permute.xlu0 %3964  ;;  %v16805_v24 = vld [vmem:[#allocation255_spill] sm:$0xff]  ;;  %v2827_v43 = vpack.c.bf16 %v2779_v14, %v2763_v28  ;;  %v2715_v14 = vrot.slane %v12316_v41, %v16811_v13 }
 0x4b9   :  { %16800 = vst [vmem:[#allocation14_spill] sm:$0xff] %v12332_v34  ;;  %16802 = vst [vmem:[#allocation80_spill] sm:$0xff] %v12340_v42  ;;  %5052 = vrot.lane.b32.xlu1 %v11200_v32, %s8772_s11  ;;  %v8475_v37 = vld [vmem:[%s15676_s2 + $0x41] ss:$8 sm:$0xf0]  ;;  %v2618_v17 = vsel %vm2598_vm2, %v12216_v50, %v12332_v34 }
 0x4ba   :  { %5046 = vrot.lane.b32.xlu0 %v11549_v22, %s8772_s11  ;;  %7041 = vmatmul.mubr.bf16.vlgmr.msra.gmra.mrb[48].mxu1 %v16803_v0  ;;  %v16812_v0 = vmov 0   ;;  %v2778_v28 = vmul.f32 %v2715_v14, %v2620_v57  ;;  %v2811_v34 = vmul.f32 %v2719_v2, %v2618_v17  ;;  %v3090_v57 = vsel %vm3072_vm3, %v12016_v18, %v12070_v5 }
 0x4bb   :  { %7062 = vmatpush1.bf16.msra.mxu1 %v6275_v29  ;;  %7050 = vmatprep.mubr.bf16.mxu1 %v16805_v24  ;;  %v8474_v29 = vld [vmem:[%s15676_s2 + $0x41] ss:$8 sm:$0xf] }
 0x4bc   :  { %v12351_v30 = vpop.permute.xlu1 %3022  ;;  %7063 = vmatprep.subr.bf16.mxu1 %v6292_v60  ;;  %v12354_v16 = vpop.permute.xlu0 %3497  ;;  %v2619_v60 = vsel %vm2598_vm2, %v11864_v11, %v11825_v36  ;;  %v16851_v11 = vld [vmem:[#allocation176_spill] sm:$0xff] }
 0x4bd   :  { %16804 = vst [vmem:[#allocation254_spill] sm:$0xff] %v12351_v30  ;;  %16806 = vst [vmem:[#allocation255_spill] sm:$0xff] %v12354_v16  ;;  %5060 = vrot.lane.b32.xlu1 %v11261_v20, %s8772_s11  ;;  %v2762_v7 = vmul.f32 %v2715_v14, %v2619_v60  ;;  %v16818_v60 = vld [vmem:[#allocation17_spill] sm:$0xff] }
 0x4be   :  { %5054 = vrot.lane.b32.xlu0 %v11492_v19, %s8772_s11 }
 0x4bf   :  { %7064 = vmatpush1.bf16.msra.mxu1 %v6291_v46  ;;  %v2617_v46 = vsel %vm2598_vm2, %v12094_v25, %v12126_v53  ;;  %v2826_v5 = vpack.c.bf16 %v2778_v28, %v2762_v7  ;;  %v8478_v7 = vld [vmem:[%s15676_s2 + $0x42] ss:$8 sm:$0xf] }
 0x4c0   :  { %v12360_v55 = vpop.permute.xlu1 %3038  ;;  %7220 = vmatprep.subr.bf16.mxu1 %v2827_v43  ;;  %v12362_v63 = vpop.permute.xlu0 %3513  ;;  %v12400_v43 = vor.u32 %v8475_v37, %v8474_v29  ;;  %v16816_v37 = vld [vmem:[#allocation306_spill] sm:$0xff]  ;;  %v2795_v17 = vmul.f32 %v2719_v2, %v2617_v46 }
 0x4c1   :  { %16807 = vst [vmem:[#allocation314_spill] sm:$0xff] %v12360_v55  ;;  %16808 = vst [vmem:[#allocation315_spill] sm:$0xff] %v12362_v63  ;;  %5068 = vrot.lane.b32.xlu1 %v11920_v40, %s8772_s11  ;;  %v8479_v28 = vld [vmem:[%s15676_s2 + $0x42] ss:$8 sm:$0xf0] }
 0x4c2   :  { %5062 = vrot.lane.b32.xlu0 %v11564_v38, %s8772_s11  ;;  %7051 = vmatmul.mubr.bf16.gmra.mrb[52].mxu1 %v16809_v44  ;;  %16814 = vst [vmem:[#allocation316_spill] sm:$0xff] %v12400_v43  ;;  %v2622_v44 = vsel %vm2598_vm2, %v12300_v12, %v12216_v50  ;;  %v3194_v29 = vrot.slane %v12400_v43, %v16801_v3  ;;  %v16820_v12 = vld [vmem:[#allocation183_spill] sm:$0xff] }
 0x4c3   :  { %7093 = vmatprep.mubr.bf16.mxu1 %v16812_v0  ;;  %v2621_v50 = vsel %vm2598_vm2, %v16816_v37, %v12094_v25  ;;  %v2810_v42 = vmul.f32 %v2715_v14, %v2622_v44  ;;  %v3094_v9 = vsel %vm3072_vm3, %v16820_v12, %v12016_v18  ;;  %v16821_v25 = vld [vmem:[#allocation122_spill] sm:$0xff]  ;;  %v2843_v2 = vpack.c.bf16 %v2811_v34, %v2795_v17  ;;  %v16823_v34 = vld [vmem:[#allocation196_spill] sm:$0xff] }
 0x4c4   :  { %v12373_v10 = vpop.permute.xlu1 %3064  ;;  %v12392_v24 = vpop.permute.xlu0 %2564  ;;  %v3254_v33 = vmul.f32 %v3194_v29, %v3090_v57  ;;  %v3190_v18 = vrot.slane %v12400_v43, %v16811_v13  ;;  %v2794_v44 = vmul.f32 %v2715_v14, %v2621_v50  ;;  %v3092_v57 = vsel %vm3072_vm3, %v12268_v31, %v12360_v55  ;;  %v16825_v50 = vld [vmem:[#allocation312_spill] sm:$0xff]  ;;  %v16829_v12 = vld [vmem:[#allocation178_spill] sm:$0xff] }
 0x4c5   :  { %16810 = vst [vmem:[#allocation257_spill] sm:$0xff] %v12373_v10  ;;  %16813 = vst [vmem:[#allocation81_spill] sm:$0xff] %v12392_v24  ;;  %5048 = vrot.lane.b32.xlu1 %v11651_v62, %s8772_s11  ;;  %v3089_v24 = vsel %vm3072_vm3, %v16819_v52, %v16818_v60  ;;  %v3093_v17 = vsel %vm3072_vm3, %v16823_v34, %v16819_v52  ;;  %v12463_v37 = vor.u32 %v8479_v28, %v8478_v7  ;;  %v16831_v28 = vld [vmem:[#allocation310_spill] sm:$0xff] }
 0x4c6   :  { %5070 = vrot.lane.b32.xlu0 %v11962_v15, %s8772_s11  ;;  %v3253_v14 = vmul.f32 %v3190_v18, %v3094_v9  ;;  %v2842_v55 = vpack.c.bf16 %v2810_v42, %v2794_v44  ;;  %v3096_v52 = vsel %vm3072_vm3, %v12351_v30, %v12268_v31  ;;  %v3237_v9 = vmul.f32 %v3190_v18, %v3093_v17  ;;  %v16834_v17 = vld [vmem:[#allocation72_spill] sm:$0xff]  ;;  %v16846_v34 = vld [vmem:[#allocation90_spill] sm:$0xff] }
 0x4c7   :  { %v3565_v42 = vsel %vm3547_vm4, %v16830_v61, %v16829_v12  ;;  %v3669_v7 = vrot.slane %v12463_v37, %v16801_v3  ;;  %v8482_v12 = vld [vmem:[%s15676_s2 + $0x43] ss:$8 sm:$0xf] }
 0x4c8   :  { %v12408_v36 = vpop.permute.xlu1 %3539  ;;  %v12420_v53 = vpop.permute.xlu0 %2580 }
 0x4c9   :  { %16815 = vst [vmem:[#allocation317_spill] sm:$0xff] %v12408_v36  ;;  %16817 = vst [vmem:[#allocation318_spill] sm:$0xff] %v12420_v53  ;;  %5056 = vrot.lane.b32.xlu1 %v11606_v8, %s8772_s11  ;;  %v16826_v53 = vld [vmem:[#allocation304_spill] sm:$0xff] }
 0x4ca   :  { %5050 = vrot.lane.b32.xlu0 %v11854_v48, %s8772_s11  ;;  %8512 = vmatmul.mubr.msk.bf16.vlgmr.msra.gmra.mrb[48].mxu1 %vm6683_vm10, %v16821_v25  ;;  %v3238_v25 = vmul.f32 %v3194_v29, %v3089_v24  ;;  %16827 = vst [vmem:[#allocation304_spill] sm:$0xff] %v12463_v37  ;;  %v3286_v24 = vmul.f32 %v3194_v29, %v3092_v57  ;;  %v16833_v57 = vld [vmem:[#allocation164_spill] sm:$0xff] }
 0x4cb   :  { %7221 = vmatpush1.bf16.msra.mxu1 %v2826_v5  ;;  %7103 = vmatprep.mubr.bf16.mxu1 %v16812_v0  ;;  %v3091_v5 = vsel %vm3072_vm3, %v16826_v53, %v16825_v50  ;;  %v3095_v31 = vsel %vm3072_vm3, %v16831_v28, %v16826_v53  ;;  %v8483_v53 = vld [vmem:[%s15676_s2 + $0x43] ss:$8 sm:$0xf0]  ;;  %v3567_v28 = vsel %vm3547_vm4, %v12312_v47, %v12362_v63 }
 0x4cc   :  { %v12436_v46 = vpop.permute.xlu1 %4014  ;;  %7222 = vmatprep.subr.bf16.mxu1 %v2843_v2  ;;  %v12455_v60 = vpop.permute.xlu0 %3040  ;;  %v3302_v2 = vpack.c.bf16 %v3254_v33, %v3238_v25  ;;  %v3270_v44 = vmul.f32 %v3194_v29, %v3091_v5  ;;  %v3301_v25 = vpack.c.bf16 %v3253_v14, %v3237_v9  ;;  %v16835_v29 = vld [vmem:[#allocation177_spill] sm:$0xff]  ;;  %v3665_v9 = vrot.slane %v12463_v37, %v16811_v13  ;;  %v16857_v37 = vld [vmem:[#allocation22_spill] sm:$0xff] }
 0x4cd   :  { %16822 = vst [vmem:[#allocation156_spill] sm:$0xff] %v12436_v46  ;;  %16824 = vst [vmem:[#allocation122_spill] sm:$0xff] %v12455_v60  ;;  %5064 = vrot.lane.b32.xlu1 %v11682_v54, %s8772_s11  ;;  %v3569_v5 = vsel %vm3547_vm4, %v16835_v29, %v16830_v61  ;;  %v3269_v30 = vmul.f32 %v3190_v18, %v3095_v31  ;;  %v8752_v61 = vld [vmem:[%s15677_s5 + $0x4] ss:$12 sps:$4 sm:$0xff]   ;;  %v16843_v50 = vld [vmem:[#allocation313_spill] sm:$0xff] }
 0x4ce   :  { %5058 = vrot.lane.b32.xlu0 %v11813_v6, %s8772_s11  ;;  %v3728_v63 = vmul.f32 %v3665_v9, %v3569_v5  ;;  %v16845_v29 = vld [vmem:[#allocation95_spill] sm:$0xff]  ;;  %v16848_v5 = vld [vmem:[#allocation161_spill] sm:$0xff] }
 0x4cf   :  { %7223 = vmatpush1.bf16.msra.mxu1 %v2842_v55  ;;  %v3564_v55 = vsel %vm3547_vm4, %v16834_v17, %v16833_v57  ;;  %v3318_v57 = vpack.c.bf16 %v3286_v24, %v3270_v44  ;;  %v16838_v24 = vld [vmem:[#allocation73_spill] sm:$0xff]  ;;  %v16840_v44 = vld [vmem:[#allocation163_spill] sm:$0xff] }
 0x4d0   :  { %v12471_v60 = vpop.permute.xlu1 %2566  ;;  %7224 = vmatprep.subr.bf16.mxu1 %v3302_v2  ;;  %v12483_v33 = vpop.permute.xlu0 %2572  ;;  %v3729_v2 = vmul.f32 %v3669_v7, %v3565_v42  ;;  %v12517_v42 = vsub.s32 0, %v16838_v24 }
 0x4d1   :  { %16828 = vst [vmem:[#allocation319_spill] sm:$0xff] %v12471_v60  ;;  %16832 = vst [vmem:[#allocation286_spill] sm:$0xff] %v12483_v33  ;;  %5072 = vrot.lane.b32.xlu1 %v12028_v58, %s8772_s11  ;;  %v3285_v60 = vmul.f32 %v3190_v18, %v3096_v52  ;;  %v16837_v52 = vld [vmem:[#allocation69_spill] sm:$0xff]  ;;  %v3713_v18 = vmul.f32 %v3669_v7, %v3564_v55  ;;  %v3761_v55 = vmul.f32 %v3669_v7, %v3567_v28  ;;  %v16852_v28 = vld [vmem:[#allocation311_spill] sm:$0xff] }
 0x4d2   :  { %5066 = vrot.lane.b32.xlu0 %v11868_v51, %s8772_s11  ;;  %8513 = vmatmul.mubr.msk.bf16.gmra.mrb[52].mxu1 %vm6683_vm10, %v16837_v52  ;;  %16839 = vst [vmem:[#allocation69_spill] sm:$0xff] %v12517_v42  ;;  %v3568_v52 = vsel %vm3547_vm4, %v16840_v44, %v16834_v17  ;;  %v2657_v17 = vsel %vm2598_vm2, %v16846_v34, %v16845_v29  ;;  %v16850_v44 = vld [vmem:[#allocation296_spill] sm:$0xff] }
 0x4d3   :  { %7225 = vmatpush1.bf16.msra.mxu1 %v3301_v25  ;;  %7252 = vmatprep.mubr.bf16.mxu1 %v8752_v61  ;;  %v12527_v25 = vor.u32 %v8483_v53, %v8482_v12  ;;  %v16844_v61 = vld [vmem:[#allocation307_spill] sm:$0xff]  ;;  %v3777_v12 = vpack.c.bf16 %v3729_v2, %v3713_v18 }
 0x4d4   :  { %v12503_v14 = vpop.permute.xlu1 %2582  ;;  %7226 = vmatprep.subr.bf16.mxu1 %v3318_v57  ;;  %v12523_v31 = vpop.permute.xlu0 %2588  ;;  %v3566_v33 = vsel %vm3547_vm4, %v16844_v61, %v16843_v50  ;;  %v3571_v57 = vsel %vm3547_vm4, %v12354_v16, %v12312_v47  ;;  %v16849_v50 = vld [vmem:[#allocation154_spill] sm:$0xff]  ;;  %v4040_v47 = vsel %vm4022_vm5, %v16851_v11, %v16850_v44  ;;  %v3570_v2 = vsel %vm3547_vm4, %v16852_v28, %v16844_v61  ;;  %v16853_v16 = vld [vmem:[#allocation76_spill] sm:$0xff] }
 0x4d5   :  { %16836 = vst [vmem:[#allocation72_spill] sm:$0xff] %v12503_v14  ;;  %16841 = vst [vmem:[#allocation73_spill] sm:$0xff] %v12523_v31  ;;  %5519 = vrot.lane.b32.xlu1 %v11234_v27, %s8773_s12  ;;  %v3317_v14 = vpack.c.bf16 %v3285_v60, %v3269_v30  ;;  %v2658_v30 = vsel %vm2598_vm2, %v16849_v50, %v16848_v5  ;;  %v3712_v60 = vmul.f32 %v3665_v9, %v3568_v52 }
 0x4d6   :  { %16842 = vst [vmem:[#allocation320_spill] sm:$0xff] %v12527_v25  ;;  %5074 = vrot.lane.b32.xlu0 %v12050_v21, %s8772_s11  ;;  %v12551_v29 = vrot.slane %v12527_v25, %v16801_v3  ;;  %v3745_v18 = vmul.f32 %v3669_v7, %v3566_v33  ;;  %v12563_v5 = vrot.slane %v16853_v16, %v12517_v42  ;;  %v16858_v33 = vld [vmem:[#allocation79_spill] sm:$0xff] }
 0x4d7   :  { %7227 = vmatpush1.bf16.msra.mxu1 %v3317_v14  ;;  %v3776_v44 = vpack.c.bf16 %v3728_v63, %v3712_v60  ;;  %v3760_v59 = vmul.f32 %v3665_v9, %v3571_v57  ;;  %v2659_v7 = vsel %vm2598_vm2, %v12523_v31, %v16857_v37  ;;  %v2801_v61 = vmul.f32 %v16858_v33, %v2658_v30  ;;  %v16861_v37 = vld [vmem:[#allocation170_spill] sm:$0xff] }
 0x4d8   :  { %v12543_v53 = vpop.permute.xlu1 %2574  ;;  %7228 = vmatprep.subr.bf16.mxu1 %v3777_v12  ;;  %v12565_v52 = vpop.permute.xlu0 %3066  ;;  %v16859_v12 = vld [vmem:[#allocation294_spill] sm:$0xff]  ;;  %v4204_v43 = vmul.f32 %v12551_v29, %v4040_v47  ;;  %v12589_v57 = vrot.slane %v12527_v25, %v16811_v13  ;;  %v4043_v30 = vsel %vm4022_vm5, %v16861_v37, %v16856_v35  ;;  %v3744_v60 = vmul.f32 %v3665_v9, %v3570_v2 }
 0x4d9   :  { %16847 = vst [vmem:[#allocation307_spill] sm:$0xff] %v12543_v53  ;;  %16854 = vst [vmem:[#allocation95_spill] sm:$0xff] %v12565_v52  ;;  %5527 = vrot.lane.b32.xlu1 %v11200_v32, %s8773_s12  ;;  %v16855_v53 = vld [vmem:[#allocation171_spill] sm:$0xff]  ;;  %v4044_v28 = vsel %vm4022_vm5, %v16859_v12, %v16851_v11  ;;  %v16862_v11 = vld [vmem:[#allocation70_spill] sm:$0xff] }
 0x4da   :  { %v4039_v14 = vsel %vm4022_vm5, %v16856_v35, %v16855_v53  ;;  %5521 = vrot.lane.b32.xlu0 %v11549_v22, %s8773_s12  ;;  %v3793_v53 = vpack.c.bf16 %v3761_v55, %v3745_v18  ;;  %v2752_v18 = vmul.f32 %v12563_v5, %v2659_v7  ;;  %v4203_v35 = vmul.f32 %v12589_v57, %v4044_v28 }
 0x4db   :  { %7229 = vmatpush1.bf16.msra.mxu1 %v3776_v44  ;;  %v4188_v55 = vmul.f32 %v12551_v29, %v4039_v14  ;;  %v3792_v9 = vpack.c.bf16 %v3760_v59, %v3744_v60  ;;  %v2785_v44 = vmul.f32 %v16858_v33, %v2657_v17 }
 0x4dc   :  { %v12585_v63 = vpop.permute.xlu1 %2590  ;;  %7230 = vmatprep.subr.bf16.mxu1 %v3793_v53  ;;  %v12602_v31 = vpop.permute.xlu0 %3541  ;;  %v4187_v53 = vmul.f32 %v12589_v57, %v4043_v30 }
 0x4dd   :  { %16860 = vst [vmem:[#allocation90_spill] sm:$0xff] %v12585_v63  ;;  %v2660_v47 = vsel %vm2598_vm2, %v12585_v63, %v16862_v11  ;;  %16863 = vst [vmem:[#allocation161_spill] sm:$0xff] %v12602_v31  ;;  %5535 = vrot.lane.b32.xlu1 %v11261_v20, %s8773_s12  ;;  %v4252_v14 = vpack.c.bf16 %v4204_v43, %v4188_v55  ;;  %v2833_v28 = vpack.c.bf16 %v2801_v61, %v2785_v44 }
 0x4de   :  { %v2768_v12 = vmul.f32 %v12563_v5, %v2660_v47  ;;  %5529 = vrot.lane.b32.xlu0 %v11492_v19, %s8773_s12  ;;  %v4251_v59 = vpack.c.bf16 %v4203_v35, %v4187_v53  ;;  %v16876_v35 = vld [vmem:[#allocation74_spill] sm:$0xff] }
 0x4df   :  { %7231 = vmatpush1.bf16.msra.mxu1 %v3792_v9 }
 0x4e0   :  { %v2816_v2 = vpack.c.bf16 %v2768_v12, %v2752_v18  ;;  %v12610_v11 = vpop.permute.xlu1 %3068  ;;  %7232 = vmatprep.subr.bf16.mxu1 %v4252_v14  ;;  %v12613_v7 = vpop.permute.xlu0 %4016  ;;  %v16875_v18 = vld [vmem:[#allocation85_spill] sm:$0xff] }
 0x4e1   :  { %16864 = vst [vmem:[#allocation154_spill] sm:$0xff] %v12610_v11  ;;  %16865 = vst [vmem:[#allocation176_spill] sm:$0xff] %v12613_v7  ;;  %5543 = vrot.lane.b32.xlu1 %v11920_v40, %s8773_s12  ;;  %v3130_v9 = vsel %vm3072_vm3, %v16876_v35, %v16875_v18  ;;  %v16879_v14 = vld [vmem:[#allocation165_spill] sm:$0xff] }
 0x4e2   :  { %6691 = vmatpush1.bf16.msra.mxu0 %v2816_v2  ;;  %5537 = vrot.lane.b32.xlu0 %v11564_v38, %s8773_s12  ;;  %v16878_v2 = vld [vmem:[#allocation77_spill] sm:$0xff] }
 0x4e3   :  { %6692 = vmatprep.subr.bf16.mxu0 %v2833_v28  ;;  %7233 = vmatpush1.bf16.msra.mxu1 %v4251_v59  ;;  %v3154_v53 = vrot.slane %v16879_v14, %v16878_v2  ;;  %v16880_v59 = vld [vmem:[#allocation31_spill] sm:$0xff] }
 0x4e4   :  { %v12619_v17 = vpop.permute.xlu1 %3543  ;;  %v12621_v43 = vpop.permute.xlu0 %2568 }
 0x4e5   :  { %16866 = vst [vmem:[#allocation76_spill] sm:$0xff] %v12619_v17  ;;  %16867 = vst [vmem:[#allocation211_spill] sm:$0xff] %v12621_v43  ;;  %5523 = vrot.lane.b32.xlu1 %v11651_v62, %s8773_s12  ;;  %v16881_v43 = vld [vmem:[#allocation24_spill] sm:$0xff] }
 0x4e6   :  { %5545 = vrot.lane.b32.xlu0 %v11962_v15, %s8773_s12 }
 0x4e8   :  { %v12627_v33 = vpop.permute.xlu1 %4018  ;;  %v12629_v61 = vpop.permute.xlu0 %2584 }
 0x4e9   :  { %16868 = vst [vmem:[#allocation22_spill] sm:$0xff] %v12627_v33  ;;  %16869 = vst [vmem:[#allocation79_spill] sm:$0xff] %v12629_v61  ;;  %5531 = vrot.lane.b32.xlu1 %v11606_v8, %s8773_s12  ;;  %v16883_v61 = vld [vmem:[#allocation174_spill] sm:$0xff] }
 0x4ea   :  { %5525 = vrot.lane.b32.xlu0 %v11854_v48, %s8773_s12 }
 0x4ec   :  { %v12635_v12 = vpop.permute.xlu1 %2570  ;;  %v12637_v30 = vpop.permute.xlu0 %2576 }
 0x4ed   :  { %16870 = vst [vmem:[#allocation70_spill] sm:$0xff] %v12635_v12  ;;  %16871 = vst [vmem:[#allocation321_spill] sm:$0xff] %v12637_v30  ;;  %5539 = vrot.lane.b32.xlu1 %v11682_v54, %s8773_s12  ;;  %v3129_v12 = vsel %vm3072_vm3, %v16881_v43, %v16880_v59  ;;  %v3244_v30 = vmul.f32 %v3154_v53, %v3130_v9 }
 0x4ee   :  { %5533 = vrot.lane.b32.xlu0 %v11813_v6, %s8773_s12 }
 0x4f0   :  { %v12643_v60 = vpop.permute.xlu1 %2586  ;;  %v12645_v47 = vpop.permute.xlu0 %2592 }
 0x4f1   :  { %16872 = vst [vmem:[#allocation322_spill] sm:$0xff] %v12643_v60  ;;  %16873 = vst [vmem:[#allocation323_spill] sm:$0xff] %v12645_v47  ;;  %5547 = vrot.lane.b32.xlu1 %v12028_v58, %s8773_s12  ;;  %v2661_v28 = vsel %vm2598_vm2, %v12645_v47, %v16846_v34  ;;  %v16884_v47 = vld [vmem:[#allocation158_spill] sm:$0xff]  ;;  %v3150_v60 = vrot.slane %v16879_v14, %v12517_v42 }
 0x4f2   :  { %5541 = vrot.lane.b32.xlu0 %v11868_v51, %s8773_s12  ;;  %v3132_v59 = vsel %vm3072_vm3, %v16884_v47, %v16883_v61  ;;  %v2784_v9 = vmul.f32 %v12563_v5, %v2661_v28 }
 0x4f3   :  { %v3276_v28 = vmul.f32 %v3154_v53, %v3132_v59 }
 0x4f4   :  { %v12651_v55 = vpop.permute.xlu1 %2578  ;;  %v12657_v44 = vpop.permute.xlu0 %3972 }
 0x4f5   :  { %16874 = vst [vmem:[#allocation324_spill] sm:$0xff] %v12651_v55  ;;  %16877 = vst [vmem:[#allocation85_spill] sm:$0xff] %v12657_v44  ;;  %5994 = vrot.lane.b32.xlu1 %v11234_v27, %s8774_s13  ;;  %v3134_v55 = vsel %vm3072_vm3, %v12565_v52, %v16876_v35  ;;  %v3228_v35 = vmul.f32 %v3154_v53, %v3129_v12  ;;  %v16885_v52 = vld [vmem:[#allocation100_spill] sm:$0xff]  ;;  %v16888_v12 = vld [vmem:[#allocation181_spill] sm:$0xff] }
 0x4f6   :  { %5549 = vrot.lane.b32.xlu0 %v12050_v21, %s8773_s12  ;;  %v3243_v25 = vmul.f32 %v3150_v60, %v3134_v55  ;;  %v3629_v56 = vrot.slane %v16888_v12, %v16878_v2  ;;  %v16892_v55 = vld [vmem:[#allocation61_spill] sm:$0xff] }
 0x4f8   :  { %v12673_v18 = vpop.permute.xlu1 %2594  ;;  %v3981_v37 = vpop.permute.xlu0 %3980 }
 0x4f9   :  { %16882 = vst [vmem:[#allocation74_spill] sm:$0xff] %v12673_v18  ;;  %v2662_v34 = vsel %vm2598_vm2, %v12673_v18, %v16849_v50  ;;  %6002 = vrot.lane.b32.xlu1 %v11200_v32, %s8774_s13  ;;  %v3133_v50 = vsel %vm3072_vm3, %v12373_v10, %v16881_v43  ;;  %v16886_v18 = vld [vmem:[#allocation92_spill] sm:$0xff]  ;;  %v16891_v43 = vld [vmem:[#allocation21_spill] sm:$0xff] }
 0x4fa   :  { %v2800_v63 = vmul.f32 %v12563_v5, %v2662_v34  ;;  %v3131_v61 = vsel %vm3072_vm3, %v16886_v18, %v16885_v52  ;;  %5996 = vrot.lane.b32.xlu0 %v11549_v22, %s8774_s13  ;;  %v3292_v34 = vpack.c.bf16 %v3244_v30, %v3228_v35  ;;  %v3227_v26 = vmul.f32 %v3150_v60, %v3133_v50  ;;  %v16890_v52 = vld [vmem:[#allocation43_spill] sm:$0xff]  ;;  %v17044_v22 = vld [vmem:[#allocation45_spill] sm:$0xff] }
 0x4fb   :  { %v3260_v59 = vmul.f32 %v3154_v53, %v3131_v61 }
 0x4fc   :  { %v2832_v41 = vpack.c.bf16 %v2800_v63, %v2784_v9  ;;  %v12703_v5 = vpop.permute.xlu1 %3970  ;;  %v12707_v23 = vpop.permute.xlu0 %3988  ;;  %v3604_v63 = vsel %vm3547_vm4, %v16891_v43, %v16890_v52  ;;  %v16893_v9 = vld [vmem:[#allocation36_spill] sm:$0xff]  ;;  %v3291_v35 = vpack.c.bf16 %v3243_v25, %v3227_v26  ;;  %v16895_v26 = vld [vmem:[#allocation146_spill] sm:$0xff]  ;;  %v16896_v25 = vld [vmem:[#allocation105_spill] sm:$0xff] }
 0x4fd   :  { %16887 = vst [vmem:[#allocation165_spill] sm:$0xff] %v12703_v5  ;;  %16889 = vst [vmem:[#allocation31_spill] sm:$0xff] %v12707_v23  ;;  %6010 = vrot.lane.b32.xlu1 %v11261_v20, %s8774_s13  ;;  %v3605_v30 = vsel %vm3547_vm4, %v16893_v9, %v16892_v55  ;;  %v3308_v10 = vpack.c.bf16 %v3276_v28, %v3260_v59  ;;  %v3703_v39 = vmul.f32 %v3629_v56, %v3604_v63 }
 0x4fe   :  { %6693 = vmatpush1.bf16.msra.mxu0 %v2832_v41  ;;  %6004 = vrot.lane.b32.xlu0 %v11492_v19, %s8774_s13  ;;  %v3135_v41 = vsel %vm3072_vm3, %v12610_v11, %v16886_v18  ;;  %v3719_v52 = vmul.f32 %v3629_v56, %v3605_v30  ;;  %v3607_v53 = vsel %vm3547_vm4, %v16896_v25, %v16895_v26  ;;  %v16899_v26 = vld [vmem:[#allocation89_spill] sm:$0xff] }
 0x4ff   :  { %6694 = vmatprep.subr.bf16.mxu0 %v3292_v34  ;;  %v3609_v18 = vsel %vm3547_vm4, %v12602_v31, %v16893_v9  ;;  %v4042_v61 = vsel %vm4022_vm5, %v3981_v37, %v12707_v23  ;;  %v3625_v34 = vrot.slane %v16888_v12, %v12517_v42  ;;  %v3259_v63 = vmul.f32 %v3150_v60, %v3135_v41  ;;  %v16902_v31 = vld [vmem:[#allocation40_spill] sm:$0xff] }
 0x500   :  { %v3979_v50 = vpop.permute.xlu1 %3978  ;;  %v12728_v55 = vpop.permute.xlu0 %3070  ;;  %v4046_v30 = vsel %vm4022_vm5, %v12657_v44, %v3981_v37 }
 0x501   :  { %v4045_v0 = vsel %vm4022_vm5, %v12703_v5, %v3979_v50  ;;  %16894 = vst [vmem:[#allocation24_spill] sm:$0xff] %v12728_v55  ;;  %6018 = vrot.lane.b32.xlu1 %v11920_v40, %s8774_s13  ;;  %v3136_v28 = vsel %vm3072_vm3, %v12728_v55, %v16884_v47 }
 0x502   :  { %6695 = vmatpush1.bf16.msra.mxu0 %v3291_v35  ;;  %v3275_v59 = vmul.f32 %v3150_v60, %v3136_v28  ;;  %6012 = vrot.lane.b32.xlu0 %v11564_v38, %s8774_s13  ;;  %v16898_v35 = vld [vmem:[#allocation112_spill] sm:$0xff]  ;;  %v4219_v41 = vmul.f32 %v12589_v57, %v4045_v0  ;;  %v3718_v60 = vmul.f32 %v3625_v34, %v3609_v18  ;;  %v16903_v18 = vld [vmem:[#allocation189_spill] sm:$0xff] }
 0x503   :  { %6696 = vmatprep.subr.bf16.mxu0 %v3308_v10  ;;  %v3606_v47 = vsel %vm3547_vm4, %v16899_v26, %v16898_v35  ;;  %v3608_v10 = vsel %vm3547_vm4, %v12408_v36, %v16891_v43  ;;  %v4236_v28 = vmul.f32 %v12551_v29, %v4042_v61  ;;  %v16901_v35 = vld [vmem:[#allocation65_spill] sm:$0xff]  ;;  %v3751_v43 = vmul.f32 %v3629_v56, %v3607_v53 }
 0x504   :  { %v12754_v9 = vpop.permute.xlu1 %3986  ;;  %v3307_v23 = vpack.c.bf16 %v3275_v59, %v3259_v63  ;;  %v12770_v5 = vpop.permute.xlu0 %4571  ;;  %v4080_v0 = vsel %vm4022_vm5, %v16902_v31, %v16901_v35  ;;  %v4235_v36 = vmul.f32 %v12589_v57, %v4046_v30  ;;  %v4104_v61 = vrot.slane %v16903_v18, %v16878_v2 }
 0x505   :  { %16897 = vst [vmem:[#allocation174_spill] sm:$0xff] %v12754_v9  ;;  %v4041_v37 = vsel %vm4022_vm5, %v3979_v50, %v12754_v9  ;;  %16900 = vst [vmem:[#allocation158_spill] sm:$0xff] %v12770_v5  ;;  %5998 = vrot.lane.b32.xlu1 %v11651_v62, %s8774_s13  ;;  %v3767_v50 = vpack.c.bf16 %v3719_v52, %v3703_v39  ;;  %v3702_v63 = vmul.f32 %v3625_v34, %v3608_v10  ;;  %v16906_v9 = vld [vmem:[#allocation23_spill] sm:$0xff]  ;;  %v16943_v5 = vld [vmem:[#allocation113_spill] sm:$0xff] }
 0x506   :  { %v4220_v44 = vmul.f32 %v12551_v29, %v4041_v37  ;;  %6020 = vrot.lane.b32.xlu0 %v11962_v15, %s8774_s13  ;;  %6697 = vmatpush1.bf16.msra.mxu0 %v3307_v23  ;;  %v16905_v37 = vld [vmem:[#allocation48_spill] sm:$0xff]  ;;  %v3735_v53 = vmul.f32 %v3629_v56, %v3606_v47  ;;  %v3610_v39 = vsel %vm3547_vm4, %v12619_v17, %v16899_v26  ;;  %v16909_v56 = vld [vmem:[#allocation109_spill] sm:$0xff]  ;;  %v16940_v17 = vld [vmem:[#allocation47_spill] sm:$0xff] }
 0x507   :  { %v4079_v35 = vsel %vm4022_vm5, %v16906_v9, %v16905_v37  ;;  %v4267_v57 = vpack.c.bf16 %v4235_v36, %v4219_v41  ;;  %6698 = vmatprep.subr.bf16.mxu0 %v3767_v50  ;;  %v4194_v52 = vmul.f32 %v4104_v61, %v4080_v0  ;;  %v3766_v30 = vpack.c.bf16 %v3718_v60, %v3702_v63  ;;  %v16912_v50 = vld [vmem:[#allocation91_spill] sm:$0xff] }
 0x508   :  { %v12783_v29 = vpop.permute.xlu1 %4569  ;;  %v4268_v59 = vpack.c.bf16 %v4236_v28, %v4220_v44  ;;  %v12793_v10 = vpop.permute.xlu0 %3545  ;;  %v4380_v23 = vpack.c.bf16 %v11564_v38, %v11261_v20  ;;  %v16908_v44 = vld [vmem:[#allocation150_spill] sm:$0xff]  ;;  %v4084_v36 = vsel %vm4022_vm5, %v12613_v7, %v16902_v31  ;;  %v3783_v41 = vpack.c.bf16 %v3751_v43, %v3735_v53  ;;  %v16911_v43 = vld [vmem:[#allocation124_spill] sm:$0xff] }
 0x509   :  { %16904 = vst [vmem:[#allocation100_spill] sm:$0xff] %v12783_v29  ;;  %16907 = vst [vmem:[#allocation92_spill] sm:$0xff] %v12793_v10  ;;  %6006 = vrot.lane.b32.xlu1 %v11606_v8, %s8774_s13  ;;  %v4082_v47 = vsel %vm4022_vm5, %v16909_v56, %v16908_v44  ;;  %v3611_v26 = vsel %vm3547_vm4, %v12793_v10, %v16896_v25  ;;  %v4100_v20 = vrot.slane %v16903_v18, %v12517_v42  ;;  %v16939_v7 = vld [vmem:[#allocation28_spill] sm:$0xff]  ;;  %v16944_v29 = vld [vmem:[#allocation155_spill] sm:$0xff] }
 0x50a   :  { %7234 = vmatprep.subr.bf16.mxu1 %v4268_v59  ;;  %v3734_v38 = vmul.f32 %v3625_v34, %v3610_v39  ;;  %v3750_v60 = vmul.f32 %v3625_v34, %v3611_v26  ;;  %6000 = vrot.lane.b32.xlu0 %v11854_v48, %s8774_s13  ;;  %v4178_v0 = vmul.f32 %v4104_v61, %v4079_v35  ;;  %v16917_v26 = vld [vmem:[#allocation4_spill] sm:$0xff]  ;;  %v17028_v48 = vld [vmem:[#allocation46_spill] sm:$0xff] }
 0x50b   :  { %7235 = vmatpush1.bf16.msra.mxu1 %v4267_v57  ;;  %6699 = vmatpush1.bf16.msra.mxu0 %v3766_v30  ;;  %v4083_v31 = vsel %vm4022_vm5, %v12436_v46, %v16906_v9  ;;  %v4379_v25 = vpack.c.bf16 %v11492_v19, %v11200_v32  ;;  %v4081_v34 = vsel %vm4022_vm5, %v16912_v50, %v16911_v43  ;;  %v16921_v43 = vld [vmem:[#allocation66_spill] sm:$0xff]  ;;  %v16938_v46 = vld [vmem:[#allocation52_spill] sm:$0xff] }
 0x50c   :  { %v12815_v28 = vpop.permute.xlu1 %4577  ;;  %6700 = vmatprep.subr.bf16.mxu0 %v3783_v41  ;;  %7236 = vmatprep.subr.bf16.mxu1 %v4380_v23  ;;  %v4193_v63 = vmul.f32 %v4100_v20, %v4084_v36  ;;  %v3782_v59 = vpack.c.bf16 %v3750_v60, %v3734_v38  ;;  %v12827_v37 = vpop.permute.xlu0 %4579  ;;  %v4226_v35 = vmul.f32 %v4104_v61, %v4082_v47  ;;  %v16916_v47 = vld [vmem:[#allocation15_spill] sm:$0xff] }
 0x50d   :  { %16910 = vst [vmem:[#allocation181_spill] sm:$0xff] %v12815_v28  ;;  %16913 = vst [vmem:[#allocation43_spill] sm:$0xff] %v12827_v37  ;;  %6014 = vrot.lane.b32.xlu1 %v11682_v54, %s8774_s13  ;;  %v4242_v53 = vpack.c.bf16 %v4194_v52, %v4178_v0  ;;  %v4396_v9 = vpack.c.bf16 %v11868_v51, %v11682_v54  ;;  %v4177_v39 = vmul.f32 %v4100_v20, %v4083_v31  ;;  %v8486_v54 = vld [vmem:[%s15676_s2 + $0x45] ss:$8 sm:$0xf] }
 0x50e   :  { %6008 = vrot.lane.b32.xlu0 %v11813_v6, %s8774_s13  ;;  %v4210_v19 = vmul.f32 %v4104_v61, %v4081_v34  ;;  %v4085_v57 = vsel %vm4022_vm5, %v12627_v33, %v16912_v50  ;;  %v4395_v52 = vpack.c.bf16 %v11813_v6, %v11606_v8  ;;  %v8487_v61 = vld [vmem:[%s15676_s2 + $0x45] ss:$8 sm:$0xf0] }
 0x50f   :  { %7237 = vmatpush1.bf16.msra.mxu1 %v4379_v25  ;;  %6701 = vmatpush1.bf16.msra.mxu0 %v3782_v59  ;;  %v4241_v30 = vpack.c.bf16 %v4193_v63, %v4177_v39  ;;  %v16915_v6 = vld [vmem:[#allocation6_spill] sm:$0xff]  ;;  %v16918_v41 = vld [vmem:[#allocation7_spill] sm:$0xff]  ;;  %v4209_v60 = vmul.f32 %v4100_v20, %v4085_v57 }
 0x510   :  { %v4586_v32 = vpop.permute.xlu1 %4585  ;;  %6702 = vmatprep.subr.bf16.mxu0 %v4242_v53  ;;  %7238 = vmatprep.subr.bf16.mxu1 %v4396_v9  ;;  %v12841_v23 = vpop.permute.xlu0 %4020  ;;  %v4258_v8 = vpack.c.bf16 %v4226_v35, %v4210_v19  ;;  %v4370_v36 = vpack.c.bf16 %v16916_v47, %v16915_v6  ;;  %v4369_v38 = vpack.c.bf16 %v16918_v41, %v16917_v26  ;;  %v16920_v25 = vld [vmem:[#allocation34_spill] sm:$0xff]  ;;  %v16952_v26 = vld [vmem:[#allocation136_spill] sm:$0xff] }
 0x511   :  { %16914 = vst [vmem:[#allocation21_spill] sm:$0xff] %v12841_v23  ;;  %6022 = vrot.lane.b32.xlu1 %v12028_v58, %s8774_s13  ;;  %v4086_v44 = vsel %vm4022_vm5, %v12841_v23, %v16909_v56  ;;  %v4386_v50 = vpack.c.bf16 %v16921_v43, %v16920_v25  ;;  %v16922_v56 = vld [vmem:[#allocation37_spill] sm:$0xff]  ;;  %v16924_v59 = vld [vmem:[#allocation42_spill] sm:$0xff]  ;;  %v12881_v53 = vrot.slane %v16772_v49, %v16878_v2 }
 0x512   :  { %v4225_v0 = vmul.f32 %v4100_v20, %v4086_v44  ;;  %6016 = vrot.lane.b32.xlu0 %v11868_v51, %s8774_s13  ;;  %v12867_v34 = vrot.slane %v16922_v56, %v12517_v42  ;;  %v12871_v63 = vrot.slane %v16922_v56, %v16878_v2  ;;  %v12875_v20 = vrot.slane %v16772_v49, %v12517_v42  ;;  %v16923_v51 = vld [vmem:[#allocation25_spill] sm:$0xff]  ;;  %v16937_v23 = vld [vmem:[#allocation26_spill] sm:$0xff] }
 0x513   :  { %7239 = vmatpush1.bf16.msra.mxu1 %v4395_v52  ;;  %6703 = vmatpush1.bf16.msra.mxu0 %v4241_v30  ;;  %v4385_v35 = vpack.c.bf16 %v16924_v59, %v16923_v51  ;;  %v12883_v9 = vor.u32 %v8487_v61, %v8486_v54  ;;  %v12891_v44 = vrot.slane %v16782_v45, %v12517_v42  ;;  %v16948_v61 = vld [vmem:[#allocation56_spill] sm:$0xff]  ;;  %v16954_v30 = vld [vmem:[#allocation283_spill] sm:$0xff]  ;;  %v16958_v6 = vld [vmem:[#allocation38_spill] sm:$0xff] }
 0x514   :  { %v12861_v31 = vpop.permute.xlu1 %4593  ;;  %6704 = vmatprep.subr.bf16.mxu0 %v4258_v8  ;;  %v4257_v39 = vpack.c.bf16 %v4225_v0, %v4209_v60  ;;  %v4588_v19 = vpop.permute.xlu0 %4587  ;;  %v12895_v8 = vrot.slane %v16782_v45, %v16878_v2  ;;  %v16932_v60 = vld [vmem:[#allocation44_spill] sm:$0xff]  ;;  %v16933_v0 = vld [vmem:[#allocation71_spill] sm:$0xff]  ;;  %v12917_v41 = vrot.slane %v16793_v4, %v12517_v42  ;;  %v4678_v54 = vsel %vm4625_vm6, %v16938_v46, %v16937_v23 }
 0x515   :  { %16919 = vst [vmem:[#allocation61_spill] sm:$0xff] %v12861_v31  ;;  %16925 = vst [vmem:[#allocation36_spill] sm:$0xff] %v12883_v9  ;;  %3042 = vrot.lane.b32.xlu1 %v11962_v15, %s8770_s30  ;;  %v4679_v25 = vsel %vm4625_vm6, %v16933_v0, %v16932_v60  ;;  %v12907_v43 = vrot.slane %v12883_v9, %v16801_v3  ;;  %v12921_v60 = vrot.slane %v16793_v4, %v16878_v2 }
 0x516   :  { %6024 = vrot.lane.b32.xlu0 %v12050_v21, %s8774_s13  ;;  %v4638_v33 = vsel %vm4625_vm6, %v4586_v32, %v12861_v31  ;;  %v4683_v31 = vsel %vm4625_vm6, %v16940_v17, %v16933_v0  ;;  %v12943_v10 = vrot.slane %v12883_v9, %v16811_v13  ;;  %v4797_v23 = vmul.f32 %v12871_v63, %v4679_v25  ;;  %v16945_v25 = vld [vmem:[#allocation281_spill] sm:$0xff] }
 0x517   :  { %6705 = vmatpush1.bf16.msra.mxu0 %v4257_v39  ;;  %v4643_v39 = vsel %vm4625_vm6, %v12827_v37, %v4588_v19  ;;  %v16942_v37 = vld [vmem:[#allocation284_spill] sm:$0xff]  ;;  %v4642_v0 = vsel %vm4625_vm6, %v12815_v28, %v4586_v32  ;;  %v4791_v17 = vmul.f32 %v12907_v43, %v4638_v33  ;;  %v4781_v32 = vmul.f32 %v12871_v63, %v4678_v54  ;;  %v16947_v28 = vld [vmem:[#allocation30_spill] sm:$0xff] }
 0x518   :  { %v12911_v51 = vpop.permute.xlu1 %4573  ;;  %6706 = vmatprep.subr.bf16.mxu0 %v4370_v36  ;;  %v12945_v36 = vpop.permute.xlu0 %4595  ;;  %v4806_v9 = vmul.f32 %v12943_v10, %v4643_v39  ;;  %v4796_v33 = vmul.f32 %v12867_v34, %v4683_v31  ;;  %v16949_v39 = vld [vmem:[#allocation49_spill] sm:$0xff]  ;;  %v4790_v54 = vmul.f32 %v12943_v10, %v4642_v0  ;;  %v16955_v31 = vld [vmem:[#allocation32_spill] sm:$0xff] }
 0x519   :  { %16934 = vst [vmem:[#allocation146_spill] sm:$0xff] %v12911_v51  ;;  %v4682_v51 = vsel %vm4625_vm6, %v16939_v7, %v16938_v46  ;;  %16941 = vst [vmem:[#allocation105_spill] sm:$0xff] %v12945_v36  ;;  %3050 = vrot.lane.b32.xlu1 %v16942_v37, %s8770_s30  ;;  %v4681_v46 = vsel %vm4625_vm6, %v16944_v29, %v16943_v5  ;;  %v4639_v7 = vsel %vm4625_vm6, %v4588_v19, %v12945_v36  ;;  %v16957_v0 = vld [vmem:[#allocation60_spill] sm:$0xff] }
 0x51a   :  { %v4807_v11 = vmul.f32 %v12907_v43, %v4639_v7  ;;  %3048 = vrot.lane.b32.xlu0 %v16945_v25, %s8770_s30  ;;  %v4780_v5 = vmul.f32 %v12867_v34, %v4682_v51  ;;  %v5153_v19 = vsel %vm5100_vm7, %v16948_v61, %v16947_v28  ;;  %v16950_v7 = vld [vmem:[#allocation75_spill] sm:$0xff]  ;;  %v4845_v52 = vpack.c.bf16 %v4797_v23, %v4781_v32  ;;  %v16961_v23 = vld [vmem:[#allocation97_spill] sm:$0xff] }
 0x51b   :  { %6707 = vmatpush1.bf16.msra.mxu0 %v4369_v38  ;;  %v5154_v36 = vsel %vm5100_vm7, %v16950_v7, %v16949_v39  ;;  %v16951_v38 = vld [vmem:[#allocation94_spill] sm:$0xff]  ;;  %v16956_v39 = vld [vmem:[#allocation119_spill] sm:$0xff]  ;;  %v4854_v47 = vpack.c.bf16 %v4806_v9, %v4790_v54 }
 0x51c   :  { %v12965_v55 = vpop.permute.xlu1 %4581  ;;  %6708 = vmatprep.subr.bf16.mxu0 %v4386_v50  ;;  %v4680_v51 = vsel %vm4625_vm6, %v16952_v26, %v16951_v38  ;;  %v12983_v59 = vpop.permute.xlu0 %4575  ;;  %v4855_v28 = vpack.c.bf16 %v4807_v11, %v4791_v17  ;;  %v5157_v50 = vsel %vm5100_vm7, %v16955_v31, %v16948_v61  ;;  %v4685_v57 = vsel %vm4625_vm6, %v16956_v39, %v16944_v29  ;;  %v16959_v11 = vld [vmem:[#allocation51_spill] sm:$0xff]  ;;  %v16960_v61 = vld [vmem:[#allocation278_spill] sm:$0xff] }
 0x51d   :  { %16946 = vst [vmem:[#allocation112_spill] sm:$0xff] %v12965_v55  ;;  %16953 = vst [vmem:[#allocation89_spill] sm:$0xff] %v12983_v59  ;;  %3058 = vrot.lane.b32.xlu1 %v16954_v30, %s8770_s30  ;;  %v4829_v38 = vmul.f32 %v12871_v63, %v4681_v46  ;;  %v5632_v59 = vsel %vm5575_vm8, %v16958_v6, %v16957_v0  ;;  %v5158_v17 = vsel %vm5100_vm7, %v16959_v11, %v16950_v7  ;;  %v16962_v6 = vld [vmem:[#allocation35_spill] sm:$0xff] }
 0x51e   :  { %3056 = vrot.lane.b32.xlu0 %v16960_v61, %s8770_s30  ;;  %v5272_v29 = vmul.f32 %v12881_v53, %v5154_v36  ;;  %v4684_v46 = vsel %vm4625_vm6, %v16961_v23, %v16952_v26  ;;  %v4813_v32 = vmul.f32 %v12871_v63, %v4680_v51  ;;  %7240 = vmatprep.subr.bf16.mxu1 %v4855_v28  ;;  %v16968_v28 = vld [vmem:[#allocation64_spill] sm:$0xff]  ;;  %v16974_v11 = vld [vmem:[#allocation99_spill] sm:$0xff]  ;;  %v16975_v23 = vld [vmem:[#allocation141_spill] sm:$0xff] }
 0x51f   :  { %6709 = vmatpush1.bf16.msra.mxu0 %v4385_v35  ;;  %v5628_v9 = vsel %vm5575_vm8, %v16957_v0, %v16962_v6  ;;  %v4844_v7 = vpack.c.bf16 %v4796_v33, %v4780_v5  ;;  %v4828_v35 = vmul.f32 %v12867_v34, %v4685_v57  ;;  %7241 = vmatpush1.bf16.msra.mxu1 %v4854_v47  ;;  %v16964_v5 = vld [vmem:[#allocation125_spill] sm:$0xff]  ;;  %v16965_v57 = vld [vmem:[#allocation159_spill] sm:$0xff] }
 0x520   :  { %v4590_v31 = vpop.permute.xlu1 %4589  ;;  %6710 = vmatprep.subr.bf16.mxu0 %v4845_v52  ;;  %v13017_v54 = vpop.permute.xlu0 %4583  ;;  %v5255_v26 = vmul.f32 %v12875_v20, %v5157_v50  ;;  %v5256_v63 = vmul.f32 %v12881_v53, %v5153_v19  ;;  %v13024_v52 = vmul.f32 %v12891_v44, %v5632_v59  ;;  %v4861_v36 = vpack.c.bf16 %v4829_v38, %v4813_v32  ;;  %v16967_v59 = vld [vmem:[#allocation39_spill] sm:$0xff] }
 0x521   :  { %16963 = vst [vmem:[#allocation65_spill] sm:$0xff] %v13017_v54  ;;  %3046 = vrot.lane.b32.xlu1 %v12050_v21, %s8770_s30  ;;  %v5271_v51 = vmul.f32 %v12875_v20, %v5158_v17  ;;  %v4812_v6 = vmul.f32 %v12867_v34, %v4684_v46  ;;  %v5156_v47 = vsel %vm5100_vm7, %v16965_v57, %v16964_v5  ;;  %v16969_v34 = vld [vmem:[#allocation82_spill] sm:$0xff]  ;;  %v16970_v38 = vld [vmem:[#allocation55_spill] sm:$0xff]  ;;  %v16971_v46 = vld [vmem:[#allocation53_spill] sm:$0xff] }
 0x522   :  { %3044 = vrot.lane.b32.xlu0 %v12028_v58, %s8770_s30  ;;  %v13037_v19 = vmul.f32 %v12895_v8, %v5628_v9  ;;  %v6103_v50 = vsel %vm6050_vm9, %v16968_v28, %v16967_v59  ;;  %v5633_v0 = vsel %vm5575_vm8, %v16970_v38, %v16969_v34  ;;  %v5320_v17 = vpack.c.bf16 %v5272_v29, %v5256_v63  ;;  %v16973_v9 = vld [vmem:[#allocation86_spill] sm:$0xff]  ;;  %v16977_v29 = vld [vmem:[#allocation59_spill] sm:$0xff] }
 0x523   :  { %6711 = vmatpush1.bf16.msra.mxu0 %v4844_v7  ;;  %v5629_v32 = vsel %vm5575_vm8, %v16969_v34, %v16971_v46  ;;  %v16972_v7 = vld [vmem:[#allocation57_spill] sm:$0xff]  ;;  %v5155_v59 = vsel %vm5100_vm7, %v16975_v23, %v16974_v11  ;;  %v4860_v39 = vpack.c.bf16 %v4828_v35, %v4812_v6  ;;  %v6108_v63 = vsel %vm6050_vm9, %v16977_v29, %v16973_v9 }
 0x524   :  { %v13034_v33 = vpop.permute.xlu1 %4597  ;;  %6712 = vmatprep.subr.bf16.mxu0 %v4861_v36  ;;  %v6104_v5 = vsel %vm6050_vm9, %v16973_v9, %v16972_v7  ;;  %v4592_v2 = vpop.permute.xlu0 %4591  ;;  %v16976_v36 = vld [vmem:[#allocation297_spill] sm:$0xff]  ;;  %v5304_v35 = vmul.f32 %v12881_v53, %v5156_v47  ;;  %v5319_v42 = vpack.c.bf16 %v5271_v51, %v5255_v26  ;;  %v13079_v9 = vmul.f32 %v12891_v44, %v5633_v0 }
 0x525   :  { %16966 = vst [vmem:[#allocation40_spill] sm:$0xff] %v13034_v33  ;;  %3054 = vrot.lane.b32.xlu1 %v16976_v36, %s8770_s30  ;;  %v16978_v34 = vld [vmem:[#allocation101_spill] sm:$0xff]  ;;  %v4640_v47 = vsel %vm4625_vm6, %v4590_v31, %v13034_v33  ;;  %v4645_v26 = vsel %vm4625_vm6, %v13017_v54, %v4592_v2  ;;  %v13094_v51 = vmul.f32 %v12917_v41, %v6108_v63 }
 0x526   :  { %v5159_v46 = vsel %vm5100_vm7, %v16978_v34, %v16975_v23  ;;  %v16979_v7 = vld [vmem:[#allocation129_spill] sm:$0xff]  ;;  %v5747_v34 = vmul.f32 %v12895_v8, %v5629_v32  ;;  %v16984_v32 = vld [vmem:[#allocation295_spill] sm:$0xff]  ;;  %v4644_v63 = vsel %vm4625_vm6, %v12965_v55, %v4590_v31  ;;  %v13126_v31 = vmul.f32 %v12921_v60, %v6103_v50  ;;  %v17032_v55 = vld [vmem:[#allocation68_spill] sm:$0xff] }
 0x527   :  { %v5160_v11 = vsel %vm5100_vm7, %v16979_v7, %v16965_v57  ;;  %v16980_v6 = vld [vmem:[#allocation41_spill] sm:$0xff]  ;;  %6713 = vmatpush1.bf16.msra.mxu0 %v4860_v39  ;;  %v5288_v57 = vmul.f32 %v12881_v53, %v5155_v59  ;;  %v13097_v39 = vmul.f32 %v12921_v60, %v6104_v5  ;;  %v16987_v7 = vld [vmem:[#allocation291_spill] sm:$0xff] }
 0x528   :  { %v6107_v38 = vsel %vm6050_vm9, %v16980_v6, %v16968_v28  ;;  %v16981_v29 = vld [vmem:[#allocation293_spill] sm:$0xff]  ;;  %v13083_v23 = vpop.permute.xlu1 %5044  ;;  %6714 = vmatprep.subr.bf16.mxu0 %v5320_v17  ;;  %v5287_v28 = vmul.f32 %v12875_v20, %v5159_v46  ;;  %v5303_v0 = vmul.f32 %v12875_v20, %v5160_v11  ;;  %v13101_v53 = vpop.permute.xlu0 %4599  ;;  %v16986_v6 = vld [vmem:[#allocation162_spill] sm:$0xff]  ;;  %v4823_v20 = vmul.f32 %v12907_v43, %v4640_v47 }
 0x529   :  { %3052 = vrot.lane.b32.xlu0 %v16981_v29, %s8770_s30  ;;  %16982 = vst [vmem:[#allocation189_spill] sm:$0xff] %v13083_v23  ;;  %16983 = vst [vmem:[#allocation48_spill] sm:$0xff] %v13101_v53  ;;  %3062 = vrot.lane.b32.xlu1 %v16984_v32, %s8770_s30  ;;  %v16985_v59 = vld [vmem:[#allocation137_spill] sm:$0xff]  ;;  %v4641_v5 = vsel %vm4625_vm6, %v4592_v2, %v13101_v53  ;;  %v5336_v46 = vpack.c.bf16 %v5304_v35, %v5288_v57  ;;  %v13131_v35 = vsub.s32 4, %v16838_v24 }
 0x52a   :  { %v5631_v17 = vsel %vm5575_vm8, %v16986_v6, %v16985_v59  ;;  %v4838_v11 = vmul.f32 %v12943_v10, %v4645_v26  ;;  %v4839_v33 = vmul.f32 %v12907_v43, %v4641_v5  ;;  %v13123_v23 = vmul.f32 %v12917_v41, %v6107_v38  ;;  %v16990_v43 = vld [vmem:[#allocation104_spill] sm:$0xff]  ;;  %v16991_v57 = vld [vmem:[#allocation145_spill] sm:$0xff] }
 0x52b   :  { %6715 = vmatpush1.bf16.msra.mxu0 %v5319_v42  ;;  %v5794_v2 = vpack.c.bf16 %v13079_v9, %v13024_v52  ;;  %16989 = vst [vmem:[#allocation150_spill] sm:$0xff] %v13131_v35  ;;  %v5630_v42 = vsel %vm5575_vm8, %v16991_v57, %v16990_v43  ;;  %v5335_v47 = vpack.c.bf16 %v5303_v0, %v5287_v28  ;;  %v16993_v52 = vld [vmem:[#allocation140_spill] sm:$0xff] }
 0x52c   :  { %v13120_v59 = vpop.permute.xlu1 %5052  ;;  %6716 = vmatprep.subr.bf16.mxu0 %v5336_v46  ;;  %v4822_v26 = vmul.f32 %v12943_v10, %v4644_v63  ;;  %v13138_v38 = vpop.permute.xlu0 %5046  ;;  %v4871_v50 = vpack.c.bf16 %v4839_v33, %v4823_v20  ;;  %v5635_v9 = vsel %vm5575_vm8, %v16993_v52, %v16986_v6  ;;  %v5779_v5 = vmul.f32 %v12895_v8, %v5631_v17  ;;  %v16995_v6 = vld [vmem:[#allocation107_spill] sm:$0xff]  ;;  %v17004_v10 = vld [vmem:[#allocation149_spill] sm:$0xff] }
 0x52d   :  { %3060 = vrot.lane.b32.xlu0 %v16987_v7, %s8770_s30  ;;  %16988 = vst [vmem:[#allocation23_spill] sm:$0xff] %v13120_v59  ;;  %16992 = vst [vmem:[#allocation109_spill] sm:$0xff] %v13138_v38  ;;  %3517 = vrot.lane.b32.xlu1 %v11962_v15, %s8767_s27  ;;  %v13148_v46 = vsub.s32 5, %v16838_v24  ;;  %v5795_v28 = vpack.c.bf16 %v5747_v34, %v13037_v19  ;;  %v6270_v63 = vpack.c.bf16 %v13097_v39, %v13126_v31 }
 0x52e   :  { %v4870_v0 = vpack.c.bf16 %v4838_v11, %v4822_v26  ;;  %v5634_v24 = vsel %vm5575_vm8, %v16995_v6, %v16991_v57  ;;  %v5763_v17 = vmul.f32 %v12895_v8, %v5630_v42  ;;  %v13164_v19 = vrot.slane %v16853_v16, %v13131_v35  ;;  %7242 = vmatprep.subr.bf16.mxu1 %v4871_v50  ;;  %v8490_v57 = vld [vmem:[%s15676_s2 + $0x46] ss:$8 sm:$0xf] }
 0x52f   :  { %16994 = vst [vmem:[#allocation124_spill] sm:$0xff] %v13148_v46  ;;  %6717 = vmatpush1.bf16.msra.mxu0 %v5335_v47  ;;  %v5778_v34 = vmul.f32 %v12891_v44, %v5635_v9  ;;  %v13169_v20 = vrot.slane %v16879_v14, %v13131_v35  ;;  %v13173_v39 = vrot.slane %v16888_v12, %v13131_v35  ;;  %v8491_v42 = vld [vmem:[%s15676_s2 + $0x46] ss:$8 sm:$0xf0] }
 0x530   :  { %v5061_v33 = vpop.permute.xlu1 %5060  ;;  %6718 = vmatprep.subr.bf16.mxu0 %v5795_v28  ;;  %7243 = vmatpush1.bf16.msra.mxu1 %v4870_v0  ;;  %v13175_v11 = vpop.permute.xlu0 %5054  ;;  %v13181_v8 = vrot.slane %v16853_v16, %v13148_v46  ;;  %v13185_v31 = vrot.slane %v16903_v18, %v13131_v35  ;;  %v13189_v43 = vrot.slane %v16879_v14, %v13148_v46  ;;  %v16998_v26 = vld [vmem:[#allocation142_spill] sm:$0xff]  ;;  %v16999_v50 = vld [vmem:[#allocation175_spill] sm:$0xff]  ;;  %v17007_v0 = vld [vmem:[#allocation144_spill] sm:$0xff] }
 0x531   :  { %3515 = vrot.lane.b32.xlu0 %v11920_v40, %s8767_s27  ;;  %16996 = vst [vmem:[#allocation91_spill] sm:$0xff] %v13175_v11  ;;  %3525 = vrot.lane.b32.xlu1 %v16942_v37, %s8767_s27  ;;  %v5811_v47 = vpack.c.bf16 %v5779_v5, %v5763_v17  ;;  %v5762_v16 = vmul.f32 %v12891_v44, %v5634_v24  ;;  %v17030_v24 = vld [vmem:[#allocation50_spill] sm:$0xff] }
 0x532   :  { %16997 = vst [vmem:[#allocation6_spill] sm:$0xff] %v13185_v31  ;;  %v6106_v9 = vsel %vm6050_vm9, %v16999_v50, %v16998_v26  ;;  %v13204_v14 = vrot.slane %v16888_v12, %v13148_v46  ;;  %v13212_v5 = vrot.slane %v16903_v18, %v13148_v46  ;;  %v13216_v44 = vrot.slane %v16922_v56, %v13131_v35  ;;  %v17003_v26 = vld [vmem:[#allocation108_spill] sm:$0xff]  ;;  %v17029_v12 = vld [vmem:[#allocation5_spill] sm:$0xff] }
 0x533   :  { %6719 = vmatpush1.bf16.msra.mxu0 %v5794_v2  ;;  %v6105_v2 = vsel %vm6050_vm9, %v17004_v10, %v17003_v26  ;;  %v5810_v6 = vpack.c.bf16 %v5778_v34, %v5762_v16  ;;  %v13228_v18 = vrot.slane %v16922_v56, %v13148_v46  ;;  %v13230_v52 = vor.u32 %v8491_v42, %v8490_v57  ;;  %v17008_v57 = vld [vmem:[#allocation232_spill] sm:$0xff]  ;;  %v17009_v42 = vld [vmem:[#allocation226_spill] sm:$0xff] }
 0x534   :  { %v13208_v28 = vpop.permute.xlu1 %5068  ;;  %6720 = vmatprep.subr.bf16.mxu0 %v5811_v47  ;;  %v5063_v53 = vpop.permute.xlu0 %5062  ;;  %v17006_v47 = vld [vmem:[#allocation110_spill] sm:$0xff]  ;;  %v6110_v34 = vsel %vm6050_vm9, %v17007_v0, %v16999_v50  ;;  %v6254_v16 = vmul.f32 %v12921_v60, %v6106_v9  ;;  %v2640_v26 = vsel %vm2598_vm2, %v17009_v42, %v17008_v57  ;;  %v6238_v56 = vmul.f32 %v12921_v60, %v6105_v2  ;;  %v17014_v50 = vld [vmem:[#allocation187_spill] sm:$0xff] }
 0x535   :  { %3523 = vrot.lane.b32.xlu0 %v16945_v25, %s8767_s27  ;;  %17000 = vst [vmem:[#allocation15_spill] sm:$0xff] %v13208_v28  ;;  %17005 = vst [vmem:[#allocation4_spill] sm:$0xff] %v13230_v52  ;;  %3533 = vrot.lane.b32.xlu1 %v16954_v30, %s8767_s27  ;;  %v6109_v17 = vsel %vm6050_vm9, %v17006_v47, %v17004_v10  ;;  %v13251_v38 = vrot.slane %v13230_v52, %v16801_v3  ;;  %v17013_v47 = vld [vmem:[#allocation195_spill] sm:$0xff] }
 0x536   :  { %v13262_v0 = vrot.slane %v16772_v49, %v13131_v35  ;;  %v5113_v57 = vsel %vm5100_vm7, %v5061_v33, %v13208_v28  ;;  %v5118_v62 = vsel %vm5100_vm7, %v13175_v11, %v5063_v53  ;;  %v2639_v60 = vsel %vm2598_vm2, %v17014_v50, %v17013_v47  ;;  %v13294_v47 = vld [vmem:[%s15677_s5] ss:$12 sps:$4 sm:$0xff]  }
 0x537   :  { %6721 = vmatpush1.bf16.msra.mxu0 %v5810_v6  ;;  %v6237_v6 = vmul.f32 %v12917_v41, %v6109_v17  ;;  %v13278_v2 = vrot.slane %v13230_v52, %v16811_v13  ;;  %17016 = vst [vmem:[#allocation66_spill] sm:$0xff] %v13294_v47  ;;  %v5266_v28 = vmul.f32 %v13251_v38, %v5113_v57  ;;  %v17046_v52 = vld [vmem:[#allocation186_spill] sm:$0xff] }
 0x538   :  { %v13255_v10 = vpop.permute.xlu1 %5048  ;;  %6743 = vmatprep.subr.bf16.mxu0 %v6270_v63  ;;  %v13280_v9 = vpop.permute.xlu0 %5070  ;;  %v2773_v63 = vmul.f32 %v13181_v8, %v2640_v26  ;;  %v13363_v27 = vrot.slane %v16793_v4, %v13148_v46 }
 0x539   :  { %3531 = vrot.lane.b32.xlu0 %v16960_v61, %s8767_s27  ;;  %17010 = vst [vmem:[#allocation7_spill] sm:$0xff] %v13255_v10  ;;  %v6253_v10 = vmul.f32 %v12917_v41, %v6110_v34  ;;  %17015 = vst [vmem:[#allocation34_spill] sm:$0xff] %v13280_v9  ;;  %3521 = vrot.lane.b32.xlu1 %v12050_v21, %s8767_s27  ;;  %v5117_v41 = vsel %vm5100_vm7, %v13120_v59, %v5061_v33  ;;  %v17023_v59 = vld [vmem:[#allocation63_spill] sm:$0xff] }
 0x53a   :  { %v5114_v17 = vsel %vm5100_vm7, %v5063_v53, %v13280_v9  ;;  %6723 = vmatmul.mubr.bf16.vlgmr.msra.gmra.mrb[40].mxu0 %v13294_v47  ;;  %v6286_v34 = vpack.c.bf16 %v6254_v16, %v6238_v56  ;;  %v5281_v26 = vmul.f32 %v13278_v2, %v5118_v62  ;;  %v17017_v53 = vpack.c.bf16 %v13094_v51, %v13123_v23  ;;  %v13319_v56 = vld [vmem:[%s15677_s5 + $0x1c] ss:$12 sps:$4 sm:$0xff]  }
 0x53b   :  { %v5282_v11 = vmul.f32 %v13251_v38, %v5114_v17  ;;  %v2757_v9 = vmul.f32 %v13181_v8, %v2639_v60  ;;  %v13310_v16 = vrot.slane %v16772_v49, %v13148_v46  ;;  %v13314_v62 = vrot.slane %v16782_v45, %v13131_v35  ;;  %17019 = vst [vmem:[#allocation25_spill] sm:$0xff] %v13319_v56  ;;  %v17021_v17 = vld [vmem:[#allocation29_spill] sm:$0xff] }
 0x53c   :  { %6744 = vmatpush1.bf16.msra.mxu0 %v17017_v53  ;;  %v13305_v33 = vpop.permute.xlu1 %5056  ;;  %6732 = vmatprep.mubr.bf16.mxu0 %v13319_v56  ;;  %v6285_v23 = vpack.c.bf16 %v6253_v10, %v6237_v6  ;;  %v13324_v51 = vrot.slane %v16782_v45, %v13148_v46  ;;  %v5265_v49 = vmul.f32 %v13278_v2, %v5117_v41  ;;  %v13327_v57 = vpop.permute.xlu0 %5050  ;;  %v17022_v53 = vld [vmem:[#allocation203_spill] sm:$0xff]  ;;  %v17048_v56 = vld [vmem:[#allocation241_spill] sm:$0xff] }
 0x53d   :  { %3519 = vrot.lane.b32.xlu0 %v12028_v58, %s8767_s27  ;;  %17018 = vst [vmem:[#allocation37_spill] sm:$0xff] %v13305_v33  ;;  %6745 = vmatprep.subr.bf16.mxu0 %v6286_v34  ;;  %17020 = vst [vmem:[#allocation42_spill] sm:$0xff] %v13327_v57  ;;  %v5330_v60 = vpack.c.bf16 %v5282_v11, %v5266_v28  ;;  %v2643_v34 = vsel %vm2598_vm2, %v17021_v17, %v17014_v50  ;;  %v17025_v41 = vld [vmem:[#allocation191_spill] sm:$0xff]  ;;  %v17026_v57 = vld [vmem:[#allocation33_spill] sm:$0xff] }
 0x53e   :  { %3529 = vrot.lane.b32.xlu1 %v16976_v36, %s8767_s27  ;;  %v3593_v10 = vsel %vm3547_vm4, %v17023_v59, %v17022_v53  ;;  %v13341_v45 = vrot.slane %v16793_v4, %v13131_v35  ;;  %v2821_v6 = vpack.c.bf16 %v2773_v63, %v2757_v9  ;;  %v3117_v11 = vsel %vm3072_vm3, %v17026_v57, %v17025_v41  ;;  %v17027_v28 = vld [vmem:[#allocation194_spill] sm:$0xff] }
 0x53f   :  { %v3592_v50 = vsel %vm3547_vm4, %v17028_v48, %v17027_v28  ;;  %v5329_v17 = vpack.c.bf16 %v5281_v26, %v5265_v49  ;;  %v4067_v9 = vsel %vm4022_vm5, %v17030_v24, %v17029_v12  ;;  %v17031_v63 = vld [vmem:[#allocation206_spill] sm:$0xff]  ;;  %17033 = vst [vmem:[#allocation71_spill] sm:$0xff] %v13363_v27  ;;  %7244 = vmatprep.subr.bf16.mxu1 %v5330_v60  ;;  %v17036_v60 = vld [vmem:[#allocation8_spill] sm:$0xff] }
 0x540   :  { %17024 = vst [vmem:[#allocation44_spill] sm:$0xff] %v13341_v45  ;;  %6746 = vmatpush1.bf16.msra.mxu0 %v6285_v23  ;;  %v5065_v59 = vpop.permute.xlu1 %5064  ;;  %v4068_v57 = vsel %vm4022_vm5, %v17032_v55, %v17031_v63  ;;  %v2756_v48 = vmul.f32 %v13164_v19, %v2643_v34  ;;  %v13367_v26 = vmul.f32 %v13173_v39, %v3593_v10  ;;  %v17034_v23 = vld [vmem:[#allocation83_spill] sm:$0xff]  ;;  %v13373_v49 = vpop.permute.xlu0 %5058  ;;  %v17037_v10 = vld [vmem:[#allocation202_spill] sm:$0xff] }
 0x541   :  { %3527 = vrot.lane.b32.xlu0 %v16981_v29, %s8767_s27  ;;  %6902 = vmatprep.subr.bf16.mxu0 %v2821_v6  ;;  %v2644_v24 = vsel %vm2598_vm2, %v17034_v23, %v17009_v42  ;;  %17035 = vst [vmem:[#allocation26_spill] sm:$0xff] %v13373_v49  ;;  %v13378_v4 = vmul.f32 %v13169_v20, %v3117_v11  ;;  %v13394_v6 = vld [vmem:[%s15677_s5 + $0x18] ss:$12 sps:$4 sm:$0xff]  }
 0x542   :  { %7245 = vmatpush1.bf16.msra.mxu1 %v5329_v17  ;;  %3537 = vrot.lane.b32.xlu1 %v16984_v32, %s8767_s27  ;;  %v13381_v55 = vmul.f32 %v13173_v39, %v3592_v50  ;;  %v3113_v34 = vsel %vm3072_vm3, %v17025_v41, %v17036_v60  ;;  %v3588_v42 = vsel %vm3547_vm4, %v17027_v28, %v17037_v10  ;;  %v17039_v17 = vld [vmem:[#allocation272_spill] sm:$0xff]  ;;  %v17040_v41 = vld [vmem:[#allocation19_spill] sm:$0xff]  ;;  %v17042_v60 = vmov 0   ;;  %v17043_v10 = vld [vmem:[#allocation205_spill] sm:$0xff] }
 0x543   :  { %17038 = vst [vmem:[#allocation52_spill] sm:$0xff] %v13394_v6  ;;  %6733 = vmatmul.mubr.bf16.gmra.mrb[44].mxu0 %v13394_v6  ;;  %v13398_v11 = vmul.f32 %v13185_v31, %v4067_v9  ;;  %v13401_v50 = vmul.f32 %v13185_v31, %v4068_v57  ;;  %v2642_v23 = vsel %vm2598_vm2, %v17040_v41, %v17039_v17  ;;  %v17045_v57 = vld [vmem:[#allocation12_spill] sm:$0xff] }
 0x544   :  { %v13409_v28 = vpop.permute.xlu1 %5072  ;;  %6775 = vmatprep.mubr.bf16.mxu0 %v17042_v60  ;;  %v4063_v9 = vsel %vm4022_vm5, %v17029_v12, %v17043_v10  ;;  %v4662_v54 = vsel %vm4625_vm6, %v17045_v57, %v17044_v22  ;;  %v4666_v17 = vsel %vm4625_vm6, %v17046_v52, %v17045_v57  ;;  %v2772_v46 = vmul.f32 %v13164_v19, %v2644_v24  ;;  %v17047_v10 = vld [vmem:[#allocation246_spill] sm:$0xff]  ;;  %v5067_v47 = vpop.permute.xlu0 %5066  ;;  %v17049_v52 = vld [vmem:[#allocation236_spill] sm:$0xff]  ;;  %v17050_v57 = vld [vmem:[#allocation229_spill] sm:$0xff] }
 0x545   :  { %3535 = vrot.lane.b32.xlu0 %v16987_v7, %s8767_s27  ;;  %17041 = vst [vmem:[#allocation113_spill] sm:$0xff] %v13409_v28  ;;  %v3232_v35 = vmul.f32 %v13189_v43, %v3113_v34  ;;  %v13427_v6 = vmul.f32 %v13204_v14, %v3588_v42  ;;  %v2641_v22 = vsel %vm2598_vm2, %v17048_v56, %v17047_v10  ;;  %v17051_v34 = vld [vmem:[#allocation98_spill] sm:$0xff]  ;;  %v17052_v12 = vld [vmem:[#allocation168_spill] sm:$0xff] }
 0x546   :  { %3992 = vrot.lane.b32.xlu1 %v11962_v15, %s8769_s29  ;;  %v3114_v24 = vsel %vm3072_vm3, %v17050_v57, %v17049_v52  ;;  %v2645_v42 = vsel %vm2598_vm2, %v17051_v34, %v17048_v56  ;;  %v2646_v31 = vsel %vm2598_vm2, %v17052_v12, %v17040_v41  ;;  %v2805_v10 = vmul.f32 %v13181_v8, %v2642_v23  ;;  %v17054_v12 = vld [vmem:[#allocation87_spill] sm:$0xff] }
 0x547   :  { %v13451_v27 = vmul.f32 %v13212_v5, %v4063_v9  ;;  %v13456_v52 = vmul.f32 %v13216_v44, %v4666_v17  ;;  %v13459_v45 = vmul.f32 %v13228_v18, %v4662_v54  ;;  %v2820_v41 = vpack.c.bf16 %v2772_v46, %v2756_v48  ;;  %v17056_v48 = vld [vmem:[#allocation274_spill] sm:$0xff] }
 0x548   :  { %v13463_v56 = vpop.permute.xlu1 %5519  ;;  %v2789_v23 = vmul.f32 %v13181_v8, %v2641_v22  ;;  %v5115_v9 = vsel %vm5100_vm7, %v5065_v59, %v13409_v28  ;;  %v5120_v17 = vsel %vm5100_vm7, %v13373_v49, %v5067_v47  ;;  %v3118_v54 = vsel %vm3072_vm3, %v17054_v12, %v17050_v57  ;;  %v13479_v8 = vpop.permute.xlu0 %5074  ;;  %v17057_v22 = vld [vmem:[#allocation270_spill] sm:$0xff] }
 0x549   :  { %3990 = vrot.lane.b32.xlu0 %v11920_v40, %s8769_s29  ;;  %17053 = vst [vmem:[#allocation155_spill] sm:$0xff] %v13463_v56  ;;  %v3248_v34 = vmul.f32 %v13189_v43, %v3114_v24  ;;  %v2788_v15 = vmul.f32 %v13164_v19, %v2645_v42  ;;  %v2804_v46 = vmul.f32 %v13164_v19, %v2646_v31  ;;  %17055 = vst [vmem:[#allocation30_spill] sm:$0xff] %v13479_v8  ;;  %v13496_v19 = vld [vmem:[%s15677_s5 + $0x8] ss:$12 sps:$4 sm:$0xff]   ;;  %v17062_v56 = vld [vmem:[#allocation219_spill] sm:$0xff] }
 0x54a   :  { %4000 = vrot.lane.b32.xlu1 %v16942_v37, %s8769_s29  ;;  %v3116_v28 = vsel %vm3072_vm3, %v17057_v22, %v17056_v48  ;;  %v5119_v57 = vsel %vm5100_vm7, %v13305_v33, %v5065_v59  ;;  %v5116_v24 = vsel %vm5100_vm7, %v5067_v47, %v13479_v8  ;;  %17058 = vst [vmem:[#allocation56_spill] sm:$0xff] %v13496_v19  ;;  %v17060_v59 = vld [vmem:[#allocation54_spill] sm:$0xff] }
 0x54b   :  { %8506 = vmatmul.mubr.msk.bf16.vlgmr.msra.gmra.mrb[40].mxu0 %vm6683_vm10, %v13496_v19  ;;  %v2837_v31 = vpack.c.bf16 %v2805_v10, %v2789_v23  ;;  %v5298_v42 = vmul.f32 %v13251_v38, %v5115_v9  ;;  %v5313_v12 = vmul.f32 %v13278_v2, %v5120_v17  ;;  %v5314_v48 = vmul.f32 %v13251_v38, %v5116_v24  ;;  %v17061_v8 = vld [vmem:[#allocation214_spill] sm:$0xff]  ;;  %v17063_v38 = vld [vmem:[#allocation116_spill] sm:$0xff] }
 0x54c   :  { %6903 = vmatpush1.bf16.msra.mxu0 %v2820_v41  ;;  %v13505_v47 = vpop.permute.xlu1 %5527  ;;  %v5137_v40 = vsel %vm5100_vm7, %v17061_v8, %v17060_v59  ;;  %v3589_v10 = vsel %vm3547_vm4, %v17022_v53, %v17062_v56  ;;  %v3247_v23 = vmul.f32 %v13169_v20, %v3118_v54  ;;  %6785 = vmatprep.mubr.bf16.mxu0 %v17042_v60  ;;  %v17064_v41 = vld [vmem:[#allocation243_spill] sm:$0xff]  ;;  %v13522_v33 = vpop.permute.xlu0 %5521  ;;  %v17066_v53 = vld [vmem:[#allocation188_spill] sm:$0xff] }
 0x54d   :  { %3998 = vrot.lane.b32.xlu0 %v16945_v25, %s8769_s29  ;;  %17059 = vst [vmem:[#allocation49_spill] sm:$0xff] %v13505_v47  ;;  %6904 = vmatprep.subr.bf16.mxu0 %v2837_v31  ;;  %v3115_v9 = vsel %vm3072_vm3, %v17064_v41, %v17063_v38  ;;  %v2836_v17 = vpack.c.bf16 %v2804_v46, %v2788_v15  ;;  %17065 = vst [vmem:[#allocation75_spill] sm:$0xff] %v13522_v33  ;;  %v17067_v54 = vld [vmem:[#allocation180_spill] sm:$0xff]  ;;  %v17107_v33 = vld [vmem:[#allocation237_spill] sm:$0xff] }
 0x54e   :  { %v5297_v24 = vmul.f32 %v13278_v2, %v5119_v57  ;;  %4008 = vrot.lane.b32.xlu1 %v16954_v30, %s8769_s29  ;;  %v5346_v59 = vpack.c.bf16 %v5314_v48, %v5298_v42  ;;  %v5141_v56 = vsel %vm5100_vm7, %v17066_v53, %v17061_v8  ;;  %v3120_v31 = vsel %vm3072_vm3, %v17067_v54, %v17057_v22  ;;  %v17068_v2 = vld [vmem:[#allocation218_spill] sm:$0xff] }
 0x54f   :  { %v3280_v15 = vmul.f32 %v13189_v43, %v3116_v28  ;;  %v3296_v46 = vpack.c.bf16 %v3248_v34, %v3232_v35  ;;  %v17069_v57 = vld [vmem:[#allocation190_spill] sm:$0xff]  ;;  %v3723_v42 = vmul.f32 %v13204_v14, %v3589_v10  ;;  %v3264_v34 = vmul.f32 %v13189_v43, %v3115_v9 }
 0x550   :  { %v5616_v38 = vsel %vm5575_vm8, %v17069_v57, %v17068_v2  ;;  %v5345_v48 = vpack.c.bf16 %v5313_v12, %v5297_v24  ;;  %6905 = vmatpush1.bf16.msra.mxu0 %v2836_v17  ;;  %v5536_v8 = vpop.permute.xlu1 %5535  ;;  %v17070_v53 = vld [vmem:[#allocation222_spill] sm:$0xff]  ;;  %7246 = vmatprep.subr.bf16.mxu1 %v5346_v59  ;;  %v13552_v12 = vmul.f32 %v13262_v0, %v5141_v56  ;;  %v13556_v24 = vpop.permute.xlu0 %5529 }
 0x551   :  { %4006 = vrot.lane.b32.xlu0 %v16960_v61, %s8769_s29  ;;  %v4064_v22 = vsel %vm4022_vm5, %v17031_v63, %v17070_v53  ;;  %v17071_v35 = vld [vmem:[#allocation102_spill] sm:$0xff]  ;;  %6906 = vmatprep.subr.bf16.mxu0 %v3296_v46  ;;  %v3295_v10 = vpack.c.bf16 %v3247_v23, %v13378_v4  ;;  %v3279_v17 = vmul.f32 %v13169_v20, %v3120_v31  ;;  %v17076_v31 = vld [vmem:[#allocation264_spill] sm:$0xff]  ;;  %v17077_v46 = vld [vmem:[#allocation147_spill] sm:$0xff] }
 0x552   :  { %v3119_v28 = vsel %vm3072_vm3, %v17071_v35, %v17064_v41  ;;  %7247 = vmatpush1.bf16.msra.mxu1 %v5345_v48  ;;  %17072 = vst [vmem:[#allocation94_spill] sm:$0xff] %v13556_v24  ;;  %3996 = vrot.lane.b32.xlu1 %v12050_v21, %s8769_s29  ;;  %v13561_v63 = vmul.f32 %v13310_v16, %v5137_v40  ;;  %v17073_v41 = vld [vmem:[#allocation199_spill] sm:$0xff]  ;;  %v13581_v40 = vld [vmem:[%s15677_s5 + $0x20] ss:$12 sps:$4 sm:$0xff]  }
 0x553   :  { %v13567_v43 = vsel %vm5575_vm8, %v17068_v2, %v17073_v41  ;;  %v13570_v9 = vmul.f32 %v13314_v62, %v5616_v38  ;;  %v8494_v4 = vld [vmem:[%s15676_s2 + $0x47] ss:$8 sm:$0xf]  ;;  %17075 = vst [vmem:[#allocation283_spill] sm:$0xff] %v13581_v40  ;;  %8507 = vmatmul.mubr.msk.bf16.gmra.mrb[44].mxu0 %vm6683_vm10, %v13581_v40  ;;  %v3312_v59 = vpack.c.bf16 %v3280_v15, %v3264_v34 }
 0x554   :  { %v8495_v23 = vld [vmem:[%s15676_s2 + $0x47] ss:$8 sm:$0xf0]  ;;  %v13586_v56 = vmul.f32 %v13212_v5, %v4064_v22  ;;  %v3263_v54 = vmul.f32 %v13169_v20, %v3119_v28  ;;  %v3591_v2 = vsel %vm3547_vm4, %v17077_v46, %v17076_v31  ;;  %6907 = vmatpush1.bf16.msra.mxu0 %v3295_v10  ;;  %v13595_v57 = vpop.permute.xlu1 %5543  ;;  %v3771_v35 = vpack.c.bf16 %v3723_v42, %v13427_v6  ;;  %v5538_v6 = vpop.permute.xlu0 %5537 }
 0x555   :  { %17074 = vst [vmem:[#allocation136_spill] sm:$0xff] %v13570_v9  ;;  %3994 = vrot.lane.b32.xlu0 %v12028_v58, %s8769_s29  ;;  %17078 = vst [vmem:[#allocation60_spill] sm:$0xff] %v13595_v57  ;;  %v17079_v38 = vld [vmem:[#allocation16_spill] sm:$0xff]  ;;  %v17080_v48 = vld [vmem:[#allocation13_spill] sm:$0xff]  ;;  %6908 = vmatprep.subr.bf16.mxu0 %v3312_v59 }
 0x556   :  { %v13601_v15 = vsel %vm6050_vm9, %v17080_v48, %v17079_v38  ;;  %v17081_v53 = vld [vmem:[#allocation227_spill] sm:$0xff]  ;;  %v17082_v22 = vld [vmem:[#allocation10_spill] sm:$0xff]  ;;  %v17085_v41 = vld [vmem:[#allocation84_spill] sm:$0xff]  ;;  %v3311_v59 = vpack.c.bf16 %v3279_v17, %v3263_v54  ;;  %4004 = vrot.lane.b32.xlu1 %v16976_v36, %s8769_s29 }
 0x557   :  { %v4667_v20 = vsel %vm4625_vm6, %v17082_v22, %v17081_v53  ;;  %v13611_v28 = vld [vmem:[%s15677_s5 + $0x4] ss:$12 sps:$4 sm:$0xff]   ;;  %v17086_v31 = vld [vmem:[#allocation115_spill] sm:$0xff]  ;;  %v13622_v22 = vor.u32 %v8495_v23, %v8494_v4  ;;  %v17088_v42 = vld [vmem:[#allocation193_spill] sm:$0xff]  ;;  %v3755_v4 = vmul.f32 %v13204_v14, %v3591_v2 }
 0x558   :  { %17083 = vst [vmem:[#allocation278_spill] sm:$0xff] %v13611_v28  ;;  %6934 = vmatprep.mubr.bf16.mxu0 %v13611_v28  ;;  %v17084_v34 = vld [vmem:[#allocation210_spill] sm:$0xff]  ;;  %v3590_v38 = vsel %vm3547_vm4, %v17086_v31, %v17085_v41  ;;  %v13630_v21 = vsel %vm6050_vm9, %v17088_v42, %v17080_v48  ;;  %v17090_v41 = vld [vmem:[#allocation148_spill] sm:$0xff]  ;;  %v13642_v23 = vmul.f32 %v13216_v44, %v4667_v20  ;;  %v13650_v48 = vpop.permute.xlu1 %5523 }
 0x559   :  { %v4663_v10 = vsel %vm4625_vm6, %v17081_v53, %v17084_v34  ;;  %17087 = vst [vmem:[#allocation35_spill] sm:$0xff] %v13622_v22  ;;  %v17089_v53 = vld [vmem:[#allocation118_spill] sm:$0xff]  ;;  %v3595_v17 = vsel %vm3547_vm4, %v17090_v41, %v17077_v46  ;;  %v13646_v54 = vrot.slane %v13622_v22, %v16801_v3  ;;  %6909 = vmatpush1.bf16.msra.mxu0 %v3311_v59  ;;  %17091 = vst [vmem:[#allocation125_spill] sm:$0xff] %v13650_v48 }
 0x55a   :  { %v3594_v34 = vsel %vm3547_vm4, %v17089_v53, %v17086_v31  ;;  %4002 = vrot.lane.b32.xlu0 %v16981_v29, %s8769_s29  ;;  %v4246_v31 = vpack.c.bf16 %v13586_v56, %v13451_v27  ;;  %v13655_v46 = vmul.f32 %v13228_v18, %v4663_v10  ;;  %v3739_v2 = vmul.f32 %v13204_v14, %v3590_v38  ;;  %v17092_v42 = vld [vmem:[#allocation230_spill] sm:$0xff]  ;;  %v13674_v10 = vpop.permute.xlu0 %5545  ;;  %v17095_v38 = vld [vmem:[#allocation268_spill] sm:$0xff] }
 0x55b   :  { %v5588_v20 = vsel %vm5575_vm8, %v5536_v8, %v13595_v57  ;;  %v5593_v59 = vsel %vm5575_vm8, %v13556_v24, %v5538_v6  ;;  %6910 = vmatprep.subr.bf16.mxu0 %v3771_v35  ;;  %v17093_v53 = vld [vmem:[#allocation198_spill] sm:$0xff]  ;;  %v3738_v27 = vmul.f32 %v13173_v39, %v3594_v34  ;;  %v3754_v56 = vmul.f32 %v13173_v39, %v3595_v17  ;;  %v17096_v35 = vld [vmem:[#allocation256_spill] sm:$0xff] }
 0x55c   :  { %v5142_v41 = vsel %vm5100_vm7, %v17093_v53, %v17092_v42  ;;  %v13672_v14 = vrot.slane %v13622_v22, %v16811_v13  ;;  %17094 = vst [vmem:[#allocation159_spill] sm:$0xff] %v13674_v10  ;;  %4012 = vrot.lane.b32.xlu1 %v16984_v32, %s8769_s29  ;;  %v4066_v57 = vsel %vm4022_vm5, %v17096_v35, %v17095_v38  ;;  %v13696_v38 = vpop.permute.xlu1 %5531  ;;  %v17133_v24 = vld [vmem:[#allocation320_spill] sm:$0xff] }
 0x55d   :  { %v5592_v34 = vsel %vm5575_vm8, %v13505_v47, %v5536_v8  ;;  %v5589_v39 = vsel %vm5575_vm8, %v5538_v6, %v13674_v10  ;;  %v3787_v17 = vpack.c.bf16 %v3755_v4, %v3739_v2  ;;  %v5741_v53 = vmul.f32 %v13646_v54, %v5588_v20  ;;  %17098 = vst [vmem:[#allocation39_spill] sm:$0xff] %v13696_v38  ;;  %v17099_v8 = vld [vmem:[#allocation213_spill] sm:$0xff]  ;;  %v17100_v2 = vld [vmem:[#allocation215_spill] sm:$0xff] }
 0x55e   :  { %v5756_v58 = vmul.f32 %v13672_v14, %v5593_v59  ;;  %v5757_v48 = vmul.f32 %v13646_v54, %v5589_v39  ;;  %v17097_v22 = vpack.c.bf16 %v13367_v26, %v13381_v55  ;;  %4010 = vrot.lane.b32.xlu0 %v16987_v7, %s8769_s29  ;;  %v5138_v6 = vsel %vm5100_vm7, %v17092_v42, %v17099_v8  ;;  %v17101_v20 = vld [vmem:[#allocation233_spill] sm:$0xff]  ;;  %v17102_v26 = vld [vmem:[#allocation200_spill] sm:$0xff]  ;;  %v13718_v8 = vpop.permute.xlu0 %5525 }
 0x55f   :  { %v13703_v4 = vmul.f32 %v13262_v0, %v5142_v41  ;;  %v5613_v59 = vsel %vm5575_vm8, %v17101_v20, %v17100_v2  ;;  %v5617_v55 = vsel %vm5575_vm8, %v17102_v26, %v17101_v20  ;;  %v17103_v39 = vld [vmem:[#allocation88_spill] sm:$0xff]  ;;  %v17104_v10 = vld [vmem:[#allocation249_spill] sm:$0xff]  ;;  %v5740_v41 = vmul.f32 %v13672_v14, %v5592_v34  ;;  %17105 = vst [vmem:[#allocation64_spill] sm:$0xff] %v13718_v8 }
 0x560   :  { %6911 = vmatpush1.bf16.msra.mxu0 %v17097_v22  ;;  %v3786_v22 = vpack.c.bf16 %v3754_v56, %v3738_v27  ;;  %v4065_v42 = vsel %vm4022_vm5, %v17104_v10, %v17103_v39  ;;  %4603 = vrot.lane.b32.xlu1 %v16942_v37, %s8771_s10  ;;  %v5805_v2 = vpack.c.bf16 %v5757_v48, %v5741_v53  ;;  %v17106_v47 = vld [vmem:[#allocation217_spill] sm:$0xff]  ;;  %v17108_v27 = vld [vmem:[#allocation11_spill] sm:$0xff] }
 0x561   :  { %6912 = vmatprep.subr.bf16.mxu0 %v3787_v17  ;;  %v6088_v20 = vsel %vm6050_vm9, %v17107_v33, %v17106_v47  ;;  %v6092_v56 = vsel %vm6050_vm9, %v17108_v27, %v17107_v33  ;;  %v17109_v17 = vld [vmem:[#allocation152_spill] sm:$0xff]  ;;  %v4230_v26 = vmul.f32 %v13212_v5, %v4066_v57  ;;  %v13736_v39 = vmul.f32 %v13310_v16, %v5138_v6  ;;  %v5540_v47 = vpop.permute.xlu1 %5539 }
 0x562   :  { %v4070_v34 = vsel %vm4022_vm5, %v17109_v17, %v17096_v35  ;;  %v13739_v48 = vmul.f32 %v13314_v62, %v5617_v55  ;;  %v5804_v53 = vpack.c.bf16 %v5756_v58, %v5740_v41  ;;  %4601 = vrot.lane.b32.xlu0 %v16945_v25, %s8771_s10  ;;  %v13744_v33 = vmul.f32 %v13324_v51, %v5613_v59  ;;  %v17111_v27 = vld [vmem:[#allocation128_spill] sm:$0xff]  ;;  %v17114_v58 = vld [vmem:[#allocation71_spill] sm:$0xff]  ;;  %v17116_v41 = vld [vmem:[#allocation6_spill] sm:$0xff]  ;;  %v13758_v59 = vpop.permute.xlu0 %5533 }
 0x563   :  { %v4069_v57 = vsel %vm4022_vm5, %v17111_v27, %v17104_v10  ;;  %v4214_v35 = vmul.f32 %v13212_v5, %v4065_v42  ;;  %7248 = vmatprep.subr.bf16.mxu1 %v5805_v2  ;;  %v17112_v6 = vld [vmem:[#allocation44_spill] sm:$0xff]  ;;  %v4229_v17 = vmul.f32 %v17116_v41, %v4070_v34  ;;  %17117 = vst [vmem:[#allocation86_spill] sm:$0xff] %v13758_v59  ;;  %v17123_v27 = vld [vmem:[#allocation69_spill] sm:$0xff] }
 0x564   :  { %17110 = vst [vmem:[#allocation82_spill] sm:$0xff] %v13739_v48  ;;  %6913 = vmatpush1.bf16.msra.mxu0 %v3786_v22  ;;  %v13752_v55 = vmul.f32 %v17112_v6, %v6092_v56  ;;  %v13755_v22 = vmul.f32 %v17114_v58, %v6088_v20  ;;  %7249 = vmatpush1.bf16.msra.mxu1 %v5804_v53  ;;  %v17126_v34 = vld [vmem:[#allocation157_spill] sm:$0xff] }
 0x565   :  { %6914 = vmatprep.subr.bf16.mxu0 %v4246_v31  ;;  %4611 = vrot.lane.b32.xlu1 %v16954_v30, %s8771_s10  ;;  %v13764_v10 = vmul.f32 %v13324_v51, %v13567_v43  ;;  %v13768_v5 = vmul.f32 %v17112_v6, %v13630_v21  ;;  %v13772_v31 = vmul.f32 %v17114_v58, %v13601_v15  ;;  %v13782_v43 = vpop.permute.xlu1 %5547  ;;  %v17127_v15 = vld [vmem:[#allocation121_spill] sm:$0xff] }
 0x566   :  { %17113 = vst [vmem:[#allocation53_spill] sm:$0xff] %v13752_v55  ;;  %17115 = vst [vmem:[#allocation57_spill] sm:$0xff] %v13755_v22  ;;  %v4262_v42 = vpack.c.bf16 %v4230_v26, %v4214_v35  ;;  %v4213_v20 = vmul.f32 %v17116_v41, %v4069_v57  ;;  %v17121_v56 = vpack.c.bf16 %v13401_v50, %v13398_v11  ;;  %4609 = vrot.lane.b32.xlu0 %v16960_v61, %s8771_s10  ;;  %v17124_v57 = vld [vmem:[#allocation62_spill] sm:$0xff]  ;;  %v5542_v41 = vpop.permute.xlu0 %5541  ;;  %v17128_v26 = vld [vmem:[#allocation240_spill] sm:$0xff] }
 0x567   :  { %17118 = vst [vmem:[#allocation99_spill] sm:$0xff] %v13764_v10  ;;  %17119 = vst [vmem:[#allocation141_spill] sm:$0xff] %v13768_v5  ;;  %v13798_v35 = vrot.slane %v17124_v57, %v17123_v27  ;;  %v4664_v11 = vsel %vm4625_vm6, %v17127_v15, %v17126_v34  ;;  %v17130_v2 = vld [vmem:[#allocation77_spill] sm:$0xff]  ;;  %v13826_v34 = vrot.slane %v17133_v24, %v17123_v27  ;;  %v17140_v55 = vld [vmem:[#allocation103_spill] sm:$0xff] }
 0x568   :  { %17120 = vst [vmem:[#allocation295_spill] sm:$0xff] %v13772_v31  ;;  %6915 = vmatpush1.bf16.msra.mxu0 %v17121_v56  ;;  %17122 = vst [vmem:[#allocation137_spill] sm:$0xff] %v13782_v43  ;;  %v4261_v53 = vpack.c.bf16 %v4229_v17, %v4213_v20  ;;  %v17125_v56 = vld [vmem:[#allocation285_spill] sm:$0xff]  ;;  %v4668_v17 = vsel %vm4625_vm6, %v17128_v26, %v17127_v15  ;;  %v17129_v20 = vld [vmem:[#allocation316_spill] sm:$0xff]  ;;  %v13818_v21 = vrot.slane %v17124_v57, %v17130_v2 }
 0x569   :  { %6916 = vmatprep.subr.bf16.mxu0 %v4262_v42  ;;  %4619 = vrot.lane.b32.xlu1 %v17125_v56, %s8771_s10  ;;  %v13814_v50 = vrot.slane %v17129_v20, %v17123_v27  ;;  %v17131_v42 = vld [vmem:[#allocation304_spill] sm:$0xff]  ;;  %17134 = vst [vmem:[#allocation291_spill] sm:$0xff] %v13826_v34  ;;  %v13830_v49 = vrot.slane %v17129_v20, %v17130_v2  ;;  %v17135_v15 = vld [vmem:[#allocation167_spill] sm:$0xff]  ;;  %v13834_v26 = vpop.permute.xlu1 %5994  ;;  %v17139_v5 = vld [vmem:[#allocation153_spill] sm:$0xff] }
 0x56a   :  { %v13822_v8 = vrot.slane %v17131_v42, %v17123_v27  ;;  %4617 = vrot.lane.b32.xlu0 %v17135_v15, %s8771_s10  ;;  %17136 = vst [vmem:[#allocation104_spill] sm:$0xff] %v13834_v26  ;;  %v13838_v28 = vrot.slane %v17131_v42, %v17130_v2  ;;  %v13842_v40 = vrot.slane %v17133_v24, %v17130_v2  ;;  %v17142_v22 = vld [vmem:[#allocation139_spill] sm:$0xff]  ;;  %v17143_v24 = vld [vmem:[#allocation260_spill] sm:$0xff]  ;;  %v17150_v48 = vld [vmem:[#allocation93_spill] sm:$0xff] }
 0x56b   :  { %v5590_v19 = vsel %vm5575_vm8, %v5540_v47, %v13782_v43  ;;  %v17141_v31 = vpack.c.bf16 %v17139_v5, %v17140_v55  ;;  %v13854_v26 = vmul.f32 %v13216_v44, %v4668_v17  ;;  %v4817_v42 = vmul.f32 %v13228_v18, %v4664_v11  ;;  %v17144_v43 = vld [vmem:[#allocation242_spill] sm:$0xff]  ;;  %v17146_v55 = vld [vmem:[#allocation259_spill] sm:$0xff]  ;;  %v17165_v2 = vld [vmem:[#allocation273_spill] sm:$0xff] }
 0x56c   :  { %17132 = vst [vmem:[#allocation162_spill] sm:$0xff] %v13822_v8  ;;  %6917 = vmatpush1.bf16.msra.mxu0 %v4261_v53  ;;  %17137 = vst [vmem:[#allocation145_spill] sm:$0xff] %v13838_v28  ;;  %v5595_v53 = vsel %vm5575_vm8, %v13758_v59, %v5542_v41  ;;  %v5143_v57 = vsel %vm5100_vm7, %v17144_v43, %v17143_v24  ;;  %v13865_v59 = vpop.permute.xlu0 %5549  ;;  %v17147_v5 = vld [vmem:[#allocation127_spill] sm:$0xff]  ;;  %v17148_v11 = vld [vmem:[#allocation78_spill] sm:$0xff]  ;;  %v5594_v17 = vsel %vm5575_vm8, %v13696_v38, %v5540_v47 }
 0x56d   :  { %17138 = vst [vmem:[#allocation142_spill] sm:$0xff] %v13842_v40  ;;  %6918 = vmatprep.subr.bf16.mxu0 %v17141_v31  ;;  %v5139_v40 = vsel %vm5100_vm7, %v17143_v24, %v17142_v22  ;;  %17145 = vst [vmem:[#allocation175_spill] sm:$0xff] %v13865_v59  ;;  %4607 = vrot.lane.b32.xlu1 %v16976_v36, %s8771_s10  ;;  %v4665_v31 = vsel %vm4625_vm6, %v17147_v5, %v17146_v55  ;;  %v17149_v55 = vld [vmem:[#allocation111_spill] sm:$0xff]  ;;  %v17161_v38 = vld [vmem:[#allocation261_spill] sm:$0xff] }
 0x56e   :  { %v4669_v22 = vsel %vm4625_vm6, %v17148_v11, %v17147_v5  ;;  %v5591_v24 = vsel %vm5575_vm8, %v5542_v41, %v13865_v59  ;;  %v5773_v43 = vmul.f32 %v13646_v54, %v5590_v19  ;;  %v5788_v28 = vmul.f32 %v13672_v14, %v5595_v53  ;;  %4605 = vrot.lane.b32.xlu0 %v16981_v29, %s8771_s10  ;;  %v13891_v5 = vpop.permute.xlu1 %6002  ;;  %v17153_v19 = vld [vmem:[#allocation143_spill] sm:$0xff]  ;;  %v17166_v10 = vld [vmem:[#allocation160_spill] sm:$0xff] }
 0x56f   :  { %v5789_v9 = vmul.f32 %v13646_v54, %v5591_v24  ;;  %v17151_v20 = vpack.c.bf16 %v17149_v55, %v17150_v48  ;;  %17152 = vst [vmem:[#allocation108_spill] sm:$0xff] %v13891_v5  ;;  %v13894_v47 = vmul.f32 %v13262_v0, %v5143_v57  ;;  %v13897_v41 = vmul.f32 %v13310_v16, %v5139_v40  ;;  %v17154_v11 = vld [vmem:[#allocation123_spill] sm:$0xff]  ;;  %v17156_v24 = vld [vmem:[#allocation253_spill] sm:$0xff]  ;;  %v17160_v57 = vld [vmem:[#allocation114_spill] sm:$0xff] }
 0x570   :  { %v5614_v54 = vsel %vm5575_vm8, %v17154_v11, %v17153_v19  ;;  %v17155_v53 = vld [vmem:[#allocation271_spill] sm:$0xff]  ;;  %v5618_v40 = vsel %vm5575_vm8, %v17160_v57, %v17154_v11  ;;  %v5772_v19 = vmul.f32 %v13672_v14, %v5594_v17  ;;  %v13919_v36 = vpop.permute.xlu0 %5996  ;;  %v4832_v11 = vmul.f32 %v13216_v44, %v4669_v22  ;;  %v17167_v17 = vld [vmem:[#allocation262_spill] sm:$0xff]  ;;  %v17174_v22 = vld [vmem:[#allocation277_spill] sm:$0xff] }
 0x571   :  { %6919 = vmatpush1.bf16.msra.mxu0 %v17151_v20  ;;  %v5144_v48 = vsel %vm5100_vm7, %v17156_v24, %v17155_v53  ;;  %v17157_v20 = vld [vmem:[#allocation223_spill] sm:$0xff]  ;;  %v5140_v29 = vsel %vm5100_vm7, %v17155_v53, %v17161_v38  ;;  %17162 = vst [vmem:[#allocation149_spill] sm:$0xff] %v13919_v36  ;;  %4615 = vrot.lane.b32.xlu1 %v16984_v32, %s8771_s10  ;;  %v17168_v53 = vld [vmem:[#allocation201_spill] sm:$0xff] }
 0x572   :  { %v17158_v55 = vld [vmem:[#allocation27_spill] sm:$0xff]  ;;  %v5821_v24 = vpack.c.bf16 %v5789_v9, %v5773_v43  ;;  %v4833_v57 = vmul.f32 %v13228_v18, %v4665_v31  ;;  %v5619_v14 = vsel %vm5575_vm8, %v17166_v10, %v17165_v2  ;;  %v13934_v38 = vmul.f32 %v13262_v0, %v5144_v48  ;;  %4613 = vrot.lane.b32.xlu0 %v16987_v7, %s8771_s10  ;;  %v6011_v44 = vpop.permute.xlu1 %6010  ;;  %v17171_v10 = vld [vmem:[#allocation276_spill] sm:$0xff] }
 0x573   :  { %v17159_v59 = vpack.c.bf16 %v17157_v20, %v17158_v55  ;;  %v17163_v20 = vld [vmem:[#allocation267_spill] sm:$0xff]  ;;  %v5615_v9 = vsel %vm5575_vm8, %v17165_v2, %v17167_v17  ;;  %v5820_v43 = vpack.c.bf16 %v5788_v28, %v5772_v19  ;;  %v13946_v18 = vmul.f32 %v13314_v62, %v5618_v40  ;;  %v17172_v31 = vld [vmem:[#allocation120_spill] sm:$0xff] }
 0x574   :  { %v13949_v0 = vmul.f32 %v13310_v16, %v5140_v29  ;;  %v6094_v2 = vsel %vm6050_vm9, %v17172_v31, %v17171_v10  ;;  %v17173_v28 = vpack.c.bf16 %v13655_v46, %v13459_v45  ;;  %7250 = vmatprep.subr.bf16.mxu1 %v5821_v24  ;;  %v6089_v48 = vsel %vm6050_vm9, %v17163_v20, %v17174_v22  ;;  %v17175_v29 = vld [vmem:[#allocation20_spill] sm:$0xff]  ;;  %v13969_v40 = vpop.permute.xlu0 %6004  ;;  %v17177_v45 = vld [vmem:[#allocation299_spill] sm:$0xff] }
 0x575   :  { %6920 = vmatprep.subr.bf16.mxu0 %v17159_v59  ;;  %v17164_v59 = vld [vmem:[#allocation245_spill] sm:$0xff]  ;;  %v6090_v16 = vsel %vm6050_vm9, %v17171_v10, %v17175_v29  ;;  %7251 = vmatpush1.bf16.msra.mxu1 %v5820_v43  ;;  %17176 = vst [vmem:[#allocation232_spill] sm:$0xff] %v13969_v40  ;;  %v13974_v46 = vmul.f32 %v13324_v51, %v5614_v54  ;;  %v17186_v31 = vld [vmem:[#allocation207_spill] sm:$0xff] }
 0x576   :  { %v6093_v55 = vsel %vm6050_vm9, %v17164_v59, %v17163_v20  ;;  %v17169_v59 = vld [vmem:[#allocation192_spill] sm:$0xff]  ;;  %4623 = vrot.lane.b32.xlu1 %v17177_v45, %s8771_s10  ;;  %v13980_v19 = vmul.f32 %v13324_v51, %v5615_v9  ;;  %v4864_v17 = vpack.c.bf16 %v4832_v11, %v13854_v26  ;;  %v17178_v51 = vpack.c.bf16 %v13642_v23, %v13456_v52  ;;  %v13999_v43 = vpop.permute.xlu1 %6018  ;;  %v17181_v26 = vld [vmem:[#allocation66_spill] sm:$0xff]  ;;  %v17182_v23 = vld [vmem:[#allocation209_spill] sm:$0xff] }
 0x577   :  { %v17170_v36 = vpack.c.bf16 %v17168_v53, %v17169_v59  ;;  %v8498_v24 = vld [vmem:[%s15676_s2 + $0xc0] ss:$8 sm:$0xf]  ;;  %17180 = vst [vmem:[#allocation226_spill] sm:$0xff] %v13999_v43  ;;  %v14002_v53 = vmul.f32 %v17114_v58, %v6089_v48 }
 0x578   :  { %v8499_v20 = vld [vmem:[%s15676_s2 + $0xc0] ss:$8 sm:$0xf0]  ;;  %7253 = vmatmul.mubr.bf16.vlgmr.msra.gmra.mrb[56].mxu1 %v17181_v26  ;;  %v6013_v10 = vpop.permute.xlu0 %6012 }
 0x579   :  { %6921 = vmatpush1.bf16.msra.mxu0 %v17170_v36  ;;  %v13959_v36 = vmul.f32 %v13314_v62, %v5619_v14  ;;  %v13977_v62 = vmul.f32 %v17112_v6, %v6093_v55  ;;  %v4865_v14 = vpack.c.bf16 %v4833_v57, %v4817_v42  ;;  %v13992_v55 = vmul.f32 %v17112_v6, %v6094_v2  ;;  %v17179_v9 = vld [vmem:[#allocation288_spill] sm:$0xff]  ;;  %v17183_v11 = vld [vmem:[#allocation197_spill] sm:$0xff]  ;;  %v17190_v48 = vld [vmem:[#allocation138_spill] sm:$0xff] }
 0x57a   :  { %6922 = vmatprep.subr.bf16.mxu0 %v17173_v28  ;;  %4621 = vrot.lane.b32.xlu0 %v17179_v9, %s8771_s10  ;;  %v14005_v42 = vmul.f32 %v17114_v58, %v6090_v16  ;;  %v5340_v6 = vpack.c.bf16 %v13949_v0, %v13897_v41  ;;  %v2627_v57 = vsel %vm2598_vm2, %v17183_v11, %v17182_v23  ;;  %v17185_v58 = vld [vmem:[#allocation25_spill] sm:$0xff]  ;;  %v17188_v2 = vld [vmem:[#allocation96_spill] sm:$0xff]  ;;  %v17202_v54 = vld [vmem:[#allocation303_spill] sm:$0xff] }
 0x57b   :  { %v14016_v59 = vor.u32 %v8499_v20, %v8498_v24  ;;  %5078 = vrot.lane.b32.xlu1 %v16942_v37, %s8772_s11  ;;  %7262 = vmatprep.mubr.bf16.mxu1 %v17185_v58  ;;  %v17187_v41 = vld [vmem:[#allocation9_spill] sm:$0xff]  ;;  %v17189_v28 = vld [vmem:[#allocation204_spill] sm:$0xff]  ;;  %v2623_v29 = vsel %vm2598_vm2, %v17182_v23, %v17190_v48  ;;  %v17191_v20 = vld [vmem:[#allocation135_spill] sm:$0xff]  ;;  %v5999_v23 = vpop.permute.xlu1 %5998  ;;  %v6068_v48 = vsel %vm6050_vm9, %v13969_v40, %v6013_v10 }
 0x57c   :  { %v3101_v0 = vsel %vm3072_vm3, %v17187_v41, %v17186_v31  ;;  %v3576_v22 = vsel %vm3547_vm4, %v17189_v28, %v17188_v2  ;;  %v14048_v41 = vmul.f32 %v13798_v35, %v2627_v57  ;;  %v6063_v28 = vsel %vm6050_vm9, %v6011_v44, %v13999_v43  ;;  %v14074_v16 = vpop.permute.xlu0 %6020 }
 0x57d   :  { %6923 = vmatpush1.bf16.msra.mxu0 %v17178_v51  ;;  %17184 = vst [vmem:[#allocation195_spill] sm:$0xff] %v14016_v59  ;;  %v14043_v11 = vrot.slane %v14016_v59, %v16801_v3  ;;  %v17193_v3 = vpack.c.bf16 %v13736_v39, %v13561_v63  ;;  %v14065_v57 = vmul.f32 %v13822_v8, %v3576_v22  ;;  %17196 = vst [vmem:[#allocation203_spill] sm:$0xff] %v14074_v16  ;;  %v17198_v39 = vld [vmem:[#allocation196_spill] sm:$0xff] }
 0x57e   :  { %6924 = vmatprep.subr.bf16.mxu0 %v4865_v14  ;;  %v17192_v14 = vld [vmem:[#allocation208_spill] sm:$0xff]  ;;  %5076 = vrot.lane.b32.xlu0 %v16945_v25, %s8772_s11  ;;  %v14068_v24 = vmul.f32 %v13818_v21, %v2623_v29  ;;  %v14072_v52 = vrot.slane %v14016_v59, %v16811_v13  ;;  %v6067_v22 = vsel %vm6050_vm9, %v13891_v5, %v6011_v44 }
 0x57f   :  { %v4051_v51 = vsel %vm4022_vm5, %v17192_v14, %v17191_v20  ;;  %v14062_v14 = vmul.f32 %v13814_v50, %v3101_v0  ;;  %17195 = vst [vmem:[#allocation29_spill] sm:$0xff] %v14065_v57  ;;  %5086 = vrot.lane.b32.xlu1 %v16954_v30, %s8772_s11  ;;  %v3097_v0 = vsel %vm3072_vm3, %v17186_v31, %v17198_v39  ;;  %v14099_v31 = vpop.permute.xlu1 %6006  ;;  %v17200_v44 = vld [vmem:[#allocation172_spill] sm:$0xff]  ;;  %v17201_v39 = vld [vmem:[#allocation234_spill] sm:$0xff] }
 0x580   :  { %v14079_v63 = vmul.f32 %v13826_v34, %v4051_v51  ;;  %v6064_v13 = vsel %vm6050_vm9, %v6013_v10, %v14074_v16  ;;  %v6216_v29 = vmul.f32 %v14043_v11, %v6063_v28  ;;  %v2628_v10 = vsel %vm2598_vm2, %v17201_v39, %v17200_v44  ;;  %v17207_v16 = vld [vmem:[#allocation289_spill] sm:$0xff]  ;;  %v17208_v5 = vld [vmem:[#allocation220_spill] sm:$0xff]  ;;  %v17235_v34 = vld [vmem:[#allocation258_spill] sm:$0xff] }
 0x581   :  { %6925 = vmatpush1.bf16.msra.mxu0 %v4864_v17  ;;  %17194 = vst [vmem:[#allocation187_spill] sm:$0xff] %v14062_v14  ;;  %v6232_v51 = vmul.f32 %v14043_v11, %v6064_v13  ;;  %v17199_v17 = vpack.c.bf16 %v13703_v4, %v13552_v12  ;;  %v6077_v28 = vsel %vm6050_vm9, %v17202_v54, %v5999_v23  ;;  %v17203_v4 = vld [vmem:[#allocation52_spill] sm:$0xff]  ;;  %v6001_v13 = vpop.permute.xlu0 %6000  ;;  %v17237_v14 = vld [vmem:[#allocation67_spill] sm:$0xff] }
 0x582   :  { %6926 = vmatprep.subr.bf16.mxu0 %v17193_v3  ;;  %17197 = vst [vmem:[#allocation63_spill] sm:$0xff] %v14079_v63  ;;  %v6231_v3 = vmul.f32 %v14072_v52, %v6068_v48  ;;  %5084 = vrot.lane.b32.xlu0 %v16960_v61, %s8772_s11  ;;  %v6073_v12 = vsel %vm6050_vm9, %v5999_v23, %v14099_v31  ;;  %v17206_v23 = vld [vmem:[#allocation221_spill] sm:$0xff] }
 0x583   :  { %7263 = vmatmul.mubr.bf16.gmra.mrb[60].mxu1 %v17203_v4  ;;  %v14114_v48 = vrot.slane %v14016_v59, %v17123_v27  ;;  %5094 = vrot.lane.b32.xlu1 %v17125_v56, %s8772_s11  ;;  %v6280_v39 = vpack.c.bf16 %v6232_v51, %v6216_v29  ;;  %v14121_v54 = vmul.f32 %v13830_v49, %v3097_v0  ;;  %v17231_v63 = vld [vmem:[#allocation145_spill] sm:$0xff] }
 0x584   :  { %7305 = vmatprep.mubr.bf16.mxu1 %v17042_v60  ;;  %v6078_v40 = vsel %vm6050_vm9, %v17208_v5, %v6001_v13  ;;  %v17211_v27 = vpack.c.bf16 %v13934_v38, %v13894_v47  ;;  %v17215_v47 = vld [vmem:[#allocation99_spill] sm:$0xff] }
 0x585   :  { %6927 = vmatpush1.bf16.msra.mxu0 %v17199_v17  ;;  %17204 = vst [vmem:[#allocation191_spill] sm:$0xff] %v14114_v48  ;;  %v6215_v17 = vmul.f32 %v14072_v52, %v6067_v22  ;;  %v2624_v22 = vsel %vm2598_vm2, %v17200_v44, %v17207_v16  ;;  %v14135_v51 = vmul.f32 %v14114_v48, %v6077_v28  ;;  %v17212_v16 = vld [vmem:[#allocation163_spill] sm:$0xff] }
 0x586   :  { %6928 = vmatprep.subr.bf16.mxu0 %v5340_v6  ;;  %v17205_v6 = vld [vmem:[#allocation173_spill] sm:$0xff]  ;;  %v14138_v0 = vmul.f32 %v14114_v48, %v6078_v40  ;;  %5092 = vrot.lane.b32.xlu0 %v17135_v15, %s8772_s11  ;;  %v3572_v5 = vsel %vm3547_vm4, %v17188_v2, %v17212_v16  ;;  %v17213_v44 = vld [vmem:[#allocation183_spill] sm:$0xff] }
 0x587   :  { %v3577_v43 = vsel %vm3547_vm4, %v17206_v23, %v17205_v6  ;;  %v6279_v29 = vpack.c.bf16 %v6231_v3, %v6215_v17  ;;  %17209 = vst [vmem:[#allocation33_spill] sm:$0xff] %v14135_v51  ;;  %v6015_v23 = vpop.permute.xlu1 %6014  ;;  %v14150_v3 = vmul.f32 %v13798_v35, %v2628_v10  ;;  %v17214_v28 = vld [vmem:[#allocation179_spill] sm:$0xff]  ;;  %7273 = vmatprep.subr.bf16.mxu1 %v6280_v39  ;;  %v17218_v17 = vld [vmem:[#allocation77_spill] sm:$0xff]  ;;  %v6009_v10 = vpop.permute.xlu0 %6008  ;;  %v17222_v39 = vld [vmem:[#allocation150_spill] sm:$0xff] }
 0x588   :  { %17210 = vst [vmem:[#allocation194_spill] sm:$0xff] %v14138_v0  ;;  %v3098_v40 = vsel %vm3072_vm3, %v17214_v28, %v17213_v44  ;;  %v14160_v38 = vmul.f32 %v13822_v8, %v3577_v43  ;;  %v14164_v48 = vrot.slane %v14016_v59, %v17218_v17  ;;  %v17220_v16 = vld [vmem:[#allocation297_spill] sm:$0xff]  ;;  %v17221_v44 = vld [vmem:[#allocation238_spill] sm:$0xff]  ;;  %v14175_v43 = vmul.f32 %v13818_v21, %v2624_v22  ;;  %v17234_v8 = vld [vmem:[#allocation248_spill] sm:$0xff] }
 0x589   :  { %6929 = vmatpush1.bf16.msra.mxu0 %v17211_v27  ;;  %v17216_v27 = vpack.c.bf16 %v13744_v33, %v17215_v47  ;;  %7274 = vmatpush1.bf16.msra.mxu1 %v6279_v29  ;;  %v3102_v33 = vsel %vm3072_vm3, %v17221_v44, %v17214_v28  ;;  %v17223_v47 = vld [vmem:[#allocation316_spill] sm:$0xff]  ;;  %v6074_v2 = vsel %vm6050_vm9, %v6001_v13, %v6009_v10  ;;  %v17226_v28 = vld [vmem:[#allocation82_spill] sm:$0xff]  ;;  %v17229_v0 = vld [vmem:[#allocation293_spill] sm:$0xff] }
 0x58a   :  { %17217 = vst [vmem:[#allocation46_spill] sm:$0xff] %v14160_v38  ;;  %17219 = vst [vmem:[#allocation5_spill] sm:$0xff] %v14164_v48  ;;  %5082 = vrot.lane.b32.xlu1 %v17220_v16, %s8772_s11  ;;  %v14184_v29 = vmul.f32 %v13830_v49, %v3098_v40  ;;  %v14187_v59 = vmul.f32 %v14164_v48, %v6073_v12  ;;  %v14190_v51 = vmul.f32 %v14164_v48, %v6074_v2  ;;  %v17227_v44 = vld [vmem:[#allocation136_spill] sm:$0xff]  ;;  %v17233_v40 = vld [vmem:[#allocation298_spill] sm:$0xff] }
 0x58b   :  { %6930 = vmatprep.subr.bf16.mxu0 %v17216_v27  ;;  %v14179_v27 = vrot.slane %v17223_v47, %v17222_v39  ;;  %v17228_v22 = vpack.c.bf16 %v17226_v28, %v17227_v44  ;;  %5080 = vrot.lane.b32.xlu0 %v17229_v0, %s8772_s11  ;;  %v14197_v17 = vpop.permute.xlu1 %6022  ;;  %v14200_v13 = vmul.f32 %v17231_v63, %v3572_v5  ;;  %v17236_v2 = vld [vmem:[#allocation62_spill] sm:$0xff]  ;;  %v6017_v63 = vpop.permute.xlu0 %6016  ;;  %v17255_v38 = vld [vmem:[#allocation239_spill] sm:$0xff] }
 0x58c   :  { %17224 = vst [vmem:[#allocation50_spill] sm:$0xff] %v14187_v59  ;;  %17225 = vst [vmem:[#allocation206_spill] sm:$0xff] %v14190_v51  ;;  %v2629_v12 = vsel %vm2598_vm2, %v17234_v8, %v17233_v40  ;;  %v14208_v48 = vrot.slane %v17236_v2, %v17235_v34  ;;  %v14212_v28 = vrot.slane %v17236_v2, %v17237_v14  ;;  %v17242_v2 = vld [vmem:[#allocation224_spill] sm:$0xff]  ;;  %v17247_v59 = vld [vmem:[#allocation307_spill] sm:$0xff] }
 0x58d   :  { %6931 = vmatpush1.bf16.msra.mxu0 %v17228_v22  ;;  %17230 = vst [vmem:[#allocation68_spill] sm:$0xff] %v14197_v17  ;;  %17232 = vst [vmem:[#allocation83_spill] sm:$0xff] %v14200_v13  ;;  %v17238_v44 = vpack.c.bf16 %v13980_v19, %v13974_v46  ;;  %v17239_v22 = vld [vmem:[#allocation170_spill] sm:$0xff]  ;;  %v14232_v19 = vmul.f32 %v13814_v50, %v3102_v33  ;;  %v2825_v8 = vpack.c.bf16 %v14175_v43, %v14068_v24  ;;  %v17246_v33 = vld [vmem:[#allocation72_spill] sm:$0xff] }
 0x58e   :  { %v14221_v5 = vsel %vm4022_vm5, %v17191_v20, %v17239_v22  ;;  %5090 = vrot.lane.b32.xlu1 %v16984_v32, %s8772_s11  ;;  %v17244_v22 = vld [vmem:[#allocation177_spill] sm:$0xff]  ;;  %v14249_v46 = vmul.f32 %v13798_v35, %v2629_v12  ;;  %v2604_v51 = vsel %vm2598_vm2, %v17247_v59, %v17246_v33  ;;  %v17249_v43 = vld [vmem:[#allocation306_spill] sm:$0xff] }
 0x58f   :  { %6932 = vmatprep.subr.bf16.mxu0 %v17238_v44  ;;  %17240 = vst [vmem:[#allocation8_spill] sm:$0xff] %v14221_v5  ;;  %v17241_v44 = vld [vmem:[#allocation287_spill] sm:$0xff]  ;;  %v14244_v13 = vsel %vm3547_vm4, %v17205_v6, %v17244_v22  ;;  %5088 = vrot.lane.b32.xlu0 %v16987_v7, %s8772_s11  ;;  %v14260_v6 = vpop.permute.xlu1 %3042  ;;  %v14268_v12 = vsel %vm2598_vm2, %v17233_v40, %v17249_v43  ;;  %v17250_v22 = vld [vmem:[#allocation252_spill] sm:$0xff]  ;;  %v17251_v59 = vld [vmem:[#allocation130_spill] sm:$0xff] }
 0x590   :  { %v14238_v20 = vsel %vm4022_vm5, %v17242_v2, %v17241_v44  ;;  %17245 = vst [vmem:[#allocation272_spill] sm:$0xff] %v14244_v13  ;;  %v17248_v2 = vpack.c.bf16 %v13959_v36, %v13946_v18  ;;  %v14274_v18 = vsel %vm2598_vm2, %v17251_v59, %v17250_v22  ;;  %v6065_v36 = vsel %vm6050_vm9, %v6015_v23, %v14197_v17  ;;  %v17252_v24 = vld [vmem:[#allocation57_spill] sm:$0xff]  ;;  %v17253_v5 = vld [vmem:[#allocation295_spill] sm:$0xff]  ;;  %v17256_v43 = vld [vmem:[#allocation318_spill] sm:$0xff]  ;;  %v14298_v17 = vpop.permute.xlu0 %6024 }
 0x591   :  { %17243 = vst [vmem:[#allocation202_spill] sm:$0xff] %v14238_v20  ;;  %v17254_v57 = vpack.c.bf16 %v17252_v24, %v17253_v5  ;;  %v14288_v40 = vsel %vm2598_vm2, %v17250_v22, %v17255_v38  ;;  %v17257_v59 = vld [vmem:[#allocation286_spill] sm:$0xff]  ;;  %17259 = vst [vmem:[#allocation19_spill] sm:$0xff] %v14298_v17  ;;  %v17261_v38 = vld [vmem:[#allocation73_spill] sm:$0xff]  ;;  %v14311_v22 = vmul.f32 %v14208_v48, %v2604_v51 }
 0x592   :  { %6933 = vmatpush1.bf16.msra.mxu0 %v17248_v2  ;;  %v6070_v2 = vsel %vm6050_vm9, %v6009_v10, %v6017_v63  ;;  %v2603_v20 = vsel %vm2598_vm2, %v17257_v59, %v17256_v43  ;;  %v17258_v44 = vld [vmem:[#allocation90_spill] sm:$0xff]  ;;  %5098 = vrot.lane.b32.xlu1 %v17177_v45, %s8772_s11  ;;  %v2599_v24 = vsel %vm2598_vm2, %v17256_v43, %v17261_v38  ;;  %v17262_v43 = vld [vmem:[#allocation53_spill] sm:$0xff] }
 0x593   :  { %6955 = vmatprep.subr.bf16.mxu0 %v17254_v57  ;;  %v2600_v10 = vsel %vm2598_vm2, %v17246_v33, %v17258_v44  ;;  %v17260_v57 = vld [vmem:[#allocation124_spill] sm:$0xff]  ;;  %v6069_v44 = vsel %vm6050_vm9, %v14099_v31, %v6015_v23  ;;  %v6066_v33 = vsel %vm6050_vm9, %v6017_v63, %v14298_v17  ;;  %v6248_v59 = vmul.f32 %v14043_v11, %v6065_v36  ;;  %v17263_v38 = vld [vmem:[#allocation141_spill] sm:$0xff]  ;;  %v3051_v31 = vpop.permute.xlu1 %3050  ;;  %v17265_v45 = vld [vmem:[#allocation74_spill] sm:$0xff] }
 0x594   :  { %v14304_v5 = vrot.slane %v17223_v47, %v17260_v57  ;;  %v6263_v13 = vmul.f32 %v14072_v52, %v6070_v2  ;;  %v6264_v57 = vmul.f32 %v14043_v11, %v6066_v33  ;;  %v17264_v51 = vpack.c.bf16 %v17262_v43, %v17263_v38  ;;  %5096 = vrot.lane.b32.xlu0 %v17179_v9, %s8772_s11  ;;  %v17266_v63 = vld [vmem:[#allocation322_spill] sm:$0xff]  ;;  %v3049_v43 = vpop.permute.xlu0 %3048  ;;  %v17269_v38 = vld [vmem:[#allocation79_spill] sm:$0xff] }
 0x595   :  { %6935 = vmatmul.mubr.bf16.vlgmr.msra.gmra.mrb[48].mxu0 %v17181_v26  ;;  %v2783_v23 = vmul.f32 %v14212_v28, %v2600_v10  ;;  %v2602_v26 = vsel %vm2598_vm2, %v17266_v63, %v17265_v45  ;;  %v17267_v36 = vpack.c.bf16 %v14005_v42, %v14002_v53  ;;  %v3082_v11 = vsel %vm3072_vm3, %v14260_v6, %v3051_v31  ;;  %v17268_v42 = vld [vmem:[#allocation323_spill] sm:$0xff] }
 0x596   :  { %6956 = vmatpush1.bf16.msra.mxu0 %v17264_v51  ;;  %6944 = vmatprep.mubr.bf16.mxu0 %v17185_v58  ;;  %v2766_v2 = vmul.f32 %v14208_v48, %v2603_v20  ;;  %v6247_v33 = vmul.f32 %v14072_v52, %v6069_v44  ;;  %v14343_v10 = vmul.f32 %v14304_v5, %v3082_v11  ;;  %v17270_v58 = vld [vmem:[#allocation324_spill] sm:$0xff]  ;;  %v17271_v20 = vld [vmem:[#allocation122_spill] sm:$0xff] }
 0x597   :  { %6957 = vmatprep.subr.bf16.mxu0 %v17267_v36  ;;  %5553 = vrot.lane.b32.xlu1 %v16942_v37, %s8773_s12  ;;  %v6296_v45 = vpack.c.bf16 %v6264_v57, %v6248_v59  ;;  %v2767_v53 = vmul.f32 %v14212_v28, %v2599_v24  ;;  %v2601_v51 = vsel %vm2598_vm2, %v17269_v38, %v17268_v42  ;;  %v3059_v24 = vpop.permute.xlu1 %3058 }
 0x598   :  { %v2606_v52 = vsel %vm2598_vm2, %v17270_v58, %v17266_v63  ;;  %v3081_v44 = vsel %vm3072_vm3, %v17271_v20, %v3049_v43  ;;  %v2815_v36 = vmul.f32 %v14212_v28, %v2602_v26  ;;  %v6295_v11 = vpack.c.bf16 %v6263_v13, %v6247_v33  ;;  %5551 = vrot.lane.b32.xlu0 %v16945_v25, %s8773_s12  ;;  %v17273_v33 = vld [vmem:[#allocation95_spill] sm:$0xff] }
 0x599   :  { %v14361_v59 = vmul.f32 %v14304_v5, %v3081_v44  ;;  %v17272_v57 = vpack.c.bf16 %v13992_v55, %v13977_v62  ;;  %v2830_v63 = vpack.c.bf16 %v14311_v22, %v2766_v2  ;;  %7275 = vmatprep.subr.bf16.mxu1 %v6296_v45  ;;  %v14371_v42 = vrot.slane %v17223_v47, %v17237_v14  ;;  %v3057_v55 = vpop.permute.xlu0 %3056  ;;  %v14381_v22 = vpop.f32.mrb[40].mxu1  ;;  %v17275_v2 = vld [vmem:[#allocation321_spill] sm:$0xff] }
 0x59a   :  { %v2831_v13 = vpack.c.bf16 %v2783_v23, %v2767_v53  ;;  %v2799_v26 = vmul.f32 %v14212_v28, %v2601_v51  ;;  %7276 = vmatpush1.bf16.msra.mxu1 %v6295_v11  ;;  %v3074_v62 = vsel %vm3072_vm3, %v3059_v24, %v17273_v33  ;;  %17274 = vst [vmem:[#allocation205_spill] sm:$0xff] %v14381_v22  ;;  %v17276_v45 = vld [vmem:[#allocation257_spill] sm:$0xff]  ;;  %v14392_v51 = vpop.f32.mrb[41].mxu1  ;;  %v17279_v33 = vld [vmem:[#allocation56_spill] sm:$0xff] }
 0x59b   :  { %6958 = vmatpush1.bf16.msra.mxu0 %v17272_v57  ;;  %5561 = vrot.lane.b32.xlu1 %v16954_v30, %s8773_s12  ;;  %v2605_v23 = vsel %vm2598_vm2, %v17275_v2, %v17269_v38  ;;  %v2814_v28 = vmul.f32 %v14208_v48, %v2606_v52  ;;  %v3073_v53 = vsel %vm3072_vm3, %v3057_v55, %v17276_v45  ;;  %v3047_v38 = vpop.permute.xlu1 %3046  ;;  %v14403_v57 = vpop.f32.mrb[42].mxu1 }
 0x59c   :  { %7114 = vmatprep.subr.bf16.mxu0 %v2825_v8  ;;  %7432 = vmatprep.subr.bf16.mxu1 %v2831_v13  ;;  %17277 = vst [vmem:[#allocation45_spill] sm:$0xff] %v14392_v51  ;;  %v14396_v44 = vrot.slane %v17223_v47, %v17235_v34  ;;  %v3078_v11 = vsel %vm3072_vm3, %v3051_v31, %v3059_v24  ;;  %17278 = vst [vmem:[#allocation12_spill] sm:$0xff] %v14403_v57  ;;  %v17280_v31 = vld [vmem:[#allocation314_spill] sm:$0xff]  ;;  %v14414_v45 = vpop.f32.mrb[43].mxu1  ;;  %v17328_v57 = vld [vmem:[#allocation29_spill] sm:$0xff] }
 0x59d   :  { %6945 = vmatmul.mubr.bf16.gmra.mrb[52].mxu0 %v17203_v4  ;;  %5559 = vrot.lane.b32.xlu0 %v16960_v61, %s8773_s12  ;;  %v2847_v52 = vpack.c.bf16 %v2815_v36, %v2799_v26  ;;  %v3258_v4 = vmul.f32 %v14371_v42, %v3074_v62  ;;  %v3077_v13 = vsel %vm3072_vm3, %v3049_v43, %v3057_v55  ;;  %v3045_v43 = vpop.permute.xlu0 %3044  ;;  %v17282_v55 = vld [vmem:[#allocation302_spill] sm:$0xff] }
 0x59e   :  { %6987 = vmatprep.mubr.bf16.mxu0 %v17042_v60  ;;  %v3242_v47 = vmul.f32 %v14371_v42, %v3073_v53  ;;  %8516 = vmatmul.mubr.msk.bf16.vlgmr.msra.gmra.mrb[56].mxu1 %vm6683_vm10, %v17279_v33  ;;  %v3088_v24 = vsel %vm3072_vm3, %v17280_v31, %v3047_v38  ;;  %17281 = vst [vmem:[#allocation186_spill] sm:$0xff] %v14414_v45  ;;  %v17283_v53 = vld [vmem:[#allocation117_spill] sm:$0xff] }
 0x59f   :  { %v2808_v36 = vmul.f32 %v13798_v35, %v14274_v18  ;;  %v2798_v26 = vmul.f32 %v14208_v48, %v2605_v23  ;;  %7433 = vmatpush1.bf16.msra.mxu1 %v2830_v63  ;;  %v14420_v62 = vmul.f32 %v14179_v27, %v3088_v24  ;;  %5569 = vrot.lane.b32.xlu1 %v17125_v56, %s8773_s12  ;;  %v17284_v35 = vld [vmem:[#allocation312_spill] sm:$0xff] }
 0x5a0   :  { %v3103_v31 = vsel %vm3072_vm3, %v17283_v53, %v17282_v55  ;;  %v2809_v8 = vmul.f32 %v13818_v21, %v14288_v40  ;;  %7434 = vmatprep.subr.bf16.mxu1 %v2847_v52  ;;  %v3087_v48 = vsel %vm3072_vm3, %v17284_v35, %v3045_v43  ;;  %7315 = vmatprep.mubr.bf16.mxu1 %v17042_v60  ;;  %v3055_v53 = vpop.permute.xlu1 %3054  ;;  %v17285_v52 = vld [vmem:[#allocation310_spill] sm:$0xff] }
 0x5a1   :  { %v2846_v18 = vpack.c.bf16 %v2814_v28, %v2798_v26  ;;  %v3257_v63 = vmul.f32 %v14396_v44, %v3078_v11  ;;  %v3241_v23 = vmul.f32 %v14396_v44, %v3077_v13  ;;  %v14437_v24 = vmul.f32 %v14179_v27, %v3087_v48  ;;  %5567 = vrot.lane.b32.xlu0 %v17135_v15, %s8773_s12  ;;  %v3053_v22 = vpop.permute.xlu0 %3052  ;;  %v17299_v26 = vld [vmem:[#allocation187_spill] sm:$0xff] }
 0x5a2   :  { %v2793_v40 = vmul.f32 %v13818_v21, %v14268_v12  ;;  %v3099_v35 = vsel %vm3072_vm3, %v17282_v55, %v17285_v52  ;;  %v3084_v28 = vsel %vm3072_vm3, %v3047_v38, %v3055_v53  ;;  %v3306_v11 = vpack.c.bf16 %v3258_v4, %v3242_v47  ;;  %v14457_v21 = vpop.f32.mrb[44].mxu1  ;;  %v17287_v12 = vld [vmem:[#allocation58_spill] sm:$0xff]  ;;  %v17288_v55 = vld [vmem:[#allocation275_spill] sm:$0xff] }
 0x5a3   :  { %v2840_v13 = vpack.c.bf16 %v2808_v36, %v14249_v46  ;;  %7435 = vmatpush1.bf16.msra.mxu1 %v2846_v18  ;;  %v14453_v48 = vmul.f32 %v14304_v5, %v3084_v28  ;;  %5557 = vrot.lane.b32.xlu1 %v17220_v16, %s8773_s12  ;;  %17286 = vst [vmem:[#allocation246_spill] sm:$0xff] %v14457_v21  ;;  %v14467_v47 = vpop.f32.mrb[45].mxu1  ;;  %v17290_v36 = vld [vmem:[#allocation254_spill] sm:$0xff] }
 0x5a4   :  { %v3104_v38 = vsel %vm3072_vm3, %v17288_v55, %v17287_v12  ;;  %7436 = vmatprep.subr.bf16.mxu1 %v3306_v11  ;;  %v3083_v46 = vsel %vm3072_vm3, %v3045_v43, %v3053_v22  ;;  %v2841_v4 = vpack.c.bf16 %v2809_v8, %v2793_v40  ;;  %17289 = vst [vmem:[#allocation241_spill] sm:$0xff] %v14467_v47  ;;  %v14481_v8 = vpop.f32.mrb[46].mxu1  ;;  %v17293_v43 = vld [vmem:[#allocation283_spill] sm:$0xff]  ;;  %v17294_v40 = vld [vmem:[#allocation24_spill] sm:$0xff] }
 0x5a5   :  { %8510 = vmatmul.mubr.msk.bf16.vlgmr.msra.gmra.mrb[48].mxu0 %vm6683_vm10, %v17279_v33  ;;  %v3100_v18 = vsel %vm3072_vm3, %v17287_v12, %v17290_v36  ;;  %v3305_v52 = vpack.c.bf16 %v3257_v63, %v3241_v23  ;;  %v14474_v28 = vmul.f32 %v14304_v5, %v3083_v46  ;;  %v17291_v11 = vpack.c.bf16 %v14150_v3, %v14048_v41  ;;  %v3063_v33 = vpop.permute.xlu1 %3062  ;;  %v17295_v41 = vld [vmem:[#allocation304_spill] sm:$0xff]  ;;  %v14494_v23 = vpop.f32.mrb[47].mxu1  ;;  %v17297_v36 = vld [vmem:[#allocation154_spill] sm:$0xff] }
 0x5a6   :  { %5555 = vrot.lane.b32.xlu0 %v17229_v0, %s8773_s12  ;;  %17292 = vst [vmem:[#allocation236_spill] sm:$0xff] %v14481_v8  ;;  %8517 = vmatmul.mubr.msk.bf16.gmra.mrb[60].mxu1 %vm6683_vm10, %v17293_v43  ;;  %v3076_v63 = vsel %vm3072_vm3, %v3063_v33, %v17294_v40  ;;  %v3080_v5 = vsel %vm3072_vm3, %v3055_v53, %v3063_v33  ;;  %17296 = vst [vmem:[#allocation229_spill] sm:$0xff] %v14494_v23  ;;  %v3061_v46 = vpop.permute.xlu0 %3060  ;;  %v17298_v33 = vld [vmem:[#allocation278_spill] sm:$0xff] }
 0x5a7   :  { %7115 = vmatpush1.bf16.msra.mxu0 %v17291_v11  ;;  %v14492_v3 = vrot.slane %v17295_v41, %v17222_v39  ;;  %7437 = vmatpush1.bf16.msra.mxu1 %v3305_v52  ;;  %v3289_v12 = vmul.f32 %v14396_v44, %v3080_v5  ;;  %v3290_v55 = vmul.f32 %v14371_v42, %v3076_v63 }
 0x5a8   :  { %7116 = vmatprep.subr.bf16.mxu0 %v2841_v4  ;;  %5565 = vrot.lane.b32.xlu1 %v16984_v32, %s8773_s12  ;;  %v3284_v53 = vmul.f32 %v13830_v49, %v3100_v18  ;;  %v3075_v11 = vsel %vm3072_vm3, %v3061_v46, %v17297_v36  ;;  %v3079_v52 = vsel %vm3072_vm3, %v3053_v22, %v3061_v46 }
 0x5a9   :  { %6997 = vmatprep.mubr.bf16.mxu0 %v17042_v60  ;;  %7464 = vmatprep.mubr.bf16.mxu1 %v17298_v33  ;;  %v3283_v40 = vmul.f32 %v13814_v50, %v3104_v38  ;;  %v3273_v63 = vmul.f32 %v14396_v44, %v3079_v52  ;;  %v3274_v5 = vmul.f32 %v14371_v42, %v3075_v11  ;;  %v3518_v18 = vpop.permute.xlu1 %3517  ;;  %v17301_v38 = vld [vmem:[#allocation178_spill] sm:$0xff]  ;;  %v17303_v52 = vld [vmem:[#allocation299_spill] sm:$0xff] }
 0x5aa   :  { %5563 = vrot.lane.b32.xlu0 %v16987_v7, %s8773_s12  ;;  %v3299_v36 = vpack.c.bf16 %v14232_v19, %v17299_v26  ;;  %v3267_v22 = vmul.f32 %v13814_v50, %v3103_v31  ;;  %v3268_v46 = vmul.f32 %v13830_v49, %v3099_v35  ;;  %v17300_v4 = vpack.c.bf16 %v14184_v29, %v14121_v54  ;;  %v3516_v11 = vpop.permute.xlu0 %3515  ;;  %v17304_v50 = vld [vmem:[#allocation124_spill] sm:$0xff]  ;;  %v17306_v54 = vld [vmem:[#allocation145_spill] sm:$0xff]  ;;  %v17307_v35 = vld [vmem:[#allocation311_spill] sm:$0xff] }
 0x5ab   :  { %7117 = vmatpush1.bf16.msra.mxu0 %v2840_v13  ;;  %v3561_v42 = vsel %vm3547_vm4, %v17301_v38, %v3518_v18  ;;  %v3321_v44 = vpack.c.bf16 %v3289_v12, %v3273_v63  ;;  %v3322_v19 = vpack.c.bf16 %v3290_v55, %v3274_v5  ;;  %v14532_v49 = vrot.slane %v17295_v41, %v17304_v50  ;;  %v17305_v31 = vld [vmem:[#allocation272_spill] sm:$0xff]  ;;  %v17308_v26 = vld [vmem:[#allocation305_spill] sm:$0xff]  ;;  %v17310_v38 = vld [vmem:[#allocation255_spill] sm:$0xff] }
 0x5ac   :  { %7118 = vmatprep.subr.bf16.mxu0 %v17300_v4  ;;  %v14526_v13 = vmul.f32 %v14492_v3, %v3561_v42  ;;  %5573 = vrot.lane.b32.xlu1 %v17303_v52, %s8773_s12  ;;  %v3727_v29 = vmul.f32 %v17306_v54, %v17305_v31  ;;  %v3574_v12 = vsel %vm3547_vm4, %v17308_v26, %v17307_v35  ;;  %v17309_v4 = vld [vmem:[#allocation164_spill] sm:$0xff]  ;;  %v17311_v42 = vld [vmem:[#allocation265_spill] sm:$0xff] }
 0x5ad   :  { %v3560_v63 = vsel %vm3547_vm4, %v17309_v4, %v3516_v11  ;;  %8511 = vmatmul.mubr.msk.bf16.gmra.mrb[52].mxu0 %vm6683_vm10, %v17293_v43  ;;  %v3316_v55 = vpack.c.bf16 %v3284_v53, %v3268_v46  ;;  %v3315_v5 = vpack.c.bf16 %v3283_v40, %v3267_v22  ;;  %v3575_v8 = vsel %vm3547_vm4, %v17311_v42, %v17310_v38  ;;  %v3526_v35 = vpop.permute.xlu1 %3525  ;;  %v17313_v4 = vld [vmem:[#allocation266_spill] sm:$0xff] }
 0x5ae   :  { %17302 = vst [vmem:[#allocation98_spill] sm:$0xff] %v14526_v13  ;;  %v14550_v31 = vmul.f32 %v14492_v3, %v3560_v63  ;;  %5571 = vrot.lane.b32.xlu0 %v17179_v9, %s8773_s12  ;;  %v3579_v43 = vsel %vm3547_vm4, %v17313_v4, %v17311_v42  ;;  %7438 = vmatprep.subr.bf16.mxu1 %v3322_v19  ;;  %v3524_v46 = vpop.permute.xlu0 %3523  ;;  %v17315_v63 = vld [vmem:[#allocation287_spill] sm:$0xff] }
 0x5af   :  { %7119 = vmatpush1.bf16.msra.mxu0 %v3299_v36  ;;  %v3557_v53 = vsel %vm3547_vm4, %v3518_v18, %v3526_v35  ;;  %v14562_v40 = vrot.slane %v17295_v41, %v17235_v34  ;;  %7439 = vmatpush1.bf16.msra.mxu1 %v3321_v44  ;;  %v14573_v19 = vrot.slane %v17295_v41, %v17237_v14  ;;  %v17314_v18 = vld [vmem:[#allocation294_spill] sm:$0xff]  ;;  %v17316_v42 = vld [vmem:[#allocation83_spill] sm:$0xff]  ;;  %v17319_v41 = vld [vmem:[#allocation169_spill] sm:$0xff] }
 0x5b0   :  { %17312 = vst [vmem:[#allocation168_spill] sm:$0xff] %v14550_v31  ;;  %7120 = vmatprep.subr.bf16.mxu0 %v3316_v55  ;;  %v14567_v22 = vmul.f32 %v14532_v49, %v3557_v53  ;;  %6028 = vrot.lane.b32.xlu1 %v16942_v37, %s8774_s13  ;;  %v4048_v55 = vsel %vm4022_vm5, %v17315_v63, %v17314_v18  ;;  %v17317_v53 = vld [vmem:[#allocation202_spill] sm:$0xff]  ;;  %v17318_v36 = vld [vmem:[#allocation291_spill] sm:$0xff]  ;;  %v17322_v63 = vld [vmem:[#allocation161_spill] sm:$0xff] }
 0x5b1   :  { %v3759_v38 = vmul.f32 %v17306_v54, %v3575_v8  ;;  %v3556_v44 = vsel %vm3547_vm4, %v3516_v11, %v3524_v46  ;;  %v3775_v4 = vpack.c.bf16 %v3727_v29, %v17316_v42  ;;  %7146 = vmatprep.mubr.bf16.mxu0 %v17298_v33  ;;  %v14586_v21 = vmul.f32 %v17318_v36, %v17317_v53  ;;  %v3534_v8 = vpop.permute.xlu1 %3533  ;;  %v17321_v33 = vld [vmem:[#allocation162_spill] sm:$0xff]  ;;  %v17375_v13 = vld [vmem:[#allocation131_spill] sm:$0xff] }
 0x5b2   :  { %v3578_v23 = vsel %vm3547_vm4, %v17319_v41, %v17308_v26  ;;  %v14593_v18 = vmul.f32 %v14532_v49, %v3556_v44  ;;  %6026 = vrot.lane.b32.xlu0 %v16945_v25, %s8774_s13  ;;  %v3743_v11 = vmul.f32 %v17306_v54, %v3574_v12  ;;  %v3758_v29 = vmul.f32 %v17321_v33, %v3579_v43  ;;  %v17323_v53 = vld [vmem:[#allocation142_spill] sm:$0xff]  ;;  %v3532_v47 = vpop.permute.xlu0 %3531  ;;  %v17324_v43 = vld [vmem:[#allocation317_spill] sm:$0xff] }
 0x5b3   :  { %7121 = vmatpush1.bf16.msra.mxu0 %v3315_v5  ;;  %v3549_v42 = vsel %vm3547_vm4, %v3534_v8, %v17322_v63  ;;  %v3553_v26 = vsel %vm3547_vm4, %v3526_v35, %v3534_v8  ;;  %v4202_v44 = vmul.f32 %v17323_v53, %v4048_v55  ;;  %v3742_v12 = vmul.f32 %v17321_v33, %v3578_v23  ;;  %v17325_v8 = vld [vmem:[#allocation165_spill] sm:$0xff]  ;;  %v17327_v54 = vld [vmem:[#allocation46_spill] sm:$0xff] }
 0x5b4   :  { %17320 = vst [vmem:[#allocation87_spill] sm:$0xff] %v14593_v18  ;;  %7122 = vmatprep.subr.bf16.mxu0 %v3775_v4  ;;  %v3732_v5 = vmul.f32 %v14562_v40, %v3553_v26  ;;  %v3733_v41 = vmul.f32 %v14573_v19, %v3549_v42  ;;  %6036 = vrot.lane.b32.xlu1 %v16954_v30, %s8774_s13  ;;  %v17326_v63 = vld [vmem:[#allocation309_spill] sm:$0xff] }
 0x5b5   :  { %v3548_v4 = vsel %vm3547_vm4, %v3532_v47, %v17324_v43  ;;  %v3552_v35 = vsel %vm3547_vm4, %v3524_v46, %v3532_v47  ;;  %v3791_v55 = vpack.c.bf16 %v3759_v38, %v3743_v11  ;;  %v4049_v42 = vsel %vm4022_vm5, %v17326_v63, %v17325_v8  ;;  %v3522_v33 = vpop.permute.xlu1 %3521  ;;  %v17330_v43 = vld [vmem:[#allocation8_spill] sm:$0xff]  ;;  %v17332_v11 = vld [vmem:[#allocation126_spill] sm:$0xff] }
 0x5b6   :  { %v3716_v26 = vmul.f32 %v14562_v40, %v3552_v35  ;;  %v3717_v51 = vmul.f32 %v14573_v19, %v3548_v4  ;;  %v17329_v23 = vpack.c.bf16 %v17327_v54, %v17328_v57  ;;  %6034 = vrot.lane.b32.xlu0 %v16960_v61, %s8774_s13  ;;  %v4186_v47 = vmul.f32 %v17323_v53, %v17330_v43  ;;  %v17331_v38 = vld [vmem:[#allocation80_spill] sm:$0xff]  ;;  %v17333_v35 = vld [vmem:[#allocation315_spill] sm:$0xff]  ;;  %v17334_v57 = vld [vmem:[#allocation85_spill] sm:$0xff] }
 0x5b7   :  { %v3790_v46 = vpack.c.bf16 %v3758_v29, %v3742_v12  ;;  %v4054_v8 = vsel %vm4022_vm5, %v17332_v11, %v17331_v38  ;;  %v3563_v4 = vsel %vm3547_vm4, %v17333_v35, %v3522_v33  ;;  %v4050_v54 = vsel %vm4022_vm5, %v17331_v38, %v17334_v57  ;;  %v3520_v29 = vpop.permute.xlu0 %3519  ;;  %v17336_v43 = vld [vmem:[#allocation63_spill] sm:$0xff]  ;;  %v17337_v35 = vld [vmem:[#allocation313_spill] sm:$0xff] }
 0x5b8   :  { %7123 = vmatpush1.bf16.msra.mxu0 %v17329_v23  ;;  %v3780_v23 = vpack.c.bf16 %v3732_v5, %v3716_v26  ;;  %v14642_v45 = vmul.f32 %v14492_v3, %v3563_v4  ;;  %6044 = vrot.lane.b32.xlu1 %v17125_v56, %s8774_s13  ;;  %v3781_v12 = vpack.c.bf16 %v3733_v41, %v3717_v51  ;;  %v17338_v5 = vld [vmem:[#allocation151_spill] sm:$0xff]  ;;  %v17339_v38 = vld [vmem:[#allocation69_spill] sm:$0xff]  ;;  %v17340_v4 = vld [vmem:[#allocation36_spill] sm:$0xff] }
 0x5b9   :  { %7124 = vmatprep.subr.bf16.mxu0 %v3791_v55  ;;  %v4249_v55 = vpack.c.bf16 %v14586_v21, %v17336_v43  ;;  %v4218_v11 = vmul.f32 %v17323_v53, %v4049_v42  ;;  %v3562_v17 = vsel %vm3547_vm4, %v17337_v35, %v3520_v29  ;;  %v4250_v37 = vpack.c.bf16 %v4202_v44, %v4186_v47  ;;  %v3530_v21 = vpop.permute.xlu1 %3529  ;;  %v17342_v42 = vld [vmem:[#allocation100_spill] sm:$0xff]  ;;  %v17343_v47 = vld [vmem:[#allocation247_spill] sm:$0xff]  ;;  %v17346_v43 = vld [vmem:[#allocation158_spill] sm:$0xff] }
 0x5ba   :  { %17335 = vst [vmem:[#allocation274_spill] sm:$0xff] %v14642_v45  ;;  %v4053_v26 = vsel %vm4022_vm5, %v17338_v5, %v17326_v63  ;;  %v14658_v57 = vrot.slane %v17340_v4, %v17339_v38  ;;  %v14661_v51 = vmul.f32 %v14492_v3, %v3562_v17  ;;  %6042 = vrot.lane.b32.xlu0 %v17135_v15, %s8774_s13  ;;  %v17347_v35 = vld [vmem:[#allocation212_spill] sm:$0xff]  ;;  %v17355_v3 = vld [vmem:[#allocation43_spill] sm:$0xff] }
 0x5bb   :  { %v4233_v41 = vmul.f32 %v17318_v36, %v4054_v8  ;;  %v4234_v44 = vmul.f32 %v17323_v53, %v4050_v54  ;;  %7440 = vmatprep.subr.bf16.mxu1 %v3781_v12  ;;  %v3559_v63 = vsel %vm3547_vm4, %v3522_v33, %v3530_v21  ;;  %v4650_v17 = vsel %vm4625_vm6, %v17343_v47, %v17342_v42  ;;  %v3528_v8 = vpop.permute.xlu0 %3527  ;;  %v17345_v53 = vld [vmem:[#allocation77_spill] sm:$0xff]  ;;  %v17348_v5 = vld [vmem:[#allocation4_spill] sm:$0xff] }
 0x5bc   :  { %17341 = vst [vmem:[#allocation270_spill] sm:$0xff] %v14661_v51  ;;  %7125 = vmatpush1.bf16.msra.mxu0 %v3790_v46  ;;  %7441 = vmatpush1.bf16.msra.mxu1 %v3780_v23  ;;  %v14676_v46 = vmul.f32 %v14532_v49, %v3559_v63  ;;  %v14683_v33 = vrot.slane %v17340_v4, %v17345_v53  ;;  %v17364_v51 = vld [vmem:[#allocation185_spill] sm:$0xff] }
 0x5bd   :  { %7126 = vmatprep.subr.bf16.mxu0 %v4250_v37  ;;  %6032 = vrot.lane.b32.xlu1 %v17220_v16, %s8774_s13  ;;  %v4217_v37 = vmul.f32 %v17318_v36, %v4053_v26  ;;  %v3558_v54 = vsel %vm3547_vm4, %v3520_v29, %v3528_v8  ;;  %v4266_v12 = vpack.c.bf16 %v4234_v44, %v4218_v11  ;;  %v3538_v36 = vpop.permute.xlu1 %3537  ;;  %v17350_v11 = vld [vmem:[#allocation92_spill] sm:$0xff] }
 0x5be   :  { %17344 = vst [vmem:[#allocation54_spill] sm:$0xff] %v14676_v46  ;;  %v4651_v23 = vsel %vm4625_vm6, %v17347_v35, %v17346_v43  ;;  %v14693_v63 = vrot.slane %v17348_v5, %v17339_v38  ;;  %v14696_v47 = vmul.f32 %v14532_v49, %v3558_v54  ;;  %6030 = vrot.lane.b32.xlu0 %v17229_v0, %s8774_s13  ;;  %v17357_v0 = vld [vmem:[#allocation89_spill] sm:$0xff] }
 0x5bf   :  { %v4265_v26 = vpack.c.bf16 %v4233_v41, %v4217_v37  ;;  %v14701_v29 = vmul.f32 %v14658_v57, %v4650_v17  ;;  %v3551_v44 = vsel %vm3547_vm4, %v3538_v36, %v17350_v11  ;;  %v3555_v35 = vsel %vm3547_vm4, %v3530_v21, %v3538_v36  ;;  %v3536_v54 = vpop.permute.xlu0 %3535  ;;  %v17351_v41 = vld [vmem:[#allocation320_spill] sm:$0xff]  ;;  %v17353_v11 = vld [vmem:[#allocation181_spill] sm:$0xff] }
 0x5c0   :  { %17349 = vst [vmem:[#allocation214_spill] sm:$0xff] %v14696_v47  ;;  %7127 = vmatpush1.bf16.msra.mxu0 %v4249_v55  ;;  %v3764_v49 = vmul.f32 %v14562_v40, %v3555_v35  ;;  %v3765_v55 = vmul.f32 %v14573_v19, %v3551_v44  ;;  %v14714_v17 = vrot.slane %v17351_v41, %v17222_v39  ;;  %v17354_v36 = vld [vmem:[#allocation76_spill] sm:$0xff] }
 0x5c1   :  { %7128 = vmatprep.subr.bf16.mxu0 %v4266_v12  ;;  %6040 = vrot.lane.b32.xlu1 %v16984_v32, %s8774_s13  ;;  %v14719_v12 = vmul.f32 %v14658_v57, %v4651_v23  ;;  %v4646_v21 = vsel %vm4625_vm6, %v17342_v42, %v17353_v11  ;;  %v3550_v44 = vsel %vm3547_vm4, %v3536_v54, %v17354_v36  ;;  %v3993_v42 = vpop.permute.xlu1 %3992  ;;  %v17356_v36 = vld [vmem:[#allocation65_spill] sm:$0xff]  ;;  %v17371_v47 = vld [vmem:[#allocation244_spill] sm:$0xff] }
 0x5c2   :  { %17352 = vst [vmem:[#allocation219_spill] sm:$0xff] %v14714_v17  ;;  %v3554_v35 = vsel %vm3547_vm4, %v3528_v8, %v3536_v54  ;;  %v4647_v37 = vsel %vm4625_vm6, %v17346_v43, %v17355_v3  ;;  %v3749_v16 = vmul.f32 %v14573_v19, %v3550_v44  ;;  %6038 = vrot.lane.b32.xlu0 %v16987_v7, %s8774_s13  ;;  %v17359_v43 = vld [vmem:[#allocation251_spill] sm:$0xff] }
 0x5c3   :  { %v3748_v23 = vmul.f32 %v14562_v40, %v3554_v35  ;;  %v4649_v8 = vsel %vm4625_vm6, %v17357_v0, %v17356_v36  ;;  %v14746_v3 = vrot.slane %v17348_v5, %v17345_v53  ;;  %v17358_v40 = vld [vmem:[#allocation263_spill] sm:$0xff]  ;;  %v3991_v11 = vpop.permute.xlu0 %3990  ;;  %v14761_v25 = vrot.slane %v17351_v41, %v17304_v50 }
 0x5c4   :  { %7129 = vmatpush1.bf16.msra.mxu0 %v4265_v26  ;;  %v17360_v19 = vpack.c.bf16 %v17358_v40, %v17359_v43  ;;  %v17361_v26 = vld [vmem:[#allocation296_spill] sm:$0xff]  ;;  %v3797_v36 = vpack.c.bf16 %v3765_v55, %v3749_v16  ;;  %v4789_v40 = vmul.f32 %v14683_v33, %v4646_v21  ;;  %v4805_v43 = vmul.f32 %v14683_v33, %v4647_v37  ;;  %v6630_v16 = vld [vmem:[%s15678_s6 + $0x8] sm:$0xff]  ;;  %v14775_v55 = vpop.f32.mrb[48].mxu1  ;;  %v17368_v21 = vld [vmem:[#allocation231_spill] sm:$0xff] }
 0x5c5   :  { %v4036_v54 = vsel %vm4022_vm5, %v17361_v26, %v3993_v42  ;;  %v3796_v44 = vpack.c.bf16 %v3764_v49, %v3748_v23  ;;  %6048 = vrot.lane.b32.xlu1 %v17303_v52, %s8774_s13  ;;  %v17365_v23 = vld [vmem:[#allocation171_spill] sm:$0xff]  ;;  %17366 = vst [vmem:[#allocation243_spill] sm:$0xff] %v14775_v55  ;;  %v4001_v55 = vpop.permute.xlu1 %4000  ;;  %v14793_v31 = vpop.f32.mrb[49].mxu1 }
 0x5c6   :  { %7130 = vmatprep.subr.bf16.mxu0 %v17360_v19  ;;  %v14755_v35 = vmul.f32 %v14714_v17, %v4036_v54  ;;  %v17363_v19 = vld [vmem:[#allocation146_spill] sm:$0xff]  ;;  %v4035_v26 = vsel %vm4022_vm5, %v17365_v23, %v3991_v11  ;;  %v17367_v54 = vld [vmem:[#allocation112_spill] sm:$0xff]  ;;  %6046 = vrot.lane.b32.xlu0 %v17179_v9, %s8774_s13  ;;  %17373 = vst [vmem:[#allocation180_spill] sm:$0xff] %v14793_v31  ;;  %v17380_v31 = vld [vmem:[#allocation109_spill] sm:$0xff] }
 0x5c7   :  { %v4652_v49 = vsel %vm4625_vm6, %v17364_v51, %v17363_v19  ;;  %v4648_v37 = vsel %vm4625_vm6, %v17363_v19, %v17367_v54  ;;  %v4653_v51 = vsel %vm4625_vm6, %v17368_v21, %v17357_v0  ;;  %v14786_v45 = vmul.f32 %v14714_v17, %v4035_v26  ;;  %v17370_v23 = vld [vmem:[#allocation18_spill] sm:$0xff]  ;;  %7442 = vmatprep.subr.bf16.mxu1 %v3797_v36  ;;  %v14808_v26 = vpop.f32.mrb[50].mxu1 }
 0x5c8   :  { %17362 = vst [vmem:[#allocation116_spill] sm:$0xff] %v14755_v35  ;;  %v17372_v46 = vpack.c.bf16 %v17370_v23, %v17371_v47  ;;  %v4837_v19 = vmul.f32 %v14683_v33, %v4649_v8  ;;  %v17374_v54 = vld [vmem:[#allocation134_spill] sm:$0xff]  ;;  %v4032_v0 = vsel %vm4022_vm5, %v3993_v42, %v4001_v55  ;;  %v14806_v47 = vrot.slane %v17351_v41, %v17235_v34  ;;  %v14819_v36 = vpop.f32.mrb[51].mxu1 }
 0x5c9   :  { %17369 = vst [vmem:[#allocation188_spill] sm:$0xff] %v14786_v45  ;;  %v17376_v18 = vpack.c.bf16 %v17374_v54, %v17375_v13  ;;  %17377 = vst [vmem:[#allocation218_spill] sm:$0xff] %v14808_v26  ;;  %7443 = vmatpush1.bf16.msra.mxu1 %v3796_v44  ;;  %v14813_v13 = vmul.f32 %v14761_v25, %v4032_v0  ;;  %6640 = vperm.xlu1 %8741, %v6630_v16   ;;  %v6632_v44 = vld [vmem:[%s15678_s6 + $0x18] sm:$0xff] }
 0x5ca   :  { %7131 = vmatpush1.bf16.msra.mxu0 %v17372_v46  ;;  %v6629_v46 = vld [vmem:[%s15678_s6] sm:$0xff]  ;;  %v14817_v42 = vrot.slane %v17351_v41, %v17237_v14  ;;  %17378 = vst [vmem:[#allocation190_spill] sm:$0xff] %v14819_v36  ;;  %v4820_v21 = vmul.f32 %v14658_v57, %v4652_v49  ;;  %v4821_v23 = vmul.f32 %v14683_v33, %v4648_v37  ;;  %v17379_v0 = vld [vmem:[#allocation91_spill] sm:$0xff]  ;;  %v17382_v33 = vld [vmem:[#allocation269_spill] sm:$0xff] }
 0x5cb   :  { %7132 = vmatprep.subr.bf16.mxu0 %v17376_v18  ;;  %v3999_v18 = vpop.permute.xlu0 %3998  ;;  %v4853_v8 = vpack.c.bf16 %v4805_v43, %v4789_v40  ;;  %v4836_v16 = vmul.f32 %v14658_v57, %v4653_v51  ;;  %v5122_v41 = vsel %vm5100_vm7, %v17380_v31, %v17379_v0  ;;  %v17381_v49 = vld [vmem:[#allocation132_spill] sm:$0xff]  ;;  %6635 = vperm.xlu0 %8740, %v6629_v46   ;;  %v14839_v40 = vpop.f32.mrb[52].mxu1  ;;  %v17385_v43 = vld [vmem:[#allocation23_spill] sm:$0xff]  ;;  %v17386_v36 = vld [vmem:[#allocation189_spill] sm:$0xff] }
 0x5cc   :  { %v4031_v54 = vsel %vm4022_vm5, %v3991_v11, %v3999_v18  ;;  %v17383_v37 = vpack.c.bf16 %v17381_v49, %v17382_v33  ;;  %v4009_v11 = vpop.permute.xlu1 %4008  ;;  %17384 = vst [vmem:[#allocation222_spill] sm:$0xff] %v14839_v40  ;;  %v5121_v57 = vsel %vm5100_vm7, %v17386_v36, %v17385_v43  ;;  %v17387_v51 = vld [vmem:[#allocation176_spill] sm:$0xff]  ;;  %v4869_v45 = vpack.c.bf16 %v4837_v19, %v4821_v23  ;;  %v6631_v46 = vld [vmem:[%s15678_s6 + $0x10] sm:$0xff]  ;;  %v17388_v49 = vld [vmem:[#allocation279_spill] sm:$0xff] }
 0x5cd   :  { %v14834_v26 = vmul.f32 %v14761_v25, %v4031_v54  ;;  %v4024_v0 = vsel %vm4022_vm5, %v4009_v11, %v17387_v51  ;;  %v4028_v54 = vsel %vm4022_vm5, %v4001_v55, %v4009_v11  ;;  %v5126_v33 = vsel %vm5100_vm7, %v17388_v49, %v17380_v31  ;;  %6650 = vperm.xlu1 %8741, %v6632_v44   ;;  %v17389_v55 = vld [vmem:[#allocation133_spill] sm:$0xff]  ;;  %v17390_v11 = vld [vmem:[#allocation156_spill] sm:$0xff]  ;;  %v17392_v44 = vld [vmem:[#allocation26_spill] sm:$0xff] }
 0x5ce   :  { %7133 = vmatpush1.bf16.msra.mxu0 %v17383_v37  ;;  %v4207_v37 = vmul.f32 %v14806_v47, %v4028_v54  ;;  %v5125_v19 = vsel %vm5100_vm7, %v17389_v55, %v17386_v36  ;;  %v5280_v23 = vmul.f32 %v14746_v3, %v5122_v41  ;;  %v17393_v49 = vld [vmem:[#allocation42_spill] sm:$0xff]  ;;  %v17394_v41 = vpack.c.bf16 %v14719_v12, %v14701_v29  ;;  %v7603_v29 = vld [vmem:[%s15679_s8] sm:$0xff] }
 0x5cf   :  { %7134 = vmatprep.subr.bf16.mxu0 %v4853_v8  ;;  %v4208_v8 = vmul.f32 %v14817_v42, %v4024_v0  ;;  %v4007_v43 = vpop.permute.xlu0 %4006  ;;  %v14871_v0 = vpop.f32.mrb[53].mxu1  ;;  %v5124_v51 = vsel %vm5100_vm7, %v17393_v49, %v17392_v44  ;;  %6645 = vperm.xlu0 %8740, %v6631_v46   ;;  %v17396_v44 = vld [vmem:[#allocation216_spill] sm:$0xff]  ;;  %v5263_v46 = vmul.f32 %v14693_v63, %v5125_v19 }
 0x5d0   :  { %v4023_v31 = vsel %vm4022_vm5, %v4007_v43, %v17390_v11  ;;  %v4027_v54 = vsel %vm4022_vm5, %v3999_v18, %v4007_v43  ;;  %17391 = vst [vmem:[#allocation102_spill] sm:$0xff] %v14871_v0  ;;  %v14882_v55 = vpop.permute.xlu1 %3996  ;;  %v14884_v11 = vpop.f32.mrb[54].mxu1  ;;  %v4868_v18 = vpack.c.bf16 %v4836_v16, %v4820_v21  ;;  %v5264_v43 = vmul.f32 %v14746_v3, %v5121_v57  ;;  %v17399_v21 = vld [vmem:[#allocation7_spill] sm:$0xff] }
 0x5d1   :  { %v4191_v40 = vmul.f32 %v14806_v47, %v4027_v54  ;;  %v4192_v36 = vmul.f32 %v14817_v42, %v4023_v31  ;;  %17395 = vst [vmem:[#allocation199_spill] sm:$0xff] %v14884_v11  ;;  %v5279_v0 = vmul.f32 %v14693_v63, %v5126_v33  ;;  %v5128_v54 = vsel %vm5100_vm7, %v17396_v44, %v17393_v49  ;;  %v14895_v12 = vpop.f32.mrb[55].mxu1  ;;  %v17398_v31 = vld [vmem:[#allocation37_spill] sm:$0xff]  ;;  %v17400_v49 = vld [vmem:[#allocation300_spill] sm:$0xff]  ;;  %v17401_v11 = vld [vmem:[#allocation94_spill] sm:$0xff] }
 0x5d2   :  { %7135 = vmatpush1.bf16.msra.mxu0 %v17394_v41  ;;  %17397 = vst [vmem:[#allocation264_spill] sm:$0xff] %v14895_v12  ;;  %v5123_v16 = vsel %vm5100_vm7, %v17399_v21, %v17398_v31  ;;  %v5312_v44 = vmul.f32 %v14746_v3, %v5124_v51  ;;  %v17402_v12 = vld [vmem:[#allocation75_spill] sm:$0xff]  ;;  %v5328_v35 = vpack.c.bf16 %v5280_v23, %v5264_v43 }
 0x5d3   :  { %7136 = vmatprep.subr.bf16.mxu0 %v4869_v45  ;;  %v4255_v57 = vpack.c.bf16 %v4207_v37, %v4191_v40  ;;  %v14902_v33 = vpop.permute.xlu0 %3994  ;;  %v4256_v41 = vpack.c.bf16 %v4208_v8, %v4192_v36  ;;  %v5127_v45 = vsel %vm5100_vm7, %v17400_v49, %v17399_v21  ;;  %v5597_v19 = vsel %vm5575_vm8, %v17402_v12, %v17401_v11  ;;  %v17403_v40 = vld [vmem:[#allocation35_spill] sm:$0xff]  ;;  %v17404_v21 = vld [vmem:[#allocation49_spill] sm:$0xff] }
 0x5d4   :  { %v5311_v17 = vmul.f32 %v14693_v63, %v5128_v54  ;;  %v5685_v37 = vrot.slane %v17403_v40, %v17339_v38  ;;  %v5689_v8 = vrot.slane %v17403_v40, %v17345_v53  ;;  %7606 = vperm.xlu0 %8740, %v7603_v29   ;;  %v14918_v36 = vpop.permute.xlu1 %4004  ;;  %v5327_v31 = vpack.c.bf16 %v5279_v0, %v5263_v46  ;;  %v17405_v49 = vld [vmem:[#allocation155_spill] sm:$0xff]  ;;  %v17406_v38 = vld [vmem:[#allocation250_spill] sm:$0xff]  ;;  %v17419_v40 = vld [vmem:[#allocation104_spill] sm:$0xff] }
 0x5d5   :  { %v5296_v51 = vmul.f32 %v14746_v3, %v5123_v16  ;;  %v5596_v23 = vsel %vm5575_vm8, %v17405_v49, %v17404_v21  ;;  %7444 = vmatprep.subr.bf16.mxu1 %v4256_v41  ;;  %v5295_v11 = vmul.f32 %v14693_v63, %v5127_v45  ;;  %v5600_v53 = vsel %vm5575_vm8, %v17406_v38, %v17405_v49  ;;  %v17408_v46 = vld [vmem:[#allocation86_spill] sm:$0xff]  ;;  %v17409_v16 = vld [vmem:[#allocation64_spill] sm:$0xff]  ;;  %v17410_v49 = vld [vmem:[#allocation21_spill] sm:$0xff] }
 0x5d6   :  { %7137 = vmatpush1.bf16.msra.mxu0 %v4868_v18  ;;  %v17407_v18 = vld [vmem:[#allocation166_spill] sm:$0xff]  ;;  %v5755_v3 = vmul.f32 %v5689_v8, %v5597_v19  ;;  %7445 = vmatpush1.bf16.msra.mxu1 %v4255_v57  ;;  %v5599_v63 = vsel %vm5575_vm8, %v17409_v16, %v17408_v46  ;;  %v5738_v45 = vmul.f32 %v5685_v37, %v5600_v53  ;;  %v17413_v38 = vld [vmem:[#allocation235_spill] sm:$0xff] }
 0x5d7   :  { %7138 = vmatprep.subr.bf16.mxu0 %v5328_v35  ;;  %v5601_v0 = vsel %vm5575_vm8, %v17407_v18, %v17402_v12  ;;  %v14934_v43 = vpop.permute.xlu0 %4002  ;;  %v5344_v54 = vpack.c.bf16 %v5312_v44, %v5296_v51  ;;  %v5343_v29 = vpack.c.bf16 %v5311_v17, %v5295_v11  ;;  %v5739_v35 = vmul.f32 %v5689_v8, %v5596_v23  ;;  %v17411_v17 = vld [vmem:[#allocation39_spill] sm:$0xff]  ;;  %v17412_v44 = vld [vmem:[#allocation125_spill] sm:$0xff] }
 0x5d8   :  { %v4013_v41 = vpop.permute.xlu1 %4012  ;;  %v5754_v21 = vmul.f32 %v5685_v37, %v5601_v0  ;;  %v5598_v19 = vsel %vm5575_vm8, %v17412_v44, %v17411_v17  ;;  %v5603_v53 = vsel %vm5575_vm8, %v17413_v38, %v17409_v16  ;;  %v5787_v18 = vmul.f32 %v5689_v8, %v5599_v63  ;;  %v17414_v0 = vld [vmem:[#allocation22_spill] sm:$0xff] }
 0x5d9   :  { %v4026_v12 = vsel %vm4022_vm5, %v4013_v41, %v17410_v49  ;;  %v4030_v57 = vsel %vm4022_vm5, %v14918_v36, %v4013_v41  ;;  %v5803_v11 = vpack.c.bf16 %v5755_v3, %v5739_v35  ;;  %v17415_v41 = vld [vmem:[#allocation232_spill] sm:$0xff]  ;;  %v17416_v49 = vld [vmem:[#allocation149_spill] sm:$0xff]  ;;  %v5771_v38 = vmul.f32 %v5689_v8, %v5598_v19 }
 0x5da   :  { %7139 = vmatpush1.bf16.msra.mxu0 %v5327_v31  ;;  %v4239_v51 = vmul.f32 %v14806_v47, %v4030_v57  ;;  %v4240_v31 = vmul.f32 %v14817_v42, %v4026_v12  ;;  %v6072_v12 = vsel %vm6050_vm9, %v17416_v49, %v17415_v41  ;;  %v5802_v63 = vpack.c.bf16 %v5754_v21, %v5738_v45  ;;  %v17417_v57 = vld [vmem:[#allocation301_spill] sm:$0xff] }
 0x5db   :  { %7140 = vmatprep.subr.bf16.mxu0 %v5344_v54  ;;  %v4011_v23 = vpop.permute.xlu0 %4010  ;;  %v5602_v17 = vsel %vm5575_vm8, %v17417_v57, %v17412_v44  ;;  %v17421_v21 = vld [vmem:[#allocation5_spill] sm:$0xff]  ;;  %v5819_v44 = vpack.c.bf16 %v5787_v18, %v5771_v38 }
 0x5dc   :  { %v4025_v54 = vsel %vm4022_vm5, %v4011_v23, %v17414_v0  ;;  %v4029_v46 = vsel %vm4022_vm5, %v14934_v43, %v4011_v23  ;;  %v14968_v16 = vpop.permute.xlu1 %4603  ;;  %v5786_v23 = vmul.f32 %v5685_v37, %v5603_v53  ;;  %v17418_v0 = vld [vmem:[#allocation108_spill] sm:$0xff]  ;;  %v5770_v8 = vmul.f32 %v5685_v37, %v5602_v17 }
 0x5dd   :  { %v4223_v3 = vmul.f32 %v14806_v47, %v4029_v46  ;;  %v4224_v35 = vmul.f32 %v14817_v42, %v4025_v54  ;;  %v6071_v41 = vsel %vm6050_vm9, %v17419_v40, %v17418_v0  ;;  %v6230_v54 = vmul.f32 %v17421_v21, %v6072_v12  ;;  %v17423_v12 = vld [vmem:[#allocation191_spill] sm:$0xff]  ;;  %v17426_v0 = vld [vmem:[#allocation62_spill] sm:$0xff] }
 0x5de   :  { %7141 = vmatpush1.bf16.msra.mxu0 %v5343_v29  ;;  %v17420_v29 = vld [vmem:[#allocation282_spill] sm:$0xff]  ;;  %v6214_v53 = vmul.f32 %v17421_v21, %v6071_v41  ;;  %v2727_v41 = vrot.slane %v17426_v0, %v17304_v50 }
 0x5df   :  { %7142 = vmatprep.subr.bf16.mxu0 %v5803_v11  ;;  %v4271_v47 = vpack.c.bf16 %v4239_v51, %v4223_v3  ;;  %v14978_v46 = vpop.permute.xlu0 %4601  ;;  %v4272_v42 = vpack.c.bf16 %v4240_v31, %v4224_v35  ;;  %v6076_v45 = vsel %vm6050_vm9, %v17420_v29, %v17416_v49  ;;  %v4384_v11 = vpack.c.bf16 %v17125_v56, %v17135_v15  ;;  %v17422_v51 = vld [vmem:[#allocation106_spill] sm:$0xff]  ;;  %v17424_v35 = vld [vmem:[#allocation307_spill] sm:$0xff]  ;;  %v17429_v29 = vld [vmem:[#allocation81_spill] sm:$0xff] }
 0x5e0   :  { %v14985_v19 = vpop.permute.xlu1 %4611  ;;  %v6075_v31 = vsel %vm6050_vm9, %v17422_v51, %v17419_v40  ;;  %v5818_v49 = vpack.c.bf16 %v5786_v23, %v5770_v8  ;;  %v6229_v18 = vmul.f32 %v17423_v12, %v6076_v45  ;;  %v14999_v3 = vrot.slane %v17340_v4, %v17235_v34  ;;  %v15031_v8 = vld [vmem:[%s15677_s5] ss:$12 sps:$4 sm:$0xff]  }
 0x5e1   :  { %7446 = vmatprep.subr.bf16.mxu1 %v4272_v42  ;;  %v15003_v56 = vrot.slane %v17340_v4, %v17237_v14  ;;  %v6278_v15 = vpack.c.bf16 %v6230_v54, %v6214_v53  ;;  %v4383_v40 = vpack.c.bf16 %v16954_v30, %v16960_v61  ;;  %v6213_v17 = vmul.f32 %v17423_v12, %v6075_v31  ;;  %v17427_v61 = vld [vmem:[#allocation47_spill] sm:$0xff]  ;;  %v17428_v42 = vld [vmem:[#allocation286_spill] sm:$0xff]  ;;  %v17430_v51 = vld [vmem:[#allocation28_spill] sm:$0xff] }
 0x5e2   :  { %7143 = vmatpush1.bf16.msra.mxu0 %v5802_v63  ;;  %7447 = vmatpush1.bf16.msra.mxu1 %v4271_v47  ;;  %v17425_v63 = vld [vmem:[#allocation319_spill] sm:$0xff]  ;;  %v4400_v23 = vpack.c.bf16 %v17303_v52, %v17179_v9  ;;  %v2607_v45 = vsel %vm2598_vm2, %v17429_v29, %v17428_v42  ;;  %v4399_v53 = vpack.c.bf16 %v16984_v32, %v16987_v7 }
 0x5e3   :  { %7144 = vmatprep.subr.bf16.mxu0 %v5819_v44  ;;  %7448 = vmatprep.subr.bf16.mxu1 %v4384_v11  ;;  %v14995_v37 = vpop.permute.xlu0 %4609  ;;  %v2608_v57 = vsel %vm2598_vm2, %v17425_v63, %v17424_v35  ;;  %v6277_v21 = vpack.c.bf16 %v6229_v18, %v6213_v17  ;;  %v17431_v35 = vld [vmem:[#allocation206_spill] sm:$0xff] }
 0x5e4   :  { %v4620_v38 = vpop.permute.xlu1 %4619  ;;  %v2781_v44 = vmul.f32 %v2727_v41, %v2608_v57  ;;  %v17432_v57 = vld [vmem:[#allocation50_spill] sm:$0xff] }
 0x5e5   :  { %v4627_v30 = vsel %vm4625_vm6, %v14985_v19, %v4620_v38  ;;  %v4687_v47 = vsel %vm4625_vm6, %v4620_v38, %v17427_v61  ;;  %v17433_v17 = vpack.c.bf16 %v17431_v35, %v17432_v57  ;;  %v17435_v61 = vld [vmem:[#allocation33_spill] sm:$0xff] }
 0x5e6   :  { %7145 = vmatpush1.bf16.msra.mxu0 %v5818_v49  ;;  %7449 = vmatpush1.bf16.msra.mxu1 %v4383_v40  ;;  %v4810_v9 = vmul.f32 %v14999_v3, %v4627_v30  ;;  %v4811_v52 = vmul.f32 %v15003_v56, %v4687_v47  ;;  %v2765_v40 = vmul.f32 %v2727_v41, %v2607_v45  ;;  %v17434_v30 = vld [vmem:[#allocation194_spill] sm:$0xff] }
 0x5e7   :  { %7167 = vmatprep.subr.bf16.mxu0 %v6278_v15  ;;  %7450 = vmatprep.subr.bf16.mxu1 %v4400_v23  ;;  %v4618_v54 = vpop.permute.xlu0 %4617  ;;  %v15049_v15 = vld [vmem:[%s15677_s5 + $0x1c] ss:$12 sps:$4 sm:$0xff]   ;;  %v17436_v47 = vpack.c.bf16 %v17434_v30, %v17435_v61 }
 0x5e8   :  { %v4626_v11 = vsel %vm4625_vm6, %v14995_v37, %v4618_v54  ;;  %v4686_v31 = vsel %vm4625_vm6, %v4618_v54, %v17430_v51  ;;  %v15044_v18 = vpop.permute.xlu1 %4607  ;;  %v2829_v23 = vpack.c.bf16 %v2781_v44, %v2765_v40  ;;  %v2723_v54 = vrot.slane %v17426_v0, %v17222_v39  ;;  %v17438_v44 = vld [vmem:[#allocation70_spill] sm:$0xff]  ;;  %v17441_v40 = vld [vmem:[#allocation211_spill] sm:$0xff]  ;;  %v17443_v30 = vld [vmem:[#allocation97_spill] sm:$0xff] }
 0x5e9   :  { %7147 = vmatmul.mubr.bf16.vlgmr.msra.gmra.mrb[56].mxu0 %v15031_v8  ;;  %v4794_v49 = vmul.f32 %v14999_v3, %v4626_v11  ;;  %v4795_v12 = vmul.f32 %v15003_v56, %v4686_v31  ;;  %v2610_v11 = vsel %vm2598_vm2, %v17438_v44, %v17270_v58  ;;  %v2609_v58 = vsel %vm2598_vm2, %v17441_v40, %v17275_v2 }
 0x5ea   :  { %7168 = vmatpush1.bf16.msra.mxu0 %v6277_v21  ;;  %7156 = vmatprep.mubr.bf16.mxu0 %v15049_v15  ;;  %v17437_v21 = vld [vmem:[#allocation182_spill] sm:$0xff] }
 0x5eb   :  { %7169 = vmatprep.subr.bf16.mxu0 %v17433_v17  ;;  %7451 = vmatpush1.bf16.msra.mxu1 %v4399_v53  ;;  %v4858_v7 = vpack.c.bf16 %v4810_v9, %v4794_v49  ;;  %v15055_v32 = vpop.permute.xlu0 %4605  ;;  %v4859_v38 = vpack.c.bf16 %v4811_v52, %v4795_v12  ;;  %v2612_v9 = vsel %vm2598_vm2, %v17437_v21, %v17425_v63  ;;  %v15071_v52 = vld [vmem:[%s15677_s5 + $0x18] ss:$12 sps:$4 sm:$0xff]   ;;  %v17439_v63 = vld [vmem:[#allocation225_spill] sm:$0xff] }
 0x5ec   :  { %v15060_v42 = vpop.permute.xlu1 %4615  ;;  %v2611_v31 = vsel %vm2598_vm2, %v17439_v63, %v17429_v29  ;;  %v17440_v49 = vld [vmem:[#allocation119_spill] sm:$0xff]  ;;  %v2780_v12 = vmul.f32 %v2723_v54, %v2612_v9  ;;  %v17442_v29 = vld [vmem:[#allocation14_spill] sm:$0xff] }
 0x5ed   :  { %7452 = vmatprep.subr.bf16.mxu1 %v4859_v38  ;;  %v2813_v38 = vmul.f32 %v2727_v41, %v2610_v11  ;;  %v2764_v2 = vmul.f32 %v2723_v54, %v2611_v31  ;;  %v2797_v11 = vmul.f32 %v2727_v41, %v2609_v58  ;;  %v17445_v31 = vld [vmem:[#allocation184_spill] sm:$0xff]  ;;  %v17446_v58 = vld [vmem:[#allocation17_spill] sm:$0xff] }
 0x5ee   :  { %7170 = vmatpush1.bf16.msra.mxu0 %v17436_v47 }
 0x5ef   :  { %7326 = vmatprep.subr.bf16.mxu0 %v2829_v23  ;;  %7453 = vmatpush1.bf16.msra.mxu1 %v4858_v7  ;;  %v15062_v45 = vpop.permute.xlu0 %4613  ;;  %v2614_v7 = vsel %vm2598_vm2, %v17442_v29, %v17438_v44  ;;  %v2828_v63 = vpack.c.bf16 %v2780_v12, %v2764_v2  ;;  %v2845_v41 = vpack.c.bf16 %v2813_v38, %v2797_v11 }
 0x5f0   :  { %v4624_v51 = vpop.permute.xlu1 %4623 }
 0x5f1   :  { %7157 = vmatmul.mubr.bf16.gmra.mrb[60].mxu0 %v15071_v52  ;;  %v4629_v53 = vsel %vm4625_vm6, %v15060_v42, %v4624_v51  ;;  %v4689_v0 = vsel %vm4625_vm6, %v4624_v51, %v17440_v49  ;;  %v17444_v51 = vld [vmem:[#allocation308_spill] sm:$0xff] }
 0x5f2   :  { %7199 = vmatprep.mubr.bf16.mxu0 %v17042_v60  ;;  %v4842_v35 = vmul.f32 %v14999_v3, %v4629_v53  ;;  %v4843_v57 = vmul.f32 %v15003_v56, %v4689_v0  ;;  %v2613_v44 = vsel %vm2598_vm2, %v17444_v51, %v17441_v40  ;;  %v2812_v53 = vmul.f32 %v2723_v54, %v2614_v7 }
 0x5f3   :  { %v4622_v17 = vpop.permute.xlu0 %4621  ;;  %v2796_v12 = vmul.f32 %v2723_v54, %v2613_v44  ;;  %v5234_v54 = vrot.slane %v17348_v5, %v17235_v34  ;;  %v5238_v7 = vrot.slane %v17348_v5, %v17237_v14 }
 0x5f4   :  { %v4628_v23 = vsel %vm4625_vm6, %v15062_v45, %v4622_v17  ;;  %v4688_v61 = vsel %vm4625_vm6, %v4622_v17, %v17443_v30  ;;  %v15109_v9 = vpop.permute.xlu1 %5078 }
 0x5f5   :  { %v4826_v47 = vmul.f32 %v14999_v3, %v4628_v23  ;;  %v4827_v21 = vmul.f32 %v15003_v56, %v4688_v61  ;;  %v3086_v3 = vsel %vm3072_vm3, %v17445_v31, %v14260_v6  ;;  %v15124_v56 = vld [vmem:[%s15677_s5 + $0x8] ss:$12 sps:$4 sm:$0xff]   ;;  %v2844_v6 = vpack.c.bf16 %v2812_v53, %v2796_v12  ;;  %v17448_v61 = vld [vmem:[#allocation51_spill] sm:$0xff] }
 0x5f6   :  { %v17450_v31 = vpack.c.bf16 %v14453_v48, %v14474_v28  ;;  %v4034_v48 = vsel %vm4022_vm5, %v14882_v55, %v14918_v36  ;;  %v17455_v28 = vld [vmem:[#allocation168_spill] sm:$0xff] }
 0x5f7   :  { %v4874_v49 = vpack.c.bf16 %v4842_v35, %v4826_v47  ;;  %v15115_v0 = vpop.permute.xlu0 %5076  ;;  %v4875_v29 = vpack.c.bf16 %v4843_v57, %v4827_v21  ;;  %v3085_v35 = vsel %vm3072_vm3, %v17446_v58, %v17271_v20  ;;  %v3255_v57 = vmul.f32 %v14179_v27, %v3086_v3 }
 0x5f8   :  { %v15128_v40 = vpop.permute.xlu1 %5086  ;;  %v3239_v38 = vmul.f32 %v14179_v27, %v3085_v35  ;;  %v17447_v20 = vpack.c.bf16 %v14343_v10, %v14361_v59  ;;  %v15155_v27 = vld [vmem:[%s15677_s5 + $0x20] ss:$12 sps:$4 sm:$0xff]   ;;  %v17451_v58 = vpack.c.bf16 %v14420_v62, %v14437_v24  ;;  %v4033_v62 = vsel %vm4022_vm5, %v14902_v33, %v14934_v43  ;;  %v17454_v24 = vld [vmem:[#allocation98_spill] sm:$0xff] }
 0x5f9   :  { %8514 = vmatmul.mubr.msk.bf16.vlgmr.msra.gmra.mrb[56].mxu0 %vm6683_vm10, %v15124_v56  ;;  %7454 = vmatprep.subr.bf16.mxu1 %v4875_v29  ;;  %v17449_v59 = vld [vmem:[#allocation32_spill] sm:$0xff] }
 0x5fa   :  { %7327 = vmatpush1.bf16.msra.mxu0 %v2828_v63  ;;  %7455 = vmatpush1.bf16.msra.mxu1 %v4874_v49  ;;  %v3303_v47 = vpack.c.bf16 %v3255_v57, %v3239_v38  ;;  %v8764_v29 = vld [vmem:[%s15677_s5 + $0x4] ss:$12 sps:$4 sm:$0xff]  }
 0x5fb   :  { %7328 = vmatprep.subr.bf16.mxu0 %v2845_v41  ;;  %v15135_v17 = vpop.permute.xlu0 %5084  ;;  %7209 = vmatprep.mubr.bf16.mxu0 %v17042_v60 }
 0x5fc   :  { %v5095_v23 = vpop.permute.xlu1 %5094 }
 0x5fd   :  { %v5102_v30 = vsel %vm5100_vm7, %v15128_v40, %v5095_v23  ;;  %v5162_v2 = vsel %vm5100_vm7, %v5095_v23, %v17448_v61  ;;  %v17456_v23 = vpack.c.bf16 %v17454_v24, %v17455_v28 }
 0x5fe   :  { %7329 = vmatpush1.bf16.msra.mxu0 %v2844_v6  ;;  %v5285_v21 = vmul.f32 %v5234_v54, %v5102_v30  ;;  %v5286_v51 = vmul.f32 %v5238_v7, %v5162_v2  ;;  %v17452_v6 = vld [vmem:[#allocation87_spill] sm:$0xff]  ;;  %v17458_v30 = vld [vmem:[#allocation214_spill] sm:$0xff] }
 0x5ff   :  { %7330 = vmatprep.subr.bf16.mxu0 %v17447_v20  ;;  %v5093_v44 = vpop.permute.xlu0 %5092  ;;  %v17453_v57 = vpack.c.bf16 %v14567_v22, %v17452_v6  ;;  %v17457_v22 = vld [vmem:[#allocation54_spill] sm:$0xff] }
 0x600   :  { %v5101_v10 = vsel %vm5100_vm7, %v15135_v17, %v5093_v44  ;;  %v5161_v11 = vsel %vm5100_vm7, %v5093_v44, %v17449_v59  ;;  %v15165_v49 = vpop.permute.xlu1 %5082  ;;  %v17459_v61 = vpack.c.bf16 %v17457_v22, %v17458_v30  ;;  %v17469_v30 = vld [vmem:[#allocation116_spill] sm:$0xff] }
 0x601   :  { %8515 = vmatmul.mubr.msk.bf16.gmra.mrb[60].mxu0 %vm6683_vm10, %v15155_v27  ;;  %v5269_v63 = vmul.f32 %v5234_v54, %v5101_v10  ;;  %v5270_v53 = vmul.f32 %v5238_v7, %v5161_v11 }
 0x602   :  { %7331 = vmatpush1.bf16.msra.mxu0 %v3303_v47  ;;  %7358 = vmatprep.mubr.bf16.mxu0 %v8764_v29  ;;  %v17460_v47 = vld [vmem:[#allocation129_spill] sm:$0xff] }
 0x603   :  { %7332 = vmatprep.subr.bf16.mxu0 %v17450_v31  ;;  %v5333_v3 = vpack.c.bf16 %v5285_v21, %v5269_v63  ;;  %v15173_v41 = vpop.permute.xlu0 %5080  ;;  %v5334_v12 = vpack.c.bf16 %v5286_v51, %v5270_v53  ;;  %v17461_v21 = vld [vmem:[#allocation31_spill] sm:$0xff]  ;;  %v17462_v51 = vld [vmem:[#allocation174_spill] sm:$0xff]  ;;  %v4238_v63 = vmul.f32 %v14761_v25, %v4034_v48  ;;  %v4222_v53 = vmul.f32 %v14761_v25, %v4033_v62  ;;  %v17463_v31 = vld [vmem:[#allocation101_spill] sm:$0xff] }
 0x604   :  { %v15178_v35 = vpop.permute.xlu1 %5090  ;;  %v4038_v43 = vsel %vm4022_vm5, %v17461_v21, %v14882_v55  ;;  %v4037_v44 = vsel %vm4022_vm5, %v17462_v51, %v14902_v33  ;;  %v17467_v48 = vpack.c.bf16 %v14813_v13, %v14834_v26  ;;  %v17468_v25 = vld [vmem:[#allocation219_spill] sm:$0xff]  ;;  %v4755_v13 = vrot.slane %v17340_v4, %v17304_v50  ;;  %v17473_v51 = vld [vmem:[#allocation281_spill] sm:$0xff] }
 0x605   :  { %7456 = vmatprep.subr.bf16.mxu1 %v5334_v12  ;;  %v17465_v12 = vld [vmem:[#allocation270_spill] sm:$0xff]  ;;  %v4237_v62 = vmul.f32 %v17468_v25, %v4038_v43  ;;  %v4221_v24 = vmul.f32 %v17468_v25, %v4037_v44  ;;  %v4270_v22 = vpack.c.bf16 %v4238_v63, %v4222_v53  ;;  %v4631_v43 = vsel %vm4625_vm6, %v14968_v16, %v14985_v19  ;;  %v17474_v44 = vld [vmem:[#allocation284_spill] sm:$0xff]  ;;  %v17482_v25 = vld [vmem:[#allocation55_spill] sm:$0xff] }
 0x606   :  { %7333 = vmatpush1.bf16.msra.mxu0 %v17451_v58  ;;  %7457 = vmatpush1.bf16.msra.mxu1 %v5333_v3  ;;  %v17464_v3 = vld [vmem:[#allocation274_spill] sm:$0xff]  ;;  %v4751_v53 = vrot.slane %v17340_v4, %v17222_v39  ;;  %v5230_v4 = vrot.slane %v17348_v5, %v17304_v50 }
 0x607   :  { %7334 = vmatprep.subr.bf16.mxu0 %v17453_v57  ;;  %v15183_v38 = vpop.permute.xlu0 %5088  ;;  %v17466_v58 = vpack.c.bf16 %v17464_v3, %v17465_v12  ;;  %v4269_v26 = vpack.c.bf16 %v4237_v62, %v4221_v24  ;;  %v17478_v3 = vld [vmem:[#allocation297_spill] sm:$0xff]  ;;  %v17479_v19 = vld [vmem:[#allocation290_spill] sm:$0xff] }
 0x608   :  { %v5099_v20 = vpop.permute.xlu1 %5098  ;;  %v17483_v24 = vld [vmem:[#allocation61_spill] sm:$0xff] }
 0x609   :  { %v5104_v2 = vsel %vm5100_vm7, %v15178_v35, %v5099_v20  ;;  %v5164_v36 = vsel %vm5100_vm7, %v5099_v20, %v17460_v47  ;;  %v17472_v47 = vld [vmem:[#allocation35_spill] sm:$0xff] }
 0x60a   :  { %7335 = vmatpush1.bf16.msra.mxu0 %v17456_v23  ;;  %v5317_v10 = vmul.f32 %v5234_v54, %v5104_v2  ;;  %v5318_v59 = vmul.f32 %v5238_v7, %v5164_v36  ;;  %v15244_v36 = vrot.slane %v17472_v47, %v17235_v34  ;;  %v15248_v21 = vrot.slane %v17472_v47, %v17237_v14 }
 0x60b   :  { %7336 = vmatprep.subr.bf16.mxu0 %v17459_v61  ;;  %v5097_v11 = vpop.permute.xlu0 %5096  ;;  %v17470_v61 = vld [vmem:[#allocation188_spill] sm:$0xff] }
 0x60c   :  { %v5103_v29 = vsel %vm5100_vm7, %v15183_v38, %v5097_v11  ;;  %v5163_v55 = vsel %vm5100_vm7, %v5097_v11, %v17463_v31  ;;  %v15224_v57 = vpop.permute.xlu1 %5553  ;;  %v17471_v2 = vpack.c.bf16 %v17469_v30, %v17470_v61  ;;  %v17476_v11 = vld [vmem:[#allocation280_spill] sm:$0xff] }
 0x60d   :  { %v5301_v33 = vmul.f32 %v5234_v54, %v5103_v29  ;;  %v5302_v6 = vmul.f32 %v5238_v7, %v5163_v55  ;;  %v4630_v29 = vsel %vm4625_vm6, %v14978_v46, %v14995_v37  ;;  %v17477_v55 = vld [vmem:[#allocation293_spill] sm:$0xff] }
 0x60e   :  { %7337 = vmatpush1.bf16.msra.mxu0 %v17466_v58  ;;  %v4398_v12 = vpack.c.bf16 %v17478_v3, %v17477_v55  ;;  %v17480_v58 = vld [vmem:[#allocation292_spill] sm:$0xff]  ;;  %v4793_v61 = vmul.f32 %v4755_v13, %v4630_v29 }
 0x60f   :  { %7338 = vmatprep.subr.bf16.mxu0 %v17467_v48  ;;  %v5349_v28 = vpack.c.bf16 %v5317_v10, %v5301_v33  ;;  %v15231_v23 = vpop.permute.xlu0 %5551  ;;  %v5350_v20 = vpack.c.bf16 %v5318_v59, %v5302_v6  ;;  %v4382_v10 = vpack.c.bf16 %v17474_v44, %v17473_v51  ;;  %v17475_v59 = vld [vmem:[#allocation228_spill] sm:$0xff]  ;;  %v4397_v33 = vpack.c.bf16 %v17480_v58, %v17479_v19  ;;  %v17481_v6 = vld [vmem:[#allocation105_spill] sm:$0xff]  ;;  %v17485_v44 = vld [vmem:[#allocation38_spill] sm:$0xff] }
 0x610   :  { %v15236_v54 = vpop.permute.xlu1 %5561  ;;  %v4381_v63 = vpack.c.bf16 %v17476_v11, %v17475_v59  ;;  %v4635_v48 = vsel %vm4625_vm6, %v17481_v6, %v14968_v16 }
 0x611   :  { %7458 = vmatprep.subr.bf16.mxu1 %v5350_v20  ;;  %v4809_v20 = vmul.f32 %v4755_v13, %v4631_v43  ;;  %v4633_v43 = vsel %vm4625_vm6, %v15044_v18, %v15060_v42  ;;  %v5106_v42 = vsel %vm5100_vm7, %v15109_v9, %v15128_v40 }
 0x612   :  { %7339 = vmatpush1.bf16.msra.mxu0 %v17471_v2  ;;  %7459 = vmatpush1.bf16.msra.mxu1 %v5349_v28  ;;  %v4634_v28 = vsel %vm4625_vm6, %v17483_v24, %v14978_v46  ;;  %v17484_v2 = vld [vmem:[#allocation48_spill] sm:$0xff]  ;;  %v5284_v24 = vmul.f32 %v5230_v4, %v5106_v42  ;;  %v17492_v42 = vld [vmem:[#allocation159_spill] sm:$0xff] }
 0x613   :  { %7340 = vmatprep.subr.bf16.mxu0 %v4270_v22  ;;  %v15240_v7 = vpop.permute.xlu0 %5559  ;;  %v4792_v3 = vmul.f32 %v4751_v53, %v4634_v28 }
 0x614   :  { %v5570_v31 = vpop.permute.xlu1 %5569 }
 0x615   :  { %v5577_v37 = vsel %vm5575_vm8, %v15236_v54, %v5570_v31  ;;  %v5637_v62 = vsel %vm5575_vm8, %v5570_v31, %v17482_v25  ;;  %v17486_v31 = vld [vmem:[#allocation40_spill] sm:$0xff]  ;;  %v4857_v25 = vpack.c.bf16 %v4809_v20, %v4793_v61 }
 0x616   :  { %7341 = vmatpush1.bf16.msra.mxu0 %v4269_v26  ;;  %v5760_v16 = vmul.f32 %v15244_v36, %v5577_v37  ;;  %v5761_v22 = vmul.f32 %v15248_v21, %v5637_v62  ;;  %v4637_v26 = vsel %vm4625_vm6, %v17484_v2, %v15044_v18  ;;  %v4636_v55 = vsel %vm4625_vm6, %v17486_v31, %v15055_v32  ;;  %v17487_v2 = vld [vmem:[#allocation34_spill] sm:$0xff] }
 0x617   :  { %7342 = vmatprep.subr.bf16.mxu0 %v4382_v10  ;;  %v5568_v30 = vpop.permute.xlu0 %5567  ;;  %v4632_v10 = vsel %vm4625_vm6, %v15055_v32, %v15062_v45  ;;  %v5226_v18 = vrot.slane %v17348_v5, %v17222_v39  ;;  %v5105_v45 = vsel %vm5100_vm7, %v15115_v0, %v15135_v17  ;;  %v4840_v6 = vmul.f32 %v4751_v53, %v4637_v26 }
 0x618   :  { %v5576_v51 = vsel %vm5575_vm8, %v15240_v7, %v5568_v30  ;;  %v5636_v46 = vsel %vm5575_vm8, %v5568_v30, %v17485_v44  ;;  %v15306_v29 = vpop.permute.xlu1 %5557  ;;  %v4841_v37 = vmul.f32 %v4755_v13, %v4633_v43  ;;  %v4825_v5 = vmul.f32 %v4755_v13, %v4632_v10  ;;  %v17490_v10 = vld [vmem:[#allocation30_spill] sm:$0xff] }
 0x619   :  { %v5744_v59 = vmul.f32 %v15244_v36, %v5576_v51  ;;  %v5745_v11 = vmul.f32 %v15248_v21, %v5636_v46  ;;  %v4824_v62 = vmul.f32 %v4751_v53, %v4636_v55  ;;  %v5268_v30 = vmul.f32 %v5230_v4, %v5105_v45  ;;  %v17489_v46 = vld [vmem:[#allocation140_spill] sm:$0xff] }
 0x61a   :  { %7343 = vmatpush1.bf16.msra.mxu0 %v4381_v63  ;;  %v4808_v63 = vmul.f32 %v4751_v53, %v4635_v48  ;;  %v5110_v17 = vsel %vm5100_vm7, %v17487_v2, %v15109_v9  ;;  %v5108_v53 = vsel %vm5100_vm7, %v15165_v49, %v15178_v35  ;;  %v15342_v9 = vrot.slane %v17472_v47, %v17222_v39 }
 0x61b   :  { %7344 = vmatprep.subr.bf16.mxu0 %v4398_v12  ;;  %v5808_v19 = vpack.c.bf16 %v5760_v16, %v5744_v59  ;;  %v15322_v58 = vpop.permute.xlu0 %5555  ;;  %v5809_v32 = vpack.c.bf16 %v5761_v22, %v5745_v11  ;;  %v17488_v12 = vld [vmem:[#allocation15_spill] sm:$0xff]  ;;  %v4873_v20 = vpack.c.bf16 %v4841_v37, %v4825_v5  ;;  %v4872_v16 = vpack.c.bf16 %v4840_v6, %v4824_v62  ;;  %v17491_v59 = vld [vmem:[#allocation113_spill] sm:$0xff] }
 0x61c   :  { %v5566_v40 = vpop.permute.xlu1 %5565  ;;  %v5109_v48 = vsel %vm5100_vm7, %v17488_v12, %v15115_v0  ;;  %v4856_v13 = vpack.c.bf16 %v4808_v63, %v4792_v3  ;;  %v5705_v0 = vrot.slane %v17472_v47, %v17304_v50  ;;  %v5283_v22 = vmul.f32 %v5226_v18, %v5110_v17  ;;  %v17493_v63 = vld [vmem:[#allocation60_spill] sm:$0xff] }
 0x61d   :  { %7460 = vmatprep.subr.bf16.mxu1 %v5809_v32  ;;  %v5267_v61 = vmul.f32 %v5226_v18, %v5109_v48  ;;  %v5332_v35 = vpack.c.bf16 %v5284_v24, %v5268_v30  ;;  %v5316_v51 = vmul.f32 %v5230_v4, %v5108_v53  ;;  %v5112_v47 = vsel %vm5100_vm7, %v17490_v10, %v15165_v49  ;;  %v17496_v53 = vld [vmem:[#allocation137_spill] sm:$0xff] }
 0x61e   :  { %7345 = vmatpush1.bf16.msra.mxu0 %v4397_v33  ;;  %7461 = vmatpush1.bf16.msra.mxu1 %v5808_v19  ;;  %v5107_v33 = vsel %vm5100_vm7, %v15173_v41, %v15183_v38  ;;  %v5111_v11 = vsel %vm5100_vm7, %v17491_v59, %v15173_v41  ;;  %v5585_v45 = vsel %vm5575_vm8, %v17492_v42, %v15224_v57  ;;  %v17494_v19 = vld [vmem:[#allocation107_spill] sm:$0xff] }
 0x61f   :  { %7346 = vmatprep.subr.bf16.mxu0 %v4857_v25  ;;  %v5564_v28 = vpop.permute.xlu0 %5563  ;;  %v5300_v44 = vmul.f32 %v5230_v4, %v5107_v33  ;;  %v5584_v49 = vsel %vm5575_vm8, %v17493_v63, %v15231_v23  ;;  %v5581_v32 = vsel %vm5575_vm8, %v15224_v57, %v15236_v54  ;;  %v5580_v6 = vsel %vm5575_vm8, %v15231_v23, %v15240_v7  ;;  %v17498_v59 = vld [vmem:[#allocation59_spill] sm:$0xff] }
 0x620   :  { %v5574_v26 = vpop.permute.xlu1 %5573  ;;  %v5331_v62 = vpack.c.bf16 %v5283_v22, %v5267_v61  ;;  %v5315_v24 = vmul.f32 %v5226_v18, %v5112_v47  ;;  %v5299_v30 = vmul.f32 %v5226_v18, %v5111_v11  ;;  %v5583_v57 = vsel %vm5575_vm8, %v15306_v29, %v5566_v40  ;;  %v17495_v18 = vld [vmem:[#allocation175_spill] sm:$0xff] }
 0x621   :  { %v5579_v38 = vsel %vm5575_vm8, %v5566_v40, %v5574_v26  ;;  %v5639_v43 = vsel %vm5575_vm8, %v5574_v26, %v17489_v46  ;;  %v5348_v2 = vpack.c.bf16 %v5316_v51, %v5300_v44  ;;  %v5582_v54 = vsel %vm5575_vm8, %v15322_v58, %v5564_v28  ;;  %v17497_v22 = vld [vmem:[#allocation195_spill] sm:$0xff] }
 0x622   :  { %7347 = vmatpush1.bf16.msra.mxu0 %v4856_v13  ;;  %v5792_v4 = vmul.f32 %v15244_v36, %v5579_v38  ;;  %v5793_v31 = vmul.f32 %v15248_v21, %v5639_v43  ;;  %v5759_v12 = vmul.f32 %v5705_v0, %v5581_v32  ;;  %v5743_v48 = vmul.f32 %v5705_v0, %v5580_v6  ;;  %v17501_v32 = vld [vmem:[#allocation41_spill] sm:$0xff] }
 0x623   :  { %7348 = vmatprep.subr.bf16.mxu0 %v4873_v20  ;;  %v5572_v55 = vpop.permute.xlu0 %5571  ;;  %v5587_v13 = vsel %vm5575_vm8, %v17495_v18, %v15306_v29  ;;  %v5586_v33 = vsel %vm5575_vm8, %v17496_v53, %v15322_v58  ;;  %v5775_v20 = vmul.f32 %v5705_v0, %v5582_v54  ;;  %v6176_v61 = vrot.slane %v17497_v22, %v17222_v39 }
 0x624   :  { %v5578_v3 = vsel %vm5575_vm8, %v5564_v28, %v5572_v55  ;;  %v5638_v41 = vsel %vm5575_vm8, %v5572_v55, %v17494_v19  ;;  %v6029_v25 = vpop.permute.xlu1 %6028  ;;  %v5791_v28 = vmul.f32 %v5705_v0, %v5583_v57  ;;  %v15406_v29 = vrot.slane %v17497_v22, %v17235_v34  ;;  %v17500_v55 = vld [vmem:[#allocation226_spill] sm:$0xff] }
 0x625   :  { %v5776_v37 = vmul.f32 %v15244_v36, %v5578_v3  ;;  %v5777_v5 = vmul.f32 %v15248_v21, %v5638_v41  ;;  %v5758_v36 = vmul.f32 %v15342_v9, %v5585_v45  ;;  %v5742_v21 = vmul.f32 %v15342_v9, %v5584_v49 }
 0x626   :  { %7349 = vmatpush1.bf16.msra.mxu0 %v4872_v16  ;;  %v5347_v16 = vpack.c.bf16 %v5315_v24, %v5299_v30  ;;  %v15410_v51 = vrot.slane %v17497_v22, %v17237_v14  ;;  %v5790_v0 = vmul.f32 %v15342_v9, %v5587_v13  ;;  %v6180_v44 = vrot.slane %v17497_v22, %v17304_v50 }
 0x627   :  { %7350 = vmatprep.subr.bf16.mxu0 %v5332_v35  ;;  %v5824_v23 = vpack.c.bf16 %v5792_v4, %v5776_v37  ;;  %v6027_v7 = vpop.permute.xlu0 %6026  ;;  %v5825_v17 = vpack.c.bf16 %v5793_v31, %v5777_v5  ;;  %v15402_v35 = vpop.f32.mrb[40].mxu0  ;;  %v5806_v58 = vpack.c.bf16 %v5758_v36, %v5742_v21  ;;  %v5807_v38 = vpack.c.bf16 %v5759_v12, %v5743_v48  ;;  %v17499_v4 = vld [vmem:[#allocation203_spill] sm:$0xff]  ;;  %v17503_v12 = vld [vmem:[#allocation68_spill] sm:$0xff] }
 0x628   :  { %v6037_v40 = vpop.permute.xlu1 %6036  ;;  %v15415_v46 = vpop.f32.mrb[41].mxu0  ;;  %v5774_v39 = vmul.f32 %v15342_v9, %v5586_v33  ;;  %v5823_v11 = vpack.c.bf16 %v5791_v28, %v5775_v20  ;;  %v6060_v31 = vsel %vm6050_vm9, %v17499_v4, %v6029_v25  ;;  %v6059_v42 = vsel %vm6050_vm9, %v17500_v55, %v6027_v7  ;;  %v17502_v36 = vld [vmem:[#allocation19_spill] sm:$0xff] }
 0x629   :  { %7462 = vmatprep.subr.bf16.mxu1 %v5825_v17  ;;  %v6056_v34 = vsel %vm6050_vm9, %v6029_v25, %v6037_v40  ;;  %v15422_v14 = vpop.f32.mrb[42].mxu0  ;;  %v6233_v24 = vmul.f32 %v6176_v61, %v6060_v31  ;;  %v6217_v30 = vmul.f32 %v6176_v61, %v6059_v42  ;;  %v17507_v42 = vld [vmem:[#allocation186_spill] sm:$0xff] }
 0x62a   :  { %7351 = vmatpush1.bf16.msra.mxu0 %v5331_v62  ;;  %7463 = vmatpush1.bf16.msra.mxu1 %v5824_v23  ;;  %v15425_v47 = vpop.f32.mrb[43].mxu0  ;;  %v6234_v3 = vmul.f32 %v6180_v44, %v6056_v34  ;;  %v5822_v62 = vpack.c.bf16 %v5790_v0, %v5774_v39  ;;  %v17504_v39 = vld [vmem:[#allocation144_spill] sm:$0xff] }
 0x62b   :  { %7352 = vmatprep.subr.bf16.mxu0 %v5348_v2  ;;  %v6035_v26 = vpop.permute.xlu0 %6034  ;;  %v15448_v54 = vpop.f32.mrb[44].mxu0  ;;  %v6281_v33 = vpack.c.bf16 %v6233_v24, %v6217_v30  ;;  %v17512_v30 = vmov 0.0  }
 0x62c   :  { %v6055_v43 = vsel %vm6050_vm9, %v6027_v7, %v6035_v26  ;;  %v6045_v10 = vpop.permute.xlu1 %6044  ;;  %v15450_v17 = vpop.f32.mrb[45].mxu0 }
 0x62d   :  { %7465 = vmatmul.mubr.bf16.vlgmr.msra.gmra.mrb[64].mxu1 %v15031_v8  ;;  %v6052_v50 = vsel %vm6050_vm9, %v6037_v40, %v6045_v10  ;;  %v6112_v9 = vsel %vm6050_vm9, %v6045_v10, %v17498_v59  ;;  %v6218_v19 = vmul.f32 %v6180_v44, %v6055_v43  ;;  %v15458_v18 = vpop.f32.mrb[46].mxu0  ;;  %v17505_v59 = vld [vmem:[#allocation110_spill] sm:$0xff] }
 0x62e   :  { %7353 = vmatpush1.bf16.msra.mxu0 %v5347_v16  ;;  %7474 = vmatprep.mubr.bf16.mxu1 %v15049_v15  ;;  %v6235_v45 = vmul.f32 %v15406_v29, %v6052_v50  ;;  %v6236_v63 = vmul.f32 %v15410_v51, %v6112_v9  ;;  %v6793_v40 = vpop.f32.mrb[47].mxu0 }
 0x62f   :  { %7354 = vmatprep.subr.bf16.mxu0 %v5807_v38  ;;  %v6043_v49 = vpop.permute.xlu0 %6042  ;;  %v6282_v7 = vpack.c.bf16 %v6234_v3, %v6218_v19 }
 0x630   :  { %v6051_v41 = vsel %vm6050_vm9, %v6035_v26, %v6043_v49  ;;  %v6111_v6 = vsel %vm6050_vm9, %v6043_v49, %v17501_v32  ;;  %v6033_v25 = vpop.permute.xlu1 %6032  ;;  %v17509_v49 = vld [vmem:[#allocation218_spill] sm:$0xff] }
 0x631   :  { %v6219_v37 = vmul.f32 %v15406_v29, %v6051_v41  ;;  %v6220_v5 = vmul.f32 %v15410_v51, %v6111_v6  ;;  %v6062_v21 = vsel %vm6050_vm9, %v17502_v36, %v6033_v25 }
 0x632   :  { %7355 = vmatpush1.bf16.msra.mxu0 %v5806_v58  ;;  %v6265_v16 = vmul.f32 %v6176_v61, %v6062_v21 }
 0x633   :  { %7356 = vmatprep.subr.bf16.mxu0 %v5823_v11  ;;  %v6283_v2 = vpack.c.bf16 %v6235_v45, %v6219_v37  ;;  %v6031_v57 = vpop.permute.xlu0 %6030  ;;  %v6284_v23 = vpack.c.bf16 %v6236_v63, %v6220_v5  ;;  %v17510_v37 = vld [vmem:[#allocation45_spill] sm:$0xff] }
 0x634   :  { %v6061_v48 = vsel %vm6050_vm9, %v17503_v12, %v6031_v57  ;;  %v6041_v13 = vpop.permute.xlu1 %6040 }
 0x635   :  { %7485 = vmatprep.subr.bf16.mxu1 %v6284_v23  ;;  %v6058_v53 = vsel %vm6050_vm9, %v6033_v25, %v6041_v13  ;;  %7475 = vmatmul.mubr.bf16.gmra.mrb[68].mxu1 %v15071_v52  ;;  %v6249_v22 = vmul.f32 %v6176_v61, %v6061_v48 }
 0x636   :  { %7357 = vmatpush1.bf16.msra.mxu0 %v5822_v62  ;;  %7486 = vmatpush1.bf16.msra.mxu1 %v6283_v2  ;;  %v6266_v28 = vmul.f32 %v6180_v44, %v6058_v53  ;;  %v17511_v62 = vld [vmem:[#allocation205_spill] sm:$0xff]  ;;  %v17513_v2 = vld [vmem:[#allocation264_spill] sm:$0xff] }
 0x637   :  { %7379 = vmatprep.subr.bf16.mxu0 %v6282_v7  ;;  %v6039_v20 = vpop.permute.xlu0 %6038  ;;  %7517 = vmatprep.mubr.bf16.mxu1 %v17042_v60  ;;  %v6297_v50 = vpack.c.bf16 %v6265_v16, %v6249_v22 }
 0x638   :  { %v6057_v26 = vsel %vm6050_vm9, %v6031_v57, %v6039_v20  ;;  %v6049_v0 = vpop.permute.xlu1 %6048 }
 0x639   :  { %7359 = vmatmul.mubr.bf16.vlgmr.msra.gmra.mrb[64].mxu0 %v15031_v8  ;;  %v6250_v58 = vmul.f32 %v6180_v44, %v6057_v26  ;;  %v6054_v38 = vsel %vm6050_vm9, %v6041_v13, %v6049_v0  ;;  %v6114_v34 = vsel %vm6050_vm9, %v6049_v0, %v17504_v39  ;;  %v17514_v26 = vld [vmem:[#allocation241_spill] sm:$0xff] }
 0x63a   :  { %7380 = vmatpush1.bf16.msra.mxu0 %v6281_v33  ;;  %7368 = vmatprep.mubr.bf16.mxu0 %v15049_v15  ;;  %v6267_v61 = vmul.f32 %v15406_v29, %v6054_v38  ;;  %v6268_v8 = vmul.f32 %v15410_v51, %v6114_v34  ;;  %v17515_v0 = vld [vmem:[#allocation229_spill] sm:$0xff] }
 0x63b   :  { %v6047_v43 = vpop.permute.xlu0 %6046  ;;  %v6298_v10 = vpack.c.bf16 %v6266_v28, %v6250_v58 }
 0x63c   :  { %v6053_v44 = vsel %vm6050_vm9, %v6039_v20, %v6047_v43  ;;  %v6113_v15 = vsel %vm6050_vm9, %v6047_v43, %v17505_v59  ;;  %v17519_v59 = vld [vmem:[#allocation243_spill] sm:$0xff] }
 0x63d   :  { %v6251_v9 = vmul.f32 %v15406_v29, %v6053_v44  ;;  %v6252_v11 = vmul.f32 %v15410_v51, %v6113_v15  ;;  %7381 = vmatprep.subr.bf16.mxu0 %v6298_v10  ;;  %v17506_v29 = vld [vmem:[#allocation190_spill] sm:$0xff] }
 0x63e   :  { %7382 = vmatpush1.bf16.msra.mxu0 %v6297_v50 }
 0x63f   :  { %v6299_v4 = vpack.c.bf16 %v6267_v61, %v6251_v9  ;;  %v6300_v31 = vpack.c.bf16 %v6268_v8, %v6252_v11  ;;  %v17517_v61 = vld [vmem:[#allocation236_spill] sm:$0xff] }
 0x641   :  { %7369 = vmatmul.mubr.bf16.gmra.mrb[68].mxu0 %v15071_v52  ;;  %7487 = vmatprep.subr.bf16.mxu1 %v6300_v31 }
 0x642   :  { %7411 = vmatprep.mubr.bf16.mxu0 %v17042_v60  ;;  %7488 = vmatpush1.bf16.msra.mxu1 %v6299_v4 }
 0x645   :  { %8520 = vmatmul.mubr.msk.bf16.vlgmr.msra.gmra.mrb[64].mxu1 %vm6683_vm10, %v15124_v56 }
 0x646   :  { %7527 = vmatprep.mubr.bf16.mxu1 %v17042_v60 }
 0x648   :  { %v15490_v1 = vpop.permute.xlu1 %6640 }
 0x649   :  { %8518 = vmatmul.mubr.msk.bf16.vlgmr.msra.gmra.mrb[64].mxu0 %vm6683_vm10, %v15124_v56  ;;  %v15494_v51 = vadd.f32 %v17506_v29, %v15490_v1  ;;  %v8605_v52 = vadd.f32 %v15425_v47, %v15490_v1  ;;  %v8604_v55 = vadd.f32 %v15422_v14, %v15490_v1  ;;  %v8613_v45 = vadd.f32 %v17507_v42, %v15490_v1  ;;  %v17508_v56 = vld [vmem:[#allocation12_spill] sm:$0xff] }
 0x64a   :  { %7421 = vmatprep.mubr.bf16.mxu0 %v17042_v60  ;;  %v15502_v63 = vpop.permute.xlu0 %6635  ;;  %v8612_v60 = vadd.f32 %v17508_v56, %v15490_v1  ;;  %v15508_v3 = vadd.f32 %v17509_v49, %v15490_v1  ;;  %v17521_v49 = vld [vmem:[#allocation222_spill] sm:$0xff] }
 0x64b   :  { %v7561_v19 = vmax.f32 %v15494_v51, 0.0  ;;  %v8603_v14 = vadd.f32 %v15415_v46, %v15502_v63  ;;  %v7555_v47 = vmax.f32 %v8605_v52, 0.0  ;;  %v8602_v41 = vadd.f32 %v15402_v35, %v15502_v63 }
 0x64c   :  { %v15517_v32 = vpop.permute.xlu1 %6650  ;;  %v7554_v6 = vmax.f32 %v8604_v55, 0.0  ;;  %v8611_v5 = vadd.f32 %v17510_v37, %v15502_v63  ;;  %v7557_v25 = vmax.f32 %v8613_v45, 0.0  ;;  %v8610_v24 = vadd.f32 %v17511_v62, %v15502_v63  ;;  %v17520_v55 = vld [vmem:[#allocation102_spill] sm:$0xff]  ;;  %v15556_v45 = vld [vmem:[%s15680_s7] sm:$0xff] }
 0x64d   :  { %8521 = vmatmul.mubr.msk.bf16.gmra.mrb[68].mxu1 %vm6683_vm10, %v15155_v27  ;;  %v8633_v57 = vadd.f32 %v17513_v2, %v15517_v32  ;;  %v7539_v46 = vmax.f32 %v8603_v14, 0.0  ;;  %v7538_v23 = vmax.f32 %v8602_v41, 0.0  ;;  %v8609_v7 = vadd.f32 %v6793_v40, %v15517_v32 }
 0x64e   :  { %7818 = vmatprep.mubr.f32.mxu1 %v17512_v30  ;;  %v15529_v35 = vpop.permute.xlu0 %6645  ;;  %v8608_v36 = vadd.f32 %v15458_v18, %v15517_v32  ;;  %v7541_v21 = vmax.f32 %v8611_v5, 0.0  ;;  %v7540_v12 = vmax.f32 %v8610_v24, 0.0  ;;  %v7556_v48 = vmax.f32 %v8612_v60, 0.0 }
 0x64f   :  { %v7593_v13 = vmax.f32 %v8633_v57, 0.0  ;;  %v8538_v53 = vpack.c.bf16 %v7555_v47, %v7539_v46  ;;  %v8540_v33 = vpack.c.bf16 %v7554_v6, %v7538_v23  ;;  %v8607_v28 = vadd.f32 %v15450_v17, %v15529_v35  ;;  %v17516_v17 = vld [vmem:[#allocation246_spill] sm:$0xff]  ;;  %v17522_v47 = vld [vmem:[#allocation199_spill] sm:$0xff] }
 0x650   :  { %v7587_v40 = vmax.f32 %v8609_v7, 0.0  ;;  %v7586_v20 = vmax.f32 %v8608_v36, 0.0  ;;  %v8546_v16 = vpack.c.bf16 %v7557_v25, %v7541_v21  ;;  %v8548_v18 = vpack.c.bf16 %v7556_v48, %v7540_v12 }
 0x651   :  { %8519 = vmatmul.mubr.msk.bf16.gmra.mrb[68].mxu0 %vm6683_vm10, %v15155_v27  ;;  %v8606_v27 = vadd.f32 %v15448_v54, %v15529_v35  ;;  %8539 = vmatprep.subr.bf16.mxu0 %v8538_v53  ;;  %v7571_v22 = vmax.f32 %v8607_v28, 0.0  ;;  %v8615_v58 = vadd.f32 %v17514_v26, %v15529_v35  ;;  %v8617_v38 = vadd.f32 %v17515_v0, %v15517_v32  ;;  %v17518_v54 = vld [vmem:[#allocation180_spill] sm:$0xff] }
 0x652   :  { %7676 = vmatprep.mubr.f32.mxu0 %v17512_v30  ;;  %8541 = vmatpush1.bf16.msra.mxu0 %v8540_v33  ;;  %v8614_v34 = vadd.f32 %v17516_v17, %v15529_v35  ;;  %v8616_v8 = vadd.f32 %v17517_v61, %v15517_v32  ;;  %v8627_v43 = vadd.f32 %v17518_v54, %v15502_v63  ;;  %v7560_v52 = vmax.f32 %v15508_v3, 0.0 }
 0x653   :  { %v7570_v39 = vmax.f32 %v8606_v27, 0.0  ;;  %v8542_v10 = vpack.c.bf16 %v7587_v40, %v7571_v22  ;;  %v7573_v50 = vmax.f32 %v8615_v58, 0.0  ;;  %v7589_v44 = vmax.f32 %v8617_v38, 0.0 }
 0x654   :  { %v8626_v15 = vadd.f32 %v17519_v59, %v15502_v63  ;;  %v7572_v11 = vmax.f32 %v8614_v34, 0.0  ;;  %v7588_v4 = vmax.f32 %v8616_v8, 0.0  ;;  %v7545_v31 = vmax.f32 %v8627_v43, 0.0 }
 0x655   :  { %v8544_v9 = vpack.c.bf16 %v7586_v20, %v7570_v39  ;;  %8543 = vmatprep.subr.bf16.mxu0 %v8542_v10  ;;  %v8550_v29 = vpack.c.bf16 %v7589_v44, %v7573_v50  ;;  %v8631_v42 = vadd.f32 %v17520_v55, %v15529_v35  ;;  %v8630_v14 = vadd.f32 %v17521_v49, %v15529_v35 }
 0x656   :  { %v7544_v51 = vmax.f32 %v8626_v15, 0.0  ;;  %v8552_v56 = vpack.c.bf16 %v7588_v4, %v7572_v11  ;;  %v8562_v60 = vpack.c.bf16 %v7561_v19, %v7545_v31  ;;  %v8632_v41 = vadd.f32 %v17522_v47, %v15517_v32 }
 0x657   :  { %8545 = vmatpush1.bf16.msra.mxu0 %v8544_v9  ;;  %v7577_v3 = vmax.f32 %v8631_v42, 0.0  ;;  %v7576_v37 = vmax.f32 %v8630_v14, 0.0 }
 0x658   :  { %8547 = vmatprep.subr.bf16.mxu0 %v8546_v16  ;;  %v8564_v6 = vpack.c.bf16 %v7560_v52, %v7544_v51  ;;  %v7592_v5 = vmax.f32 %v8632_v41, 0.0 }
 0x659   :  { %v8566_v25 = vpack.c.bf16 %v7593_v13, %v7577_v3 }
 0x65a   :  { %8522 = vmatmul.mubr.msk.f32.vlgmr.msra.gmra.mrb[72].mxu0 %vm6683_vm10, %v15556_v45  ;;  %v8568_v62 = vpack.c.bf16 %v7592_v5, %v7576_v37 }
 0x65b   :  { %8549 = vmatpush1.bf16.msra.mxu0 %v8548_v18  ;;  %7747 = vmatprep.mubr.f32.mxu0 %v17512_v30 }
 0x65c   :  { %8551 = vmatprep.subr.bf16.mxu0 %v8550_v29 }
 0x65f   :  { %8553 = vmatpush1.bf16.msra.mxu0 %v8552_v56 }
 0x660   :  { %8563 = vmatprep.subr.bf16.mxu0 %v8562_v60 }
 0x662   :  { %8523 = vmatmul.mubr.msk.f32.vlgmr.msra.gmra.mrb[74].mxu0 %vm6683_vm10, %v15556_v45 }
 0x663   :  { %8565 = vmatpush1.bf16.msra.mxu0 %v8564_v6  ;;  %7889 = vmatprep.mubr.f32.mxu0 %v17512_v30 }
 0x664   :  { %8567 = vmatprep.subr.bf16.mxu0 %v8566_v25 }
 0x667   :  { %8569 = vmatpush1.bf16.msra.mxu0 %v8568_v62 }
 0x66a   :  { %8525 = vmatmul.mubr.msk.f32.vlgmr.msra.gmra.mrb[76].mxu0 %vm6683_vm10, %v15556_v45 }
 0x66b   :  { %8031 = vmatprep.mubr.f32.mxu0 %v17512_v30 }
 0x671   :  { %v7307_v19 = vpop.f32.mrb[56].mxu1 }
 0x672   :  { %v8642_v24 = vadd.f32 %v7307_v19, %v15502_v63  ;;  %v7309_v2 = vpop.f32.mrb[57].mxu1 }
 0x673   :  { %v8643_v57 = vadd.f32 %v7309_v2, %v15502_v63  ;;  %v7311_v46 = vpop.f32.mrb[58].mxu1 }
 0x674   :  { %v8644_v23 = vadd.f32 %v7311_v46, %v15490_v1  ;;  %v7313_v7 = vpop.f32.mrb[59].mxu1  ;;  %v7548_v21 = vmax.f32 %v8642_v24, 0.0 }
 0x675   :  { %v8645_v36 = vadd.f32 %v7313_v7, %v15490_v1  ;;  %v7549_v48 = vmax.f32 %v8643_v57, 0.0 }
 0x676   :  { %v7564_v12 = vmax.f32 %v8644_v23, 0.0 }
 0x677   :  { %v7565_v13 = vmax.f32 %v8645_v36, 0.0 }
 0x678   :  { %v6989_v53 = vpop.f32.mrb[48].mxu0  ;;  %v8580_v33 = vpack.c.bf16 %v7564_v12, %v7548_v21 }
 0x679   :  { %v8618_v28 = vadd.f32 %v6989_v53, %v15502_v63  ;;  %v6991_v40 = vpop.f32.mrb[49].mxu0  ;;  %v8578_v27 = vpack.c.bf16 %v7565_v13, %v7549_v48  ;;  %v7317_v22 = vpop.f32.mrb[60].mxu1 }
 0x67a   :  { %v8619_v20 = vadd.f32 %v6991_v40, %v15502_v63  ;;  %v6993_v16 = vpop.f32.mrb[50].mxu0  ;;  %v8646_v26 = vadd.f32 %v7317_v22, %v15529_v35  ;;  %v7319_v0 = vpop.f32.mrb[61].mxu1 }
 0x67b   :  { %v8620_v18 = vadd.f32 %v6993_v16, %v15490_v1  ;;  %v6995_v58 = vpop.f32.mrb[51].mxu0  ;;  %v8647_v39 = vadd.f32 %v7319_v0, %v15529_v35  ;;  %v7321_v17 = vpop.f32.mrb[62].mxu1  ;;  %8579 = vmatprep.subr.bf16.mxu0 %v8578_v27  ;;  %v7542_v34 = vmax.f32 %v8618_v28, 0.0 }
 0x67c   :  { %v8621_v38 = vadd.f32 %v6995_v58, %v15490_v1  ;;  %v8648_v8 = vadd.f32 %v7321_v17, %v15517_v32  ;;  %v7323_v54 = vpop.f32.mrb[63].mxu1  ;;  %8581 = vmatpush1.bf16.msra.mxu0 %v8580_v33  ;;  %v7543_v43 = vmax.f32 %v8619_v20, 0.0  ;;  %v7580_v59 = vmax.f32 %v8646_v26, 0.0 }
 0x67d   :  { %v7558_v61 = vmax.f32 %v8620_v18, 0.0  ;;  %v8649_v50 = vadd.f32 %v7323_v54, %v15517_v32  ;;  %v7581_v11 = vmax.f32 %v8647_v39, 0.0 }
 0x67e   :  { %v7559_v10 = vmax.f32 %v8621_v38, 0.0  ;;  %v7596_v15 = vmax.f32 %v8648_v8, 0.0 }
 0x67f   :  { %v8556_v44 = vpack.c.bf16 %v7558_v61, %v7542_v34  ;;  %v7597_v4 = vmax.f32 %v8649_v50, 0.0 }
 0x680   :  { %v8554_v9 = vpack.c.bf16 %v7559_v10, %v7543_v43  ;;  %v6999_v31 = vpop.f32.mrb[52].mxu0  ;;  %v8584_v29 = vpack.c.bf16 %v7596_v15, %v7580_v59 }
 0x681   :  { %v8622_v51 = vadd.f32 %v6999_v31, %v15529_v35  ;;  %v7001_v52 = vpop.f32.mrb[53].mxu0  ;;  %v8582_v55 = vpack.c.bf16 %v7597_v4, %v7581_v11 }
 0x682   :  { %v8623_v42 = vadd.f32 %v7001_v52, %v15529_v35  ;;  %v7003_v56 = vpop.f32.mrb[54].mxu0  ;;  %8555 = vmatprep.subr.bf16.mxu1 %v8554_v9 }
 0x683   :  { %v8624_v60 = vadd.f32 %v7003_v56, %v15517_v32  ;;  %v7005_v49 = vpop.f32.mrb[55].mxu0  ;;  %8557 = vmatpush1.bf16.msra.mxu1 %v8556_v44  ;;  %8583 = vmatprep.subr.bf16.mxu0 %v8582_v55  ;;  %v7574_v47 = vmax.f32 %v8622_v51, 0.0 }
 0x684   :  { %v8625_v14 = vadd.f32 %v7005_v49, %v15517_v32  ;;  %8585 = vmatpush1.bf16.msra.mxu0 %v8584_v29  ;;  %v7575_v6 = vmax.f32 %v8623_v42, 0.0 }
 0x685   :  { %v7590_v41 = vmax.f32 %v8624_v60, 0.0 }
 0x686   :  { %v7591_v3 = vmax.f32 %v8625_v14, 0.0 }
 0x687   :  { %v8560_v37 = vpack.c.bf16 %v7590_v41, %v7574_v47  ;;  %8527 = vmatmul.mubr.msk.f32.vlgmr.msra.gmra.mrb[78].mxu0 %vm6683_vm10, %v15556_v45 }
 0x688   :  { %v8558_v5 = vpack.c.bf16 %v7591_v3, %v7575_v6  ;;  %8173 = vmatprep.mubr.f32.mxu0 %v17512_v30 }
 0x68a   :  { %8559 = vmatprep.subr.bf16.mxu1 %v8558_v5 }
 0x68b   :  { %8561 = vmatpush1.bf16.msra.mxu1 %v8560_v37 }
 0x68e   :  { %8524 = vmatmul.mubr.msk.f32.vlgmr.msra.gmra.mrb[72].mxu1 %vm6683_vm10, %v15556_v45 }
 0x68f   :  { %7960 = vmatprep.mubr.f32.mxu1 %v17512_v30 }
 0x6cc   :  { %v7201_v25 = vpop.f32.mrb[56].mxu0 }
 0x6cd   :  { %v8634_v62 = vadd.f32 %v7201_v25, %v15502_v63  ;;  %v7203_v19 = vpop.f32.mrb[57].mxu0 }
 0x6ce   :  { %v8635_v24 = vadd.f32 %v7203_v19, %v15502_v63  ;;  %v7205_v2 = vpop.f32.mrb[58].mxu0 }
 0x6cf   :  { %v8636_v57 = vadd.f32 %v7205_v2, %v15490_v1  ;;  %v7207_v46 = vpop.f32.mrb[59].mxu0  ;;  %v7546_v7 = vmax.f32 %v8634_v62, 0.0 }
 0x6d0   :  { %v8637_v23 = vadd.f32 %v7207_v46, %v15490_v1  ;;  %v7547_v21 = vmax.f32 %v8635_v24, 0.0 }
 0x6d1   :  { %v7562_v36 = vmax.f32 %v8636_v57, 0.0 }
 0x6d2   :  { %v7563_v12 = vmax.f32 %v8637_v23, 0.0 }
 0x6d3   :  { %v8572_v48 = vpack.c.bf16 %v7562_v36, %v7546_v7 }
 0x6d4   :  { %v8570_v13 = vpack.c.bf16 %v7563_v12, %v7547_v21  ;;  %v7211_v53 = vpop.f32.mrb[60].mxu0 }
 0x6d5   :  { %v8638_v33 = vadd.f32 %v7211_v53, %v15529_v35  ;;  %v7213_v28 = vpop.f32.mrb[61].mxu0 }
 0x6d6   :  { %v8639_v40 = vadd.f32 %v7213_v28, %v15529_v35  ;;  %v7215_v27 = vpop.f32.mrb[62].mxu0  ;;  %8571 = vmatprep.subr.bf16.mxu1 %v8570_v13 }
 0x6d7   :  { %v8640_v20 = vadd.f32 %v7215_v27, %v15517_v32  ;;  %v7217_v16 = vpop.f32.mrb[63].mxu0  ;;  %8573 = vmatpush1.bf16.msra.mxu1 %v8572_v48  ;;  %v7578_v18 = vmax.f32 %v8638_v33, 0.0 }
 0x6d8   :  { %v8641_v22 = vadd.f32 %v7217_v16, %v15517_v32  ;;  %v7579_v58 = vmax.f32 %v8639_v40, 0.0 }
 0x6d9   :  { %v7594_v26 = vmax.f32 %v8640_v20, 0.0 }
 0x6da   :  { %v7595_v0 = vmax.f32 %v8641_v22, 0.0 }
 0x6db   :  { %v8576_v38 = vpack.c.bf16 %v7594_v26, %v7578_v18  ;;  %v7607_v18 = vpop.permute.xlu0 %7606 }
 0x6dc   :  { %v8574_v39 = vpack.c.bf16 %v7595_v0, %v7579_v58 }
 0x6de   :  { %8575 = vmatprep.subr.bf16.mxu1 %v8574_v39 }
 0x6df   :  { %8577 = vmatpush1.bf16.msra.mxu1 %v8576_v38 }
 0x6e2   :  { %8526 = vmatmul.mubr.msk.f32.vlgmr.msra.gmra.mrb[74].mxu1 %vm6683_vm10, %v15556_v45 }
 0x6e3   :  { %8102 = vmatprep.mubr.f32.mxu1 %v17512_v30 }
 0x718   :  { %v7519_v17 = vpop.f32.mrb[64].mxu1 }
 0x719   :  { %v8658_v34 = vadd.f32 %v7519_v17, %v15502_v63  ;;  %v7521_v61 = vpop.f32.mrb[65].mxu1 }
 0x71a   :  { %v8659_v8 = vadd.f32 %v7521_v61, %v15502_v63  ;;  %v7523_v54 = vpop.f32.mrb[66].mxu1 }
 0x71b   :  { %v8660_v10 = vadd.f32 %v7523_v54, %v15490_v1  ;;  %v7525_v50 = vpop.f32.mrb[67].mxu1  ;;  %v7552_v9 = vmax.f32 %v8658_v34, 0.0 }
 0x71c   :  { %v7413_v43 = vpop.f32.mrb[64].mxu0  ;;  %v8661_v15 = vadd.f32 %v7525_v50, %v15490_v1  ;;  %v7553_v31 = vmax.f32 %v8659_v8, 0.0 }
 0x71d   :  { %v8650_v44 = vadd.f32 %v7413_v43, %v15502_v63  ;;  %v7415_v59 = vpop.f32.mrb[65].mxu0  ;;  %v7568_v4 = vmax.f32 %v8660_v10, 0.0 }
 0x71e   :  { %v8651_v11 = vadd.f32 %v7415_v59, %v15502_v63  ;;  %v7417_v30 = vpop.f32.mrb[66].mxu0  ;;  %v7569_v52 = vmax.f32 %v8661_v15, 0.0 }
 0x71f   :  { %v8652_v29 = vadd.f32 %v7417_v30, %v15490_v1  ;;  %v7419_v51 = vpop.f32.mrb[67].mxu0  ;;  %v8596_v55 = vpack.c.bf16 %v7568_v4, %v7552_v9  ;;  %v7550_v56 = vmax.f32 %v8650_v44, 0.0 }
 0x720   :  { %v8653_v42 = vadd.f32 %v7419_v51, %v15490_v1  ;;  %v8594_v49 = vpack.c.bf16 %v7569_v52, %v7553_v31  ;;  %v7529_v14 = vpop.f32.mrb[68].mxu1  ;;  %v7551_v47 = vmax.f32 %v8651_v11, 0.0 }
 0x721   :  { %v7566_v60 = vmax.f32 %v8652_v29, 0.0  ;;  %v8662_v6 = vadd.f32 %v7529_v14, %v15529_v35  ;;  %v7531_v3 = vpop.f32.mrb[69].mxu1 }
 0x722   :  { %v7567_v41 = vmax.f32 %v8653_v42, 0.0  ;;  %v8663_v37 = vadd.f32 %v7531_v3, %v15529_v35  ;;  %v7533_v5 = vpop.f32.mrb[70].mxu1  ;;  %8595 = vmatprep.subr.bf16.mxu0 %v8594_v49 }
 0x723   :  { %v8588_v63 = vpack.c.bf16 %v7566_v60, %v7550_v56  ;;  %v8664_v19 = vadd.f32 %v7533_v5, %v15517_v32  ;;  %v7535_v24 = vpop.f32.mrb[71].mxu1  ;;  %8597 = vmatpush1.bf16.msra.mxu0 %v8596_v55  ;;  %v7584_v46 = vmax.f32 %v8662_v6, 0.0 }
 0x724   :  { %v8586_v25 = vpack.c.bf16 %v7567_v41, %v7551_v47  ;;  %v7423_v62 = vpop.f32.mrb[68].mxu0  ;;  %v8665_v57 = vadd.f32 %v7535_v24, %v15517_v32  ;;  %v7585_v21 = vmax.f32 %v8663_v37, 0.0 }
 0x725   :  { %v8654_v1 = vadd.f32 %v7423_v62, %v15529_v35  ;;  %v7425_v2 = vpop.f32.mrb[69].mxu0  ;;  %v7600_v36 = vmax.f32 %v8664_v19, 0.0 }
 0x726   :  { %v8655_v23 = vadd.f32 %v7425_v2, %v15529_v35  ;;  %v7427_v7 = vpop.f32.mrb[70].mxu0  ;;  %8587 = vmatprep.subr.bf16.mxu1 %v8586_v25  ;;  %v7601_v13 = vmax.f32 %v8665_v57, 0.0 }
 0x727   :  { %v8656_v12 = vadd.f32 %v7427_v7, %v15517_v32  ;;  %v7429_v48 = vpop.f32.mrb[71].mxu0  ;;  %8589 = vmatpush1.bf16.msra.mxu1 %v8588_v63  ;;  %v8600_v53 = vpack.c.bf16 %v7600_v36, %v7584_v46  ;;  %v7582_v28 = vmax.f32 %v8654_v1, 0.0 }
 0x728   :  { %v8657_v33 = vadd.f32 %v7429_v48, %v15517_v32  ;;  %v8598_v27 = vpack.c.bf16 %v7601_v13, %v7585_v21  ;;  %v7583_v20 = vmax.f32 %v8655_v23, 0.0 }
 0x729   :  { %v7598_v40 = vmax.f32 %v8656_v12, 0.0 }
 0x72a   :  { %v7599_v16 = vmax.f32 %v8657_v33, 0.0  ;;  %8599 = vmatprep.subr.bf16.mxu0 %v8598_v27 }
 0x72b   :  { %v8592_v22 = vpack.c.bf16 %v7598_v40, %v7582_v28  ;;  %8601 = vmatpush1.bf16.msra.mxu0 %v8600_v53 }
 0x72c   :  { %v8590_v35 = vpack.c.bf16 %v7599_v16, %v7583_v20 }
 0x72d   :  { %v7678_v26 = vpop.f32.mrb[72].mxu0 }
 0x72e   :  { %8591 = vmatprep.subr.bf16.mxu1 %v8590_v35  ;;  %8529 = vmatmul.mubr.msk.f32.vlgmr.msra.gmra.mrb[80].mxu0 %vm6683_vm10, %v15556_v45  ;;  %v7679_v58 = vadd.f32 %v7678_v26, %v7607_v18  ;;  %v7680_v0 = vpop.f32.mrb[73].mxu0 }
 0x72f   :  { %8593 = vmatpush1.bf16.msra.mxu1 %v8592_v22  ;;  %v7681_v38 = vadd.f32 %v7680_v0, %v7607_v18 }
 0x730   :  { %8180 = vst [vmem:[%s15681_s9] sm:$0xff] %v7679_v58 }
 0x731   :  { %8181 = vst [vmem:[%s15681_s9 + $0x8] sm:$0xff] %v7681_v38 }
 0x732   :  { %8528 = vmatmul.mubr.msk.f32.vlgmr.msra.gmra.mrb[76].mxu1 %vm6683_vm10, %v15556_v45 }
 0x735   :  { %v7749_v32 = vpop.f32.mrb[74].mxu0 }
 0x736   :  { %v7750_v39 = vadd.f32 %v7749_v32, %v7607_v18  ;;  %v7751_v17 = vpop.f32.mrb[75].mxu0 }
 0x737   :  { %v7752_v34 = vadd.f32 %v7751_v17, %v7607_v18 }
 0x738   :  { %8182 = vst [vmem:[%s15681_s9 + $0x10] sm:$0xff] %v7750_v39 }
 0x739   :  { %8183 = vst [vmem:[%s15681_s9 + $0x18] sm:$0xff] %v7752_v34 }
 0x73d   :  { %v7891_v61 = vpop.f32.mrb[76].mxu0 }
 0x73e   :  { %v7892_v8 = vadd.f32 %v7891_v61, %v7607_v18  ;;  %v7893_v54 = vpop.f32.mrb[77].mxu0 }
 0x73f   :  { %v7894_v45 = vadd.f32 %v7893_v54, %v7607_v18 }
 0x740   :  { %8186 = vst [vmem:[%s15681_s9 + $0x30] sm:$0xff] %v7892_v8 }
 0x741   :  { %8187 = vst [vmem:[%s15681_s9 + $0x38] sm:$0xff] %v7894_v45 }
 0x75a   :  { %v8033_v43 = vpop.f32.mrb[78].mxu0 }
 0x75b   :  { %v8034_v10 = vadd.f32 %v8033_v43, %v7607_v18  ;;  %v8035_v50 = vpop.f32.mrb[79].mxu0 }
 0x75c   :  { %v8036_v44 = vadd.f32 %v8035_v50, %v7607_v18 }
 0x75d   :  { %8532 = vst [vmem:[%s15681_s9 + $0x50] sm:$0xff] %v8034_v10 }
 0x75e   :  { %8533 = vst [vmem:[%s15681_s9 + $0x58] sm:$0xff] %v8036_v44 }
 0x761   :  { %v7820_v59 = vpop.f32.mrb[72].mxu1 }
 0x762   :  { %v7821_v15 = vadd.f32 %v7820_v59, %v7607_v18  ;;  %v7822_v9 = vpop.f32.mrb[73].mxu1 }
 0x763   :  { %v7823_v11 = vadd.f32 %v7822_v9, %v7607_v18 }
 0x764   :  { %8184 = vst [vmem:[%s15681_s9 + $0x20] sm:$0xff] %v7821_v15 }
 0x765   :  { %8185 = vst [vmem:[%s15681_s9 + $0x28] sm:$0xff] %v7823_v11 }
 0x7b5   :  { %v7962_v30 = vpop.f32.mrb[74].mxu1 }
 0x7b6   :  { %v7963_v4 = vadd.f32 %v7962_v30, %v7607_v18  ;;  %v7964_v31 = vpop.f32.mrb[75].mxu1 }
 0x7b7   :  { %v7965_v29 = vadd.f32 %v7964_v31, %v7607_v18 }
 0x7b8   :  { %8530 = vst [vmem:[%s15681_s9 + $0x40] sm:$0xff] %v7963_v4 }
 0x7b9   :  { %8531 = vst [vmem:[%s15681_s9 + $0x48] sm:$0xff] %v7965_v29 }
 0x801   :  { %v8175_v51 = vpop.f32.mrb[80].mxu0 }
 0x802   :  { %v8176_v52 = vadd.f32 %v8175_v51, %v7607_v18  ;;  %v8177_v55 = vpop.f32.mrb[81].mxu0 }
 0x803   :  { %v8178_v42 = vadd.f32 %v8177_v55, %v7607_v18 }
 0x804   :  { %8536 = vst [vmem:[%s15681_s9 + $0x70] sm:$0xff] %v8176_v52 }
 0x805   :  { %v8104_v56 = vpop.f32.mrb[76].mxu1  ;;  %8537 = vst [vmem:[%s15681_s9 + $0x78] sm:$0xff] %v8178_v42 }
 0x806   :  { %v8105_v60 = vadd.f32 %v8104_v56, %v7607_v18  ;;  %v8106_v49 = vpop.f32.mrb[77].mxu1 }
 0x807   :  { %v8107_v14 = vadd.f32 %v8106_v49, %v7607_v18 }
 0x808   :  { %8534 = vst [vmem:[%s15681_s9 + $0x60] sm:$0xff] %v8105_v60 }
 0x809   :  { %8535 = vst [vmem:[%s15681_s9 + $0x68] sm:$0xff] %v8107_v14 }

</bundles_post_ra>
